<compile_context>
chip_gen: v7x
topology: tpu7x:2x2x1
jax: 0.10.0
libtpu: 0.0.40
codegen_flags: <defaults>
</compile_context>

<pallas_src>
import functools

import jax
import jax.numpy as jnp
from jax import lax
from jax.experimental import pallas as pl
from jax.experimental.pallas import tpu as pltpu

BN_EPS = 1e-5
_VMEM_LIMIT = 32 * 1024 * 1024  # fits v5e/v6e/v7x scoped VMEM comfortably

# Newer JAX spells this CompilerParams; keep a fallback for older releases.
_CompilerParams = getattr(pltpu, "CompilerParams", None) or getattr(
    pltpu, "TPUCompilerParams"
)


# ---------------------------------------------------------------------------
# Pallas kernels
# ---------------------------------------------------------------------------
def _matmul_bias_act_kernel(a_ref, w_ref, b_ref, o_ref, acc_ref, *, apply_relu):
    """One (tm, tn) output tile: acc += A_tile @ W_tile; epilogue on last k."""
    k = pl.program_id(2)

    @pl.when(k == 0)
    def _init():
        acc_ref[...] = jnp.zeros_like(acc_ref)

    acc_ref[...] += jnp.dot(
        a_ref[...], w_ref[...], preferred_element_type=jnp.float32
    )

    @pl.when(k == pl.num_programs(2) - 1)
    def _epilogue():
        out = acc_ref[...] + b_ref[...]
        if apply_relu:
            out = jnp.maximum(out, 0.0)
        o_ref[...] = out.astype(o_ref.dtype)


def _maxpool3x3s2_kernel(x_ref, o_ref):
    # x_ref: (H, W, N, Ct)   o_ref: (Ho, Wo, N, Ct)
    # Pooled dims (H, W) are leading/untiled axes, so the 3x3 / stride-2
    # window max is pure static leading-dim indexing (no sublane shuffles,
    # no 9x tap materialization in HBM).
    ho, wo = o_ref.shape[0], o_ref.shape[1]
    for a in range(ho):
        h0 = 2 * a
        hm = jnp.maximum(jnp.maximum(x_ref[h0], x_ref[h0 + 1]), x_ref[h0 + 2])
        for b in range(wo):
            w0 = 2 * b
            o_ref[a, b] = jnp.maximum(
                jnp.maximum(hm[w0], hm[w0 + 1]), hm[w0 + 2]
            )


# ---------------------------------------------------------------------------
# Tiled matmul wrapper (bf16 MXU operands, f32 accumulation)
# ---------------------------------------------------------------------------
def _round_up(x, m):
    return (x + m - 1) // m * m


def _pick_m_tile(m):
    mp = _round_up(m, 16)  # sublane / bf16-pack friendly
    if mp <= 512:
        return mp, mp      # single M block
    for t in (512, 256, 128):
        if mp % t == 0:
            return t, mp
    mp = _round_up(mp, 256)
    return 256, mp


def _pick_tile(dim, candidates, align):
    dp = _round_up(dim, align)
    for t in candidates:
        if dp % t == 0:
            return t, dp
    return candidates[0], _round_up(dp, candidates[0])


def matmul_bias_act(a, w, bias, apply_relu, out_dtype):
    """out = act(A @ W + bias) as a tiled, pipelined Pallas matmul."""
    m, k = a.shape
    k2, n = w.shape
    assert k == k2
    tm, m_p = _pick_m_tile(m)
    tk, k_p = _pick_tile(k, (512, 384, 256, 128), 128)
    tn, n_p = _pick_tile(n, (512, 384, 256, 128), 128)

    a_p = a if (m_p, k_p) == (m, k) else jnp.pad(a, ((0, m_p - m), (0, k_p - k)))
    w_p = w if (k_p, n_p) == (k, n) else jnp.pad(w, ((0, k_p - k), (0, n_p - n)))
    b_p = bias.reshape(1, n).astype(jnp.float32)
    if n_p != n:
        b_p = jnp.pad(b_p, ((0, 0), (0, n_p - n)))
    a_p = a_p.astype(jnp.bfloat16)
    w_p = w_p.astype(jnp.bfloat16)

    grid = (m_p // tm, n_p // tn, k_p // tk)
    out_bytes = m_p * n_p * jnp.dtype(out_dtype).itemsize
    cost = pl.CostEstimate(
        flops=2 * m_p * n_p * k_p,
        transcendentals=0,
        bytes_accessed=int(a_p.size * 2 + w_p.size * 2 + b_p.size * 4 + out_bytes),
    )

    out = pl.pallas_call(
        functools.partial(_matmul_bias_act_kernel, apply_relu=apply_relu),
        out_shape=jax.ShapeDtypeStruct((m_p, n_p), out_dtype),
        grid=grid,
        in_specs=[
            pl.BlockSpec((tm, tk), lambda i, j, kk: (i, kk)),
            pl.BlockSpec((tk, tn), lambda i, j, kk: (kk, j)),
            pl.BlockSpec((1, tn), lambda i, j, kk: (0, j)),
        ],
        out_specs=pl.BlockSpec((tm, tn), lambda i, j, kk: (i, j)),
        scratch_shapes=[pltpu.VMEM((tm, tn), jnp.float32)],
        compiler_params=_CompilerParams(
            dimension_semantics=("parallel", "parallel", "arbitrary"),
            vmem_limit_bytes=_VMEM_LIMIT,
        ),
        cost_estimate=cost,
    )(a_p, w_p, b_p)

    if (m_p, n_p) != (m, n):
        out = out[:m, :n]
    return out


# ---------------------------------------------------------------------------
# MaxPool 3x3 stride 2 (VALID)
# ---------------------------------------------------------------------------
def maxpool_3x3_s2(x_nhwc):
    n, h, w, c = x_nhwc.shape
    ho = (h - 3) // 2 + 1
    wo = (w - 3) // 2 + 1
    xt = jnp.transpose(x_nhwc, (1, 2, 0, 3))  # (H, W, N, C): pooled dims leading
    tc = 128 if c % 128 == 0 else c           # lane-dim tile (full C if small)
    grid = (c // tc,)
    out = pl.pallas_call(
        _maxpool3x3s2_kernel,
        out_shape=jax.ShapeDtypeStruct((ho, wo, n, c), x_nhwc.dtype),
        grid=grid,
        in_specs=[pl.BlockSpec((h, w, n, tc), lambda ci: (0, 0, 0, ci))],
        out_specs=pl.BlockSpec((ho, wo, n, tc), lambda ci: (0, 0, 0, ci)),
        compiler_params=_CompilerParams(
            dimension_semantics=("parallel",),
            vmem_limit_bytes=_VMEM_LIMIT,
        ),
    )(xt)
    return jnp.transpose(out, (2, 0, 1, 3))   # -> (N, Ho, Wo, C)


# ---------------------------------------------------------------------------
# Glue: BN folding, im2col, conv wrappers
# ---------------------------------------------------------------------------
def _fold_bn(p):
    """Fold conv bias + inference BN into the weight matrix and a bias vector."""
    kh, kw, cin, cout = p["w"].shape
    scale = p["gamma"] / jnp.sqrt(p["var"] + BN_EPS)
    wmat = p["w"].reshape(kh * kw * cin, cout) * scale[None, :]
    bias = (p["b"] - p["mean"]) * scale + p["beta"]
    return wmat, bias


def _extract_patches(x_nhwc, kh, kw, stride, padding):
    """im2col: (N, Ho, Wo, kh*kw*Cin) patches ordered (kh, kw, cin)."""
    # TODO(synk): a direct-conv kernel (taps sliced inside the kernel) would
    # avoid materializing this patch tensor in HBM for the 3x3 layers.
    if padding:
        x_nhwc = jnp.pad(
            x_nhwc, ((0, 0), (padding, padding), (padding, padding), (0, 0))
        )
    n, hp, wp, cin = x_nhwc.shape
    ho = (hp - kh) // stride + 1
    wo = (wp - kw) // stride + 1
    taps = []
    for i in range(kh):
        for j in range(kw):
            taps.append(
                x_nhwc[
                    :,
                    i : i + stride * (ho - 1) + 1 : stride,
                    j : j + stride * (wo - 1) + 1 : stride,
                    :,
                ]
            )
    return jnp.concatenate(taps, axis=-1), ho, wo


def conv_bn(x_nhwc, p, stride, padding, apply_relu, out_dtype=jnp.bfloat16):
    """Conv2d + BatchNorm2d (+ReLU) via im2col + fused tiled Pallas matmul."""
    kh, kw, cin, cout = p["w"].shape
    n = x_nhwc.shape[0]
    patches, ho, wo = _extract_patches(x_nhwc, kh, kw, stride, padding)
    a = patches.reshape(n * ho * wo, kh * kw * cin)
    wmat, bias = _fold_bn(p)
    out = matmul_bias_act(a, wmat, bias, apply_relu, out_dtype)
    return out.reshape(n, ho, wo, cout)


def fused_pointwise_convs(x_nhwc, plist, apply_relu, out_dtype=jnp.bfloat16):
    """Fuse several shared-input 1x1 conv+BN(+ReLU) layers into ONE matmul."""
    n, h, w, cin = x_nhwc.shape
    a = x_nhwc.reshape(n * h * w, cin)
    wmats, biases, couts = [], [], []
    for p in plist:
        wm, b = _fold_bn(p)
        wmats.append(wm)
        biases.append(b)
        couts.append(wm.shape[1])
    out = matmul_bias_act(
        a,
        jnp.concatenate(wmats, axis=1),
        jnp.concatenate(biases, axis=0),
        apply_relu,
        out_dtype,
    )
    ys, off = [], 0
    for c in couts:
        ys.append(out[:, off : off + c].reshape(n, h, w, c))
        off += c
    return ys


# ---------------------------------------------------------------------------
# ReductionB forward (NCHW in / NCHW out, like PyTorch)
# ---------------------------------------------------------------------------
def reduction_b(x_nchw, params):
    x = jnp.transpose(x_nchw, (0, 2, 3, 1))  # NCHW -> NHWC (lane-dense)

    # branch 1: MaxPool2d(3, stride=2)
    y1 = maxpool_3x3_s2(x)

    # Shared-input 1x1 convs of branches 2/3/4 fused into one wide matmul.
    y2, y3, y4 = fused_pointwise_convs(
        x, [params["b2_1"], params["b3_1"], params["b4_1"]], apply_relu=True
    )

    # branch 2: 1x1 -> relu -> 3x3 s2 -> relu
    y2 = conv_bn(y2, params["b2_2"], 2, 0, True, out_dtype=jnp.float32)
    # branch 3: 1x1 -> relu -> 3x3 s2 -> relu
    y3 = conv_bn(y3, params["b3_2"], 2, 0, True, out_dtype=jnp.float32)
    # branch 4: 1x1 -> relu -> 3x3 p1 -> relu -> 3x3 s2 -> relu
    y4 = conv_bn(y4, params["b4_2"], 1, 1, True, out_dtype=jnp.bfloat16)
    y4 = conv_bn(y4, params["b4_3"], 2, 0, True, out_dtype=jnp.float32)

    # TODO(synk): branch outputs could be written straight into channel slices
    # of the concat result via out_spec index maps to skip this copy.
    out = jnp.concatenate([y1, y2, y3, y4], axis=-1)  # torch.cat(dim=1)
    return jnp.transpose(out, (0, 3, 1, 2))           # NHWC -> NCHW


# ---------------------------------------------------------------------------
# Deterministic parameter init
# ---------------------------------------------------------------------------
def init_basic_conv(key, kh, kw, cin, cout):
    ks = jax.random.split(key, 6)
    return {
        "w": jax.random.normal(ks[0], (kh, kw, cin, cout), jnp.float32) * 0.05,
        "b": jax.random.normal(ks[1], (cout,), jnp.float32) * 0.05,
        "gamma": 1.0 + 0.1 * jax.random.normal(ks[2], (cout,), jnp.float32),
        "beta": 0.1 * jax.random.normal(ks[3], (cout,), jnp.float32),
        "mean": 0.1 * jax.random.normal(ks[4], (cout,), jnp.float32),
        "var": jax.random.uniform(ks[5], (cout,), jnp.float32, 0.5, 1.5),
    }


def init_reduction_b(key, in_channels):
    ks = jax.random.split(key, 7)
    return {
        "b2_1": init_basic_conv(ks[0], 1, 1, in_channels, 256),
        "b2_2": init_basic_conv(ks[1], 3, 3, 256, 384),
        "b3_1": init_basic_conv(ks[2], 1, 1, in_channels, 256),
        "b3_2": init_basic_conv(ks[3], 3, 3, 256, 256),
        "b4_1": init_basic_conv(ks[4], 1, 1, in_channels, 256),
        "b4_2": init_basic_conv(ks[5], 3, 3, 256, 256),
        "b4_3": init_basic_conv(ks[6], 3, 3, 256, 256),
    }


# ---------------------------------------------------------------------------
# Plain-JAX f32 reference (for correctness check only)
# ---------------------------------------------------------------------------
def _ref_conv_bn(x, p, stride, padding, apply_relu):
    y = lax.conv_general_dilated(
        x,
        p["w"],
        (stride, stride),
        [(padding, padding), (padding, padding)],
        dimension_numbers=("NHWC", "HWIO", "NHWC"),
        precision=lax.Precision.HIGHEST,
    )
    y = (y + p["b"] - p["mean"]) / jnp.sqrt(p["var"] + BN_EPS) * p["gamma"] + p["beta"]
    return jnp.maximum(y, 0.0) if apply_relu else y


def _ref_reduction_b(x_nchw, params):
    x = jnp.transpose(x_nchw, (0, 2, 3, 1))
    y1 = lax.reduce_window(x, -jnp.inf, lax.max, (1, 3, 3, 1), (1, 2, 2, 1), "VALID")
    y2 = _ref_conv_bn(x, params["b2_1"], 1, 0, True)
    y2 = _ref_conv_bn(y2, params["b2_2"], 2, 0, True)
    y3 = _ref_conv_bn(x, params["b3_1"], 1, 0, True)
    y3 = _ref_conv_bn(y3, params["b3_2"], 2, 0, True)
    y4 = _ref_conv_bn(x, params["b4_1"], 1, 0, True)
    y4 = _ref_conv_bn(y4, params["b4_2"], 1, 1, True)
    y4 = _ref_conv_bn(y4, params["b4_3"], 2, 0, True)
    out = jnp.concatenate([y1, y2, y3, y4], axis=-1)
    return jnp.transpose(out, (0, 3, 1, 2))


# ---------------------------------------------------------------------------
if __name__ == "__main__":
    key = jax.random.PRNGKey(0)
    k_x, k_p = jax.random.split(key)

    N, C_IN, H, W = 2, 4, 16, 16
    x = jax.random.normal(k_x, (N, C_IN, H, W), jnp.float32)
    params = init_reduction_b(k_p, C_IN)

    fwd = jax.jit(reduction_b)
    out = jax.block_until_ready(fwd(x, params))

    # shape check: channels = in_channels + 384 + 256 + 256, spatial (H-3)//2+1
    Ho = (H - 3) // 2 + 1
    assert out.shape == (N, C_IN + 384 + 256 + 256, Ho, Ho), out.shape
    assert out.dtype == jnp.float32

    # numerical check against full-f32 reference (kernel uses bf16 MXU
    # operands + bf16 inter-layer activations, hence the relaxed tolerance)
    ref = jax.block_until_ready(jax.jit(_ref_reduction_b)(x, params))
    max_err = float(jnp.max(jnp.abs(out - ref)))
    assert jnp.allclose(out, ref, rtol=2e-2, atol=2e-2), max_err

    print("KERNEL_OK")
</pallas_src>

<mosaic_0001>
module attributes {stable_mosaic.version = 11 : i64} {
  func.func @_matmul_bias_act_kernel(%arg0: i32, %arg1: i32, %arg2: i32, %arg3: memref<512x128xbf16, #tpu.memory_space<vmem>>, %arg4: memref<128x384xbf16, #tpu.memory_space<vmem>>, %arg5: memref<1x384xf32, #tpu.memory_space<vmem>>, %arg6: memref<512x384xbf16, #tpu.memory_space<vmem>>, %arg7: memref<512x384xf32, #tpu.memory_space<vmem>>) attributes {dimension_semantics = [#tpu.dimension_semantics<parallel>, #tpu.dimension_semantics<parallel>, #tpu.dimension_semantics<arbitrary>], iteration_bounds = array<i64: 1, 2, 1>, scalar_prefetch = 0 : i64, scratch_operands = 1 : i64, tpu.core_type = #tpu.core_type<tc>, window_params = [{transform_indices = @transform_0, window_bounds = array<i64: 512, 128>}, {transform_indices = @transform_1, window_bounds = array<i64: 128, 384>}, {transform_indices = @transform_2, window_bounds = array<i64: 1, 384>}, {transform_indices = @transform_3, window_bounds = array<i64: 512, 384>}]} {
    %c0_i32 = arith.constant 0 : i32
    %0 = arith.cmpi eq, %arg2, %c0_i32 : i32
    %1 = arith.extui %0 : i1 to i32
    %c0_i32_0 = arith.constant 0 : i32
    %2 = arith.cmpi ne, %1, %c0_i32_0 : i32
    scf.if %2 {
      %cst_10 = arith.constant 0.000000e+00 : f32
      %12 = vector.broadcast %cst_10 : f32 to vector<512x384xf32>
      %c0_11 = arith.constant 0 : index
      %c0_12 = arith.constant 0 : index
      %13 = vector.load %arg7[%c0_11, %c0_12] : memref<512x384xf32, #tpu.memory_space<vmem>>, vector<512x384xf32>
      tpu.vector_store %arg7[%c0_11, %c0_12], %12 {strides = array<i32>} : memref<512x384xf32, #tpu.memory_space<vmem>>, vector<512x384xf32>,
    } else {
    }
    %c0 = arith.constant 0 : index
    %c0_1 = arith.constant 0 : index
    %3 = vector.load %arg7[%c0, %c0_1] : memref<512x384xf32, #tpu.memory_space<vmem>>, vector<512x384xf32>
    %c0_2 = arith.constant 0 : index
    %c0_3 = arith.constant 0 : index
    %4 = vector.load %arg3[%c0_2, %c0_3] : memref<512x128xbf16, #tpu.memory_space<vmem>>, vector<512x128xbf16>
    %c0_4 = arith.constant 0 : index
    %c0_5 = arith.constant 0 : index
    %5 = vector.load %arg4[%c0_4, %c0_5] : memref<128x384xbf16, #tpu.memory_space<vmem>>, vector<128x384xbf16>
    %cst = arith.constant dense<0.000000e+00> : vector<512x384xf32>
    %6 = tpu.matmul %4, %5, %cst {dimension_numbers = #tpu.dot_dimension_numbers<[1], [0], [0], [1], [0, 0, 1, 1], [], []>} : vector<512x128xbf16>, vector<128x384xbf16>, vector<512x384xf32> -> vector<512x384xf32>
    %7 = arith.addf %3, %6 : vector<512x384xf32>
    %c0_6 = arith.constant 0 : index
    %c0_7 = arith.constant 0 : index
    %8 = vector.load %arg7[%c0_6, %c0_7] : memref<512x384xf32, #tpu.memory_space<vmem>>, vector<512x384xf32>
    tpu.vector_store %arg7[%c0_6, %c0_7], %7 {strides = array<i32>} : memref<512x384xf32, #tpu.memory_space<vmem>>, vector<512x384xf32>,
    %c0_i32_8 = arith.constant 0 : i32
    %9 = arith.cmpi eq, %arg2, %c0_i32_8 : i32
    %10 = arith.extui %9 : i1 to i32
    %c0_i32_9 = arith.constant 0 : i32
    %11 = arith.cmpi ne, %10, %c0_i32_9 : i32
    scf.if %11 {
      %c0_10 = arith.constant 0 : index
      %c0_11 = arith.constant 0 : index
      %12 = vector.load %arg7[%c0_10, %c0_11] : memref<512x384xf32, #tpu.memory_space<vmem>>, vector<512x384xf32>
      %c0_12 = arith.constant 0 : index
      %c0_13 = arith.constant 0 : index
      %13 = vector.load %arg5[%c0_12, %c0_13] : memref<1x384xf32, #tpu.memory_space<vmem>>, vector<1x384xf32>
      %14 = vector.broadcast %13 : vector<1x384xf32> to vector<512x384xf32>
      %15 = arith.addf %12, %14 : vector<512x384xf32>
      %cst_14 = arith.constant 0.000000e+00 : f32
      %16 = vector.broadcast %cst_14 : f32 to vector<512x384xf32>
      %17 = arith.maximumf %15, %16 : vector<512x384xf32>
      %18 = arith.truncf %17 : vector<512x384xf32> to vector<512x384xbf16>
      %c0_15 = arith.constant 0 : index
      %c0_16 = arith.constant 0 : index
      %19 = vector.load %arg6[%c0_15, %c0_16] : memref<512x384xbf16, #tpu.memory_space<vmem>>, vector<512x384xbf16>
      tpu.vector_store %arg6[%c0_15, %c0_16], %18 {strides = array<i32>} : memref<512x384xbf16, #tpu.memory_space<vmem>>, vector<512x384xbf16>,
    } else {
    }
    return
  }
  func.func @transform_0(%arg0: i32, %arg1: i32, %arg2: i32) -> (i32, i32) {
    %c0_i32 = arith.constant 0 : i32
    return %arg0, %arg2 : i32, i32
  }
  func.func @transform_1(%arg0: i32, %arg1: i32, %arg2: i32) -> (i32, i32) {
    %c0_i32 = arith.constant 0 : i32
    return %arg2, %arg1 : i32, i32
  }
  func.func @transform_2(%arg0: i32, %arg1: i32, %arg2: i32) -> (i32, i32) {
    %c0_i32 = arith.constant 0 : i32
    %c0_i32_0 = arith.constant 0 : i32
    return %c0_i32, %arg1 : i32, i32
  }
  func.func @transform_3(%arg0: i32, %arg1: i32, %arg2: i32) -> (i32, i32) {
    %c0_i32 = arith.constant 0 : i32
    return %arg0, %arg1 : i32, i32
  }
}

module attributes {stable_mosaic.version = 11 : i64} {
  func.func @_matmul_bias_act_kernel(%arg0: i32, %arg1: i32, %arg2: i32, %arg3: memref<112x384xbf16, #tpu.memory_space<vmem>>, %arg4: memref<384x384xbf16, #tpu.memory_space<vmem>>, %arg5: memref<1x384xf32, #tpu.memory_space<vmem>>, %arg6: memref<112x384xf32, #tpu.memory_space<vmem>>, %arg7: memref<112x384xf32, #tpu.memory_space<vmem>>) attributes {dimension_semantics = [#tpu.dimension_semantics<parallel>, #tpu.dimension_semantics<parallel>, #tpu.dimension_semantics<arbitrary>], iteration_bounds = array<i64: 1, 1, 6>, scalar_prefetch = 0 : i64, scratch_operands = 1 : i64, tpu.core_type = #tpu.core_type<tc>, window_params = [{transform_indices = @transform_0, window_bounds = array<i64: 112, 384>}, {transform_indices = @transform_1, window_bounds = array<i64: 384, 384>}, {transform_indices = @transform_2, window_bounds = array<i64: 1, 384>}, {transform_indices = @transform_3, window_bounds = array<i64: 112, 384>}]} {
    %c0_i32 = arith.constant 0 : i32
    %0 = arith.cmpi eq, %arg2, %c0_i32 : i32
    %1 = arith.extui %0 : i1 to i32
    %c0_i32_0 = arith.constant 0 : i32
    %2 = arith.cmpi ne, %1, %c0_i32_0 : i32
    scf.if %2 {
      %cst_9 = arith.constant 0.000000e+00 : f32
      %12 = vector.broadcast %cst_9 : f32 to vector<112x384xf32>
      %c0_10 = arith.constant 0 : index
      %c0_11 = arith.constant 0 : index
      %13 = vector.load %arg7[%c0_10, %c0_11] : memref<112x384xf32, #tpu.memory_space<vmem>>, vector<112x384xf32>
      tpu.vector_store %arg7[%c0_10, %c0_11], %12 {strides = array<i32>} : memref<112x384xf32, #tpu.memory_space<vmem>>, vector<112x384xf32>,
    } else {
    }
    %c0 = arith.constant 0 : index
    %c0_1 = arith.constant 0 : index
    %3 = vector.load %arg7[%c0, %c0_1] : memref<112x384xf32, #tpu.memory_space<vmem>>, vector<112x384xf32>
    %c0_2 = arith.constant 0 : index
    %c0_3 = arith.constant 0 : index
    %4 = vector.load %arg3[%c0_2, %c0_3] : memref<112x384xbf16, #tpu.memory_space<vmem>>, vector<112x384xbf16>
    %c0_4 = arith.constant 0 : index
    %c0_5 = arith.constant 0 : index
    %5 = vector.load %arg4[%c0_4, %c0_5] : memref<384x384xbf16, #tpu.memory_space<vmem>>, vector<384x384xbf16>
    %cst = arith.constant dense<0.000000e+00> : vector<112x384xf32>
    %6 = tpu.matmul %4, %5, %cst {dimension_numbers = #tpu.dot_dimension_numbers<[1], [0], [0], [1], [0, 0, 1, 1], [], []>} : vector<112x384xbf16>, vector<384x384xbf16>, vector<112x384xf32> -> vector<112x384xf32>
    %7 = arith.addf %3, %6 : vector<112x384xf32>
    %c0_6 = arith.constant 0 : index
    %c0_7 = arith.constant 0 : index
    %8 = vector.load %arg7[%c0_6, %c0_7] : memref<112x384xf32, #tpu.memory_space<vmem>>, vector<112x384xf32>
    tpu.vector_store %arg7[%c0_6, %c0_7], %7 {strides = array<i32>} : memref<112x384xf32, #tpu.memory_space<vmem>>, vector<112x384xf32>,
    %c5_i32 = arith.constant 5 : i32
    %9 = arith.cmpi eq, %arg2, %c5_i32 : i32
    %10 = arith.extui %9 : i1 to i32
    %c0_i32_8 = arith.constant 0 : i32
    %11 = arith.cmpi ne, %10, %c0_i32_8 : i32
    scf.if %11 {
      %c0_9 = arith.constant 0 : index
      %c0_10 = arith.constant 0 : index
      %12 = vector.load %arg7[%c0_9, %c0_10] : memref<112x384xf32, #tpu.memory_space<vmem>>, vector<112x384xf32>
      %c0_11 = arith.constant 0 : index
      %c0_12 = arith.constant 0 : index
      %13 = vector.load %arg5[%c0_11, %c0_12] : memref<1x384xf32, #tpu.memory_space<vmem>>, vector<1x384xf32>
      %14 = vector.broadcast %13 : vector<1x384xf32> to vector<112x384xf32>
      %15 = arith.addf %12, %14 : vector<112x384xf32>
      %cst_13 = arith.constant 0.000000e+00 : f32
      %16 = vector.broadcast %cst_13 : f32 to vector<112x384xf32>
      %17 = arith.maximumf %15, %16 : vector<112x384xf32>
      %c0_14 = arith.constant 0 : index
      %c0_15 = arith.constant 0 : index
      %18 = vector.load %arg6[%c0_14, %c0_15] : memref<112x384xf32, #tpu.memory_space<vmem>>, vector<112x384xf32>
      tpu.vector_store %arg6[%c0_14, %c0_15], %17 {strides = array<i32>} : memref<112x384xf32, #tpu.memory_space<vmem>>, vector<112x384xf32>,
    } else {
    }
    return
  }
  func.func @transform_0(%arg0: i32, %arg1: i32, %arg2: i32) -> (i32, i32) {
    %c0_i32 = arith.constant 0 : i32
    return %arg0, %arg2 : i32, i32
  }
  func.func @transform_1(%arg0: i32, %arg1: i32, %arg2: i32) -> (i32, i32) {
    %c0_i32 = arith.constant 0 : i32
    return %arg2, %arg1 : i32, i32
  }
  func.func @transform_2(%arg0: i32, %arg1: i32, %arg2: i32) -> (i32, i32) {
    %c0_i32 = arith.constant 0 : i32
    %c0_i32_0 = arith.constant 0 : i32
    return %c0_i32, %arg1 : i32, i32
  }
  func.func @transform_3(%arg0: i32, %arg1: i32, %arg2: i32) -> (i32, i32) {
    %c0_i32 = arith.constant 0 : i32
    return %arg0, %arg1 : i32, i32
  }
}

module attributes {stable_mosaic.version = 11 : i64} {
  func.func @_matmul_bias_act_kernel(%arg0: i32, %arg1: i32, %arg2: i32, %arg3: memref<112x384xbf16, #tpu.memory_space<vmem>>, %arg4: memref<384x256xbf16, #tpu.memory_space<vmem>>, %arg5: memref<1x256xf32, #tpu.memory_space<vmem>>, %arg6: memref<112x256xf32, #tpu.memory_space<vmem>>, %arg7: memref<112x256xf32, #tpu.memory_space<vmem>>) attributes {dimension_semantics = [#tpu.dimension_semantics<parallel>, #tpu.dimension_semantics<parallel>, #tpu.dimension_semantics<arbitrary>], iteration_bounds = array<i64: 1, 1, 6>, scalar_prefetch = 0 : i64, scratch_operands = 1 : i64, tpu.core_type = #tpu.core_type<tc>, window_params = [{transform_indices = @transform_0, window_bounds = array<i64: 112, 384>}, {transform_indices = @transform_1, window_bounds = array<i64: 384, 256>}, {transform_indices = @transform_2, window_bounds = array<i64: 1, 256>}, {transform_indices = @transform_3, window_bounds = array<i64: 112, 256>}]} {
    %c0_i32 = arith.constant 0 : i32
    %0 = arith.cmpi eq, %arg2, %c0_i32 : i32
    %1 = arith.extui %0 : i1 to i32
    %c0_i32_0 = arith.constant 0 : i32
    %2 = arith.cmpi ne, %1, %c0_i32_0 : i32
    scf.if %2 {
      %cst_9 = arith.constant 0.000000e+00 : f32
      %12 = vector.broadcast %cst_9 : f32 to vector<112x256xf32>
      %c0_10 = arith.constant 0 : index
      %c0_11 = arith.constant 0 : index
      %13 = vector.load %arg7[%c0_10, %c0_11] : memref<112x256xf32, #tpu.memory_space<vmem>>, vector<112x256xf32>
      tpu.vector_store %arg7[%c0_10, %c0_11], %12 {strides = array<i32>} : memref<112x256xf32, #tpu.memory_space<vmem>>, vector<112x256xf32>,
    } else {
    }
    %c0 = arith.constant 0 : index
    %c0_1 = arith.constant 0 : index
    %3 = vector.load %arg7[%c0, %c0_1] : memref<112x256xf32, #tpu.memory_space<vmem>>, vector<112x256xf32>
    %c0_2 = arith.constant 0 : index
    %c0_3 = arith.constant 0 : index
    %4 = vector.load %arg3[%c0_2, %c0_3] : memref<112x384xbf16, #tpu.memory_space<vmem>>, vector<112x384xbf16>
    %c0_4 = arith.constant 0 : index
    %c0_5 = arith.constant 0 : index
    %5 = vector.load %arg4[%c0_4, %c0_5] : memref<384x256xbf16, #tpu.memory_space<vmem>>, vector<384x256xbf16>
    %cst = arith.constant dense<0.000000e+00> : vector<112x256xf32>
    %6 = tpu.matmul %4, %5, %cst {dimension_numbers = #tpu.dot_dimension_numbers<[1], [0], [0], [1], [0, 0, 1, 1], [], []>} : vector<112x384xbf16>, vector<384x256xbf16>, vector<112x256xf32> -> vector<112x256xf32>
    %7 = arith.addf %3, %6 : vector<112x256xf32>
    %c0_6 = arith.constant 0 : index
    %c0_7 = arith.constant 0 : index
    %8 = vector.load %arg7[%c0_6, %c0_7] : memref<112x256xf32, #tpu.memory_space<vmem>>, vector<112x256xf32>
    tpu.vector_store %arg7[%c0_6, %c0_7], %7 {strides = array<i32>} : memref<112x256xf32, #tpu.memory_space<vmem>>, vector<112x256xf32>,
    %c5_i32 = arith.constant 5 : i32
    %9 = arith.cmpi eq, %arg2, %c5_i32 : i32
    %10 = arith.extui %9 : i1 to i32
    %c0_i32_8 = arith.constant 0 : i32
    %11 = arith.cmpi ne, %10, %c0_i32_8 : i32
    scf.if %11 {
      %c0_9 = arith.constant 0 : index
      %c0_10 = arith.constant 0 : index
      %12 = vector.load %arg7[%c0_9, %c0_10] : memref<112x256xf32, #tpu.memory_space<vmem>>, vector<112x256xf32>
      %c0_11 = arith.constant 0 : index
      %c0_12 = arith.constant 0 : index
      %13 = vector.load %arg5[%c0_11, %c0_12] : memref<1x256xf32, #tpu.memory_space<vmem>>, vector<1x256xf32>
      %14 = vector.broadcast %13 : vector<1x256xf32> to vector<112x256xf32>
      %15 = arith.addf %12, %14 : vector<112x256xf32>
      %cst_13 = arith.constant 0.000000e+00 : f32
      %16 = vector.broadcast %cst_13 : f32 to vector<112x256xf32>
      %17 = arith.maximumf %15, %16 : vector<112x256xf32>
      %c0_14 = arith.constant 0 : index
      %c0_15 = arith.constant 0 : index
      %18 = vector.load %arg6[%c0_14, %c0_15] : memref<112x256xf32, #tpu.memory_space<vmem>>, vector<112x256xf32>
      tpu.vector_store %arg6[%c0_14, %c0_15], %17 {strides = array<i32>} : memref<112x256xf32, #tpu.memory_space<vmem>>, vector<112x256xf32>,
    } else {
    }
    return
  }
  func.func @transform_0(%arg0: i32, %arg1: i32, %arg2: i32) -> (i32, i32) {
    %c0_i32 = arith.constant 0 : i32
    return %arg0, %arg2 : i32, i32
  }
  func.func @transform_1(%arg0: i32, %arg1: i32, %arg2: i32) -> (i32, i32) {
    %c0_i32 = arith.constant 0 : i32
    return %arg2, %arg1 : i32, i32
  }
  func.func @transform_2(%arg0: i32, %arg1: i32, %arg2: i32) -> (i32, i32) {
    %c0_i32 = arith.constant 0 : i32
    %c0_i32_0 = arith.constant 0 : i32
    return %c0_i32, %arg1 : i32, i32
  }
  func.func @transform_3(%arg0: i32, %arg1: i32, %arg2: i32) -> (i32, i32) {
    %c0_i32 = arith.constant 0 : i32
    return %arg0, %arg1 : i32, i32
  }
}

module attributes {stable_mosaic.version = 11 : i64} {
  func.func @_matmul_bias_act_kernel(%arg0: i32, %arg1: i32, %arg2: i32, %arg3: memref<512x384xbf16, #tpu.memory_space<vmem>>, %arg4: memref<384x256xbf16, #tpu.memory_space<vmem>>, %arg5: memref<1x256xf32, #tpu.memory_space<vmem>>, %arg6: memref<512x256xbf16, #tpu.memory_space<vmem>>, %arg7: memref<512x256xf32, #tpu.memory_space<vmem>>) attributes {dimension_semantics = [#tpu.dimension_semantics<parallel>, #tpu.dimension_semantics<parallel>, #tpu.dimension_semantics<arbitrary>], iteration_bounds = array<i64: 1, 1, 6>, scalar_prefetch = 0 : i64, scratch_operands = 1 : i64, tpu.core_type = #tpu.core_type<tc>, window_params = [{transform_indices = @transform_0, window_bounds = array<i64: 512, 384>}, {transform_indices = @transform_1, window_bounds = array<i64: 384, 256>}, {transform_indices = @transform_2, window_bounds = array<i64: 1, 256>}, {transform_indices = @transform_3, window_bounds = array<i64: 512, 256>}]} {
    %c0_i32 = arith.constant 0 : i32
    %0 = arith.cmpi eq, %arg2, %c0_i32 : i32
    %1 = arith.extui %0 : i1 to i32
    %c0_i32_0 = arith.constant 0 : i32
    %2 = arith.cmpi ne, %1, %c0_i32_0 : i32
    scf.if %2 {
      %cst_9 = arith.constant 0.000000e+00 : f32
      %12 = vector.broadcast %cst_9 : f32 to vector<512x256xf32>
      %c0_10 = arith.constant 0 : index
      %c0_11 = arith.constant 0 : index
      %13 = vector.load %arg7[%c0_10, %c0_11] : memref<512x256xf32, #tpu.memory_space<vmem>>, vector<512x256xf32>
      tpu.vector_store %arg7[%c0_10, %c0_11], %12 {strides = array<i32>} : memref<512x256xf32, #tpu.memory_space<vmem>>, vector<512x256xf32>,
    } else {
    }
    %c0 = arith.constant 0 : index
    %c0_1 = arith.constant 0 : index
    %3 = vector.load %arg7[%c0, %c0_1] : memref<512x256xf32, #tpu.memory_space<vmem>>, vector<512x256xf32>
    %c0_2 = arith.constant 0 : index
    %c0_3 = arith.constant 0 : index
    %4 = vector.load %arg3[%c0_2, %c0_3] : memref<512x384xbf16, #tpu.memory_space<vmem>>, vector<512x384xbf16>
    %c0_4 = arith.constant 0 : index
    %c0_5 = arith.constant 0 : index
    %5 = vector.load %arg4[%c0_4, %c0_5] : memref<384x256xbf16, #tpu.memory_space<vmem>>, vector<384x256xbf16>
    %cst = arith.constant dense<0.000000e+00> : vector<512x256xf32>
    %6 = tpu.matmul %4, %5, %cst {dimension_numbers = #tpu.dot_dimension_numbers<[1], [0], [0], [1], [0, 0, 1, 1], [], []>} : vector<512x384xbf16>, vector<384x256xbf16>, vector<512x256xf32> -> vector<512x256xf32>
    %7 = arith.addf %3, %6 : vector<512x256xf32>
    %c0_6 = arith.constant 0 : index
    %c0_7 = arith.constant 0 : index
    %8 = vector.load %arg7[%c0_6, %c0_7] : memref<512x256xf32, #tpu.memory_space<vmem>>, vector<512x256xf32>
    tpu.vector_store %arg7[%c0_6, %c0_7], %7 {strides = array<i32>} : memref<512x256xf32, #tpu.memory_space<vmem>>, vector<512x256xf32>,
    %c5_i32 = arith.constant 5 : i32
    %9 = arith.cmpi eq, %arg2, %c5_i32 : i32
    %10 = arith.extui %9 : i1 to i32
    %c0_i32_8 = arith.constant 0 : i32
    %11 = arith.cmpi ne, %10, %c0_i32_8 : i32
    scf.if %11 {
      %c0_9 = arith.constant 0 : index
      %c0_10 = arith.constant 0 : index
      %12 = vector.load %arg7[%c0_9, %c0_10] : memref<512x256xf32, #tpu.memory_space<vmem>>, vector<512x256xf32>
      %c0_11 = arith.constant 0 : index
      %c0_12 = arith.constant 0 : index
      %13 = vector.load %arg5[%c0_11, %c0_12] : memref<1x256xf32, #tpu.memory_space<vmem>>, vector<1x256xf32>
      %14 = vector.broadcast %13 : vector<1x256xf32> to vector<512x256xf32>
      %15 = arith.addf %12, %14 : vector<512x256xf32>
      %cst_13 = arith.constant 0.000000e+00 : f32
      %16 = vector.broadcast %cst_13 : f32 to vector<512x256xf32>
      %17 = arith.maximumf %15, %16 : vector<512x256xf32>
      %18 = arith.truncf %17 : vector<512x256xf32> to vector<512x256xbf16>
      %c0_14 = arith.constant 0 : index
      %c0_15 = arith.constant 0 : index
      %19 = vector.load %arg6[%c0_14, %c0_15] : memref<512x256xbf16, #tpu.memory_space<vmem>>, vector<512x256xbf16>
      tpu.vector_store %arg6[%c0_14, %c0_15], %18 {strides = array<i32>} : memref<512x256xbf16, #tpu.memory_space<vmem>>, vector<512x256xbf16>,
    } else {
    }
    return
  }
  func.func @transform_0(%arg0: i32, %arg1: i32, %arg2: i32) -> (i32, i32) {
    %c0_i32 = arith.constant 0 : i32
    return %arg0, %arg2 : i32, i32
  }
  func.func @transform_1(%arg0: i32, %arg1: i32, %arg2: i32) -> (i32, i32) {
    %c0_i32 = arith.constant 0 : i32
    return %arg2, %arg1 : i32, i32
  }
  func.func @transform_2(%arg0: i32, %arg1: i32, %arg2: i32) -> (i32, i32) {
    %c0_i32 = arith.constant 0 : i32
    %c0_i32_0 = arith.constant 0 : i32
    return %c0_i32, %arg1 : i32, i32
  }
  func.func @transform_3(%arg0: i32, %arg1: i32, %arg2: i32) -> (i32, i32) {
    %c0_i32 = arith.constant 0 : i32
    return %arg0, %arg1 : i32, i32
  }
}

module attributes {stable_mosaic.version = 11 : i64} {
  func.func @_maxpool3x3s2_kernel(%arg0: i32, %arg1: memref<16x16x2x4xf32, #tpu.memory_space<vmem>>, %arg2: memref<7x7x2x4xf32, #tpu.memory_space<vmem>>) attributes {dimension_semantics = [#tpu.dimension_semantics<parallel>], iteration_bounds = array<i64: 1>, scalar_prefetch = 0 : i64, scratch_operands = 0 : i64, tpu.core_type = #tpu.core_type<tc>, window_params = [{transform_indices = @transform_0, window_bounds = array<i64: 16, 16, 2, 4>}, {transform_indices = @transform_1, window_bounds = array<i64: 7, 7, 2, 4>}]} {
    %c0 = arith.constant 0 : index
    %c0_0 = arith.constant 0 : index
    %c0_1 = arith.constant 0 : index
    %c0_2 = arith.constant 0 : index
    %0 = vector.load %arg1[%c0, %c0_0, %c0_1, %c0_2] : memref<16x16x2x4xf32, #tpu.memory_space<vmem>>, vector<1x16x2x4xf32>
    %1 = vector.shape_cast %0 : vector<1x16x2x4xf32> to vector<16x2x4xf32>
    %c1 = arith.constant 1 : index
    %c0_3 = arith.constant 0 : index
    %c0_4 = arith.constant 0 : index
    %c0_5 = arith.constant 0 : index
    %2 = vector.load %arg1[%c1, %c0_3, %c0_4, %c0_5] : memref<16x16x2x4xf32, #tpu.memory_space<vmem>>, vector<1x16x2x4xf32>
    %3 = vector.shape_cast %2 : vector<1x16x2x4xf32> to vector<16x2x4xf32>
    %4 = arith.maximumf %1, %3 : vector<16x2x4xf32>
    %c2 = arith.constant 2 : index
    %c0_6 = arith.constant 0 : index
    %c0_7 = arith.constant 0 : index
    %c0_8 = arith.constant 0 : index
    %5 = vector.load %arg1[%c2, %c0_6, %c0_7, %c0_8] : memref<16x16x2x4xf32, #tpu.memory_space<vmem>>, vector<1x16x2x4xf32>
    %6 = vector.shape_cast %5 : vector<1x16x2x4xf32> to vector<16x2x4xf32>
    %7 = arith.maximumf %4, %6 : vector<16x2x4xf32>
    %8 = vector.extract_strided_slice %7 {offsets = [0, 0, 0], sizes = [1, 2, 4], strides = [1, 1, 1]} : vector<16x2x4xf32> to vector<1x2x4xf32>
    %9 = vector.shape_cast %8 : vector<1x2x4xf32> to vector<2x4xf32>
    %10 = vector.extract_strided_slice %7 {offsets = [1, 0, 0], sizes = [1, 2, 4], strides = [1, 1, 1]} : vector<16x2x4xf32> to vector<1x2x4xf32>
    %11 = vector.shape_cast %10 : vector<1x2x4xf32> to vector<2x4xf32>
    %12 = arith.maximumf %9, %11 : vector<2x4xf32>
    %13 = vector.extract_strided_slice %7 {offsets = [2, 0, 0], sizes = [1, 2, 4], strides = [1, 1, 1]} : vector<16x2x4xf32> to vector<1x2x4xf32>
    %14 = vector.shape_cast %13 : vector<1x2x4xf32> to vector<2x4xf32>
    %15 = arith.maximumf %12, %14 : vector<2x4xf32>
    %c0_9 = arith.constant 0 : index
    %c0_10 = arith.constant 0 : index
    %c0_11 = arith.constant 0 : index
    %c0_12 = arith.constant 0 : index
    %16 = vector.load %arg2[%c0_9, %c0_10, %c0_11, %c0_12] : memref<7x7x2x4xf32, #tpu.memory_space<vmem>>, vector<1x1x2x4xf32>
    %17 = vector.shape_cast %16 : vector<1x1x2x4xf32> to vector<2x4xf32>
    %18 = vector.shape_cast %15 : vector<2x4xf32> to vector<1x1x2x4xf32>
    tpu.vector_store %arg2[%c0_9, %c0_10, %c0_11, %c0_12], %18 {strides = array<i32>} : memref<7x7x2x4xf32, #tpu.memory_space<vmem>>, vector<1x1x2x4xf32>,
    %19 = vector.extract_strided_slice %7 {offsets = [2, 0, 0], sizes = [1, 2, 4], strides = [1, 1, 1]} : vector<16x2x4xf32> to vector<1x2x4xf32>
    %20 = vector.shape_cast %19 : vector<1x2x4xf32> to vector<2x4xf32>
    %21 = vector.extract_strided_slice %7 {offsets = [3, 0, 0], sizes = [1, 2, 4], strides = [1, 1, 1]} : vector<16x2x4xf32> to vector<1x2x4xf32>
    %22 = vector.shape_cast %21 : vector<1x2x4xf32> to vector<2x4xf32>
    %23 = arith.maximumf %20, %22 : vector<2x4xf32>
    %24 = vector.extract_strided_slice %7 {offsets = [4, 0, 0], sizes = [1, 2, 4], strides = [1, 1, 1]} : vector<16x2x4xf32> to vector<1x2x4xf32>
    %25 = vector.shape_cast %24 : vector<1x2x4xf32> to vector<2x4xf32>
    %26 = arith.maximumf %23, %25 : vector<2x4xf32>
    %c0_13 = arith.constant 0 : index
    %c1_14 = arith.constant 1 : index
    %c0_15 = arith.constant 0 : index
    %c0_16 = arith.constant 0 : index
    %27 = vector.load %arg2[%c0_13, %c1_14, %c0_15, %c0_16] : memref<7x7x2x4xf32, #tpu.memory_space<vmem>>, vector<1x1x2x4xf32>
    %28 = vector.shape_cast %27 : vector<1x1x2x4xf32> to vector<2x4xf32>
    %29 = vector.shape_cast %26 : vector<2x4xf32> to vector<1x1x2x4xf32>
    tpu.vector_store %arg2[%c0_13, %c1_14, %c0_15, %c0_16], %29 {strides = array<i32>} : memref<7x7x2x4xf32, #tpu.memory_space<vmem>>, vector<1x1x2x4xf32>,
    %30 = vector.extract_strided_slice %7 {offsets = [4, 0, 0], sizes = [1, 2, 4], strides = [1, 1, 1]} : vector<16x2x4xf32> to vector<1x2x4xf32>
    %31 = vector.shape_cast %30 : vector<1x2x4xf32> to vector<2x4xf32>
    %32 = vector.extract_strided_slice %7 {offsets = [5, 0, 0], sizes = [1, 2, 4], strides = [1, 1, 1]} : vector<16x2x4xf32> to vector<1x2x4xf32>
    %33 = vector.shape_cast %32 : vector<1x2x4xf32> to vector<2x4xf32>
    %34 = arith.maximumf %31, %33 : vector<2x4xf32>
    %35 = vector.extract_strided_slice %7 {offsets = [6, 0, 0], sizes = [1, 2, 4], strides = [1, 1, 1]} : vector<16x2x4xf32> to vector<1x2x4xf32>
    %36 = vector.shape_cast %35 : vector<1x2x4xf32> to vector<2x4xf32>
    %37 = arith.maximumf %34, %36 : vector<2x4xf32>
    %c0_17 = arith.constant 0 : index
    %c2_18 = arith.constant 2 : index
    %c0_19 = arith.constant 0 : index
    %c0_20 = arith.constant 0 : index
    %38 = vector.load %arg2[%c0_17, %c2_18, %c0_19, %c0_20] : memref<7x7x2x4xf32, #tpu.memory_space<vmem>>, vector<1x1x2x4xf32>
    %39 = vector.shape_cast %38 : vector<1x1x2x4xf32> to vector<2x4xf32>
    %40 = vector.shape_cast %37 : vector<2x4xf32> to vector<1x1x2x4xf32>
    tpu.vector_store %arg2[%c0_17, %c2_18, %c0_19, %c0_20], %40 {strides = array<i32>} : memref<7x7x2x4xf32, #tpu.memory_space<vmem>>, vector<1x1x2x4xf32>,
    %41 = vector.extract_strided_slice %7 {offsets = [6, 0, 0], sizes = [1, 2, 4], strides = [1, 1, 1]} : vector<16x2x4xf32> to vector<1x2x4xf32>
    %42 = vector.shape_cast %41 : vector<1x2x4xf32> to vector<2x4xf32>
    %43 = vector.extract_strided_slice %7 {offsets = [7, 0, 0], sizes = [1, 2, 4], strides = [1, 1, 1]} : vector<16x2x4xf32> to vector<1x2x4xf32>
    %44 = vector.shape_cast %43 : vector<1x2x4xf32> to vector<2x4xf32>
    %45 = arith.maximumf %42, %44 : vector<2x4xf32>
    %46 = vector.extract_strided_slice %7 {offsets = [8, 0, 0], sizes = [1, 2, 4], strides = [1, 1, 1]} : vector<16x2x4xf32> to vector<1x2x4xf32>
    %47 = vector.shape_cast %46 : vector<1x2x4xf32> to vector<2x4xf32>
    %48 = arith.maximumf %45, %47 : vector<2x4xf32>
    %c0_21 = arith.constant 0 : index
    %c3 = arith.constant 3 : index
    %c0_22 = arith.constant 0 : index
    %c0_23 = arith.constant 0 : index
    %49 = vector.load %arg2[%c0_21, %c3, %c0_22, %c0_23] : memref<7x7x2x4xf32, #tpu.memory_space<vmem>>, vector<1x1x2x4xf32>
    %50 = vector.shape_cast %49 : vector<1x1x2x4xf32> to vector<2x4xf32>
    %51 = vector.shape_cast %48 : vector<2x4xf32> to vector<1x1x2x4xf32>
    tpu.vector_store %arg2[%c0_21, %c3, %c0_22, %c0_23], %51 {strides = array<i32>} : memref<7x7x2x4xf32, #tpu.memory_space<vmem>>, vector<1x1x2x4xf32>,
    %52 = vector.extract_strided_slice %7 {offsets = [8, 0, 0], sizes = [1, 2, 4], strides = [1, 1, 1]} : vector<16x2x4xf32> to vector<1x2x4xf32>
    %53 = vector.shape_cast %52 : vector<1x2x4xf32> to vector<2x4xf32>
    %54 = vector.extract_strided_slice %7 {offsets = [9, 0, 0], sizes = [1, 2, 4], strides = [1, 1, 1]} : vector<16x2x4xf32> to vector<1x2x4xf32>
    %55 = vector.shape_cast %54 : vector<1x2x4xf32> to vector<2x4xf32>
    %56 = arith.maximumf %53, %55 : vector<2x4xf32>
    %57 = vector.extract_strided_slice %7 {offsets = [10, 0, 0], sizes = [1, 2, 4], strides = [1, 1, 1]} : vector<16x2x4xf32> to vector<1x2x4xf32>
    %58 = vector.shape_cast %57 : vector<1x2x4xf32> to vector<2x4xf32>
    %59 = arith.maximumf %56, %58 : vector<2x4xf32>
    %c0_24 = arith.constant 0 : index
    %c4 = arith.constant 4 : index
    %c0_25 = arith.constant 0 : index
    %c0_26 = arith.constant 0 : index
    %60 = vector.load %arg2[%c0_24, %c4, %c0_25, %c0_26] : memref<7x7x2x4xf32, #tpu.memory_space<vmem>>, vector<1x1x2x4xf32>
    %61 = vector.shape_cast %60 : vector<1x1x2x4xf32> to vector<2x4xf32>
    %62 = vector.shape_cast %59 : vector<2x4xf32> to vector<1x1x2x4xf32>
    tpu.vector_store %arg2[%c0_24, %c4, %c0_25, %c0_26], %62 {strides = array<i32>} : memref<7x7x2x4xf32, #tpu.memory_space<vmem>>, vector<1x1x2x4xf32>,
    %63 = vector.extract_strided_slice %7 {offsets = [10, 0, 0], sizes = [1, 2, 4], strides = [1, 1, 1]} : vector<16x2x4xf32> to vector<1x2x4xf32>
    %64 = vector.shape_cast %63 : vector<1x2x4xf32> to vector<2x4xf32>
    %65 = vector.extract_strided_slice %7 {offsets = [11, 0, 0], sizes = [1, 2, 4], strides = [1, 1, 1]} : vector<16x2x4xf32> to vector<1x2x4xf32>
    %66 = vector.shape_cast %65 : vector<1x2x4xf32> to vector<2x4xf32>
    %67 = arith.maximumf %64, %66 : vector<2x4xf32>
    %68 = vector.extract_strided_slice %7 {offsets = [12, 0, 0], sizes = [1, 2, 4], strides = [1, 1, 1]} : vector<16x2x4xf32> to vector<1x2x4xf32>
    %69 = vector.shape_cast %68 : vector<1x2x4xf32> to vector<2x4xf32>
    %70 = arith.maximumf %67, %69 : vector<2x4xf32>
    %c0_27 = arith.constant 0 : index
    %c5 = arith.constant 5 : index
    %c0_28 = arith.constant 0 : index
    %c0_29 = arith.constant 0 : index
    %71 = vector.load %arg2[%c0_27, %c5, %c0_28, %c0_29] : memref<7x7x2x4xf32, #tpu.memory_space<vmem>>, vector<1x1x2x4xf32>
    %72 = vector.shape_cast %71 : vector<1x1x2x4xf32> to vector<2x4xf32>
    %73 = vector.shape_cast %70 : vector<2x4xf32> to vector<1x1x2x4xf32>
    tpu.vector_store %arg2[%c0_27, %c5, %c0_28, %c0_29], %73 {strides = array<i32>} : memref<7x7x2x4xf32, #tpu.memory_space<vmem>>, vector<1x1x2x4xf32>,
    %74 = vector.extract_strided_slice %7 {offsets = [12, 0, 0], sizes = [1, 2, 4], strides = [1, 1, 1]} : vector<16x2x4xf32> to vector<1x2x4xf32>
    %75 = vector.shape_cast %74 : vector<1x2x4xf32> to vector<2x4xf32>
    %76 = vector.extract_strided_slice %7 {offsets = [13, 0, 0], sizes = [1, 2, 4], strides = [1, 1, 1]} : vector<16x2x4xf32> to vector<1x2x4xf32>
    %77 = vector.shape_cast %76 : vector<1x2x4xf32> to vector<2x4xf32>
    %78 = arith.maximumf %75, %77 : vector<2x4xf32>
    %79 = vector.extract_strided_slice %7 {offsets = [14, 0, 0], sizes = [1, 2, 4], strides = [1, 1, 1]} : vector<16x2x4xf32> to vector<1x2x4xf32>
    %80 = vector.shape_cast %79 : vector<1x2x4xf32> to vector<2x4xf32>
    %81 = arith.maximumf %78, %80 : vector<2x4xf32>
    %c0_30 = arith.constant 0 : index
    %c6 = arith.constant 6 : index
    %c0_31 = arith.constant 0 : index
    %c0_32 = arith.constant 0 : index
    %82 = vector.load %arg2[%c0_30, %c6, %c0_31, %c0_32] : memref<7x7x2x4xf32, #tpu.memory_space<vmem>>, vector<1x1x2x4xf32>
    %83 = vector.shape_cast %82 : vector<1x1x2x4xf32> to vector<2x4xf32>
    %84 = vector.shape_cast %81 : vector<2x4xf32> to vector<1x1x2x4xf32>
    tpu.vector_store %arg2[%c0_30, %c6, %c0_31, %c0_32], %84 {strides = array<i32>} : memref<7x7x2x4xf32, #tpu.memory_space<vmem>>, vector<1x1x2x4xf32>,
    %c2_33 = arith.constant 2 : index
    %c0_34 = arith.constant 0 : index
    %c0_35 = arith.constant 0 : index
    %c0_36 = arith.constant 0 : index
    %85 = vector.load %arg1[%c2_33, %c0_34, %c0_35, %c0_36] : memref<16x16x2x4xf32, #tpu.memory_space<vmem>>, vector<1x16x2x4xf32>
    %86 = vector.shape_cast %85 : vector<1x16x2x4xf32> to vector<16x2x4xf32>
    %c3_37 = arith.constant 3 : index
    %c0_38 = arith.constant 0 : index
    %c0_39 = arith.constant 0 : index
    %c0_40 = arith.constant 0 : index
    %87 = vector.load %arg1[%c3_37, %c0_38, %c0_39, %c0_40] : memref<16x16x2x4xf32, #tpu.memory_space<vmem>>, vector<1x16x2x4xf32>
    %88 = vector.shape_cast %87 : vector<1x16x2x4xf32> to vector<16x2x4xf32>
    %89 = arith.maximumf %86, %88 : vector<16x2x4xf32>
    %c4_41 = arith.constant 4 : index
    %c0_42 = arith.constant 0 : index
    %c0_43 = arith.constant 0 : index
    %c0_44 = arith.constant 0 : index
    %90 = vector.load %arg1[%c4_41, %c0_42, %c0_43, %c0_44] : memref<16x16x2x4xf32, #tpu.memory_space<vmem>>, vector<1x16x2x4xf32>
    %91 = vector.shape_cast %90 : vector<1x16x2x4xf32> to vector<16x2x4xf32>
    %92 = arith.maximumf %89, %91 : vector<16x2x4xf32>
    %93 = vector.extract_strided_slice %92 {offsets = [0, 0, 0], sizes = [1, 2, 4], strides = [1, 1, 1]} : vector<16x2x4xf32> to vector<1x2x4xf32>
    %94 = vector.shape_cast %93 : vector<1x2x4xf32> to vector<2x4xf32>
    %95 = vector.extract_strided_slice %92 {offsets = [1, 0, 0], sizes = [1, 2, 4], strides = [1, 1, 1]} : vector<16x2x4xf32> to vector<1x2x4xf32>
    %96 = vector.shape_cast %95 : vector<1x2x4xf32> to vector<2x4xf32>
    %97 = arith.maximumf %94, %96 : vector<2x4xf32>
    %98 = vector.extract_strided_slice %92 {offsets = [2, 0, 0], sizes = [1, 2, 4], strides = [1, 1, 1]} : vector<16x2x4xf32> to vector<1x2x4xf32>
    %99 = vector.shape_cast %98 : vector<1x2x4xf32> to vector<2x4xf32>
    %100 = arith.maximumf %97, %99 : vector<2x4xf32>
    %c1_45 = arith.constant 1 : index
    %c0_46 = arith.constant 0 : index
    %c0_47 = arith.constant 0 : index
    %c0_48 = arith.constant 0 : index
    %101 = vector.load %arg2[%c1_45, %c0_46, %c0_47, %c0_48] : memref<7x7x2x4xf32, #tpu.memory_space<vmem>>, vector<1x1x2x4xf32>
    %102 = vector.shape_cast %101 : vector<1x1x2x4xf32> to vector<2x4xf32>
    %103 = vector.shape_cast %100 : vector<2x4xf32> to vector<1x1x2x4xf32>
    tpu.vector_store %arg2[%c1_45, %c0_46, %c0_47, %c0_48], %103 {strides = array<i32>} : memref<7x7x2x4xf32, #tpu.memory_space<vmem>>, vector<1x1x2x4xf32>,
    %104 = vector.extract_strided_slice %92 {offsets = [2, 0, 0], sizes = [1, 2, 4], strides = [1, 1, 1]} : vector<16x2x4xf32> to vector<1x2x4xf32>
    %105 = vector.shape_cast %104 : vector<1x2x4xf32> to vector<2x4xf32>
    %106 = vector.extract_strided_slice %92 {offsets = [3, 0, 0], sizes = [1, 2, 4], strides = [1, 1, 1]} : vector<16x2x4xf32> to vector<1x2x4xf32>
    %107 = vector.shape_cast %106 : vector<1x2x4xf32> to vector<2x4xf32>
    %108 = arith.maximumf %105, %107 : vector<2x4xf32>
    %109 = vector.extract_strided_slice %92 {offsets = [4, 0, 0], sizes = [1, 2, 4], strides = [1, 1, 1]} : vector<16x2x4xf32> to vector<1x2x4xf32>
    %110 = vector.shape_cast %109 : vector<1x2x4xf32> to vector<2x4xf32>
    %111 = arith.maximumf %108, %110 : vector<2x4xf32>
    %c1_49 = arith.constant 1 : index
    %c1_50 = arith.constant 1 : index
    %c0_51 = arith.constant 0 : index
    %c0_52 = arith.constant 0 : index
    %112 = vector.load %arg2[%c1_49, %c1_50, %c0_51, %c0_52] : memref<7x7x2x4xf32, #tpu.memory_space<vmem>>, vector<1x1x2x4xf32>
    %113 = vector.shape_cast %112 : vector<1x1x2x4xf32> to vector<2x4xf32>
    %114 = vector.shape_cast %111 : vector<2x4xf32> to vector<1x1x2x4xf32>
    tpu.vector_store %arg2[%c1_49, %c1_50, %c0_51, %c0_52], %114 {strides = array<i32>} : memref<7x7x2x4xf32, #tpu.memory_space<vmem>>, vector<1x1x2x4xf32>,
    %115 = vector.extract_strided_slice %92 {offsets = [4, 0, 0], sizes = [1, 2, 4], strides = [1, 1, 1]} : vector<16x2x4xf32> to vector<1x2x4xf32>
    %116 = vector.shape_cast %115 : vector<1x2x4xf32> to vector<2x4xf32>
    %117 = vector.extract_strided_slice %92 {offsets = [5, 0, 0], sizes = [1, 2, 4], strides = [1, 1, 1]} : vector<16x2x4xf32> to vector<1x2x4xf32>
    %118 = vector.shape_cast %117 : vector<1x2x4xf32> to vector<2x4xf32>
    %119 = arith.maximumf %116, %118 : vector<2x4xf32>
    %120 = vector.extract_strided_slice %92 {offsets = [6, 0, 0], sizes = [1, 2, 4], strides = [1, 1, 1]} : vector<16x2x4xf32> to vector<1x2x4xf32>
    %121 = vector.shape_cast %120 : vector<1x2x4xf32> to vector<2x4xf32>
    %122 = arith.maximumf %119, %121 : vector<2x4xf32>
    %c1_53 = arith.constant 1 : index
    %c2_54 = arith.constant 2 : index
    %c0_55 = arith.constant 0 : index
    %c0_56 = arith.constant 0 : index
    %123 = vector.load %arg2[%c1_53, %c2_54, %c0_55, %c0_56] : memref<7x7x2x4xf32, #tpu.memory_space<vmem>>, vector<1x1x2x4xf32>
    %124 = vector.shape_cast %123 : vector<1x1x2x4xf32> to vector<2x4xf32>
    %125 = vector.shape_cast %122 : vector<2x4xf32> to vector<1x1x2x4xf32>
    tpu.vector_store %arg2[%c1_53, %c2_54, %c0_55, %c0_56], %125 {strides = array<i32>} : memref<7x7x2x4xf32, #tpu.memory_space<vmem>>, vector<1x1x2x4xf32>,
    %126 = vector.extract_strided_slice %92 {offsets = [6, 0, 0], sizes = [1, 2, 4], strides = [1, 1, 1]} : vector<16x2x4xf32> to vector<1x2x4xf32>
    %127 = vector.shape_cast %126 : vector<1x2x4xf32> to vector<2x4xf32>
    %128 = vector.extract_strided_slice %92 {offsets = [7, 0, 0], sizes = [1, 2, 4], strides = [1, 1, 1]} : vector<16x2x4xf32> to vector<1x2x4xf32>
    %129 = vector.shape_cast %128 : vector<1x2x4xf32> to vector<2x4xf32>
    %130 = arith.maximumf %127, %129 : vector<2x4xf32>
    %131 = vector.extract_strided_slice %92 {offsets = [8, 0, 0], sizes = [1, 2, 4], strides = [1, 1, 1]} : vector<16x2x4xf32> to vector<1x2x4xf32>
    %132 = vector.shape_cast %131 : vector<1x2x4xf32> to vector<2x4xf32>
    %133 = arith.maximumf %130, %132 : vector<2x4xf32>
    %c1_57 = arith.constant 1 : index
    %c3_58 = arith.constant 3 : index
    %c0_59 = arith.constant 0 : index
    %c0_60 = arith.constant 0 : index
    %134 = vector.load %arg2[%c1_57, %c3_58, %c0_59, %c0_60] : memref<7x7x2x4xf32, #tpu.memory_space<vmem>>, vector<1x1x2x4xf32>
    %135 = vector.shape_cast %134 : vector<1x1x2x4xf32> to vector<2x4xf32>
    %136 = vector.shape_cast %133 : vector<2x4xf32> to vector<1x1x2x4xf32>
    tpu.vector_store %arg2[%c1_57, %c3_58, %c0_59, %c0_60], %136 {strides = array<i32>} : memref<7x7x2x4xf32, #tpu.memory_space<vmem>>, vector<1x1x2x4xf32>,
    %137 = vector.extract_strided_slice %92 {offsets = [8, 0, 0], sizes = [1, 2, 4], strides = [1, 1, 1]} : vector<16x2x4xf32> to vector<1x2x4xf32>
    %138 = vector.shape_cast %137 : vector<1x2x4xf32> to vector<2x4xf32>
    %139 = vector.extract_strided_slice %92 {offsets = [9, 0, 0], sizes = [1, 2, 4], strides = [1, 1, 1]} : vector<16x2x4xf32> to vector<1x2x4xf32>
    %140 = vector.shape_cast %139 : vector<1x2x4xf32> to vector<2x4xf32>
    %141 = arith.maximumf %138, %140 : vector<2x4xf32>
    %142 = vector.extract_strided_slice %92 {offsets = [10, 0, 0], sizes = [1, 2, 4], strides = [1, 1, 1]} : vector<16x2x4xf32> to vector<1x2x4xf32>
    %143 = vector.shape_cast %142 : vector<1x2x4xf32> to vector<2x4xf32>
    %144 = arith.maximumf %141, %143 : vector<2x4xf32>
    %c1_61 = arith.constant 1 : index
    %c4_62 = arith.constant 4 : index
    %c0_63 = arith.constant 0 : index
    %c0_64 = arith.constant 0 : index
    %145 = vector.load %arg2[%c1_61, %c4_62, %c0_63, %c0_64] : memref<7x7x2x4xf32, #tpu.memory_space<vmem>>, vector<1x1x2x4xf32>
    %146 = vector.shape_cast %145 : vector<1x1x2x4xf32> to vector<2x4xf32>
    %147 = vector.shape_cast %144 : vector<2x4xf32> to vector<1x1x2x4xf32>
    tpu.vector_store %arg2[%c1_61, %c4_62, %c0_63, %c0_64], %147 {strides = array<i32>} : memref<7x7x2x4xf32, #tpu.memory_space<vmem>>, vector<1x1x2x4xf32>,
    %148 = vector.extract_strided_slice %92 {offsets = [10, 0, 0], sizes = [1, 2, 4], strides = [1, 1, 1]} : vector<16x2x4xf32> to vector<1x2x4xf32>
    %149 = vector.shape_cast %148 : vector<1x2x4xf32> to vector<2x4xf32>
    %150 = vector.extract_strided_slice %92 {offsets = [11, 0, 0], sizes = [1, 2, 4], strides = [1, 1, 1]} : vector<16x2x4xf32> to vector<1x2x4xf32>
    %151 = vector.shape_cast %150 : vector<1x2x4xf32> to vector<2x4xf32>
    %152 = arith.maximumf %149, %151 : vector<2x4xf32>
    %153 = vector.extract_strided_slice %92 {offsets = [12, 0, 0], sizes = [1, 2, 4], strides = [1, 1, 1]} : vector<16x2x4xf32> to vector<1x2x4xf32>
    %154 = vector.shape_cast %153 : vector<1x2x4xf32> to vector<2x4xf32>
    %155 = arith.maximumf %152, %154 : vector<2x4xf32>
    %c1_65 = arith.constant 1 : index
    %c5_66 = arith.constant 5 : index
    %c0_67 = arith.constant 0 : index
    %c0_68 = arith.constant 0 : index
    %156 = vector.load %arg2[%c1_65, %c5_66, %c0_67, %c0_68] : memref<7x7x2x4xf32, #tpu.memory_space<vmem>>, vector<1x1x2x4xf32>
    %157 = vector.shape_cast %156 : vector<1x1x2x4xf32> to vector<2x4xf32>
    %158 = vector.shape_cast %155 : vector<2x4xf32> to vector<1x1x2x4xf32>
    tpu.vector_store %arg2[%c1_65, %c5_66, %c0_67, %c0_68], %158 {strides = array<i32>} : memref<7x7x2x4xf32, #tpu.memory_space<vmem>>, vector<1x1x2x4xf32>,
    %159 = vector.extract_strided_slice %92 {offsets = [12, 0, 0], sizes = [1, 2, 4], strides = [1, 1, 1]} : vector<16x2x4xf32> to vector<1x2x4xf32>
    %160 = vector.shape_cast %159 : vector<1x2x4xf32> to vector<2x4xf32>
    %161 = vector.extract_strided_slice %92 {offsets = [13, 0, 0], sizes = [1, 2, 4], strides = [1, 1, 1]} : vector<16x2x4xf32> to vector<1x2x4xf32>
    %162 = vector.shape_cast %161 : vector<1x2x4xf32> to vector<2x4xf32>
    %163 = arith.maximumf %160, %162 : vector<2x4xf32>
    %164 = vector.extract_strided_slice %92 {offsets = [14, 0, 0], sizes = [1, 2, 4], strides = [1, 1, 1]} : vector<16x2x4xf32> to vector<1x2x4xf32>
    %165 = vector.shape_cast %164 : vector<1x2x4xf32> to vector<2x4xf32>
    %166 = arith.maximumf %163, %165 : vector<2x4xf32>
    %c1_69 = arith.constant 1 : index
    %c6_70 = arith.constant 6 : index
    %c0_71 = arith.constant 0 : index
    %c0_72 = arith.constant 0 : index
    %167 = vector.load %arg2[%c1_69, %c6_70, %c0_71, %c0_72] : memref<7x7x2x4xf32, #tpu.memory_space<vmem>>, vector<1x1x2x4xf32>
    %168 = vector.shape_cast %167 : vector<1x1x2x4xf32> to vector<2x4xf32>
    %169 = vector.shape_cast %166 : vector<2x4xf32> to vector<1x1x2x4xf32>
    tpu.vector_store %arg2[%c1_69, %c6_70, %c0_71, %c0_72], %169 {strides = array<i32>} : memref<7x7x2x4xf32, #tpu.memory_space<vmem>>, vector<1x1x2x4xf32>,
    %c4_73 = arith.constant 4 : index
    %c0_74 = arith.constant 0 : index
    %c0_75 = arith.constant 0 : index
    %c0_76 = arith.constant 0 : index
    %170 = vector.load %arg1[%c4_73, %c0_74, %c0_75, %c0_76] : memref<16x16x2x4xf32, #tpu.memory_space<vmem>>, vector<1x16x2x4xf32>
    %171 = vector.shape_cast %170 : vector<1x16x2x4xf32> to vector<16x2x4xf32>
    %c5_77 = arith.constant 5 : index
    %c0_78 = arith.constant 0 : index
    %c0_79 = arith.constant 0 : index
    %c0_80 = arith.constant 0 : index
    %172 = vector.load %arg1[%c5_77, %c0_78, %c0_79, %c0_80] : memref<16x16x2x4xf32, #tpu.memory_space<vmem>>, vector<1x16x2x4xf32>
    %173 = vector.shape_cast %172 : vector<1x16x2x4xf32> to vector<16x2x4xf32>
    %174 = arith.maximumf %171, %173 : vector<16x2x4xf32>
    %c6_81 = arith.constant 6 : index
    %c0_82 = arith.constant 0 : index
    %c0_83 = arith.constant 0 : index
    %c0_84 = arith.constant 0 : index
    %175 = vector.load %arg1[%c6_81, %c0_82, %c0_83, %c0_84] : memref<16x16x2x4xf32, #tpu.memory_space<vmem>>, vector<1x16x2x4xf32>
    %176 = vector.shape_cast %175 : vector<1x16x2x4xf32> to vector<16x2x4xf32>
    %177 = arith.maximumf %174, %176 : vector<16x2x4xf32>
    %178 = vector.extract_strided_slice %177 {offsets = [0, 0, 0], sizes = [1, 2, 4], strides = [1, 1, 1]} : vector<16x2x4xf32> to vector<1x2x4xf32>
    %179 = vector.shape_cast %178 : vector<1x2x4xf32> to vector<2x4xf32>
    %180 = vector.extract_strided_slice %177 {offsets = [1, 0, 0], sizes = [1, 2, 4], strides = [1, 1, 1]} : vector<16x2x4xf32> to vector<1x2x4xf32>
    %181 = vector.shape_cast %180 : vector<1x2x4xf32> to vector<2x4xf32>
    %182 = arith.maximumf %179, %181 : vector<2x4xf32>
    %183 = vector.extract_strided_slice %177 {offsets = [2, 0, 0], sizes = [1, 2, 4], strides = [1, 1, 1]} : vector<16x2x4xf32> to vector<1x2x4xf32>
    %184 = vector.shape_cast %183 : vector<1x2x4xf32> to vector<2x4xf32>
    %185 = arith.maximumf %182, %184 : vector<2x4xf32>
    %c2_85 = arith.constant 2 : index
    %c0_86 = arith.constant 0 : index
    %c0_87 = arith.constant 0 : index
    %c0_88 = arith.constant 0 : index
    %186 = vector.load %arg2[%c2_85, %c0_86, %c0_87, %c0_88] : memref<7x7x2x4xf32, #tpu.memory_space<vmem>>, vector<1x1x2x4xf32>
    %187 = vector.shape_cast %186 : vector<1x1x2x4xf32> to vector<2x4xf32>
    %188 = vector.shape_cast %185 : vector<2x4xf32> to vector<1x1x2x4xf32>
    tpu.vector_store %arg2[%c2_85, %c0_86, %c0_87, %c0_88], %188 {strides = array<i32>} : memref<7x7x2x4xf32, #tpu.memory_space<vmem>>, vector<1x1x2x4xf32>,
    %189 = vector.extract_strided_slice %177 {offsets = [2, 0, 0], sizes = [1, 2, 4], strides = [1, 1, 1]} : vector<16x2x4xf32> to vector<1x2x4xf32>
    %190 = vector.shape_cast %189 : vector<1x2x4xf32> to vector<2x4xf32>
    %191 = vector.extract_strided_slice %177 {offsets = [3, 0, 0], sizes = [1, 2, 4], strides = [1, 1, 1]} : vector<16x2x4xf32> to vector<1x2x4xf32>
    %192 = vector.shape_cast %191 : vector<1x2x4xf32> to vector<2x4xf32>
    %193 = arith.maximumf %190, %192 : vector<2x4xf32>
    %194 = vector.extract_strided_slice %177 {offsets = [4, 0, 0], sizes = [1, 2, 4], strides = [1, 1, 1]} : vector<16x2x4xf32> to vector<1x2x4xf32>
    %195 = vector.shape_cast %194 : vector<1x2x4xf32> to vector<2x4xf32>
    %196 = arith.maximumf %193, %195 : vector<2x4xf32>
    %c2_89 = arith.constant 2 : index
    %c1_90 = arith.constant 1 : index
    %c0_91 = arith.constant 0 : index
    %c0_92 = arith.constant 0 : index
    %197 = vector.load %arg2[%c2_89, %c1_90, %c0_91, %c0_92] : memref<7x7x2x4xf32, #tpu.memory_space<vmem>>, vector<1x1x2x4xf32>
    %198 = vector.shape_cast %197 : vector<1x1x2x4xf32> to vector<2x4xf32>
    %199 = vector.shape_cast %196 : vector<2x4xf32> to vector<1x1x2x4xf32>
    tpu.vector_store %arg2[%c2_89, %c1_90, %c0_91, %c0_92], %199 {strides = array<i32>} : memref<7x7x2x4xf32, #tpu.memory_space<vmem>>, vector<1x1x2x4xf32>,
    %200 = vector.extract_strided_slice %177 {offsets = [4, 0, 0], sizes = [1, 2, 4], strides = [1, 1, 1]} : vector<16x2x4xf32> to vector<1x2x4xf32>
    %201 = vector.shape_cast %200 : vector<1x2x4xf32> to vector<2x4xf32>
    %202 = vector.extract_strided_slice %177 {offsets = [5, 0, 0], sizes = [1, 2, 4], strides = [1, 1, 1]} : vector<16x2x4xf32> to vector<1x2x4xf32>
    %203 = vector.shape_cast %202 : vector<1x2x4xf32> to vector<2x4xf32>
    %204 = arith.maximumf %201, %203 : vector<2x4xf32>
    %205 = vector.extract_strided_slice %177 {offsets = [6, 0, 0], sizes = [1, 2, 4], strides = [1, 1, 1]} : vector<16x2x4xf32> to vector<1x2x4xf32>
    %206 = vector.shape_cast %205 : vector<1x2x4xf32> to vector<2x4xf32>
    %207 = arith.maximumf %204, %206 : vector<2x4xf32>
    %c2_93 = arith.constant 2 : index
    %c2_94 = arith.constant 2 : index
    %c0_95 = arith.constant 0 : index
    %c0_96 = arith.constant 0 : index
    %208 = vector.load %arg2[%c2_93, %c2_94, %c0_95, %c0_96] : memref<7x7x2x4xf32, #tpu.memory_space<vmem>>, vector<1x1x2x4xf32>
    %209 = vector.shape_cast %208 : vector<1x1x2x4xf32> to vector<2x4xf32>
    %210 = vector.shape_cast %207 : vector<2x4xf32> to vector<1x1x2x4xf32>
    tpu.vector_store %arg2[%c2_93, %c2_94, %c0_95, %c0_96], %210 {strides = array<i32>} : memref<7x7x2x4xf32, #tpu.memory_space<vmem>>, vector<1x1x2x4xf32>,
    %211 = vector.extract_strided_slice %177 {offsets = [6, 0, 0], sizes = [1, 2, 4], strides = [1, 1, 1]} : vector<16x2x4xf32> to vector<1x2x4xf32>
    %212 = vector.shape_cast %211 : vector<1x2x4xf32> to vector<2x4xf32>
    %213 = vector.extract_strided_slice %177 {offsets = [7, 0, 0], sizes = [1, 2, 4], strides = [1, 1, 1]} : vector<16x2x4xf32> to vector<1x2x4xf32>
    %214 = vector.shape_cast %213 : vector<1x2x4xf32> to vector<2x4xf32>
    %215 = arith.maximumf %212, %214 : vector<2x4xf32>
    %216 = vector.extract_strided_slice %177 {offsets = [8, 0, 0], sizes = [1, 2, 4], strides = [1, 1, 1]} : vector<16x2x4xf32> to vector<1x2x4xf32>
    %217 = vector.shape_cast %216 : vector<1x2x4xf32> to vector<2x4xf32>
    %218 = arith.maximumf %215, %217 : vector<2x4xf32>
    %c2_97 = arith.constant 2 : index
    %c3_98 = arith.constant 3 : index
    %c0_99 = arith.constant 0 : index
    %c0_100 = arith.constant 0 : index
    %219 = vector.load %arg2[%c2_97, %c3_98, %c0_99, %c0_100] : memref<7x7x2x4xf32, #tpu.memory_space<vmem>>, vector<1x1x2x4xf32>
    %220 = vector.shape_cast %219 : vector<1x1x2x4xf32> to vector<2x4xf32>
    %221 = vector.shape_cast %218 : vector<2x4xf32> to vector<1x1x2x4xf32>
    tpu.vector_store %arg2[%c2_97, %c3_98, %c0_99, %c0_100], %221 {strides = array<i32>} : memref<7x7x2x4xf32, #tpu.memory_space<vmem>>, vector<1x1x2x4xf32>,
    %222 = vector.extract_strided_slice %177 {offsets = [8, 0, 0], sizes = [1, 2, 4], strides = [1, 1, 1]} : vector<16x2x4xf32> to vector<1x2x4xf32>
    %223 = vector.shape_cast %222 : vector<1x2x4xf32> to vector<2x4xf32>
    %224 = vector.extract_strided_slice %177 {offsets = [9, 0, 0], sizes = [1, 2, 4], strides = [1, 1, 1]} : vector<16x2x4xf32> to vector<1x2x4xf32>
    %225 = vector.shape_cast %224 : vector<1x2x4xf32> to vector<2x4xf32>
    %226 = arith.maximumf %223, %225 : vector<2x4xf32>
    %227 = vector.extract_strided_slice %177 {offsets = [10, 0, 0], sizes = [1, 2, 4], strides = [1, 1, 1]} : vector<16x2x4xf32> to vector<1x2x4xf32>
    %228 = vector.shape_cast %227 : vector<1x2x4xf32> to vector<2x4xf32>
    %229 = arith.maximumf %226, %228 : vector<2x4xf32>
    %c2_101 = arith.constant 2 : index
    %c4_102 = arith.constant 4 : index
    %c0_103 = arith.constant 0 : index
    %c0_104 = arith.constant 0 : index
    %230 = vector.load %arg2[%c2_101, %c4_102, %c0_103, %c0_104] : memref<7x7x2x4xf32, #tpu.memory_space<vmem>>, vector<1x1x2x4xf32>
    %231 = vector.shape_cast %230 : vector<1x1x2x4xf32> to vector<2x4xf32>
    %232 = vector.shape_cast %229 : vector<2x4xf32> to vector<1x1x2x4xf32>
    tpu.vector_store %arg2[%c2_101, %c4_102, %c0_103, %c0_104], %232 {strides = array<i32>} : memref<7x7x2x4xf32, #tpu.memory_space<vmem>>, vector<1x1x2x4xf32>,
    %233 = vector.extract_strided_slice %177 {offsets = [10, 0, 0], sizes = [1, 2, 4], strides = [1, 1, 1]} : vector<16x2x4xf32> to vector<1x2x4xf32>
    %234 = vector.shape_cast %233 : vector<1x2x4xf32> to vector<2x4xf32>
    %235 = vector.extract_strided_slice %177 {offsets = [11, 0, 0], sizes = [1, 2, 4], strides = [1, 1, 1]} : vector<16x2x4xf32> to vector<1x2x4xf32>
    %236 = vector.shape_cast %235 : vector<1x2x4xf32> to vector<2x4xf32>
    %237 = arith.maximumf %234, %236 : vector<2x4xf32>
    %238 = vector.extract_strided_slice %177 {offsets = [12, 0, 0], sizes = [1, 2, 4], strides = [1, 1, 1]} : vector<16x2x4xf32> to vector<1x2x4xf32>
    %239 = vector.shape_cast %238 : vector<1x2x4xf32> to vector<2x4xf32>
    %240 = arith.maximumf %237, %239 : vector<2x4xf32>
    %c2_105 = arith.constant 2 : index
    %c5_106 = arith.constant 5 : index
    %c0_107 = arith.constant 0 : index
    %c0_108 = arith.constant 0 : index
    %241 = vector.load %arg2[%c2_105, %c5_106, %c0_107, %c0_108] : memref<7x7x2x4xf32, #tpu.memory_space<vmem>>, vector<1x1x2x4xf32>
    %242 = vector.shape_cast %241 : vector<1x1x2x4xf32> to vector<2x4xf32>
    %243 = vector.shape_cast %240 : vector<2x4xf32> to vector<1x1x2x4xf32>
    tpu.vector_store %arg2[%c2_105, %c5_106, %c0_107, %c0_108], %243 {strides = array<i32>} : memref<7x7x2x4xf32, #tpu.memory_space<vmem>>, vector<1x1x2x4xf32>,
    %244 = vector.extract_strided_slice %177 {offsets = [12, 0, 0], sizes = [1, 2, 4], strides = [1, 1, 1]} : vector<16x2x4xf32> to vector<1x2x4xf32>
    %245 = vector.shape_cast %244 : vector<1x2x4xf32> to vector<2x4xf32>
    %246 = vector.extract_strided_slice %177 {offsets = [13, 0, 0], sizes = [1, 2, 4], strides = [1, 1, 1]} : vector<16x2x4xf32> to vector<1x2x4xf32>
    %247 = vector.shape_cast %246 : vector<1x2x4xf32> to vector<2x4xf32>
    %248 = arith.maximumf %245, %247 : vector<2x4xf32>
    %249 = vector.extract_strided_slice %177 {offsets = [14, 0, 0], sizes = [1, 2, 4], strides = [1, 1, 1]} : vector<16x2x4xf32> to vector<1x2x4xf32>
    %250 = vector.shape_cast %249 : vector<1x2x4xf32> to vector<2x4xf32>
    %251 = arith.maximumf %248, %250 : vector<2x4xf32>
    %c2_109 = arith.constant 2 : index
    %c6_110 = arith.constant 6 : index
    %c0_111 = arith.constant 0 : index
    %c0_112 = arith.constant 0 : index
    %252 = vector.load %arg2[%c2_109, %c6_110, %c0_111, %c0_112] : memref<7x7x2x4xf32, #tpu.memory_space<vmem>>, vector<1x1x2x4xf32>
    %253 = vector.shape_cast %252 : vector<1x1x2x4xf32> to vector<2x4xf32>
    %254 = vector.shape_cast %251 : vector<2x4xf32> to vector<1x1x2x4xf32>
    tpu.vector_store %arg2[%c2_109, %c6_110, %c0_111, %c0_112], %254 {strides = array<i32>} : memref<7x7x2x4xf32, #tpu.memory_space<vmem>>, vector<1x1x2x4xf32>,
    %c6_113 = arith.constant 6 : index
    %c0_114 = arith.constant 0 : index
    %c0_115 = arith.constant 0 : index
    %c0_116 = arith.constant 0 : index
    %255 = vector.load %arg1[%c6_113, %c0_114, %c0_115, %c0_116] : memref<16x16x2x4xf32, #tpu.memory_space<vmem>>, vector<1x16x2x4xf32>
    %256 = vector.shape_cast %255 : vector<1x16x2x4xf32> to vector<16x2x4xf32>
    %c7 = arith.constant 7 : index
    %c0_117 = arith.constant 0 : index
    %c0_118 = arith.constant 0 : index
    %c0_119 = arith.constant 0 : index
    %257 = vector.load %arg1[%c7, %c0_117, %c0_118, %c0_119] : memref<16x16x2x4xf32, #tpu.memory_space<vmem>>, vector<1x16x2x4xf32>
    %258 = vector.shape_cast %257 : vector<1x16x2x4xf32> to vector<16x2x4xf32>
    %259 = arith.maximumf %256, %258 : vector<16x2x4xf32>
    %c8 = arith.constant 8 : index
    %c0_120 = arith.constant 0 : index
    %c0_121 = arith.constant 0 : index
    %c0_122 = arith.constant 0 : index
    %260 = vector.load %arg1[%c8, %c0_120, %c0_121, %c0_122] : memref<16x16x2x4xf32, #tpu.memory_space<vmem>>, vector<1x16x2x4xf32>
    %261 = vector.shape_cast %260 : vector<1x16x2x4xf32> to vector<16x2x4xf32>
    %262 = arith.maximumf %259, %261 : vector<16x2x4xf32>
    %263 = vector.extract_strided_slice %262 {offsets = [0, 0, 0], sizes = [1, 2, 4], strides = [1, 1, 1]} : vector<16x2x4xf32> to vector<1x2x4xf32>
    %264 = vector.shape_cast %263 : vector<1x2x4xf32> to vector<2x4xf32>
    %265 = vector.extract_strided_slice %262 {offsets = [1, 0, 0], sizes = [1, 2, 4], strides = [1, 1, 1]} : vector<16x2x4xf32> to vector<1x2x4xf32>
    %266 = vector.shape_cast %265 : vector<1x2x4xf32> to vector<2x4xf32>
    %267 = arith.maximumf %264, %266 : vector<2x4xf32>
    %268 = vector.extract_strided_slice %262 {offsets = [2, 0, 0], sizes = [1, 2, 4], strides = [1, 1, 1]} : vector<16x2x4xf32> to vector<1x2x4xf32>
    %269 = vector.shape_cast %268 : vector<1x2x4xf32> to vector<2x4xf32>
    %270 = arith.maximumf %267, %269 : vector<2x4xf32>
    %c3_123 = arith.constant 3 : index
    %c0_124 = arith.constant 0 : index
    %c0_125 = arith.constant 0 : index
    %c0_126 = arith.constant 0 : index
    %271 = vector.load %arg2[%c3_123, %c0_124, %c0_125, %c0_126] : memref<7x7x2x4xf32, #tpu.memory_space<vmem>>, vector<1x1x2x4xf32>
    %272 = vector.shape_cast %271 : vector<1x1x2x4xf32> to vector<2x4xf32>
    %273 = vector.shape_cast %270 : vector<2x4xf32> to vector<1x1x2x4xf32>
    tpu.vector_store %arg2[%c3_123, %c0_124, %c0_125, %c0_126], %273 {strides = array<i32>} : memref<7x7x2x4xf32, #tpu.memory_space<vmem>>, vector<1x1x2x4xf32>,
    %274 = vector.extract_strided_slice %262 {offsets = [2, 0, 0], sizes = [1, 2, 4], strides = [1, 1, 1]} : vector<16x2x4xf32> to vector<1x2x4xf32>
    %275 = vector.shape_cast %274 : vector<1x2x4xf32> to vector<2x4xf32>
    %276 = vector.extract_strided_slice %262 {offsets = [3, 0, 0], sizes = [1, 2, 4], strides = [1, 1, 1]} : vector<16x2x4xf32> to vector<1x2x4xf32>
    %277 = vector.shape_cast %276 : vector<1x2x4xf32> to vector<2x4xf32>
    %278 = arith.maximumf %275, %277 : vector<2x4xf32>
    %279 = vector.extract_strided_slice %262 {offsets = [4, 0, 0], sizes = [1, 2, 4], strides = [1, 1, 1]} : vector<16x2x4xf32> to vector<1x2x4xf32>
    %280 = vector.shape_cast %279 : vector<1x2x4xf32> to vector<2x4xf32>
    %281 = arith.maximumf %278, %280 : vector<2x4xf32>
    %c3_127 = arith.constant 3 : index
    %c1_128 = arith.constant 1 : index
    %c0_129 = arith.constant 0 : index
    %c0_130 = arith.constant 0 : index
    %282 = vector.load %arg2[%c3_127, %c1_128, %c0_129, %c0_130] : memref<7x7x2x4xf32, #tpu.memory_space<vmem>>, vector<1x1x2x4xf32>
    %283 = vector.shape_cast %282 : vector<1x1x2x4xf32> to vector<2x4xf32>
    %284 = vector.shape_cast %281 : vector<2x4xf32> to vector<1x1x2x4xf32>
    tpu.vector_store %arg2[%c3_127, %c1_128, %c0_129, %c0_130], %284 {strides = array<i32>} : memref<7x7x2x4xf32, #tpu.memory_space<vmem>>, vector<1x1x2x4xf32>,
    %285 = vector.extract_strided_slice %262 {offsets = [4, 0, 0], sizes = [1, 2, 4], strides = [1, 1, 1]} : vector<16x2x4xf32> to vector<1x2x4xf32>
    %286 = vector.shape_cast %285 : vector<1x2x4xf32> to vector<2x4xf32>
    %287 = vector.extract_strided_slice %262 {offsets = [5, 0, 0], sizes = [1, 2, 4], strides = [1, 1, 1]} : vector<16x2x4xf32> to vector<1x2x4xf32>
    %288 = vector.shape_cast %287 : vector<1x2x4xf32> to vector<2x4xf32>
    %289 = arith.maximumf %286, %288 : vector<2x4xf32>
    %290 = vector.extract_strided_slice %262 {offsets = [6, 0, 0], sizes = [1, 2, 4], strides = [1, 1, 1]} : vector<16x2x4xf32> to vector<1x2x4xf32>
    %291 = vector.shape_cast %290 : vector<1x2x4xf32> to vector<2x4xf32>
    %292 = arith.maximumf %289, %291 : vector<2x4xf32>
    %c3_131 = arith.constant 3 : index
    %c2_132 = arith.constant 2 : index
    %c0_133 = arith.constant 0 : index
    %c0_134 = arith.constant 0 : index
    %293 = vector.load %arg2[%c3_131, %c2_132, %c0_133, %c0_134] : memref<7x7x2x4xf32, #tpu.memory_space<vmem>>, vector<1x1x2x4xf32>
    %294 = vector.shape_cast %293 : vector<1x1x2x4xf32> to vector<2x4xf32>
    %295 = vector.shape_cast %292 : vector<2x4xf32> to vector<1x1x2x4xf32>
    tpu.vector_store %arg2[%c3_131, %c2_132, %c0_133, %c0_134], %295 {strides = array<i32>} : memref<7x7x2x4xf32, #tpu.memory_space<vmem>>, vector<1x1x2x4xf32>,
    %296 = vector.extract_strided_slice %262 {offsets = [6, 0, 0], sizes = [1, 2, 4], strides = [1, 1, 1]} : vector<16x2x4xf32> to vector<1x2x4xf32>
    %297 = vector.shape_cast %296 : vector<1x2x4xf32> to vector<2x4xf32>
    %298 = vector.extract_strided_slice %262 {offsets = [7, 0, 0], sizes = [1, 2, 4], strides = [1, 1, 1]} : vector<16x2x4xf32> to vector<1x2x4xf32>
    %299 = vector.shape_cast %298 : vector<1x2x4xf32> to vector<2x4xf32>
    %300 = arith.maximumf %297, %299 : vector<2x4xf32>
    %301 = vector.extract_strided_slice %262 {offsets = [8, 0, 0], sizes = [1, 2, 4], strides = [1, 1, 1]} : vector<16x2x4xf32> to vector<1x2x4xf32>
    %302 = vector.shape_cast %301 : vector<1x2x4xf32> to vector<2x4xf32>
    %303 = arith.maximumf %300, %302 : vector<2x4xf32>
    %c3_135 = arith.constant 3 : index
    %c3_136 = arith.constant 3 : index
    %c0_137 = arith.constant 0 : index
    %c0_138 = arith.constant 0 : index
    %304 = vector.load %arg2[%c3_135, %c3_136, %c0_137, %c0_138] : memref<7x7x2x4xf32, #tpu.memory_space<vmem>>, vector<1x1x2x4xf32>
    %305 = vector.shape_cast %304 : vector<1x1x2x4xf32> to vector<2x4xf32>
    %306 = vector.shape_cast %303 : vector<2x4xf32> to vector<1x1x2x4xf32>
    tpu.vector_store %arg2[%c3_135, %c3_136, %c0_137, %c0_138], %306 {strides = array<i32>} : memref<7x7x2x4xf32, #tpu.memory_space<vmem>>, vector<1x1x2x4xf32>,
    %307 = vector.extract_strided_slice %262 {offsets = [8, 0, 0], sizes = [1, 2, 4], strides = [1, 1, 1]} : vector<16x2x4xf32> to vector<1x2x4xf32>
    %308 = vector.shape_cast %307 : vector<1x2x4xf32> to vector<2x4xf32>
    %309 = vector.extract_strided_slice %262 {offsets = [9, 0, 0], sizes = [1, 2, 4], strides = [1, 1, 1]} : vector<16x2x4xf32> to vector<1x2x4xf32>
    %310 = vector.shape_cast %309 : vector<1x2x4xf32> to vector<2x4xf32>
    %311 = arith.maximumf %308, %310 : vector<2x4xf32>
    %312 = vector.extract_strided_slice %262 {offsets = [10, 0, 0], sizes = [1, 2, 4], strides = [1, 1, 1]} : vector<16x2x4xf32> to vector<1x2x4xf32>
    %313 = vector.shape_cast %312 : vector<1x2x4xf32> to vector<2x4xf32>
    %314 = arith.maximumf %311, %313 : vector<2x4xf32>
    %c3_139 = arith.constant 3 : index
    %c4_140 = arith.constant 4 : index
    %c0_141 = arith.constant 0 : index
    %c0_142 = arith.constant 0 : index
    %315 = vector.load %arg2[%c3_139, %c4_140, %c0_141, %c0_142] : memref<7x7x2x4xf32, #tpu.memory_space<vmem>>, vector<1x1x2x4xf32>
    %316 = vector.shape_cast %315 : vector<1x1x2x4xf32> to vector<2x4xf32>
    %317 = vector.shape_cast %314 : vector<2x4xf32> to vector<1x1x2x4xf32>
    tpu.vector_store %arg2[%c3_139, %c4_140, %c0_141, %c0_142], %317 {strides = array<i32>} : memref<7x7x2x4xf32, #tpu.memory_space<vmem>>, vector<1x1x2x4xf32>,
    %318 = vector.extract_strided_slice %262 {offsets = [10, 0, 0], sizes = [1, 2, 4], strides = [1, 1, 1]} : vector<16x2x4xf32> to vector<1x2x4xf32>
    %319 = vector.shape_cast %318 : vector<1x2x4xf32> to vector<2x4xf32>
    %320 = vector.extract_strided_slice %262 {offsets = [11, 0, 0], sizes = [1, 2, 4], strides = [1, 1, 1]} : vector<16x2x4xf32> to vector<1x2x4xf32>
    %321 = vector.shape_cast %320 : vector<1x2x4xf32> to vector<2x4xf32>
    %322 = arith.maximumf %319, %321 : vector<2x4xf32>
    %323 = vector.extract_strided_slice %262 {offsets = [12, 0, 0], sizes = [1, 2, 4], strides = [1, 1, 1]} : vector<16x2x4xf32> to vector<1x2x4xf32>
    %324 = vector.shape_cast %323 : vector<1x2x4xf32> to vector<2x4xf32>
    %325 = arith.maximumf %322, %324 : vector<2x4xf32>
    %c3_143 = arith.constant 3 : index
    %c5_144 = arith.constant 5 : index
    %c0_145 = arith.constant 0 : index
    %c0_146 = arith.constant 0 : index
    %326 = vector.load %arg2[%c3_143, %c5_144, %c0_145, %c0_146] : memref<7x7x2x4xf32, #tpu.memory_space<vmem>>, vector<1x1x2x4xf32>
    %327 = vector.shape_cast %326 : vector<1x1x2x4xf32> to vector<2x4xf32>
    %328 = vector.shape_cast %325 : vector<2x4xf32> to vector<1x1x2x4xf32>
    tpu.vector_store %arg2[%c3_143, %c5_144, %c0_145, %c0_146], %328 {strides = array<i32>} : memref<7x7x2x4xf32, #tpu.memory_space<vmem>>, vector<1x1x2x4xf32>,
    %329 = vector.extract_strided_slice %262 {offsets = [12, 0, 0], sizes = [1, 2, 4], strides = [1, 1, 1]} : vector<16x2x4xf32> to vector<1x2x4xf32>
    %330 = vector.shape_cast %329 : vector<1x2x4xf32> to vector<2x4xf32>
    %331 = vector.extract_strided_slice %262 {offsets = [13, 0, 0], sizes = [1, 2, 4], strides = [1, 1, 1]} : vector<16x2x4xf32> to vector<1x2x4xf32>
    %332 = vector.shape_cast %331 : vector<1x2x4xf32> to vector<2x4xf32>
    %333 = arith.maximumf %330, %332 : vector<2x4xf32>
    %334 = vector.extract_strided_slice %262 {offsets = [14, 0, 0], sizes = [1, 2, 4], strides = [1, 1, 1]} : vector<16x2x4xf32> to vector<1x2x4xf32>
    %335 = vector.shape_cast %334 : vector<1x2x4xf32> to vector<2x4xf32>
    %336 = arith.maximumf %333, %335 : vector<2x4xf32>
    %c3_147 = arith.constant 3 : index
    %c6_148 = arith.constant 6 : index
    %c0_149 = arith.constant 0 : index
    %c0_150 = arith.constant 0 : index
    %337 = vector.load %arg2[%c3_147, %c6_148, %c0_149, %c0_150] : memref<7x7x2x4xf32, #tpu.memory_space<vmem>>, vector<1x1x2x4xf32>
    %338 = vector.shape_cast %337 : vector<1x1x2x4xf32> to vector<2x4xf32>
    %339 = vector.shape_cast %336 : vector<2x4xf32> to vector<1x1x2x4xf32>
    tpu.vector_store %arg2[%c3_147, %c6_148, %c0_149, %c0_150], %339 {strides = array<i32>} : memref<7x7x2x4xf32, #tpu.memory_space<vmem>>, vector<1x1x2x4xf32>,
    %c8_151 = arith.constant 8 : index
    %c0_152 = arith.constant 0 : index
    %c0_153 = arith.constant 0 : index
    %c0_154 = arith.constant 0 : index
    %340 = vector.load %arg1[%c8_151, %c0_152, %c0_153, %c0_154] : memref<16x16x2x4xf32, #tpu.memory_space<vmem>>, vector<1x16x2x4xf32>
    %341 = vector.shape_cast %340 : vector<1x16x2x4xf32> to vector<16x2x4xf32>
    %c9 = arith.constant 9 : index
    %c0_155 = arith.constant 0 : index
    %c0_156 = arith.constant 0 : index
    %c0_157 = arith.constant 0 : index
    %342 = vector.load %arg1[%c9, %c0_155, %c0_156, %c0_157] : memref<16x16x2x4xf32, #tpu.memory_space<vmem>>, vector<1x16x2x4xf32>
    %343 = vector.shape_cast %342 : vector<1x16x2x4xf32> to vector<16x2x4xf32>
    %344 = arith.maximumf %341, %343 : vector<16x2x4xf32>
    %c10 = arith.constant 10 : index
    %c0_158 = arith.constant 0 : index
    %c0_159 = arith.constant 0 : index
    %c0_160 = arith.constant 0 : index
    %345 = vector.load %arg1[%c10, %c0_158, %c0_159, %c0_160] : memref<16x16x2x4xf32, #tpu.memory_space<vmem>>, vector<1x16x2x4xf32>
    %346 = vector.shape_cast %345 : vector<1x16x2x4xf32> to vector<16x2x4xf32>
    %347 = arith.maximumf %344, %346 : vector<16x2x4xf32>
    %348 = vector.extract_strided_slice %347 {offsets = [0, 0, 0], sizes = [1, 2, 4], strides = [1, 1, 1]} : vector<16x2x4xf32> to vector<1x2x4xf32>
    %349 = vector.shape_cast %348 : vector<1x2x4xf32> to vector<2x4xf32>
    %350 = vector.extract_strided_slice %347 {offsets = [1, 0, 0], sizes = [1, 2, 4], strides = [1, 1, 1]} : vector<16x2x4xf32> to vector<1x2x4xf32>
    %351 = vector.shape_cast %350 : vector<1x2x4xf32> to vector<2x4xf32>
    %352 = arith.maximumf %349, %351 : vector<2x4xf32>
    %353 = vector.extract_strided_slice %347 {offsets = [2, 0, 0], sizes = [1, 2, 4], strides = [1, 1, 1]} : vector<16x2x4xf32> to vector<1x2x4xf32>
    %354 = vector.shape_cast %353 : vector<1x2x4xf32> to vector<2x4xf32>
    %355 = arith.maximumf %352, %354 : vector<2x4xf32>
    %c4_161 = arith.constant 4 : index
    %c0_162 = arith.constant 0 : index
    %c0_163 = arith.constant 0 : index
    %c0_164 = arith.constant 0 : index
    %356 = vector.load %arg2[%c4_161, %c0_162, %c0_163, %c0_164] : memref<7x7x2x4xf32, #tpu.memory_space<vmem>>, vector<1x1x2x4xf32>
    %357 = vector.shape_cast %356 : vector<1x1x2x4xf32> to vector<2x4xf32>
    %358 = vector.shape_cast %355 : vector<2x4xf32> to vector<1x1x2x4xf32>
    tpu.vector_store %arg2[%c4_161, %c0_162, %c0_163, %c0_164], %358 {strides = array<i32>} : memref<7x7x2x4xf32, #tpu.memory_space<vmem>>, vector<1x1x2x4xf32>,
    %359 = vector.extract_strided_slice %347 {offsets = [2, 0, 0], sizes = [1, 2, 4], strides = [1, 1, 1]} : vector<16x2x4xf32> to vector<1x2x4xf32>
    %360 = vector.shape_cast %359 : vector<1x2x4xf32> to vector<2x4xf32>
    %361 = vector.extract_strided_slice %347 {offsets = [3, 0, 0], sizes = [1, 2, 4], strides = [1, 1, 1]} : vector<16x2x4xf32> to vector<1x2x4xf32>
    %362 = vector.shape_cast %361 : vector<1x2x4xf32> to vector<2x4xf32>
    %363 = arith.maximumf %360, %362 : vector<2x4xf32>
    %364 = vector.extract_strided_slice %347 {offsets = [4, 0, 0], sizes = [1, 2, 4], strides = [1, 1, 1]} : vector<16x2x4xf32> to vector<1x2x4xf32>
    %365 = vector.shape_cast %364 : vector<1x2x4xf32> to vector<2x4xf32>
    %366 = arith.maximumf %363, %365 : vector<2x4xf32>
    %c4_165 = arith.constant 4 : index
    %c1_166 = arith.constant 1 : index
    %c0_167 = arith.constant 0 : index
    %c0_168 = arith.constant 0 : index
    %367 = vector.load %arg2[%c4_165, %c1_166, %c0_167, %c0_168] : memref<7x7x2x4xf32, #tpu.memory_space<vmem>>, vector<1x1x2x4xf32>
    %368 = vector.shape_cast %367 : vector<1x1x2x4xf32> to vector<2x4xf32>
    %369 = vector.shape_cast %366 : vector<2x4xf32> to vector<1x1x2x4xf32>
    tpu.vector_store %arg2[%c4_165, %c1_166, %c0_167, %c0_168], %369 {strides = array<i32>} : memref<7x7x2x4xf32, #tpu.memory_space<vmem>>, vector<1x1x2x4xf32>,
    %370 = vector.extract_strided_slice %347 {offsets = [4, 0, 0], sizes = [1, 2, 4], strides = [1, 1, 1]} : vector<16x2x4xf32> to vector<1x2x4xf32>
    %371 = vector.shape_cast %370 : vector<1x2x4xf32> to vector<2x4xf32>
    %372 = vector.extract_strided_slice %347 {offsets = [5, 0, 0], sizes = [1, 2, 4], strides = [1, 1, 1]} : vector<16x2x4xf32> to vector<1x2x4xf32>
    %373 = vector.shape_cast %372 : vector<1x2x4xf32> to vector<2x4xf32>
    %374 = arith.maximumf %371, %373 : vector<2x4xf32>
    %375 = vector.extract_strided_slice %347 {offsets = [6, 0, 0], sizes = [1, 2, 4], strides = [1, 1, 1]} : vector<16x2x4xf32> to vector<1x2x4xf32>
    %376 = vector.shape_cast %375 : vector<1x2x4xf32> to vector<2x4xf32>
    %377 = arith.maximumf %374, %376 : vector<2x4xf32>
    %c4_169 = arith.constant 4 : index
    %c2_170 = arith.constant 2 : index
    %c0_171 = arith.constant 0 : index
    %c0_172 = arith.constant 0 : index
    %378 = vector.load %arg2[%c4_169, %c2_170, %c0_171, %c0_172] : memref<7x7x2x4xf32, #tpu.memory_space<vmem>>, vector<1x1x2x4xf32>
    %379 = vector.shape_cast %378 : vector<1x1x2x4xf32> to vector<2x4xf32>
    %380 = vector.shape_cast %377 : vector<2x4xf32> to vector<1x1x2x4xf32>
    tpu.vector_store %arg2[%c4_169, %c2_170, %c0_171, %c0_172], %380 {strides = array<i32>} : memref<7x7x2x4xf32, #tpu.memory_space<vmem>>, vector<1x1x2x4xf32>,
    %381 = vector.extract_strided_slice %347 {offsets = [6, 0, 0], sizes = [1, 2, 4], strides = [1, 1, 1]} : vector<16x2x4xf32> to vector<1x2x4xf32>
    %382 = vector.shape_cast %381 : vector<1x2x4xf32> to vector<2x4xf32>
    %383 = vector.extract_strided_slice %347 {offsets = [7, 0, 0], sizes = [1, 2, 4], strides = [1, 1, 1]} : vector<16x2x4xf32> to vector<1x2x4xf32>
    %384 = vector.shape_cast %383 : vector<1x2x4xf32> to vector<2x4xf32>
    %385 = arith.maximumf %382, %384 : vector<2x4xf32>
    %386 = vector.extract_strided_slice %347 {offsets = [8, 0, 0], sizes = [1, 2, 4], strides = [1, 1, 1]} : vector<16x2x4xf32> to vector<1x2x4xf32>
    %387 = vector.shape_cast %386 : vector<1x2x4xf32> to vector<2x4xf32>
    %388 = arith.maximumf %385, %387 : vector<2x4xf32>
    %c4_173 = arith.constant 4 : index
    %c3_174 = arith.constant 3 : index
    %c0_175 = arith.constant 0 : index
    %c0_176 = arith.constant 0 : index
    %389 = vector.load %arg2[%c4_173, %c3_174, %c0_175, %c0_176] : memref<7x7x2x4xf32, #tpu.memory_space<vmem>>, vector<1x1x2x4xf32>
    %390 = vector.shape_cast %389 : vector<1x1x2x4xf32> to vector<2x4xf32>
    %391 = vector.shape_cast %388 : vector<2x4xf32> to vector<1x1x2x4xf32>
    tpu.vector_store %arg2[%c4_173, %c3_174, %c0_175, %c0_176], %391 {strides = array<i32>} : memref<7x7x2x4xf32, #tpu.memory_space<vmem>>, vector<1x1x2x4xf32>,
    %392 = vector.extract_strided_slice %347 {offsets = [8, 0, 0], sizes = [1, 2, 4], strides = [1, 1, 1]} : vector<16x2x4xf32> to vector<1x2x4xf32>
    %393 = vector.shape_cast %392 : vector<1x2x4xf32> to vector<2x4xf32>
    %394 = vector.extract_strided_slice %347 {offsets = [9, 0, 0], sizes = [1, 2, 4], strides = [1, 1, 1]} : vector<16x2x4xf32> to vector<1x2x4xf32>
    %395 = vector.shape_cast %394 : vector<1x2x4xf32> to vector<2x4xf32>
    %396 = arith.maximumf %393, %395 : vector<2x4xf32>
    %397 = vector.extract_strided_slice %347 {offsets = [10, 0, 0], sizes = [1, 2, 4], strides = [1, 1, 1]} : vector<16x2x4xf32> to vector<1x2x4xf32>
    %398 = vector.shape_cast %397 : vector<1x2x4xf32> to vector<2x4xf32>
    %399 = arith.maximumf %396, %398 : vector<2x4xf32>
    %c4_177 = arith.constant 4 : index
    %c4_178 = arith.constant 4 : index
    %c0_179 = arith.constant 0 : index
    %c0_180 = arith.constant 0 : index
    %400 = vector.load %arg2[%c4_177, %c4_178, %c0_179, %c0_180] : memref<7x7x2x4xf32, #tpu.memory_space<vmem>>, vector<1x1x2x4xf32>
    %401 = vector.shape_cast %400 : vector<1x1x2x4xf32> to vector<2x4xf32>
    %402 = vector.shape_cast %399 : vector<2x4xf32> to vector<1x1x2x4xf32>
    tpu.vector_store %arg2[%c4_177, %c4_178, %c0_179, %c0_180], %402 {strides = array<i32>} : memref<7x7x2x4xf32, #tpu.memory_space<vmem>>, vector<1x1x2x4xf32>,
    %403 = vector.extract_strided_slice %347 {offsets = [10, 0, 0], sizes = [1, 2, 4], strides = [1, 1, 1]} : vector<16x2x4xf32> to vector<1x2x4xf32>
    %404 = vector.shape_cast %403 : vector<1x2x4xf32> to vector<2x4xf32>
    %405 = vector.extract_strided_slice %347 {offsets = [11, 0, 0], sizes = [1, 2, 4], strides = [1, 1, 1]} : vector<16x2x4xf32> to vector<1x2x4xf32>
    %406 = vector.shape_cast %405 : vector<1x2x4xf32> to vector<2x4xf32>
    %407 = arith.maximumf %404, %406 : vector<2x4xf32>
    %408 = vector.extract_strided_slice %347 {offsets = [12, 0, 0], sizes = [1, 2, 4], strides = [1, 1, 1]} : vector<16x2x4xf32> to vector<1x2x4xf32>
    %409 = vector.shape_cast %408 : vector<1x2x4xf32> to vector<2x4xf32>
    %410 = arith.maximumf %407, %409 : vector<2x4xf32>
    %c4_181 = arith.constant 4 : index
    %c5_182 = arith.constant 5 : index
    %c0_183 = arith.constant 0 : index
    %c0_184 = arith.constant 0 : index
    %411 = vector.load %arg2[%c4_181, %c5_182, %c0_183, %c0_184] : memref<7x7x2x4xf32, #tpu.memory_space<vmem>>, vector<1x1x2x4xf32>
    %412 = vector.shape_cast %411 : vector<1x1x2x4xf32> to vector<2x4xf32>
    %413 = vector.shape_cast %410 : vector<2x4xf32> to vector<1x1x2x4xf32>
    tpu.vector_store %arg2[%c4_181, %c5_182, %c0_183, %c0_184], %413 {strides = array<i32>} : memref<7x7x2x4xf32, #tpu.memory_space<vmem>>, vector<1x1x2x4xf32>,
    %414 = vector.extract_strided_slice %347 {offsets = [12, 0, 0], sizes = [1, 2, 4], strides = [1, 1, 1]} : vector<16x2x4xf32> to vector<1x2x4xf32>
    %415 = vector.shape_cast %414 : vector<1x2x4xf32> to vector<2x4xf32>
    %416 = vector.extract_strided_slice %347 {offsets = [13, 0, 0], sizes = [1, 2, 4], strides = [1, 1, 1]} : vector<16x2x4xf32> to vector<1x2x4xf32>
    %417 = vector.shape_cast %416 : vector<1x2x4xf32> to vector<2x4xf32>
    %418 = arith.maximumf %415, %417 : vector<2x4xf32>
    %419 = vector.extract_strided_slice %347 {offsets = [14, 0, 0], sizes = [1, 2, 4], strides = [1, 1, 1]} : vector<16x2x4xf32> to vector<1x2x4xf32>
    %420 = vector.shape_cast %419 : vector<1x2x4xf32> to vector<2x4xf32>
    %421 = arith.maximumf %418, %420 : vector<2x4xf32>
    %c4_185 = arith.constant 4 : index
    %c6_186 = arith.constant 6 : index
    %c0_187 = arith.constant 0 : index
    %c0_188 = arith.constant 0 : index
    %422 = vector.load %arg2[%c4_185, %c6_186, %c0_187, %c0_188] : memref<7x7x2x4xf32, #tpu.memory_space<vmem>>, vector<1x1x2x4xf32>
    %423 = vector.shape_cast %422 : vector<1x1x2x4xf32> to vector<2x4xf32>
    %424 = vector.shape_cast %421 : vector<2x4xf32> to vector<1x1x2x4xf32>
    tpu.vector_store %arg2[%c4_185, %c6_186, %c0_187, %c0_188], %424 {strides = array<i32>} : memref<7x7x2x4xf32, #tpu.memory_space<vmem>>, vector<1x1x2x4xf32>,
    %c10_189 = arith.constant 10 : index
    %c0_190 = arith.constant 0 : index
    %c0_191 = arith.constant 0 : index
    %c0_192 = arith.constant 0 : index
    %425 = vector.load %arg1[%c10_189, %c0_190, %c0_191, %c0_192] : memref<16x16x2x4xf32, #tpu.memory_space<vmem>>, vector<1x16x2x4xf32>
    %426 = vector.shape_cast %425 : vector<1x16x2x4xf32> to vector<16x2x4xf32>
    %c11 = arith.constant 11 : index
    %c0_193 = arith.constant 0 : index
    %c0_194 = arith.constant 0 : index
    %c0_195 = arith.constant 0 : index
    %427 = vector.load %arg1[%c11, %c0_193, %c0_194, %c0_195] : memref<16x16x2x4xf32, #tpu.memory_space<vmem>>, vector<1x16x2x4xf32>
    %428 = vector.shape_cast %427 : vector<1x16x2x4xf32> to vector<16x2x4xf32>
    %429 = arith.maximumf %426, %428 : vector<16x2x4xf32>
    %c12 = arith.constant 12 : index
    %c0_196 = arith.constant 0 : index
    %c0_197 = arith.constant 0 : index
    %c0_198 = arith.constant 0 : index
    %430 = vector.load %arg1[%c12, %c0_196, %c0_197, %c0_198] : memref<16x16x2x4xf32, #tpu.memory_space<vmem>>, vector<1x16x2x4xf32>
    %431 = vector.shape_cast %430 : vector<1x16x2x4xf32> to vector<16x2x4xf32>
    %432 = arith.maximumf %429, %431 : vector<16x2x4xf32>
    %433 = vector.extract_strided_slice %432 {offsets = [0, 0, 0], sizes = [1, 2, 4], strides = [1, 1, 1]} : vector<16x2x4xf32> to vector<1x2x4xf32>
    %434 = vector.shape_cast %433 : vector<1x2x4xf32> to vector<2x4xf32>
    %435 = vector.extract_strided_slice %432 {offsets = [1, 0, 0], sizes = [1, 2, 4], strides = [1, 1, 1]} : vector<16x2x4xf32> to vector<1x2x4xf32>
    %436 = vector.shape_cast %435 : vector<1x2x4xf32> to vector<2x4xf32>
    %437 = arith.maximumf %434, %436 : vector<2x4xf32>
    %438 = vector.extract_strided_slice %432 {offsets = [2, 0, 0], sizes = [1, 2, 4], strides = [1, 1, 1]} : vector<16x2x4xf32> to vector<1x2x4xf32>
    %439 = vector.shape_cast %438 : vector<1x2x4xf32> to vector<2x4xf32>
    %440 = arith.maximumf %437, %439 : vector<2x4xf32>
    %c5_199 = arith.constant 5 : index
    %c0_200 = arith.constant 0 : index
    %c0_201 = arith.constant 0 : index
    %c0_202 = arith.constant 0 : index
    %441 = vector.load %arg2[%c5_199, %c0_200, %c0_201, %c0_202] : memref<7x7x2x4xf32, #tpu.memory_space<vmem>>, vector<1x1x2x4xf32>
    %442 = vector.shape_cast %441 : vector<1x1x2x4xf32> to vector<2x4xf32>
    %443 = vector.shape_cast %440 : vector<2x4xf32> to vector<1x1x2x4xf32>
    tpu.vector_store %arg2[%c5_199, %c0_200, %c0_201, %c0_202], %443 {strides = array<i32>} : memref<7x7x2x4xf32, #tpu.memory_space<vmem>>, vector<1x1x2x4xf32>,
    %444 = vector.extract_strided_slice %432 {offsets = [2, 0, 0], sizes = [1, 2, 4], strides = [1, 1, 1]} : vector<16x2x4xf32> to vector<1x2x4xf32>
    %445 = vector.shape_cast %444 : vector<1x2x4xf32> to vector<2x4xf32>
    %446 = vector.extract_strided_slice %432 {offsets = [3, 0, 0], sizes = [1, 2, 4], strides = [1, 1, 1]} : vector<16x2x4xf32> to vector<1x2x4xf32>
    %447 = vector.shape_cast %446 : vector<1x2x4xf32> to vector<2x4xf32>
    %448 = arith.maximumf %445, %447 : vector<2x4xf32>
    %449 = vector.extract_strided_slice %432 {offsets = [4, 0, 0], sizes = [1, 2, 4], strides = [1, 1, 1]} : vector<16x2x4xf32> to vector<1x2x4xf32>
    %450 = vector.shape_cast %449 : vector<1x2x4xf32> to vector<2x4xf32>
    %451 = arith.maximumf %448, %450 : vector<2x4xf32>
    %c5_203 = arith.constant 5 : index
    %c1_204 = arith.constant 1 : index
    %c0_205 = arith.constant 0 : index
    %c0_206 = arith.constant 0 : index
    %452 = vector.load %arg2[%c5_203, %c1_204, %c0_205, %c0_206] : memref<7x7x2x4xf32, #tpu.memory_space<vmem>>, vector<1x1x2x4xf32>
    %453 = vector.shape_cast %452 : vector<1x1x2x4xf32> to vector<2x4xf32>
    %454 = vector.shape_cast %451 : vector<2x4xf32> to vector<1x1x2x4xf32>
    tpu.vector_store %arg2[%c5_203, %c1_204, %c0_205, %c0_206], %454 {strides = array<i32>} : memref<7x7x2x4xf32, #tpu.memory_space<vmem>>, vector<1x1x2x4xf32>,
    %455 = vector.extract_strided_slice %432 {offsets = [4, 0, 0], sizes = [1, 2, 4], strides = [1, 1, 1]} : vector<16x2x4xf32> to vector<1x2x4xf32>
    %456 = vector.shape_cast %455 : vector<1x2x4xf32> to vector<2x4xf32>
    %457 = vector.extract_strided_slice %432 {offsets = [5, 0, 0], sizes = [1, 2, 4], strides = [1, 1, 1]} : vector<16x2x4xf32> to vector<1x2x4xf32>
    %458 = vector.shape_cast %457 : vector<1x2x4xf32> to vector<2x4xf32>
    %459 = arith.maximumf %456, %458 : vector<2x4xf32>
    %460 = vector.extract_strided_slice %432 {offsets = [6, 0, 0], sizes = [1, 2, 4], strides = [1, 1, 1]} : vector<16x2x4xf32> to vector<1x2x4xf32>
    %461 = vector.shape_cast %460 : vector<1x2x4xf32> to vector<2x4xf32>
    %462 = arith.maximumf %459, %461 : vector<2x4xf32>
    %c5_207 = arith.constant 5 : index
    %c2_208 = arith.constant 2 : index
    %c0_209 = arith.constant 0 : index
    %c0_210 = arith.constant 0 : index
    %463 = vector.load %arg2[%c5_207, %c2_208, %c0_209, %c0_210] : memref<7x7x2x4xf32, #tpu.memory_space<vmem>>, vector<1x1x2x4xf32>
    %464 = vector.shape_cast %463 : vector<1x1x2x4xf32> to vector<2x4xf32>
    %465 = vector.shape_cast %462 : vector<2x4xf32> to vector<1x1x2x4xf32>
    tpu.vector_store %arg2[%c5_207, %c2_208, %c0_209, %c0_210], %465 {strides = array<i32>} : memref<7x7x2x4xf32, #tpu.memory_space<vmem>>, vector<1x1x2x4xf32>,
    %466 = vector.extract_strided_slice %432 {offsets = [6, 0, 0], sizes = [1, 2, 4], strides = [1, 1, 1]} : vector<16x2x4xf32> to vector<1x2x4xf32>
    %467 = vector.shape_cast %466 : vector<1x2x4xf32> to vector<2x4xf32>
    %468 = vector.extract_strided_slice %432 {offsets = [7, 0, 0], sizes = [1, 2, 4], strides = [1, 1, 1]} : vector<16x2x4xf32> to vector<1x2x4xf32>
    %469 = vector.shape_cast %468 : vector<1x2x4xf32> to vector<2x4xf32>
    %470 = arith.maximumf %467, %469 : vector<2x4xf32>
    %471 = vector.extract_strided_slice %432 {offsets = [8, 0, 0], sizes = [1, 2, 4], strides = [1, 1, 1]} : vector<16x2x4xf32> to vector<1x2x4xf32>
    %472 = vector.shape_cast %471 : vector<1x2x4xf32> to vector<2x4xf32>
    %473 = arith.maximumf %470, %472 : vector<2x4xf32>
    %c5_211 = arith.constant 5 : index
    %c3_212 = arith.constant 3 : index
    %c0_213 = arith.constant 0 : index
    %c0_214 = arith.constant 0 : index
    %474 = vector.load %arg2[%c5_211, %c3_212, %c0_213, %c0_214] : memref<7x7x2x4xf32, #tpu.memory_space<vmem>>, vector<1x1x2x4xf32>
    %475 = vector.shape_cast %474 : vector<1x1x2x4xf32> to vector<2x4xf32>
    %476 = vector.shape_cast %473 : vector<2x4xf32> to vector<1x1x2x4xf32>
    tpu.vector_store %arg2[%c5_211, %c3_212, %c0_213, %c0_214], %476 {strides = array<i32>} : memref<7x7x2x4xf32, #tpu.memory_space<vmem>>, vector<1x1x2x4xf32>,
    %477 = vector.extract_strided_slice %432 {offsets = [8, 0, 0], sizes = [1, 2, 4], strides = [1, 1, 1]} : vector<16x2x4xf32> to vector<1x2x4xf32>
    %478 = vector.shape_cast %477 : vector<1x2x4xf32> to vector<2x4xf32>
    %479 = vector.extract_strided_slice %432 {offsets = [9, 0, 0], sizes = [1, 2, 4], strides = [1, 1, 1]} : vector<16x2x4xf32> to vector<1x2x4xf32>
    %480 = vector.shape_cast %479 : vector<1x2x4xf32> to vector<2x4xf32>
    %481 = arith.maximumf %478, %480 : vector<2x4xf32>
    %482 = vector.extract_strided_slice %432 {offsets = [10, 0, 0], sizes = [1, 2, 4], strides = [1, 1, 1]} : vector<16x2x4xf32> to vector<1x2x4xf32>
    %483 = vector.shape_cast %482 : vector<1x2x4xf32> to vector<2x4xf32>
    %484 = arith.maximumf %481, %483 : vector<2x4xf32>
    %c5_215 = arith.constant 5 : index
    %c4_216 = arith.constant 4 : index
    %c0_217 = arith.constant 0 : index
    %c0_218 = arith.constant 0 : index
    %485 = vector.load %arg2[%c5_215, %c4_216, %c0_217, %c0_218] : memref<7x7x2x4xf32, #tpu.memory_space<vmem>>, vector<1x1x2x4xf32>
    %486 = vector.shape_cast %485 : vector<1x1x2x4xf32> to vector<2x4xf32>
    %487 = vector.shape_cast %484 : vector<2x4xf32> to vector<1x1x2x4xf32>
    tpu.vector_store %arg2[%c5_215, %c4_216, %c0_217, %c0_218], %487 {strides = array<i32>} : memref<7x7x2x4xf32, #tpu.memory_space<vmem>>, vector<1x1x2x4xf32>,
    %488 = vector.extract_strided_slice %432 {offsets = [10, 0, 0], sizes = [1, 2, 4], strides = [1, 1, 1]} : vector<16x2x4xf32> to vector<1x2x4xf32>
    %489 = vector.shape_cast %488 : vector<1x2x4xf32> to vector<2x4xf32>
    %490 = vector.extract_strided_slice %432 {offsets = [11, 0, 0], sizes = [1, 2, 4], strides = [1, 1, 1]} : vector<16x2x4xf32> to vector<1x2x4xf32>
    %491 = vector.shape_cast %490 : vector<1x2x4xf32> to vector<2x4xf32>
    %492 = arith.maximumf %489, %491 : vector<2x4xf32>
    %493 = vector.extract_strided_slice %432 {offsets = [12, 0, 0], sizes = [1, 2, 4], strides = [1, 1, 1]} : vector<16x2x4xf32> to vector<1x2x4xf32>
    %494 = vector.shape_cast %493 : vector<1x2x4xf32> to vector<2x4xf32>
    %495 = arith.maximumf %492, %494 : vector<2x4xf32>
    %c5_219 = arith.constant 5 : index
    %c5_220 = arith.constant 5 : index
    %c0_221 = arith.constant 0 : index
    %c0_222 = arith.constant 0 : index
    %496 = vector.load %arg2[%c5_219, %c5_220, %c0_221, %c0_222] : memref<7x7x2x4xf32, #tpu.memory_space<vmem>>, vector<1x1x2x4xf32>
    %497 = vector.shape_cast %496 : vector<1x1x2x4xf32> to vector<2x4xf32>
    %498 = vector.shape_cast %495 : vector<2x4xf32> to vector<1x1x2x4xf32>
    tpu.vector_store %arg2[%c5_219, %c5_220, %c0_221, %c0_222], %498 {strides = array<i32>} : memref<7x7x2x4xf32, #tpu.memory_space<vmem>>, vector<1x1x2x4xf32>,
    %499 = vector.extract_strided_slice %432 {offsets = [12, 0, 0], sizes = [1, 2, 4], strides = [1, 1, 1]} : vector<16x2x4xf32> to vector<1x2x4xf32>
    %500 = vector.shape_cast %499 : vector<1x2x4xf32> to vector<2x4xf32>
    %501 = vector.extract_strided_slice %432 {offsets = [13, 0, 0], sizes = [1, 2, 4], strides = [1, 1, 1]} : vector<16x2x4xf32> to vector<1x2x4xf32>
    %502 = vector.shape_cast %501 : vector<1x2x4xf32> to vector<2x4xf32>
    %503 = arith.maximumf %500, %502 : vector<2x4xf32>
    %504 = vector.extract_strided_slice %432 {offsets = [14, 0, 0], sizes = [1, 2, 4], strides = [1, 1, 1]} : vector<16x2x4xf32> to vector<1x2x4xf32>
    %505 = vector.shape_cast %504 : vector<1x2x4xf32> to vector<2x4xf32>
    %506 = arith.maximumf %503, %505 : vector<2x4xf32>
    %c5_223 = arith.constant 5 : index
    %c6_224 = arith.constant 6 : index
    %c0_225 = arith.constant 0 : index
    %c0_226 = arith.constant 0 : index
    %507 = vector.load %arg2[%c5_223, %c6_224, %c0_225, %c0_226] : memref<7x7x2x4xf32, #tpu.memory_space<vmem>>, vector<1x1x2x4xf32>
    %508 = vector.shape_cast %507 : vector<1x1x2x4xf32> to vector<2x4xf32>
    %509 = vector.shape_cast %506 : vector<2x4xf32> to vector<1x1x2x4xf32>
    tpu.vector_store %arg2[%c5_223, %c6_224, %c0_225, %c0_226], %509 {strides = array<i32>} : memref<7x7x2x4xf32, #tpu.memory_space<vmem>>, vector<1x1x2x4xf32>,
    %c12_227 = arith.constant 12 : index
    %c0_228 = arith.constant 0 : index
    %c0_229 = arith.constant 0 : index
    %c0_230 = arith.constant 0 : index
    %510 = vector.load %arg1[%c12_227, %c0_228, %c0_229, %c0_230] : memref<16x16x2x4xf32, #tpu.memory_space<vmem>>, vector<1x16x2x4xf32>
    %511 = vector.shape_cast %510 : vector<1x16x2x4xf32> to vector<16x2x4xf32>
    %c13 = arith.constant 13 : index
    %c0_231 = arith.constant 0 : index
    %c0_232 = arith.constant 0 : index
    %c0_233 = arith.constant 0 : index
    %512 = vector.load %arg1[%c13, %c0_231, %c0_232, %c0_233] : memref<16x16x2x4xf32, #tpu.memory_space<vmem>>, vector<1x16x2x4xf32>
    %513 = vector.shape_cast %512 : vector<1x16x2x4xf32> to vector<16x2x4xf32>
    %514 = arith.maximumf %511, %513 : vector<16x2x4xf32>
    %c14 = arith.constant 14 : index
    %c0_234 = arith.constant 0 : index
    %c0_235 = arith.constant 0 : index
    %c0_236 = arith.constant 0 : index
    %515 = vector.load %arg1[%c14, %c0_234, %c0_235, %c0_236] : memref<16x16x2x4xf32, #tpu.memory_space<vmem>>, vector<1x16x2x4xf32>
    %516 = vector.shape_cast %515 : vector<1x16x2x4xf32> to vector<16x2x4xf32>
    %517 = arith.maximumf %514, %516 : vector<16x2x4xf32>
    %518 = vector.extract_strided_slice %517 {offsets = [0, 0, 0], sizes = [1, 2, 4], strides = [1, 1, 1]} : vector<16x2x4xf32> to vector<1x2x4xf32>
    %519 = vector.shape_cast %518 : vector<1x2x4xf32> to vector<2x4xf32>
    %520 = vector.extract_strided_slice %517 {offsets = [1, 0, 0], sizes = [1, 2, 4], strides = [1, 1, 1]} : vector<16x2x4xf32> to vector<1x2x4xf32>
    %521 = vector.shape_cast %520 : vector<1x2x4xf32> to vector<2x4xf32>
    %522 = arith.maximumf %519, %521 : vector<2x4xf32>
    %523 = vector.extract_strided_slice %517 {offsets = [2, 0, 0], sizes = [1, 2, 4], strides = [1, 1, 1]} : vector<16x2x4xf32> to vector<1x2x4xf32>
    %524 = vector.shape_cast %523 : vector<1x2x4xf32> to vector<2x4xf32>
    %525 = arith.maximumf %522, %524 : vector<2x4xf32>
    %c6_237 = arith.constant 6 : index
    %c0_238 = arith.constant 0 : index
    %c0_239 = arith.constant 0 : index
    %c0_240 = arith.constant 0 : index
    %526 = vector.load %arg2[%c6_237, %c0_238, %c0_239, %c0_240] : memref<7x7x2x4xf32, #tpu.memory_space<vmem>>, vector<1x1x2x4xf32>
    %527 = vector.shape_cast %526 : vector<1x1x2x4xf32> to vector<2x4xf32>
    %528 = vector.shape_cast %525 : vector<2x4xf32> to vector<1x1x2x4xf32>
    tpu.vector_store %arg2[%c6_237, %c0_238, %c0_239, %c0_240], %528 {strides = array<i32>} : memref<7x7x2x4xf32, #tpu.memory_space<vmem>>, vector<1x1x2x4xf32>,
    %529 = vector.extract_strided_slice %517 {offsets = [2, 0, 0], sizes = [1, 2, 4], strides = [1, 1, 1]} : vector<16x2x4xf32> to vector<1x2x4xf32>
    %530 = vector.shape_cast %529 : vector<1x2x4xf32> to vector<2x4xf32>
    %531 = vector.extract_strided_slice %517 {offsets = [3, 0, 0], sizes = [1, 2, 4], strides = [1, 1, 1]} : vector<16x2x4xf32> to vector<1x2x4xf32>
    %532 = vector.shape_cast %531 : vector<1x2x4xf32> to vector<2x4xf32>
    %533 = arith.maximumf %530, %532 : vector<2x4xf32>
    %534 = vector.extract_strided_slice %517 {offsets = [4, 0, 0], sizes = [1, 2, 4], strides = [1, 1, 1]} : vector<16x2x4xf32> to vector<1x2x4xf32>
    %535 = vector.shape_cast %534 : vector<1x2x4xf32> to vector<2x4xf32>
    %536 = arith.maximumf %533, %535 : vector<2x4xf32>
    %c6_241 = arith.constant 6 : index
    %c1_242 = arith.constant 1 : index
    %c0_243 = arith.constant 0 : index
    %c0_244 = arith.constant 0 : index
    %537 = vector.load %arg2[%c6_241, %c1_242, %c0_243, %c0_244] : memref<7x7x2x4xf32, #tpu.memory_space<vmem>>, vector<1x1x2x4xf32>
    %538 = vector.shape_cast %537 : vector<1x1x2x4xf32> to vector<2x4xf32>
    %539 = vector.shape_cast %536 : vector<2x4xf32> to vector<1x1x2x4xf32>
    tpu.vector_store %arg2[%c6_241, %c1_242, %c0_243, %c0_244], %539 {strides = array<i32>} : memref<7x7x2x4xf32, #tpu.memory_space<vmem>>, vector<1x1x2x4xf32>,
    %540 = vector.extract_strided_slice %517 {offsets = [4, 0, 0], sizes = [1, 2, 4], strides = [1, 1, 1]} : vector<16x2x4xf32> to vector<1x2x4xf32>
    %541 = vector.shape_cast %540 : vector<1x2x4xf32> to vector<2x4xf32>
    %542 = vector.extract_strided_slice %517 {offsets = [5, 0, 0], sizes = [1, 2, 4], strides = [1, 1, 1]} : vector<16x2x4xf32> to vector<1x2x4xf32>
    %543 = vector.shape_cast %542 : vector<1x2x4xf32> to vector<2x4xf32>
    %544 = arith.maximumf %541, %543 : vector<2x4xf32>
    %545 = vector.extract_strided_slice %517 {offsets = [6, 0, 0], sizes = [1, 2, 4], strides = [1, 1, 1]} : vector<16x2x4xf32> to vector<1x2x4xf32>
    %546 = vector.shape_cast %545 : vector<1x2x4xf32> to vector<2x4xf32>
    %547 = arith.maximumf %544, %546 : vector<2x4xf32>
    %c6_245 = arith.constant 6 : index
    %c2_246 = arith.constant 2 : index
    %c0_247 = arith.constant 0 : index
    %c0_248 = arith.constant 0 : index
    %548 = vector.load %arg2[%c6_245, %c2_246, %c0_247, %c0_248] : memref<7x7x2x4xf32, #tpu.memory_space<vmem>>, vector<1x1x2x4xf32>
    %549 = vector.shape_cast %548 : vector<1x1x2x4xf32> to vector<2x4xf32>
    %550 = vector.shape_cast %547 : vector<2x4xf32> to vector<1x1x2x4xf32>
    tpu.vector_store %arg2[%c6_245, %c2_246, %c0_247, %c0_248], %550 {strides = array<i32>} : memref<7x7x2x4xf32, #tpu.memory_space<vmem>>, vector<1x1x2x4xf32>,
    %551 = vector.extract_strided_slice %517 {offsets = [6, 0, 0], sizes = [1, 2, 4], strides = [1, 1, 1]} : vector<16x2x4xf32> to vector<1x2x4xf32>
    %552 = vector.shape_cast %551 : vector<1x2x4xf32> to vector<2x4xf32>
    %553 = vector.extract_strided_slice %517 {offsets = [7, 0, 0], sizes = [1, 2, 4], strides = [1, 1, 1]} : vector<16x2x4xf32> to vector<1x2x4xf32>
    %554 = vector.shape_cast %553 : vector<1x2x4xf32> to vector<2x4xf32>
    %555 = arith.maximumf %552, %554 : vector<2x4xf32>
    %556 = vector.extract_strided_slice %517 {offsets = [8, 0, 0], sizes = [1, 2, 4], strides = [1, 1, 1]} : vector<16x2x4xf32> to vector<1x2x4xf32>
    %557 = vector.shape_cast %556 : vector<1x2x4xf32> to vector<2x4xf32>
    %558 = arith.maximumf %555, %557 : vector<2x4xf32>
    %c6_249 = arith.constant 6 : index
    %c3_250 = arith.constant 3 : index
    %c0_251 = arith.constant 0 : index
    %c0_252 = arith.constant 0 : index
    %559 = vector.load %arg2[%c6_249, %c3_250, %c0_251, %c0_252] : memref<7x7x2x4xf32, #tpu.memory_space<vmem>>, vector<1x1x2x4xf32>
    %560 = vector.shape_cast %559 : vector<1x1x2x4xf32> to vector<2x4xf32>
    %561 = vector.shape_cast %558 : vector<2x4xf32> to vector<1x1x2x4xf32>
    tpu.vector_store %arg2[%c6_249, %c3_250, %c0_251, %c0_252], %561 {strides = array<i32>} : memref<7x7x2x4xf32, #tpu.memory_space<vmem>>, vector<1x1x2x4xf32>,
    %562 = vector.extract_strided_slice %517 {offsets = [8, 0, 0], sizes = [1, 2, 4], strides = [1, 1, 1]} : vector<16x2x4xf32> to vector<1x2x4xf32>
    %563 = vector.shape_cast %562 : vector<1x2x4xf32> to vector<2x4xf32>
    %564 = vector.extract_strided_slice %517 {offsets = [9, 0, 0], sizes = [1, 2, 4], strides = [1, 1, 1]} : vector<16x2x4xf32> to vector<1x2x4xf32>
    %565 = vector.shape_cast %564 : vector<1x2x4xf32> to vector<2x4xf32>
    %566 = arith.maximumf %563, %565 : vector<2x4xf32>
    %567 = vector.extract_strided_slice %517 {offsets = [10, 0, 0], sizes = [1, 2, 4], strides = [1, 1, 1]} : vector<16x2x4xf32> to vector<1x2x4xf32>
    %568 = vector.shape_cast %567 : vector<1x2x4xf32> to vector<2x4xf32>
    %569 = arith.maximumf %566, %568 : vector<2x4xf32>
    %c6_253 = arith.constant 6 : index
    %c4_254 = arith.constant 4 : index
    %c0_255 = arith.constant 0 : index
    %c0_256 = arith.constant 0 : index
    %570 = vector.load %arg2[%c6_253, %c4_254, %c0_255, %c0_256] : memref<7x7x2x4xf32, #tpu.memory_space<vmem>>, vector<1x1x2x4xf32>
    %571 = vector.shape_cast %570 : vector<1x1x2x4xf32> to vector<2x4xf32>
    %572 = vector.shape_cast %569 : vector<2x4xf32> to vector<1x1x2x4xf32>
    tpu.vector_store %arg2[%c6_253, %c4_254, %c0_255, %c0_256], %572 {strides = array<i32>} : memref<7x7x2x4xf32, #tpu.memory_space<vmem>>, vector<1x1x2x4xf32>,
    %573 = vector.extract_strided_slice %517 {offsets = [10, 0, 0], sizes = [1, 2, 4], strides = [1, 1, 1]} : vector<16x2x4xf32> to vector<1x2x4xf32>
    %574 = vector.shape_cast %573 : vector<1x2x4xf32> to vector<2x4xf32>
    %575 = vector.extract_strided_slice %517 {offsets = [11, 0, 0], sizes = [1, 2, 4], strides = [1, 1, 1]} : vector<16x2x4xf32> to vector<1x2x4xf32>
    %576 = vector.shape_cast %575 : vector<1x2x4xf32> to vector<2x4xf32>
    %577 = arith.maximumf %574, %576 : vector<2x4xf32>
    %578 = vector.extract_strided_slice %517 {offsets = [12, 0, 0], sizes = [1, 2, 4], strides = [1, 1, 1]} : vector<16x2x4xf32> to vector<1x2x4xf32>
    %579 = vector.shape_cast %578 : vector<1x2x4xf32> to vector<2x4xf32>
    %580 = arith.maximumf %577, %579 : vector<2x4xf32>
    %c6_257 = arith.constant 6 : index
    %c5_258 = arith.constant 5 : index
    %c0_259 = arith.constant 0 : index
    %c0_260 = arith.constant 0 : index
    %581 = vector.load %arg2[%c6_257, %c5_258, %c0_259, %c0_260] : memref<7x7x2x4xf32, #tpu.memory_space<vmem>>, vector<1x1x2x4xf32>
    %582 = vector.shape_cast %581 : vector<1x1x2x4xf32> to vector<2x4xf32>
    %583 = vector.shape_cast %580 : vector<2x4xf32> to vector<1x1x2x4xf32>
    tpu.vector_store %arg2[%c6_257, %c5_258, %c0_259, %c0_260], %583 {strides = array<i32>} : memref<7x7x2x4xf32, #tpu.memory_space<vmem>>, vector<1x1x2x4xf32>,
    %584 = vector.extract_strided_slice %517 {offsets = [12, 0, 0], sizes = [1, 2, 4], strides = [1, 1, 1]} : vector<16x2x4xf32> to vector<1x2x4xf32>
    %585 = vector.shape_cast %584 : vector<1x2x4xf32> to vector<2x4xf32>
    %586 = vector.extract_strided_slice %517 {offsets = [13, 0, 0], sizes = [1, 2, 4], strides = [1, 1, 1]} : vector<16x2x4xf32> to vector<1x2x4xf32>
    %587 = vector.shape_cast %586 : vector<1x2x4xf32> to vector<2x4xf32>
    %588 = arith.maximumf %585, %587 : vector<2x4xf32>
    %589 = vector.extract_strided_slice %517 {offsets = [14, 0, 0], sizes = [1, 2, 4], strides = [1, 1, 1]} : vector<16x2x4xf32> to vector<1x2x4xf32>
    %590 = vector.shape_cast %589 : vector<1x2x4xf32> to vector<2x4xf32>
    %591 = arith.maximumf %588, %590 : vector<2x4xf32>
    %c6_261 = arith.constant 6 : index
    %c6_262 = arith.constant 6 : index
    %c0_263 = arith.constant 0 : index
    %c0_264 = arith.constant 0 : index
    %592 = vector.load %arg2[%c6_261, %c6_262, %c0_263, %c0_264] : memref<7x7x2x4xf32, #tpu.memory_space<vmem>>, vector<1x1x2x4xf32>
    %593 = vector.shape_cast %592 : vector<1x1x2x4xf32> to vector<2x4xf32>
    %594 = vector.shape_cast %591 : vector<2x4xf32> to vector<1x1x2x4xf32>
    tpu.vector_store %arg2[%c6_261, %c6_262, %c0_263, %c0_264], %594 {strides = array<i32>} : memref<7x7x2x4xf32, #tpu.memory_space<vmem>>, vector<1x1x2x4xf32>,
    return
  }
  func.func @transform_0(%arg0: i32) -> (i32, i32, i32, i32) {
    %c0_i32 = arith.constant 0 : i32
    %c0_i32_0 = arith.constant 0 : i32
    %c0_i32_1 = arith.constant 0 : i32
    %c0_i32_2 = arith.constant 0 : i32
    return %c0_i32, %c0_i32_0, %c0_i32_1, %arg0 : i32, i32, i32, i32
  }
  func.func @transform_1(%arg0: i32) -> (i32, i32, i32, i32) {
    %c0_i32 = arith.constant 0 : i32
    %c0_i32_0 = arith.constant 0 : i32
    %c0_i32_1 = arith.constant 0 : i32
    %c0_i32_2 = arith.constant 0 : i32
    return %c0_i32, %c0_i32_0, %c0_i32_1, %arg0 : i32, i32, i32, i32
  }
}

</mosaic_0001>

<bundles_post_ra>
// kernel: reduction_b.7
= control target key start
LH: loop header
LB: loop body
LE: loop exit
PB: predicated region body
PF: predicated region fallthrough
CT: control target
= control target key end

     0   :  { %s4724_s12 = smov 0   ;;  %s4726_s13 = smov 0   ;;  %s5658_s0 = inlined_call_operand.vmem [shape: bf16[512,128], index: 0, kind: input, shape index: {}]   ;;  %s5659_s1 = inlined_call_operand.vmem [shape: bf16[128,768], index: 1, kind: input, shape index: {}]   ;;  %s5660_s2 = inlined_call_operand.vmem [shape: f32[1,768], index: 2, kind: input, shape index: {}]   ;;  %s5661_s3 = inlined_call_operand.vmem [shape: bf16[512,768], index: 3, kind: output, shape index: {}]  }
   0x1   :  { %s4728_s14 = smov 0   ;;  %s4730_s15 = smov 0  }
   0x2   :  { %s4732_s16 = smov 0  }
   0x3 LB: > { %s28_s17 = sadd.s32 1, %s4697_s15  ;;  %s3935_s18 = sadd.s32 4294967295, %s4701_s16   ;;  %s4701_s16 = sphi %s4732_s16, %s13_s16   ;;  %s4697_s15 = sphi %s4730_s15, %s5666_s15   ;;  %s4693_s14 = sphi %s4728_s14, %s5665_s14   ;;  %s4689_s13 = sphi %s4726_s13, %s5664_s13   ;;  %s4685_s12 = sphi %s4724_s12, %s5663_s12  }
   0x4   : > { %p30_p0 = scmp.ge.s32.totalorder %s28_s17, 2  ;;  %p76_p1 = scmp.ne.s32.totalorder %s4689_s13, %s4685_s12 }
   0x5   : > { %p77_p2 = scmp.eq.s32.totalorder %s4701_s16, 0  ;;  %p134_p4 = scmp.eq.s32.totalorder %s3935_s18, 1 }
   0x6   : > { %s5668_s17 = smov (%p30_p0, %s28_s17), 0  ;;  %s69_s20 = sadd.s32 1, %s4689_s13 }
   0x7   : > { %p78_p3 = por %p77_p2, %p76_p1  ;;  %s65_s19 = ssub.s32 %s4697_s15, %s5668_s17 }
   0x8   : > { %p67_p5 = scmp.eq.s32.totalorder %s65_s19, 0  ;;  %p4759_p6 = por %p134_p4, %p76_p1 }
   0x9   : > { %p3939_p7 = scmp.ge.s32.totalorder %s4701_s16, 2 }
   0xa   : > { %s4764_s22 = scalar_select %p67_p5, %s4689_s13, %s69_s20  }
   0xb   : > { %168 = sbr.rel (%p3939_p7) target bundleno = 41 (0x29), region = 20 }
  0x12   : > { %171 = sbr.rel (!%p78_p3) target bundleno = 41 (0x29), region = 24  ;;  %s173_s23 = sand.u32 (%p78_p3), 1, %s4689_s13  }
  0x13   : > { %s4289_s24 = smul.u32 (%p78_p3), 12, %s4697_s15 }
  0x14   : > { %s4555_s25 = smul.u32 (%p78_p3), 192, %s173_s23 }
  0x15   : > { %s4772_s28 = scalar_lea.vmem (%p78_p3), %s5659_s1, %s4289_s24 }
  0x16   : > { %v196_v0 = vld [vmem:[%s4772_s28] sm:$0xff] (%p78_p3)  ;;  %v198_v1 = vld [vmem:[%s4772_s28 + $0x18] sm:$0xff] (%p78_p3)  ;;  %v200_v2 = vld [vmem:[%s4772_s28 + $0x30] sm:$0xff] (%p78_p3)  ;;  %s4777_s29 = scalar_lea.vmem (%p78_p3), [#allocation3], %s4555_s25 }
  0x17   : > { %197 = vst [vmem:[%s4777_s29] sm:$0xff] (%p78_p3), %v196_v0  ;;  %199 = vst [vmem:[%s4777_s29 + $0xc] sm:$0xff] (%p78_p3), %v198_v1  ;;  %v202_v3 = vld [vmem:[%s4772_s28 + $0x48] sm:$0xff] (%p78_p3)  ;;  %v204_v4 = vld [vmem:[%s4772_s28 + $0x60] sm:$0xff] (%p78_p3) }
  0x18   : > { %201 = vst [vmem:[%s4777_s29 + $0x18] sm:$0xff] (%p78_p3), %v200_v2  ;;  %v206_v5 = vld [vmem:[%s4772_s28 + $0x78] sm:$0xff] (%p78_p3)  ;;  %203 = vst [vmem:[%s4777_s29 + $0x24] sm:$0xff] (%p78_p3), %v202_v3  ;;  %v208_v6 = vld [vmem:[%s4772_s28 + $0x90] sm:$0xff] (%p78_p3) }
  0x19   : > { %205 = vst [vmem:[%s4777_s29 + $0x30] sm:$0xff] %v204_v4  ;;  %207 = vst [vmem:[%s4777_s29 + $0x3c] sm:$0xff] %v206_v5  ;;  %v210_v7 = vld [vmem:[%s4772_s28 + $0xa8] sm:$0xff]  ;;  %v212_v8 = vld [vmem:[%s4772_s28 + $0xc0] sm:$0xff] }
  0x1a   : > { %209 = vst [vmem:[%s4777_s29 + $0x48] sm:$0xff] %v208_v6  ;;  %211 = vst [vmem:[%s4777_s29 + $0x54] sm:$0xff] %v210_v7  ;;  %v214_v9 = vld [vmem:[%s4772_s28 + $0xd8] sm:$0xff]  ;;  %v216_v10 = vld [vmem:[%s4772_s28 + $0xf0] sm:$0xff] }
  0x1b   : > { %213 = vst [vmem:[%s4777_s29 + $0x60] sm:$0xff] %v212_v8  ;;  %v218_v11 = vld [vmem:[%s4772_s28 + $0x108] sm:$0xff]  ;;  %215 = vst [vmem:[%s4777_s29 + $0x6c] sm:$0xff] %v214_v9  ;;  %v220_v12 = vld [vmem:[%s4772_s28 + $0x120] sm:$0xff] }
  0x1c   : > { %217 = vst [vmem:[%s4777_s29 + $0x78] sm:$0xff] %v216_v10  ;;  %219 = vst [vmem:[%s4777_s29 + $0x84] sm:$0xff] %v218_v11  ;;  %v222_v13 = vld [vmem:[%s4772_s28 + $0x138] sm:$0xff]  ;;  %v224_v14 = vld [vmem:[%s4772_s28 + $0x150] sm:$0xff] }
  0x1d   : > { %221 = vst [vmem:[%s4777_s29 + $0x90] sm:$0xff] %v220_v12  ;;  %223 = vst [vmem:[%s4777_s29 + $0x9c] sm:$0xff] %v222_v13  ;;  %v226_v15 = vld [vmem:[%s4772_s28 + $0x168] sm:$0xff]  ;;  %v3943_v17 = vld [vmem:[%s4772_s28 + $0x20] sm:$0xf] }
  0x1e   : > { %225 = vst [vmem:[%s4777_s29 + $0xa8] sm:$0xff] %v224_v14  ;;  %v3941_v16 = vld [vmem:[%s4772_s28 + $0x8] sm:$0xf]  ;;  %227 = vst [vmem:[%s4777_s29 + $0xb4] sm:$0xff] %v226_v15  ;;  %v3945_v18 = vld [vmem:[%s4772_s28 + $0x38] sm:$0xf] }
  0x1f   : > { %3942 = vst [vmem:[%s4777_s29 + $0x8] sm:$0xf] %v3941_v16  ;;  %3944 = vst [vmem:[%s4777_s29 + $0x14] sm:$0xf] %v3943_v17  ;;  %v3947_v19 = vld [vmem:[%s4772_s28 + $0x50] sm:$0xf] }
  0x20   : > { %v3949_v20 = vld [vmem:[%s4772_s28 + $0x68] sm:$0xf]  ;;  %3946 = vst [vmem:[%s4777_s29 + $0x20] sm:$0xf] %v3945_v18  ;;  %3948 = vst [vmem:[%s4777_s29 + $0x2c] sm:$0xf] %v3947_v19 }
  0x21   : > { %3950 = vst [vmem:[%s4777_s29 + $0x38] sm:$0xf] %v3949_v20  ;;  %v3951_v21 = vld [vmem:[%s4772_s28 + $0x80] sm:$0xf]  ;;  %v3953_v22 = vld [vmem:[%s4772_s28 + $0x98] sm:$0xf] }
  0x22   : > { %v3955_v23 = vld [vmem:[%s4772_s28 + $0xb0] sm:$0xf]  ;;  %3952 = vst [vmem:[%s4777_s29 + $0x44] sm:$0xf] %v3951_v21  ;;  %3954 = vst [vmem:[%s4777_s29 + $0x50] sm:$0xf] %v3953_v22 }
  0x23   : > { %3956 = vst [vmem:[%s4777_s29 + $0x5c] sm:$0xf] %v3955_v23  ;;  %v3957_v24 = vld [vmem:[%s4772_s28 + $0xc8] sm:$0xf]  ;;  %v3959_v25 = vld [vmem:[%s4772_s28 + $0xe0] sm:$0xf] }
  0x24   : > { %v3961_v26 = vld [vmem:[%s4772_s28 + $0xf8] sm:$0xf]  ;;  %3958 = vst [vmem:[%s4777_s29 + $0x68] sm:$0xf] %v3957_v24  ;;  %3960 = vst [vmem:[%s4777_s29 + $0x74] sm:$0xf] %v3959_v25 }
  0x25   : > { %3962 = vst [vmem:[%s4777_s29 + $0x80] sm:$0xf] %v3961_v26  ;;  %v3963_v27 = vld [vmem:[%s4772_s28 + $0x110] sm:$0xf]  ;;  %v3965_v28 = vld [vmem:[%s4772_s28 + $0x128] sm:$0xf] }
  0x26   : > { %v3967_v29 = vld [vmem:[%s4772_s28 + $0x140] sm:$0xf]  ;;  %3964 = vst [vmem:[%s4777_s29 + $0x8c] sm:$0xf] %v3963_v27  ;;  %3966 = vst [vmem:[%s4777_s29 + $0x98] sm:$0xf] %v3965_v28 }
  0x27   : > { %3968 = vst [vmem:[%s4777_s29 + $0xa4] sm:$0xf] %v3967_v29  ;;  %v3969_v30 = vld [vmem:[%s4772_s28 + $0x158] sm:$0xf]  ;;  %v3971_v31 = vld [vmem:[%s4772_s28 + $0x170] sm:$0xf] }
  0x28   : > { %3970 = vst [vmem:[%s4777_s29 + $0xb0] sm:$0xf] %v3969_v30  ;;  %3972 = vst [vmem:[%s4777_s29 + $0xbc] sm:$0xf] %v3971_v31 }
  0x29 PF: > { %p3973_p8 = scmp.ge.s32.totalorder %s4701_s16, 1  ;;  %p279_p9 = scmp.lt.s32.totalorder %s4701_s16, 3 }
  0x2b   : > { %p280_p10 = pnand %p3973_p8, %p279_p9 }
  0x2c   : > { %s286_s30 = sand.u32 (!%p280_p10), 1, %s4685_s12   ;;  %v4703_v32 = vmov (!%p280_p10), 0   ;;  %v4869_v50 = vld [vmem:[%s5658_s0] sm:$0xff] (!%p280_p10)   ;;  %v4626_v54 = vld [vmem:[%s5658_s0 + $0x8] sm:$0xff] (!%p280_p10)   ;;  %v4629_v58 = vld [vmem:[%s5658_s0 + $0x10] sm:$0xff] (!%p280_p10)   ;;  %s331_s24 = smul.u32 (!%p280_p10), 3, %s4693_s14  ;;  %v2366_v25 = vlaneseq (!%p280_p10) }
  0x2d   : > { %283 = sbr.rel (%p280_p10) target bundleno = 551 (0x227), region = 54  ;;  %1175 = vmatprep.mubr.bf16.mxu0 (!%p280_p10), %v4703_v32  ;;  %1415 = vmatprep.mubr.bf16.mxu1 (!%p280_p10), %v4703_v32  ;;  %v4874_v51 = vld [vmem:[%s5658_s0 + $0xc0] sm:$0xff] (!%p280_p10)   ;;  %v4888_v55 = vld [vmem:[%s5658_s0 + $0xc8] sm:$0xff] (!%p280_p10)   ;;  %v4901_v59 = vld [vmem:[%s5658_s0 + $0xd0] sm:$0xff] (!%p280_p10)  }
  0x2e   : > { %s4556_s4 = smul.u32 (!%p280_p10), 192, %s286_s30  ;;  %v4632_v62 = vld [vmem:[%s5658_s0 + $0x18] sm:$0xff] (!%p280_p10)   ;;  %v4635_v1 = vld [vmem:[%s5658_s0 + $0x20] sm:$0xff] (!%p280_p10)   ;;  %v4638_v3 = vld [vmem:[%s5658_s0 + $0x28] sm:$0xff] (!%p280_p10)   ;;  %p332_p11 = scmp.lt.s32.totalorder (!%p280_p10), %s331_s24, 5  ;;  %v5036_v26 = vshrl.u32 (!%p280_p10), %v2366_v25, 7 }
  0x2f   : > { %v4914_v63 = vld [vmem:[%s5658_s0 + $0xd8] sm:$0xff] (!%p280_p10)   ;;  %v4926_v2 = vld [vmem:[%s5658_s0 + $0xe0] sm:$0xff] (!%p280_p10)   ;;  %v4937_v4 = vld [vmem:[%s5658_s0 + $0xe8] sm:$0xff] (!%p280_p10)   ;;  %s4557_s28 = smul.u32 (!%p280_p10), 768, %s286_s30 }
  0x30   : > { %s4847_s5 = scalar_lea.vmem (!%p280_p10), [#allocation3], %s4556_s4  ;;  %v4641_v5 = vld [vmem:[%s5658_s0 + $0x30] sm:$0xff] (!%p280_p10)   ;;  %v4644_v7 = vld [vmem:[%s5658_s0 + $0x38] sm:$0xff] (!%p280_p10)   ;;  %v4647_v9 = vld [vmem:[%s5658_s0 + $0x40] sm:$0xff] (!%p280_p10)   ;;  %v2368_v27 = vsub.s32 (!%p280_p10), 0, %v5036_v26  ;;  %v2372_v29 = vsub.s32 (!%p280_p10), 1, %v5036_v26 }
  0x31   : > { %v4599_v33 = vld [vmem:[%s4847_s5 + $0x4] ss:$12 sps:$4 sm:$0xff] (!%p280_p10)   ;;  %v4601_v34 = vld [vmem:[%s4847_s5] ss:$12 sps:$4 sm:$0xff] (!%p280_p10)   ;;  %v4602_v35 = vld [vmem:[%s4847_s5 + $0x1c] ss:$12 sps:$4 sm:$0xff] (!%p280_p10)  }
  0x32   : > { %1143 = vmatprep.subr.bf16.mxu0 (!%p280_p10), %v4599_v33  ;;  %4539 = vmatprep.subr.bf16.mxu1 (!%p280_p10), %v4599_v33  ;;  %v4604_v36 = vld [vmem:[%s4847_s5 + $0x18] ss:$12 sps:$4 sm:$0xff] (!%p280_p10)   ;;  %v4605_v37 = vld [vmem:[%s4847_s5 + $0x34] ss:$12 sps:$4 sm:$0xff] (!%p280_p10)   ;;  %v4607_v38 = vld [vmem:[%s4847_s5 + $0x30] ss:$12 sps:$4 sm:$0xff] (!%p280_p10)  }
  0x33   : > { %1144 = vmatpush1.bf16.msra.mxu0 (!%p280_p10), %v4601_v34  ;;  %4547 = vmatpush1.bf16.msra.mxu1 (!%p280_p10), %v4601_v34  ;;  %v4608_v39 = vld [vmem:[%s4847_s5 + $0x4c] ss:$12 sps:$4 sm:$0xff] (!%p280_p10)   ;;  %v4610_v40 = vld [vmem:[%s4847_s5 + $0x48] ss:$12 sps:$4 sm:$0xff] (!%p280_p10)   ;;  %v4611_v41 = vld [vmem:[%s4847_s5 + $0x64] ss:$12 sps:$4 sm:$0xff] (!%p280_p10)  }
  0x34   : > { %1145 = vmatprep.subr.bf16.mxu0 %v4602_v35  ;;  %4540 = vmatprep.subr.bf16.mxu1 %v4602_v35  ;;  %v4613_v42 = vld [vmem:[%s4847_s5 + $0x60] ss:$12 sps:$4 sm:$0xff]   ;;  %v4614_v43 = vld [vmem:[%s4847_s5 + $0x7c] ss:$12 sps:$4 sm:$0xff]   ;;  %v4616_v44 = vld [vmem:[%s4847_s5 + $0x78] ss:$12 sps:$4 sm:$0xff]  }
  0x35   : > { %v4617_v45 = vld [vmem:[%s4847_s5 + $0x94] ss:$12 sps:$4 sm:$0xff]   ;;  %v4619_v46 = vld [vmem:[%s4847_s5 + $0x90] ss:$12 sps:$4 sm:$0xff]   ;;  %v4620_v47 = vld [vmem:[%s4847_s5 + $0xac] ss:$12 sps:$4 sm:$0xff]  }
  0x36   : > { %v4622_v48 = vld [vmem:[%s4847_s5 + $0xa8] ss:$12 sps:$4 sm:$0xff]   ;;  %v4628_v52 = vld [vmem:[%s4847_s5 + $0x20] ss:$12 sps:$4 sm:$0xff]   ;;  %v4631_v53 = vld [vmem:[%s4847_s5 + $0x38] ss:$12 sps:$4 sm:$0xff]  }
  0x37   : > { %1146 = vmatpush1.bf16.msra.mxu0 %v4604_v36  ;;  %4548 = vmatpush1.bf16.msra.mxu1 %v4604_v36  ;;  %v4625_v49 = vld [vmem:[%s4847_s5 + $0x8] ss:$12 sps:$4 sm:$0xff]   ;;  %v4634_v56 = vld [vmem:[%s4847_s5 + $0x50] ss:$12 sps:$4 sm:$0xff]   ;;  %v4640_v60 = vld [vmem:[%s4847_s5 + $0x80] ss:$12 sps:$4 sm:$0xff]  }
  0x38   : > { %1147 = vmatprep.subr.bf16.mxu0 %v4605_v37  ;;  %4541 = vmatprep.subr.bf16.mxu1 %v4605_v37  ;;  %v4637_v57 = vld [vmem:[%s4847_s5 + $0x68] ss:$12 sps:$4 sm:$0xff]   ;;  %v4643_v61 = vld [vmem:[%s4847_s5 + $0x98] ss:$12 sps:$4 sm:$0xff]   ;;  %v4646_v0 = vld [vmem:[%s4847_s5 + $0xb0] ss:$12 sps:$4 sm:$0xff]  }
  0x39   : > { %v4948_v6 = vld [vmem:[%s5658_s0 + $0xf0] sm:$0xff]   ;;  %v4959_v8 = vld [vmem:[%s5658_s0 + $0xf8] sm:$0xff]   ;;  %v4648_v10 = vld [vmem:[%s5658_s0 + $0x48] sm:$0xff]   ;;  %s5670_s24 = smov (!%p332_p11, %s331_s24), 5  ;;  %s5061_s12 = scalar_lea.vmem [#allocation4], %s4557_s28 }
  0x3a   : > { %v4649_v11 = vld [vmem:[%s5658_s0 + $0x50] sm:$0xff]   ;;  %v4650_v12 = vld [vmem:[%s5658_s0 + $0x58] sm:$0xff]   ;;  %v4651_v13 = vld [vmem:[%s5658_s0 + $0x60] sm:$0xff]   ;;  %s334_s27 = scalar_lea.vmem %s5660_s2, %s5670_s24  ;;  %s4418_s30 = smul.u32 (%p4759_p6), 12, %s4693_s14 }
  0x3b   : > { %1148 = vmatpush1.bf16.msra.mxu0 %v4607_v38  ;;  %4549 = vmatpush1.bf16.msra.mxu1 %v4607_v38  ;;  %v4652_v14 = vld [vmem:[%s5658_s0 + $0x68] sm:$0xff]   ;;  %v4653_v15 = vld [vmem:[%s5658_s0 + $0x70] sm:$0xff]   ;;  %v4654_v16 = vld [vmem:[%s5658_s0 + $0x78] sm:$0xff]  }
  0x3c   : > { %1149 = vmatprep.subr.bf16.mxu0 %v4608_v39  ;;  %4542 = vmatprep.subr.bf16.mxu1 %v4608_v39  ;;  %v4655_v17 = vld [vmem:[%s5658_s0 + $0x80] sm:$0xff]   ;;  %v4656_v18 = vld [vmem:[%s5658_s0 + $0x88] sm:$0xff]   ;;  %v4657_v19 = vld [vmem:[%s5658_s0 + $0x90] sm:$0xff]   ;;  %s5391_s4 = scalar_lea.vmem (%p4759_p6), %s5661_s3, %s4418_s30 }
  0x3d   : > { %v4658_v20 = vld [vmem:[%s5658_s0 + $0x98] sm:$0xff]   ;;  %v4659_v21 = vld [vmem:[%s5658_s0 + $0xa0] sm:$0xff]   ;;  %v4660_v22 = vld [vmem:[%s5658_s0 + $0xa8] sm:$0xff]  }
  0x3e   : > { %v4661_v23 = vld [vmem:[%s5658_s0 + $0xb0] sm:$0xff]   ;;  %v4662_v24 = vld [vmem:[%s5658_s0 + $0xb8] sm:$0xff]   ;;  %v5042_v28 = vld [vmem:[%s334_s27] sm:$0x7] }
  0x3f   : > { %1150 = vmatpush1.bf16.msra.mxu0 %v4610_v40  ;;  %4550 = vmatpush1.bf16.msra.mxu1 %v4610_v40  ;;  %v5046_v30 = vrot.slane %v5042_v28, %v2368_v27  ;;  %v5049_v31 = vrot.slane %v5042_v28, %v2372_v29 }
  0x40   : > { %1151 = vmatprep.subr.bf16.mxu0 %v4611_v41  ;;  %4543 = vmatprep.subr.bf16.mxu1 %v4611_v41 }
  0x43   : > { %1152 = vmatpush1.bf16.msra.mxu0 %v4613_v42  ;;  %4551 = vmatpush1.bf16.msra.mxu1 %v4613_v42 }
  0x44   : > { %1153 = vmatprep.subr.bf16.mxu0 %v4614_v43  ;;  %4544 = vmatprep.subr.bf16.mxu1 %v4614_v43 }
  0x47   : > { %1154 = vmatpush1.bf16.msra.mxu0 %v4616_v44  ;;  %4552 = vmatpush1.bf16.msra.mxu1 %v4616_v44 }
  0x48   : > { %1155 = vmatprep.subr.bf16.mxu0 %v4617_v45  ;;  %4545 = vmatprep.subr.bf16.mxu1 %v4617_v45 }
  0x4b   : > { %1156 = vmatpush1.bf16.msra.mxu0 %v4619_v46  ;;  %4553 = vmatpush1.bf16.msra.mxu1 %v4619_v46 }
  0x4c   : > { %1157 = vmatprep.subr.bf16.mxu0 %v4620_v47  ;;  %4546 = vmatprep.subr.bf16.mxu1 %v4620_v47 }
  0x4f   : > { %1158 = vmatpush1.bf16.msra.mxu0 %v4622_v48  ;;  %4554 = vmatpush1.bf16.msra.mxu1 %v4622_v48 }
  0x50   : > { %4459 = vmatprep.subr.bf16.mxu1 %v4625_v49 }
  0x52   : > { %1176 = vmatmul.mubr.bf16.vlgmr.msra.gmra.mrb[0].mxu0 %v4869_v50  ;;  %1416 = vmatmul.mubr.bf16.vlgmr.msra.gmra.mrb[0].mxu1 %v4874_v51 }
  0x53   : > { %4460 = vmatpush3.bf16.msra.mxu1 %v4625_v49  ;;  %1185 = vmatprep.mubr.bf16.mxu0 %v4703_v32 }
  0x54   : > { %1425 = vmatprep.mubr.bf16.mxu1 %v4703_v32  ;;  %4461 = vmatprep.subr.bf16.mxu1 %v4628_v52 }
  0x57   : > { %4462 = vmatpush3.bf16.msra.mxu1 %v4628_v52 }
  0x58   : > { %4463 = vmatprep.subr.bf16.mxu1 %v4631_v53 }
  0x5a   : > { %1186 = vmatmul.mubr.bf16.gmra.mrb[4].mxu0 %v4626_v54  ;;  %1426 = vmatmul.mubr.bf16.gmra.mrb[4].mxu1 %v4888_v55 }
  0x5b   : > { %1195 = vmatprep.mubr.bf16.mxu0 %v4703_v32  ;;  %1435 = vmatprep.mubr.bf16.mxu1 %v4703_v32 }
  0x5c   : > { %4464 = vmatpush3.bf16.msra.mxu1 %v4631_v53 }
  0x5d   : > { %4465 = vmatprep.subr.bf16.mxu1 %v4634_v56 }
  0x60   : > { %4466 = vmatpush3.bf16.msra.mxu1 %v4634_v56 }
  0x61   : > { %4467 = vmatprep.subr.bf16.mxu1 %v4637_v57 }
  0x62   : > { %1196 = vmatmul.mubr.bf16.gmra.mrb[8].mxu0 %v4629_v58  ;;  %1436 = vmatmul.mubr.bf16.gmra.mrb[8].mxu1 %v4901_v59 }
  0x63   : > { %1205 = vmatprep.mubr.bf16.mxu0 %v4703_v32  ;;  %1445 = vmatprep.mubr.bf16.mxu1 %v4703_v32 }
  0x64   : > { %4468 = vmatpush3.bf16.msra.mxu1 %v4637_v57 }
  0x65   : > { %4469 = vmatprep.subr.bf16.mxu1 %v4640_v60 }
  0x68   : > { %4470 = vmatpush3.bf16.msra.mxu1 %v4640_v60 }
  0x69   : > { %4471 = vmatprep.subr.bf16.mxu1 %v4643_v61 }
  0x6a   : > { %1206 = vmatmul.mubr.bf16.gmra.mrb[12].mxu0 %v4632_v62  ;;  %1446 = vmatmul.mubr.bf16.gmra.mrb[12].mxu1 %v4914_v63 }
  0x6b   : > { %1215 = vmatprep.mubr.bf16.mxu0 %v4703_v32  ;;  %1455 = vmatprep.mubr.bf16.mxu1 %v4703_v32 }
  0x6c   : > { %4472 = vmatpush3.bf16.msra.mxu1 %v4643_v61 }
  0x6d   : > { %4473 = vmatprep.subr.bf16.mxu1 %v4646_v0 }
  0x70   : > { %4474 = vmatpush3.bf16.msra.mxu1 %v4646_v0 }
  0x72   : > { %1216 = vmatmul.mubr.bf16.gmra.mrb[16].mxu0 %v4635_v1  ;;  %1456 = vmatmul.mubr.bf16.gmra.mrb[16].mxu1 %v4926_v2 }
  0x73   : > { %1225 = vmatprep.mubr.bf16.mxu0 %v4703_v32  ;;  %1465 = vmatprep.mubr.bf16.mxu1 %v4703_v32 }
  0x7a   : > { %1226 = vmatmul.mubr.bf16.gmra.mrb[20].mxu0 %v4638_v3  ;;  %1466 = vmatmul.mubr.bf16.gmra.mrb[20].mxu1 %v4937_v4 }
  0x7b   : > { %1235 = vmatprep.mubr.bf16.mxu0 %v4703_v32  ;;  %1475 = vmatprep.mubr.bf16.mxu1 %v4703_v32 }
  0x82   : > { %1236 = vmatmul.mubr.bf16.gmra.mrb[24].mxu0 %v4641_v5  ;;  %1476 = vmatmul.mubr.bf16.gmra.mrb[24].mxu1 %v4948_v6 }
  0x83   : > { %1245 = vmatprep.mubr.bf16.mxu0 %v4703_v32  ;;  %1485 = vmatprep.mubr.bf16.mxu1 %v4703_v32 }
  0x8a   : > { %1246 = vmatmul.mubr.bf16.gmra.mrb[28].mxu0 %v4644_v7  ;;  %1486 = vmatmul.mubr.bf16.gmra.mrb[28].mxu1 %v4959_v8 }
  0x8b   : > { %1255 = vmatprep.mubr.bf16.mxu0 %v4703_v32  ;;  %4475 = vmatprep.mubr.bf16.mxu1 %v4869_v50 }
  0x92   : > { %1256 = vmatmul.mubr.bf16.gmra.mrb[32].mxu0 %v4647_v9  ;;  %4476 = vmatmul.mubr.bf16.vlgmr.msra.gmra.mrb[32].mxu1 %v4626_v54 }
  0x93   : > { %1265 = vmatprep.mubr.bf16.mxu0 %v4703_v32  ;;  %4479 = vmatprep.mubr.bf16.mxu1 %v4629_v58 }
  0x9a   : > { %1266 = vmatmul.mubr.bf16.gmra.mrb[36].mxu0 %v4648_v10  ;;  %4480 = vmatmul.mubr.bf16.gmra.mrb[36].mxu1 %v4632_v62 }
  0x9b   : > { %1275 = vmatprep.mubr.bf16.mxu0 %v4703_v32  ;;  %4483 = vmatprep.mubr.bf16.mxu1 %v4635_v1 }
  0xa2   : > { %1276 = vmatmul.mubr.bf16.gmra.mrb[40].mxu0 %v4649_v11  ;;  %4484 = vmatmul.mubr.bf16.gmra.mrb[40].mxu1 %v4638_v3 }
  0xa3   : > { %1285 = vmatprep.mubr.bf16.mxu0 %v4703_v32  ;;  %4487 = vmatprep.mubr.bf16.mxu1 %v4641_v5 }
  0xaa   : > { %1286 = vmatmul.mubr.bf16.gmra.mrb[44].mxu0 %v4650_v12  ;;  %4488 = vmatmul.mubr.bf16.gmra.mrb[44].mxu1 %v4644_v7 }
  0xab   : > { %1295 = vmatprep.mubr.bf16.mxu0 %v4703_v32  ;;  %4491 = vmatprep.mubr.bf16.mxu1 %v4647_v9 }
  0xb2   : > { %1296 = vmatmul.mubr.bf16.gmra.mrb[48].mxu0 %v4651_v13  ;;  %4492 = vmatmul.mubr.bf16.gmra.mrb[48].mxu1 %v4648_v10 }
  0xb3   : > { %1305 = vmatprep.mubr.bf16.mxu0 %v4703_v32  ;;  %4495 = vmatprep.mubr.bf16.mxu1 %v4649_v11 }
  0xba   : > { %1306 = vmatmul.mubr.bf16.gmra.mrb[52].mxu0 %v4652_v14  ;;  %4496 = vmatmul.mubr.bf16.gmra.mrb[52].mxu1 %v4650_v12 }
  0xbb   : > { %1315 = vmatprep.mubr.bf16.mxu0 %v4703_v32  ;;  %4499 = vmatprep.mubr.bf16.mxu1 %v4651_v13 }
  0xc2   : > { %1316 = vmatmul.mubr.bf16.gmra.mrb[56].mxu0 %v4653_v15  ;;  %4500 = vmatmul.mubr.bf16.gmra.mrb[56].mxu1 %v4652_v14 }
  0xc3   : > { %1325 = vmatprep.mubr.bf16.mxu0 %v4703_v32  ;;  %4503 = vmatprep.mubr.bf16.mxu1 %v4653_v15 }
  0xca   : > { %1326 = vmatmul.mubr.bf16.gmra.mrb[60].mxu0 %v4654_v16  ;;  %4504 = vmatmul.mubr.bf16.gmra.mrb[60].mxu1 %v4654_v16 }
  0xcb   : > { %1335 = vmatprep.mubr.bf16.mxu0 %v4703_v32  ;;  %4507 = vmatprep.mubr.bf16.mxu1 %v4655_v17 }
  0xd2   : > { %1336 = vmatmul.mubr.bf16.gmra.mrb[64].mxu0 %v4655_v17  ;;  %4508 = vmatmul.mubr.bf16.gmra.mrb[64].mxu1 %v4656_v18 }
  0xd3   : > { %1345 = vmatprep.mubr.bf16.mxu0 %v4703_v32  ;;  %4511 = vmatprep.mubr.bf16.mxu1 %v4657_v19 }
  0xda   : > { %1346 = vmatmul.mubr.bf16.gmra.mrb[68].mxu0 %v4656_v18  ;;  %4512 = vmatmul.mubr.bf16.gmra.mrb[68].mxu1 %v4658_v20 }
  0xdb   : > { %1355 = vmatprep.mubr.bf16.mxu0 %v4703_v32  ;;  %4515 = vmatprep.mubr.bf16.mxu1 %v4659_v21 }
  0xe2   : > { %1356 = vmatmul.mubr.bf16.gmra.mrb[72].mxu0 %v4657_v19  ;;  %4516 = vmatmul.mubr.bf16.gmra.mrb[72].mxu1 %v4660_v22 }
  0xe3   : > { %1365 = vmatprep.mubr.bf16.mxu0 %v4703_v32  ;;  %4519 = vmatprep.mubr.bf16.mxu1 %v4661_v23 }
  0xea   : > { %1366 = vmatmul.mubr.bf16.gmra.mrb[76].mxu0 %v4658_v20  ;;  %4520 = vmatmul.mubr.bf16.gmra.mrb[76].mxu1 %v4662_v24 }
  0xeb   : > { %1375 = vmatprep.mubr.bf16.mxu0 %v4703_v32  ;;  %4523 = vmatprep.mubr.bf16.mxu1 %v4874_v51 }
  0xf2   : > { %1376 = vmatmul.mubr.bf16.gmra.mrb[80].mxu0 %v4659_v21  ;;  %4524 = vmatmul.mubr.bf16.gmra.mrb[80].mxu1 %v4888_v55 }
  0xf3   : > { %1385 = vmatprep.mubr.bf16.mxu0 %v4703_v32  ;;  %4527 = vmatprep.mubr.bf16.mxu1 %v4901_v59 }
  0xfa   : > { %1386 = vmatmul.mubr.bf16.gmra.mrb[84].mxu0 %v4660_v22  ;;  %4528 = vmatmul.mubr.bf16.gmra.mrb[84].mxu1 %v4914_v63 }
  0xfb   : > { %1395 = vmatprep.mubr.bf16.mxu0 %v4703_v32  ;;  %4531 = vmatprep.mubr.bf16.mxu1 %v4926_v2 }
 0x102   : > { %1396 = vmatmul.mubr.bf16.gmra.mrb[88].mxu0 %v4661_v23  ;;  %4532 = vmatmul.mubr.bf16.gmra.mrb[88].mxu1 %v4937_v4 }
 0x103   : > { %1405 = vmatprep.mubr.bf16.mxu0 %v4703_v32  ;;  %4535 = vmatprep.mubr.bf16.mxu1 %v4948_v6 }
 0x10a   : > { %1406 = vmatmul.mubr.bf16.gmra.mrb[92].mxu0 %v4662_v24  ;;  %4536 = vmatmul.mubr.bf16.gmra.mrb[92].mxu1 %v4959_v8 }
 0x125   : > { %v1177_v32 = vpop.f32.mrb[0].mxu0  ;;  %v1417_v33 = vpop.f32.mrb[0].mxu1 }
 0x126   : > { %v2381_v34 = vadd.f32 %v5046_v30, %v1177_v32  ;;  %v2525_v35 = vadd.f32 %v5046_v30, %v1417_v33  ;;  %v1179_v36 = vpop.f32.mrb[1].mxu0  ;;  %v1419_v37 = vpop.f32.mrb[1].mxu1 }
 0x127   : > { %v2382_v38 = vadd.f32 %v5049_v31, %v1179_v36  ;;  %v2526_v39 = vadd.f32 %v5049_v31, %v1419_v37  ;;  %v1181_v40 = vpop.f32.mrb[2].mxu0  ;;  %v1421_v41 = vpop.f32.mrb[2].mxu1 }
 0x128   : > { %v2573_v42 = vmax.f32 %v2381_v34, 0.0  ;;  %v2717_v43 = vmax.f32 %v2525_v35, 0.0  ;;  %v2384_v44 = vadd.f32 %v5046_v30, %v1181_v40  ;;  %v2528_v45 = vadd.f32 %v5046_v30, %v1421_v41  ;;  %v1183_v46 = vpop.f32.mrb[3].mxu0  ;;  %v1423_v47 = vpop.f32.mrb[3].mxu1 }
 0x129   : > { %v2574_v48 = vmax.f32 %v2382_v38, 0.0  ;;  %v2718_v49 = vmax.f32 %v2526_v39, 0.0  ;;  %v2385_v50 = vadd.f32 %v5049_v31, %v1183_v46  ;;  %v2529_v51 = vadd.f32 %v5049_v31, %v1423_v47 }
 0x12a   : > { %v2576_v52 = vmax.f32 %v2384_v44, 0.0  ;;  %v2720_v53 = vmax.f32 %v2528_v45, 0.0 }
 0x12b   : > { %v4290_v54 = vpack.c.bf16 %v2574_v48, %v2573_v42  ;;  %v4386_v55 = vpack.c.bf16 %v2718_v49, %v2717_v43  ;;  %v2577_v56 = vmax.f32 %v2385_v50, 0.0  ;;  %v2721_v57 = vmax.f32 %v2529_v51, 0.0 }
 0x12d   : > { %3405 = vst [vmem:[%s5061_s12] sm:$0xff] %v4290_v54  ;;  %3501 = vst [vmem:[%s5061_s12 + $0x240] sm:$0xff] %v4386_v55  ;;  %v4292_v58 = vpack.c.bf16 %v2577_v56, %v2576_v52  ;;  %v4388_v59 = vpack.c.bf16 %v2721_v57, %v2720_v53  ;;  %v1187_v60 = vpop.f32.mrb[4].mxu0  ;;  %v1427_v61 = vpop.f32.mrb[4].mxu1 }
 0x12e   : > { %v2387_v62 = vadd.f32 %v5046_v30, %v1187_v60  ;;  %v2531_v63 = vadd.f32 %v5046_v30, %v1427_v61  ;;  %v1189_v0 = vpop.f32.mrb[5].mxu0  ;;  %v1429_v1 = vpop.f32.mrb[5].mxu1 }
 0x12f   : > { %3407 = vst [vmem:[%s5061_s12 + $0xc] sm:$0xff] %v4292_v58  ;;  %3503 = vst [vmem:[%s5061_s12 + $0x24c] sm:$0xff] %v4388_v59  ;;  %v2388_v2 = vadd.f32 %v5049_v31, %v1189_v0  ;;  %v2532_v3 = vadd.f32 %v5049_v31, %v1429_v1  ;;  %v1191_v4 = vpop.f32.mrb[6].mxu0  ;;  %v1431_v5 = vpop.f32.mrb[6].mxu1 }
 0x130   : > { %v2579_v6 = vmax.f32 %v2387_v62, 0.0  ;;  %v2723_v7 = vmax.f32 %v2531_v63, 0.0  ;;  %v2390_v8 = vadd.f32 %v5046_v30, %v1191_v4  ;;  %v2534_v9 = vadd.f32 %v5046_v30, %v1431_v5  ;;  %v1193_v10 = vpop.f32.mrb[7].mxu0  ;;  %v1433_v11 = vpop.f32.mrb[7].mxu1 }
 0x131   : > { %v2580_v12 = vmax.f32 %v2388_v2, 0.0  ;;  %v2724_v13 = vmax.f32 %v2532_v3, 0.0  ;;  %v2391_v14 = vadd.f32 %v5049_v31, %v1193_v10  ;;  %v2535_v15 = vadd.f32 %v5049_v31, %v1433_v11 }
 0x132   : > { %v2582_v16 = vmax.f32 %v2390_v8, 0.0  ;;  %v2726_v17 = vmax.f32 %v2534_v9, 0.0 }
 0x133   : > { %v4294_v18 = vpack.c.bf16 %v2580_v12, %v2579_v6  ;;  %v4390_v19 = vpack.c.bf16 %v2724_v13, %v2723_v7  ;;  %v2583_v20 = vmax.f32 %v2391_v14, 0.0  ;;  %v2727_v21 = vmax.f32 %v2535_v15, 0.0 }
 0x135   : > { %3409 = vst [vmem:[%s5061_s12 + $0x18] sm:$0xff] %v4294_v18  ;;  %3505 = vst [vmem:[%s5061_s12 + $0x258] sm:$0xff] %v4390_v19  ;;  %v4296_v22 = vpack.c.bf16 %v2583_v20, %v2582_v16  ;;  %v4392_v23 = vpack.c.bf16 %v2727_v21, %v2726_v17  ;;  %v1197_v24 = vpop.f32.mrb[8].mxu0  ;;  %v1437_v25 = vpop.f32.mrb[8].mxu1 }
 0x136   : > { %v2393_v27 = vadd.f32 %v5046_v30, %v1197_v24  ;;  %v2537_v29 = vadd.f32 %v5046_v30, %v1437_v25  ;;  %v1199_v32 = vpop.f32.mrb[9].mxu0  ;;  %v1439_v33 = vpop.f32.mrb[9].mxu1 }
 0x137   : > { %3411 = vst [vmem:[%s5061_s12 + $0x24] sm:$0xff] %v4296_v22  ;;  %3507 = vst [vmem:[%s5061_s12 + $0x264] sm:$0xff] %v4392_v23  ;;  %v2394_v34 = vadd.f32 %v5049_v31, %v1199_v32  ;;  %v2538_v35 = vadd.f32 %v5049_v31, %v1439_v33  ;;  %v1201_v36 = vpop.f32.mrb[10].mxu0  ;;  %v1441_v37 = vpop.f32.mrb[10].mxu1 }
 0x138   : > { %v2585_v38 = vmax.f32 %v2393_v27, 0.0  ;;  %v2729_v39 = vmax.f32 %v2537_v29, 0.0  ;;  %v2396_v40 = vadd.f32 %v5046_v30, %v1201_v36  ;;  %v2540_v41 = vadd.f32 %v5046_v30, %v1441_v37  ;;  %v1203_v42 = vpop.f32.mrb[11].mxu0  ;;  %v1443_v43 = vpop.f32.mrb[11].mxu1 }
 0x139   : > { %v2586_v44 = vmax.f32 %v2394_v34, 0.0  ;;  %v2730_v45 = vmax.f32 %v2538_v35, 0.0  ;;  %v2397_v46 = vadd.f32 %v5049_v31, %v1203_v42  ;;  %v2541_v47 = vadd.f32 %v5049_v31, %v1443_v43 }
 0x13a   : > { %v2588_v48 = vmax.f32 %v2396_v40, 0.0  ;;  %v2732_v49 = vmax.f32 %v2540_v41, 0.0 }
 0x13b   : > { %v4298_v50 = vpack.c.bf16 %v2586_v44, %v2585_v38  ;;  %v4394_v51 = vpack.c.bf16 %v2730_v45, %v2729_v39  ;;  %v2589_v52 = vmax.f32 %v2397_v46, 0.0  ;;  %v2733_v53 = vmax.f32 %v2541_v47, 0.0 }
 0x13d   : > { %3413 = vst [vmem:[%s5061_s12 + $0x30] sm:$0xff] %v4298_v50  ;;  %3509 = vst [vmem:[%s5061_s12 + $0x270] sm:$0xff] %v4394_v51  ;;  %v4300_v54 = vpack.c.bf16 %v2589_v52, %v2588_v48  ;;  %v4396_v55 = vpack.c.bf16 %v2733_v53, %v2732_v49  ;;  %v1207_v56 = vpop.f32.mrb[12].mxu0  ;;  %v1447_v57 = vpop.f32.mrb[12].mxu1 }
 0x13e   : > { %v2399_v58 = vadd.f32 %v5046_v30, %v1207_v56  ;;  %v2543_v59 = vadd.f32 %v5046_v30, %v1447_v57  ;;  %v1209_v60 = vpop.f32.mrb[13].mxu0  ;;  %v1449_v61 = vpop.f32.mrb[13].mxu1 }
 0x13f   : > { %3415 = vst [vmem:[%s5061_s12 + $0x3c] sm:$0xff] %v4300_v54  ;;  %3511 = vst [vmem:[%s5061_s12 + $0x27c] sm:$0xff] %v4396_v55  ;;  %v2400_v62 = vadd.f32 %v5049_v31, %v1209_v60  ;;  %v2544_v63 = vadd.f32 %v5049_v31, %v1449_v61  ;;  %v1211_v0 = vpop.f32.mrb[14].mxu0  ;;  %v1451_v1 = vpop.f32.mrb[14].mxu1 }
 0x140   : > { %v2591_v2 = vmax.f32 %v2399_v58, 0.0  ;;  %v2735_v3 = vmax.f32 %v2543_v59, 0.0  ;;  %v2402_v4 = vadd.f32 %v5046_v30, %v1211_v0  ;;  %v2546_v5 = vadd.f32 %v5046_v30, %v1451_v1  ;;  %v1213_v6 = vpop.f32.mrb[15].mxu0  ;;  %v1453_v7 = vpop.f32.mrb[15].mxu1 }
 0x141   : > { %v2592_v8 = vmax.f32 %v2400_v62, 0.0  ;;  %v2736_v9 = vmax.f32 %v2544_v63, 0.0  ;;  %v2403_v10 = vadd.f32 %v5049_v31, %v1213_v6  ;;  %v2547_v11 = vadd.f32 %v5049_v31, %v1453_v7 }
 0x142   : > { %v2594_v12 = vmax.f32 %v2402_v4, 0.0  ;;  %v2738_v13 = vmax.f32 %v2546_v5, 0.0 }
 0x143   : > { %v4302_v14 = vpack.c.bf16 %v2592_v8, %v2591_v2  ;;  %v4398_v15 = vpack.c.bf16 %v2736_v9, %v2735_v3  ;;  %v2595_v16 = vmax.f32 %v2403_v10, 0.0  ;;  %v2739_v17 = vmax.f32 %v2547_v11, 0.0 }
 0x145   : > { %3417 = vst [vmem:[%s5061_s12 + $0x48] sm:$0xff] %v4302_v14  ;;  %3513 = vst [vmem:[%s5061_s12 + $0x288] sm:$0xff] %v4398_v15  ;;  %v4304_v18 = vpack.c.bf16 %v2595_v16, %v2594_v12  ;;  %v4400_v19 = vpack.c.bf16 %v2739_v17, %v2738_v13  ;;  %v1217_v20 = vpop.f32.mrb[16].mxu0  ;;  %v1457_v21 = vpop.f32.mrb[16].mxu1 }
 0x146   : > { %v2405_v22 = vadd.f32 %v5046_v30, %v1217_v20  ;;  %v2549_v23 = vadd.f32 %v5046_v30, %v1457_v21  ;;  %v1219_v24 = vpop.f32.mrb[17].mxu0  ;;  %v1459_v25 = vpop.f32.mrb[17].mxu1 }
 0x147   : > { %3419 = vst [vmem:[%s5061_s12 + $0x54] sm:$0xff] %v4304_v18  ;;  %3515 = vst [vmem:[%s5061_s12 + $0x294] sm:$0xff] %v4400_v19  ;;  %v2406_v27 = vadd.f32 %v5049_v31, %v1219_v24  ;;  %v2550_v29 = vadd.f32 %v5049_v31, %v1459_v25  ;;  %v1221_v32 = vpop.f32.mrb[18].mxu0  ;;  %v1461_v33 = vpop.f32.mrb[18].mxu1 }
 0x148   : > { %v2597_v34 = vmax.f32 %v2405_v22, 0.0  ;;  %v2741_v35 = vmax.f32 %v2549_v23, 0.0  ;;  %v2408_v36 = vadd.f32 %v5046_v30, %v1221_v32  ;;  %v2552_v37 = vadd.f32 %v5046_v30, %v1461_v33  ;;  %v1223_v38 = vpop.f32.mrb[19].mxu0  ;;  %v1463_v39 = vpop.f32.mrb[19].mxu1 }
 0x149   : > { %v2598_v40 = vmax.f32 %v2406_v27, 0.0  ;;  %v2742_v41 = vmax.f32 %v2550_v29, 0.0  ;;  %v2409_v42 = vadd.f32 %v5049_v31, %v1223_v38  ;;  %v2553_v43 = vadd.f32 %v5049_v31, %v1463_v39 }
 0x14a   : > { %v2600_v44 = vmax.f32 %v2408_v36, 0.0  ;;  %v2744_v45 = vmax.f32 %v2552_v37, 0.0 }
 0x14b   : > { %v4306_v46 = vpack.c.bf16 %v2598_v40, %v2597_v34  ;;  %v4402_v47 = vpack.c.bf16 %v2742_v41, %v2741_v35  ;;  %v2601_v48 = vmax.f32 %v2409_v42, 0.0  ;;  %v2745_v49 = vmax.f32 %v2553_v43, 0.0 }
 0x14d   : > { %3421 = vst [vmem:[%s5061_s12 + $0x60] sm:$0xff] %v4306_v46  ;;  %3517 = vst [vmem:[%s5061_s12 + $0x2a0] sm:$0xff] %v4402_v47  ;;  %v4308_v50 = vpack.c.bf16 %v2601_v48, %v2600_v44  ;;  %v4404_v51 = vpack.c.bf16 %v2745_v49, %v2744_v45  ;;  %v1227_v52 = vpop.f32.mrb[20].mxu0  ;;  %v1467_v53 = vpop.f32.mrb[20].mxu1 }
 0x14e   : > { %v2411_v54 = vadd.f32 %v5046_v30, %v1227_v52  ;;  %v2555_v55 = vadd.f32 %v5046_v30, %v1467_v53  ;;  %v1229_v56 = vpop.f32.mrb[21].mxu0  ;;  %v1469_v57 = vpop.f32.mrb[21].mxu1 }
 0x14f   : > { %3423 = vst [vmem:[%s5061_s12 + $0x6c] sm:$0xff] %v4308_v50  ;;  %3519 = vst [vmem:[%s5061_s12 + $0x2ac] sm:$0xff] %v4404_v51  ;;  %v2412_v58 = vadd.f32 %v5049_v31, %v1229_v56  ;;  %v2556_v59 = vadd.f32 %v5049_v31, %v1469_v57  ;;  %v1231_v60 = vpop.f32.mrb[22].mxu0  ;;  %v1471_v61 = vpop.f32.mrb[22].mxu1 }
 0x150   : > { %v2603_v62 = vmax.f32 %v2411_v54, 0.0  ;;  %v2747_v63 = vmax.f32 %v2555_v55, 0.0  ;;  %v2414_v0 = vadd.f32 %v5046_v30, %v1231_v60  ;;  %v2558_v1 = vadd.f32 %v5046_v30, %v1471_v61  ;;  %v1233_v2 = vpop.f32.mrb[23].mxu0  ;;  %v1473_v3 = vpop.f32.mrb[23].mxu1 }
 0x151   : > { %v2604_v4 = vmax.f32 %v2412_v58, 0.0  ;;  %v2748_v5 = vmax.f32 %v2556_v59, 0.0  ;;  %v2415_v6 = vadd.f32 %v5049_v31, %v1233_v2  ;;  %v2559_v7 = vadd.f32 %v5049_v31, %v1473_v3 }
 0x152   : > { %v2606_v8 = vmax.f32 %v2414_v0, 0.0  ;;  %v2750_v9 = vmax.f32 %v2558_v1, 0.0  ;;  %v2376_v54 = vsub.s32 2, %v5036_v26 }
 0x153   : > { %v4310_v10 = vpack.c.bf16 %v2604_v4, %v2603_v62  ;;  %v4406_v11 = vpack.c.bf16 %v2748_v5, %v2747_v63  ;;  %v2607_v12 = vmax.f32 %v2415_v6, 0.0  ;;  %v2751_v13 = vmax.f32 %v2559_v7, 0.0 }
 0x154   : > { %v5149_v6 = vrot.slane %v5042_v28, %v2376_v54 }
 0x155   : > { %3425 = vst [vmem:[%s5061_s12 + $0x78] sm:$0xff] %v4310_v10  ;;  %3521 = vst [vmem:[%s5061_s12 + $0x2b8] sm:$0xff] %v4406_v11  ;;  %v4312_v14 = vpack.c.bf16 %v2607_v12, %v2606_v8  ;;  %v4408_v15 = vpack.c.bf16 %v2751_v13, %v2750_v9  ;;  %v1237_v16 = vpop.f32.mrb[24].mxu0  ;;  %v1477_v17 = vpop.f32.mrb[24].mxu1 }
 0x156   : > { %v2417_v18 = vadd.f32 %v5046_v30, %v1237_v16  ;;  %v2561_v19 = vadd.f32 %v5046_v30, %v1477_v17  ;;  %v1239_v20 = vpop.f32.mrb[25].mxu0  ;;  %v1479_v21 = vpop.f32.mrb[25].mxu1 }
 0x157   : > { %3427 = vst [vmem:[%s5061_s12 + $0x84] sm:$0xff] %v4312_v14  ;;  %3523 = vst [vmem:[%s5061_s12 + $0x2c4] sm:$0xff] %v4408_v15  ;;  %v2418_v22 = vadd.f32 %v5049_v31, %v1239_v20  ;;  %v2562_v23 = vadd.f32 %v5049_v31, %v1479_v21  ;;  %v1241_v24 = vpop.f32.mrb[26].mxu0  ;;  %v1481_v25 = vpop.f32.mrb[26].mxu1 }
 0x158   : > { %v2609_v27 = vmax.f32 %v2417_v18, 0.0  ;;  %v2753_v29 = vmax.f32 %v2561_v19, 0.0  ;;  %v2420_v32 = vadd.f32 %v5046_v30, %v1241_v24  ;;  %v2564_v33 = vadd.f32 %v5046_v30, %v1481_v25  ;;  %v1243_v34 = vpop.f32.mrb[27].mxu0  ;;  %v1483_v35 = vpop.f32.mrb[27].mxu1 }
 0x159   : > { %v2610_v36 = vmax.f32 %v2418_v22, 0.0  ;;  %v2754_v37 = vmax.f32 %v2562_v23, 0.0  ;;  %v2421_v38 = vadd.f32 %v5049_v31, %v1243_v34  ;;  %v2565_v39 = vadd.f32 %v5049_v31, %v1483_v35 }
 0x15a   : > { %v2612_v40 = vmax.f32 %v2420_v32, 0.0  ;;  %v2756_v41 = vmax.f32 %v2564_v33, 0.0 }
 0x15b   : > { %v4314_v42 = vpack.c.bf16 %v2610_v36, %v2609_v27  ;;  %v4410_v43 = vpack.c.bf16 %v2754_v37, %v2753_v29  ;;  %v2613_v44 = vmax.f32 %v2421_v38, 0.0  ;;  %v2757_v45 = vmax.f32 %v2565_v39, 0.0 }
 0x15d   : > { %3429 = vst [vmem:[%s5061_s12 + $0x90] sm:$0xff] %v4314_v42  ;;  %3525 = vst [vmem:[%s5061_s12 + $0x2d0] sm:$0xff] %v4410_v43  ;;  %v4316_v46 = vpack.c.bf16 %v2613_v44, %v2612_v40  ;;  %v4412_v47 = vpack.c.bf16 %v2757_v45, %v2756_v41  ;;  %v1247_v48 = vpop.f32.mrb[28].mxu0  ;;  %v1487_v49 = vpop.f32.mrb[28].mxu1 }
 0x15e   : > { %v2423_v50 = vadd.f32 %v5046_v30, %v1247_v48  ;;  %v2567_v51 = vadd.f32 %v5046_v30, %v1487_v49  ;;  %v1249_v52 = vpop.f32.mrb[29].mxu0  ;;  %v1489_v53 = vpop.f32.mrb[29].mxu1 }
 0x15f   : > { %3431 = vst [vmem:[%s5061_s12 + $0x9c] sm:$0xff] %v4316_v46  ;;  %3527 = vst [vmem:[%s5061_s12 + $0x2dc] sm:$0xff] %v4412_v47  ;;  %v2424_v55 = vadd.f32 %v5049_v31, %v1249_v52  ;;  %v2568_v56 = vadd.f32 %v5049_v31, %v1489_v53  ;;  %v1251_v57 = vpop.f32.mrb[30].mxu0  ;;  %v1491_v58 = vpop.f32.mrb[30].mxu1 }
 0x160   : > { %v2615_v59 = vmax.f32 %v2423_v50, 0.0  ;;  %v2759_v60 = vmax.f32 %v2567_v51, 0.0  ;;  %v2426_v61 = vadd.f32 %v5046_v30, %v1251_v57  ;;  %v2570_v62 = vadd.f32 %v5046_v30, %v1491_v58  ;;  %v1253_v63 = vpop.f32.mrb[31].mxu0  ;;  %v1493_v0 = vpop.f32.mrb[31].mxu1 }
 0x161   : > { %v2616_v1 = vmax.f32 %v2424_v55, 0.0  ;;  %v2760_v26 = vmax.f32 %v2568_v56, 0.0  ;;  %v2427_v2 = vadd.f32 %v5049_v31, %v1253_v63  ;;  %v2571_v3 = vadd.f32 %v5049_v31, %v1493_v0 }
 0x162   : > { %v2618_v4 = vmax.f32 %v2426_v61, 0.0  ;;  %v2762_v5 = vmax.f32 %v2570_v62, 0.0 }
 0x163   : > { %v4318_v7 = vpack.c.bf16 %v2616_v1, %v2615_v59  ;;  %v4414_v8 = vpack.c.bf16 %v2760_v26, %v2759_v60  ;;  %v2619_v9 = vmax.f32 %v2427_v2, 0.0  ;;  %v2763_v10 = vmax.f32 %v2571_v3, 0.0 }
 0x165   : > { %3433 = vst [vmem:[%s5061_s12 + $0xa8] sm:$0xff] %v4318_v7  ;;  %3529 = vst [vmem:[%s5061_s12 + $0x2e8] sm:$0xff] %v4414_v8  ;;  %v4320_v11 = vpack.c.bf16 %v2619_v9, %v2618_v4  ;;  %v4416_v12 = vpack.c.bf16 %v2763_v10, %v2762_v5  ;;  %v1257_v13 = vpop.f32.mrb[32].mxu0  ;;  %v4477_v14 = vpop.f32.mrb[32].mxu1 }
 0x166   : > { %v2429_v15 = vadd.f32 %v5046_v30, %v1257_v13  ;;  %v2389_v16 = vadd.f32 %v4477_v14, %v5149_v6  ;;  %v1259_v17 = vpop.f32.mrb[33].mxu0  ;;  %v1530_v18 = vpop.f32.mrb[33].mxu1 }
 0x167   : > { %3435 = vst [vmem:[%s5061_s12 + $0xb4] sm:$0xff] %v4320_v11  ;;  %3531 = vst [vmem:[%s5061_s12 + $0x2f4] sm:$0xff] %v4416_v12  ;;  %v2430_v28 = vadd.f32 %v5049_v31, %v1259_v17  ;;  %v2383_v19 = vadd.f32 %v5149_v6, %v1530_v18  ;;  %v1261_v20 = vpop.f32.mrb[34].mxu0  ;;  %v4478_v21 = vpop.f32.mrb[34].mxu1 }
 0x168   : > { %v2621_v22 = vmax.f32 %v2429_v15, 0.0  ;;  %v2581_v23 = vmax.f32 %v2389_v16, 0.0  ;;  %v2432_v24 = vadd.f32 %v5046_v30, %v1261_v20  ;;  %v2392_v25 = vadd.f32 %v4478_v21, %v5149_v6  ;;  %v1263_v27 = vpop.f32.mrb[35].mxu0  ;;  %v1533_v29 = vpop.f32.mrb[35].mxu1 }
 0x169   : > { %v2622_v32 = vmax.f32 %v2430_v28, 0.0  ;;  %v2575_v33 = vmax.f32 %v2383_v19, 0.0  ;;  %v2433_v34 = vadd.f32 %v5049_v31, %v1263_v27  ;;  %v2386_v35 = vadd.f32 %v5149_v6, %v1533_v29 }
 0x16a   : > { %v4295_v36 = vpack.c.bf16 %v2581_v23, %v2581_v23  ;;  %v2624_v37 = vmax.f32 %v2432_v24, 0.0  ;;  %v2584_v38 = vmax.f32 %v2392_v25, 0.0 }
 0x16b   : > { %v4322_v39 = vpack.c.bf16 %v2622_v32, %v2621_v22  ;;  %v4291_v40 = vpack.c.bf16 %v2575_v33, %v2575_v33  ;;  %v2625_v41 = vmax.f32 %v2433_v34, 0.0  ;;  %v2578_v42 = vmax.f32 %v2386_v35, 0.0 }
 0x16c   : > { %3410 = vst [vmem:[%s5061_s12 + $0x20] sm:$0xf] %v4295_v36  ;;  %v4297_v43 = vpack.c.bf16 %v2584_v38, %v2584_v38 }
 0x16d   : > { %3437 = vst [vmem:[%s5061_s12 + $0xc0] sm:$0xff] %v4322_v39  ;;  %3406 = vst [vmem:[%s5061_s12 + $0x8] sm:$0xf] %v4291_v40  ;;  %v4324_v44 = vpack.c.bf16 %v2625_v41, %v2624_v37  ;;  %v4293_v45 = vpack.c.bf16 %v2578_v42, %v2578_v42  ;;  %v1267_v46 = vpop.f32.mrb[36].mxu0  ;;  %v4481_v47 = vpop.f32.mrb[36].mxu1 }
 0x16e   : > { %3412 = vst [vmem:[%s5061_s12 + $0x2c] sm:$0xf] %v4297_v43  ;;  %v2435_v48 = vadd.f32 %v5046_v30, %v1267_v46  ;;  %v2401_v49 = vadd.f32 %v4481_v47, %v5149_v6  ;;  %v1269_v50 = vpop.f32.mrb[37].mxu0  ;;  %v1546_v51 = vpop.f32.mrb[37].mxu1 }
 0x16f   : > { %3439 = vst [vmem:[%s5061_s12 + $0xcc] sm:$0xff] %v4324_v44  ;;  %3408 = vst [vmem:[%s5061_s12 + $0x14] sm:$0xf] %v4293_v45  ;;  %v2436_v52 = vadd.f32 %v5049_v31, %v1269_v50  ;;  %v2395_v53 = vadd.f32 %v5149_v6, %v1546_v51  ;;  %v1271_v54 = vpop.f32.mrb[38].mxu0  ;;  %v4482_v55 = vpop.f32.mrb[38].mxu1 }
 0x170   : > { %v2627_v56 = vmax.f32 %v2435_v48, 0.0  ;;  %v2593_v57 = vmax.f32 %v2401_v49, 0.0  ;;  %v2438_v58 = vadd.f32 %v5046_v30, %v1271_v54  ;;  %v2404_v59 = vadd.f32 %v4482_v55, %v5149_v6  ;;  %v1273_v60 = vpop.f32.mrb[39].mxu0  ;;  %v1549_v61 = vpop.f32.mrb[39].mxu1 }
 0x171   : > { %v2628_v62 = vmax.f32 %v2436_v52, 0.0  ;;  %v2587_v63 = vmax.f32 %v2395_v53, 0.0  ;;  %v2439_v0 = vadd.f32 %v5049_v31, %v1273_v60  ;;  %v2398_v1 = vadd.f32 %v5149_v6, %v1549_v61 }
 0x172   : > { %v4303_v26 = vpack.c.bf16 %v2593_v57, %v2593_v57  ;;  %v2630_v2 = vmax.f32 %v2438_v58, 0.0  ;;  %v2596_v3 = vmax.f32 %v2404_v59, 0.0 }
 0x173   : > { %v4326_v4 = vpack.c.bf16 %v2628_v62, %v2627_v56  ;;  %v4299_v5 = vpack.c.bf16 %v2587_v63, %v2587_v63  ;;  %v2631_v7 = vmax.f32 %v2439_v0, 0.0  ;;  %v2590_v8 = vmax.f32 %v2398_v1, 0.0 }
 0x174   : > { %3418 = vst [vmem:[%s5061_s12 + $0x50] sm:$0xf] %v4303_v26  ;;  %v4305_v9 = vpack.c.bf16 %v2596_v3, %v2596_v3 }
 0x175   : > { %3441 = vst [vmem:[%s5061_s12 + $0xd8] sm:$0xff] %v4326_v4  ;;  %3414 = vst [vmem:[%s5061_s12 + $0x38] sm:$0xf] %v4299_v5  ;;  %v4328_v10 = vpack.c.bf16 %v2631_v7, %v2630_v2  ;;  %v4301_v11 = vpack.c.bf16 %v2590_v8, %v2590_v8  ;;  %v1277_v12 = vpop.f32.mrb[40].mxu0  ;;  %v4485_v13 = vpop.f32.mrb[40].mxu1 }
 0x176   : > { %3420 = vst [vmem:[%s5061_s12 + $0x5c] sm:$0xf] %v4305_v9  ;;  %v2441_v14 = vadd.f32 %v5046_v30, %v1277_v12  ;;  %v2413_v15 = vadd.f32 %v4485_v13, %v5149_v6  ;;  %v1279_v16 = vpop.f32.mrb[41].mxu0  ;;  %v1562_v17 = vpop.f32.mrb[41].mxu1 }
 0x177   : > { %3443 = vst [vmem:[%s5061_s12 + $0xe4] sm:$0xff] %v4328_v10  ;;  %3416 = vst [vmem:[%s5061_s12 + $0x44] sm:$0xf] %v4301_v11  ;;  %v2442_v18 = vadd.f32 %v5049_v31, %v1279_v16  ;;  %v2407_v28 = vadd.f32 %v5149_v6, %v1562_v17  ;;  %v1281_v19 = vpop.f32.mrb[42].mxu0  ;;  %v4486_v20 = vpop.f32.mrb[42].mxu1 }
 0x178   : > { %v2633_v21 = vmax.f32 %v2441_v14, 0.0  ;;  %v2605_v22 = vmax.f32 %v2413_v15, 0.0  ;;  %v2444_v23 = vadd.f32 %v5046_v30, %v1281_v19  ;;  %v2416_v24 = vadd.f32 %v4486_v20, %v5149_v6  ;;  %v1283_v25 = vpop.f32.mrb[43].mxu0  ;;  %v1565_v27 = vpop.f32.mrb[43].mxu1 }
 0x179   : > { %v2634_v29 = vmax.f32 %v2442_v18, 0.0  ;;  %v2599_v32 = vmax.f32 %v2407_v28, 0.0  ;;  %v2445_v33 = vadd.f32 %v5049_v31, %v1283_v25  ;;  %v2410_v34 = vadd.f32 %v5149_v6, %v1565_v27 }
 0x17a   : > { %v4311_v35 = vpack.c.bf16 %v2605_v22, %v2605_v22  ;;  %v2636_v36 = vmax.f32 %v2444_v23, 0.0  ;;  %v2608_v37 = vmax.f32 %v2416_v24, 0.0 }
 0x17b   : > { %v4330_v38 = vpack.c.bf16 %v2634_v29, %v2633_v21  ;;  %v4307_v39 = vpack.c.bf16 %v2599_v32, %v2599_v32  ;;  %v2637_v40 = vmax.f32 %v2445_v33, 0.0  ;;  %v2602_v41 = vmax.f32 %v2410_v34, 0.0 }
 0x17c   : > { %3426 = vst [vmem:[%s5061_s12 + $0x80] sm:$0xf] %v4311_v35  ;;  %v4313_v42 = vpack.c.bf16 %v2608_v37, %v2608_v37 }
 0x17d   : > { %3445 = vst [vmem:[%s5061_s12 + $0xf0] sm:$0xff] %v4330_v38  ;;  %3422 = vst [vmem:[%s5061_s12 + $0x68] sm:$0xf] %v4307_v39  ;;  %v4332_v43 = vpack.c.bf16 %v2637_v40, %v2636_v36  ;;  %v4309_v44 = vpack.c.bf16 %v2602_v41, %v2602_v41  ;;  %v1287_v45 = vpop.f32.mrb[44].mxu0  ;;  %v4489_v46 = vpop.f32.mrb[44].mxu1 }
 0x17e   : > { %3428 = vst [vmem:[%s5061_s12 + $0x8c] sm:$0xf] %v4313_v42  ;;  %v2447_v47 = vadd.f32 %v5046_v30, %v1287_v45  ;;  %v2425_v48 = vadd.f32 %v4489_v46, %v5149_v6  ;;  %v1289_v49 = vpop.f32.mrb[45].mxu0  ;;  %v1578_v50 = vpop.f32.mrb[45].mxu1 }
 0x17f   : > { %3447 = vst [vmem:[%s5061_s12 + $0xfc] sm:$0xff] %v4332_v43  ;;  %3424 = vst [vmem:[%s5061_s12 + $0x74] sm:$0xf] %v4309_v44  ;;  %v2448_v51 = vadd.f32 %v5049_v31, %v1289_v49  ;;  %v2419_v52 = vadd.f32 %v5149_v6, %v1578_v50  ;;  %v1291_v53 = vpop.f32.mrb[46].mxu0  ;;  %v4490_v54 = vpop.f32.mrb[46].mxu1 }
 0x180   : > { %v2639_v55 = vmax.f32 %v2447_v47, 0.0  ;;  %v2617_v56 = vmax.f32 %v2425_v48, 0.0  ;;  %v2450_v57 = vadd.f32 %v5046_v30, %v1291_v53  ;;  %v2428_v58 = vadd.f32 %v4490_v54, %v5149_v6  ;;  %v1293_v59 = vpop.f32.mrb[47].mxu0  ;;  %v1581_v60 = vpop.f32.mrb[47].mxu1 }
 0x181   : > { %v2640_v61 = vmax.f32 %v2448_v51, 0.0  ;;  %v2611_v62 = vmax.f32 %v2419_v52, 0.0  ;;  %v2451_v63 = vadd.f32 %v5049_v31, %v1293_v59  ;;  %v2422_v0 = vadd.f32 %v5149_v6, %v1581_v60 }
 0x182   : > { %v4319_v1 = vpack.c.bf16 %v2617_v56, %v2617_v56  ;;  %v2642_v26 = vmax.f32 %v2450_v57, 0.0  ;;  %v2620_v2 = vmax.f32 %v2428_v58, 0.0 }
 0x183   : > { %v4334_v3 = vpack.c.bf16 %v2640_v61, %v2639_v55  ;;  %v4315_v4 = vpack.c.bf16 %v2611_v62, %v2611_v62  ;;  %v2643_v5 = vmax.f32 %v2451_v63, 0.0  ;;  %v2614_v7 = vmax.f32 %v2422_v0, 0.0 }
 0x184   : > { %3434 = vst [vmem:[%s5061_s12 + $0xb0] sm:$0xf] %v4319_v1  ;;  %v4321_v8 = vpack.c.bf16 %v2620_v2, %v2620_v2 }
 0x185   : > { %3449 = vst [vmem:[%s5061_s12 + $0x108] sm:$0xff] %v4334_v3  ;;  %3430 = vst [vmem:[%s5061_s12 + $0x98] sm:$0xf] %v4315_v4  ;;  %v4336_v9 = vpack.c.bf16 %v2643_v5, %v2642_v26  ;;  %v4317_v10 = vpack.c.bf16 %v2614_v7, %v2614_v7  ;;  %v1297_v11 = vpop.f32.mrb[48].mxu0  ;;  %v4493_v12 = vpop.f32.mrb[48].mxu1 }
 0x186   : > { %3436 = vst [vmem:[%s5061_s12 + $0xbc] sm:$0xf] %v4321_v8  ;;  %v2453_v13 = vadd.f32 %v5046_v30, %v1297_v11  ;;  %v2437_v14 = vadd.f32 %v4493_v12, %v5149_v6  ;;  %v1299_v15 = vpop.f32.mrb[49].mxu0  ;;  %v1594_v16 = vpop.f32.mrb[49].mxu1 }
 0x187   : > { %3451 = vst [vmem:[%s5061_s12 + $0x114] sm:$0xff] %v4336_v9  ;;  %3432 = vst [vmem:[%s5061_s12 + $0xa4] sm:$0xf] %v4317_v10  ;;  %v2454_v17 = vadd.f32 %v5049_v31, %v1299_v15  ;;  %v2431_v18 = vadd.f32 %v5149_v6, %v1594_v16  ;;  %v1301_v28 = vpop.f32.mrb[50].mxu0  ;;  %v4494_v19 = vpop.f32.mrb[50].mxu1 }
 0x188   : > { %v2645_v20 = vmax.f32 %v2453_v13, 0.0  ;;  %v2629_v21 = vmax.f32 %v2437_v14, 0.0  ;;  %v2456_v22 = vadd.f32 %v5046_v30, %v1301_v28  ;;  %v2440_v23 = vadd.f32 %v4494_v19, %v5149_v6  ;;  %v1303_v24 = vpop.f32.mrb[51].mxu0  ;;  %v1597_v25 = vpop.f32.mrb[51].mxu1 }
 0x189   : > { %v2646_v27 = vmax.f32 %v2454_v17, 0.0  ;;  %v2623_v29 = vmax.f32 %v2431_v18, 0.0  ;;  %v2457_v32 = vadd.f32 %v5049_v31, %v1303_v24  ;;  %v2434_v33 = vadd.f32 %v5149_v6, %v1597_v25 }
 0x18a   : > { %v4327_v34 = vpack.c.bf16 %v2629_v21, %v2629_v21  ;;  %v2648_v35 = vmax.f32 %v2456_v22, 0.0  ;;  %v2632_v36 = vmax.f32 %v2440_v23, 0.0 }
 0x18b   : > { %v4338_v37 = vpack.c.bf16 %v2646_v27, %v2645_v20  ;;  %v4323_v38 = vpack.c.bf16 %v2623_v29, %v2623_v29  ;;  %v2649_v39 = vmax.f32 %v2457_v32, 0.0  ;;  %v2626_v40 = vmax.f32 %v2434_v33, 0.0 }
 0x18c   : > { %3442 = vst [vmem:[%s5061_s12 + $0xe0] sm:$0xf] %v4327_v34  ;;  %v4329_v41 = vpack.c.bf16 %v2632_v36, %v2632_v36 }
 0x18d   : > { %3453 = vst [vmem:[%s5061_s12 + $0x120] sm:$0xff] %v4338_v37  ;;  %3438 = vst [vmem:[%s5061_s12 + $0xc8] sm:$0xf] %v4323_v38  ;;  %v4340_v42 = vpack.c.bf16 %v2649_v39, %v2648_v35  ;;  %v4325_v43 = vpack.c.bf16 %v2626_v40, %v2626_v40  ;;  %v1307_v44 = vpop.f32.mrb[52].mxu0  ;;  %v4497_v45 = vpop.f32.mrb[52].mxu1 }
 0x18e   : > { %3444 = vst [vmem:[%s5061_s12 + $0xec] sm:$0xf] %v4329_v41  ;;  %v2459_v46 = vadd.f32 %v5046_v30, %v1307_v44  ;;  %v2449_v47 = vadd.f32 %v4497_v45, %v5149_v6  ;;  %v1309_v48 = vpop.f32.mrb[53].mxu0  ;;  %v1610_v49 = vpop.f32.mrb[53].mxu1 }
 0x18f   : > { %3455 = vst [vmem:[%s5061_s12 + $0x12c] sm:$0xff] %v4340_v42  ;;  %3440 = vst [vmem:[%s5061_s12 + $0xd4] sm:$0xf] %v4325_v43  ;;  %v2460_v50 = vadd.f32 %v5049_v31, %v1309_v48  ;;  %v2443_v51 = vadd.f32 %v5149_v6, %v1610_v49  ;;  %v1311_v52 = vpop.f32.mrb[54].mxu0  ;;  %v4498_v53 = vpop.f32.mrb[54].mxu1 }
 0x190   : > { %v2651_v54 = vmax.f32 %v2459_v46, 0.0  ;;  %v2641_v55 = vmax.f32 %v2449_v47, 0.0  ;;  %v2462_v56 = vadd.f32 %v5046_v30, %v1311_v52  ;;  %v2452_v57 = vadd.f32 %v4498_v53, %v5149_v6  ;;  %v1313_v58 = vpop.f32.mrb[55].mxu0  ;;  %v1613_v59 = vpop.f32.mrb[55].mxu1 }
 0x191   : > { %v2652_v60 = vmax.f32 %v2460_v50, 0.0  ;;  %v2635_v61 = vmax.f32 %v2443_v51, 0.0  ;;  %v2463_v62 = vadd.f32 %v5049_v31, %v1313_v58  ;;  %v2446_v63 = vadd.f32 %v5149_v6, %v1613_v59 }
 0x192   : > { %v4335_v0 = vpack.c.bf16 %v2641_v55, %v2641_v55  ;;  %v2654_v1 = vmax.f32 %v2462_v56, 0.0  ;;  %v2644_v26 = vmax.f32 %v2452_v57, 0.0 }
 0x193   : > { %v4342_v2 = vpack.c.bf16 %v2652_v60, %v2651_v54  ;;  %v4331_v3 = vpack.c.bf16 %v2635_v61, %v2635_v61  ;;  %v2655_v4 = vmax.f32 %v2463_v62, 0.0  ;;  %v2638_v5 = vmax.f32 %v2446_v63, 0.0 }
 0x194   : > { %3450 = vst [vmem:[%s5061_s12 + $0x110] sm:$0xf] %v4335_v0  ;;  %v4337_v7 = vpack.c.bf16 %v2644_v26, %v2644_v26 }
 0x195   : > { %3457 = vst [vmem:[%s5061_s12 + $0x138] sm:$0xff] %v4342_v2  ;;  %3446 = vst [vmem:[%s5061_s12 + $0xf8] sm:$0xf] %v4331_v3  ;;  %v4344_v8 = vpack.c.bf16 %v2655_v4, %v2654_v1  ;;  %v4333_v9 = vpack.c.bf16 %v2638_v5, %v2638_v5  ;;  %v1317_v10 = vpop.f32.mrb[56].mxu0  ;;  %v4501_v11 = vpop.f32.mrb[56].mxu1 }
 0x196   : > { %3452 = vst [vmem:[%s5061_s12 + $0x11c] sm:$0xf] %v4337_v7  ;;  %v2465_v12 = vadd.f32 %v5046_v30, %v1317_v10  ;;  %v2461_v13 = vadd.f32 %v4501_v11, %v5149_v6  ;;  %v1319_v14 = vpop.f32.mrb[57].mxu0  ;;  %v1626_v15 = vpop.f32.mrb[57].mxu1 }
 0x197   : > { %3459 = vst [vmem:[%s5061_s12 + $0x144] sm:$0xff] %v4344_v8  ;;  %3448 = vst [vmem:[%s5061_s12 + $0x104] sm:$0xf] %v4333_v9  ;;  %v2466_v16 = vadd.f32 %v5049_v31, %v1319_v14  ;;  %v2455_v17 = vadd.f32 %v5149_v6, %v1626_v15  ;;  %v1321_v18 = vpop.f32.mrb[58].mxu0  ;;  %v4502_v28 = vpop.f32.mrb[58].mxu1 }
 0x198   : > { %v2657_v19 = vmax.f32 %v2465_v12, 0.0  ;;  %v2653_v20 = vmax.f32 %v2461_v13, 0.0  ;;  %v2468_v21 = vadd.f32 %v5046_v30, %v1321_v18  ;;  %v2464_v22 = vadd.f32 %v4502_v28, %v5149_v6  ;;  %v1323_v23 = vpop.f32.mrb[59].mxu0  ;;  %v1629_v24 = vpop.f32.mrb[59].mxu1 }
 0x199   : > { %v2658_v25 = vmax.f32 %v2466_v16, 0.0  ;;  %v2647_v27 = vmax.f32 %v2455_v17, 0.0  ;;  %v2469_v29 = vadd.f32 %v5049_v31, %v1323_v23  ;;  %v2458_v32 = vadd.f32 %v5149_v6, %v1629_v24 }
 0x19a   : > { %v4343_v33 = vpack.c.bf16 %v2653_v20, %v2653_v20  ;;  %v2660_v34 = vmax.f32 %v2468_v21, 0.0  ;;  %v2656_v35 = vmax.f32 %v2464_v22, 0.0 }
 0x19b   : > { %v4346_v36 = vpack.c.bf16 %v2658_v25, %v2657_v19  ;;  %v4339_v37 = vpack.c.bf16 %v2647_v27, %v2647_v27  ;;  %v2661_v38 = vmax.f32 %v2469_v29, 0.0  ;;  %v2650_v39 = vmax.f32 %v2458_v32, 0.0 }
 0x19c   : > { %3458 = vst [vmem:[%s5061_s12 + $0x140] sm:$0xf] %v4343_v33  ;;  %v4345_v40 = vpack.c.bf16 %v2656_v35, %v2656_v35 }
 0x19d   : > { %3461 = vst [vmem:[%s5061_s12 + $0x150] sm:$0xff] %v4346_v36  ;;  %3454 = vst [vmem:[%s5061_s12 + $0x128] sm:$0xf] %v4339_v37  ;;  %v4348_v41 = vpack.c.bf16 %v2661_v38, %v2660_v34  ;;  %v4341_v42 = vpack.c.bf16 %v2650_v39, %v2650_v39  ;;  %v1327_v43 = vpop.f32.mrb[60].mxu0  ;;  %v4505_v44 = vpop.f32.mrb[60].mxu1 }
 0x19e   : > { %3460 = vst [vmem:[%s5061_s12 + $0x14c] sm:$0xf] %v4345_v40  ;;  %v2471_v45 = vadd.f32 %v5046_v30, %v1327_v43  ;;  %v2473_v46 = vadd.f32 %v4505_v44, %v5149_v6  ;;  %v1329_v47 = vpop.f32.mrb[61].mxu0  ;;  %v1642_v48 = vpop.f32.mrb[61].mxu1 }
 0x19f   : > { %3463 = vst [vmem:[%s5061_s12 + $0x15c] sm:$0xff] %v4348_v41  ;;  %3456 = vst [vmem:[%s5061_s12 + $0x134] sm:$0xf] %v4341_v42  ;;  %v2472_v49 = vadd.f32 %v5049_v31, %v1329_v47  ;;  %v2467_v50 = vadd.f32 %v5149_v6, %v1642_v48  ;;  %v1331_v51 = vpop.f32.mrb[62].mxu0  ;;  %v4506_v52 = vpop.f32.mrb[62].mxu1 }
 0x1a0   : > { %v2663_v53 = vmax.f32 %v2471_v45, 0.0  ;;  %v2665_v54 = vmax.f32 %v2473_v46, 0.0  ;;  %v2474_v55 = vadd.f32 %v5046_v30, %v1331_v51  ;;  %v2476_v56 = vadd.f32 %v4506_v52, %v5149_v6  ;;  %v1333_v57 = vpop.f32.mrb[63].mxu0  ;;  %v1645_v58 = vpop.f32.mrb[63].mxu1 }
 0x1a1   : > { %v2664_v59 = vmax.f32 %v2472_v49, 0.0  ;;  %v2659_v60 = vmax.f32 %v2467_v50, 0.0  ;;  %v2475_v61 = vadd.f32 %v5049_v31, %v1333_v57  ;;  %v2470_v62 = vadd.f32 %v5149_v6, %v1645_v58 }
 0x1a2   : > { %v4351_v63 = vpack.c.bf16 %v2665_v54, %v2665_v54  ;;  %v2666_v0 = vmax.f32 %v2474_v55, 0.0  ;;  %v2668_v1 = vmax.f32 %v2476_v56, 0.0 }
 0x1a3   : > { %v4350_v26 = vpack.c.bf16 %v2664_v59, %v2663_v53  ;;  %v4347_v2 = vpack.c.bf16 %v2659_v60, %v2659_v60  ;;  %v2667_v3 = vmax.f32 %v2475_v61, 0.0  ;;  %v2662_v4 = vmax.f32 %v2470_v62, 0.0 }
 0x1a4   : > { %3466 = vst [vmem:[%s5061_s12 + $0x170] sm:$0xf] %v4351_v63  ;;  %v4353_v5 = vpack.c.bf16 %v2668_v1, %v2668_v1 }
 0x1a5   : > { %3465 = vst [vmem:[%s5061_s12 + $0x168] sm:$0xff] %v4350_v26  ;;  %3462 = vst [vmem:[%s5061_s12 + $0x158] sm:$0xf] %v4347_v2  ;;  %v4352_v7 = vpack.c.bf16 %v2667_v3, %v2666_v0  ;;  %v4349_v8 = vpack.c.bf16 %v2662_v4, %v2662_v4  ;;  %v1337_v9 = vpop.f32.mrb[64].mxu0  ;;  %v4509_v10 = vpop.f32.mrb[64].mxu1 }
 0x1a6   : > { %3468 = vst [vmem:[%s5061_s12 + $0x17c] sm:$0xf] %v4353_v5  ;;  %v2477_v11 = vadd.f32 %v5046_v30, %v1337_v9  ;;  %v2485_v12 = vadd.f32 %v4509_v10, %v5149_v6  ;;  %v1339_v13 = vpop.f32.mrb[65].mxu0  ;;  %v1658_v14 = vpop.f32.mrb[65].mxu1 }
 0x1a7   : > { %3467 = vst [vmem:[%s5061_s12 + $0x174] sm:$0xff] %v4352_v7  ;;  %3464 = vst [vmem:[%s5061_s12 + $0x164] sm:$0xf] %v4349_v8  ;;  %v2478_v15 = vadd.f32 %v5049_v31, %v1339_v13  ;;  %v2479_v16 = vadd.f32 %v5149_v6, %v1658_v14  ;;  %v1341_v17 = vpop.f32.mrb[66].mxu0  ;;  %v4510_v18 = vpop.f32.mrb[66].mxu1 }
 0x1a8   : > { %v2669_v28 = vmax.f32 %v2477_v11, 0.0  ;;  %v2677_v19 = vmax.f32 %v2485_v12, 0.0  ;;  %v2480_v20 = vadd.f32 %v5046_v30, %v1341_v17  ;;  %v2488_v21 = vadd.f32 %v4510_v18, %v5149_v6  ;;  %v1343_v22 = vpop.f32.mrb[67].mxu0  ;;  %v1661_v23 = vpop.f32.mrb[67].mxu1 }
 0x1a9   : > { %v2670_v24 = vmax.f32 %v2478_v15, 0.0  ;;  %v2671_v25 = vmax.f32 %v2479_v16, 0.0  ;;  %v2481_v27 = vadd.f32 %v5049_v31, %v1343_v22  ;;  %v2482_v29 = vadd.f32 %v5149_v6, %v1661_v23 }
 0x1aa   : > { %v4359_v32 = vpack.c.bf16 %v2677_v19, %v2677_v19  ;;  %v2672_v33 = vmax.f32 %v2480_v20, 0.0  ;;  %v2680_v34 = vmax.f32 %v2488_v21, 0.0 }
 0x1ab   : > { %v4354_v35 = vpack.c.bf16 %v2670_v24, %v2669_v28  ;;  %v4355_v36 = vpack.c.bf16 %v2671_v25, %v2671_v25  ;;  %v2673_v37 = vmax.f32 %v2481_v27, 0.0  ;;  %v2674_v38 = vmax.f32 %v2482_v29, 0.0 }
 0x1ac   : > { %3474 = vst [vmem:[%s5061_s12 + $0x1a0] sm:$0xf] %v4359_v32  ;;  %v4361_v39 = vpack.c.bf16 %v2680_v34, %v2680_v34 }
 0x1ad   : > { %3469 = vst [vmem:[%s5061_s12 + $0x180] sm:$0xff] %v4354_v35  ;;  %3470 = vst [vmem:[%s5061_s12 + $0x188] sm:$0xf] %v4355_v36  ;;  %v4356_v40 = vpack.c.bf16 %v2673_v37, %v2672_v33  ;;  %v4357_v41 = vpack.c.bf16 %v2674_v38, %v2674_v38  ;;  %v1347_v42 = vpop.f32.mrb[68].mxu0  ;;  %v4513_v43 = vpop.f32.mrb[68].mxu1 }
 0x1ae   : > { %3476 = vst [vmem:[%s5061_s12 + $0x1ac] sm:$0xf] %v4361_v39  ;;  %v2483_v44 = vadd.f32 %v5046_v30, %v1347_v42  ;;  %v2497_v45 = vadd.f32 %v4513_v43, %v5149_v6  ;;  %v1349_v46 = vpop.f32.mrb[69].mxu0  ;;  %v1674_v47 = vpop.f32.mrb[69].mxu1 }
 0x1af   : > { %3471 = vst [vmem:[%s5061_s12 + $0x18c] sm:$0xff] %v4356_v40  ;;  %3472 = vst [vmem:[%s5061_s12 + $0x194] sm:$0xf] %v4357_v41  ;;  %v2484_v48 = vadd.f32 %v5049_v31, %v1349_v46  ;;  %v2491_v49 = vadd.f32 %v5149_v6, %v1674_v47  ;;  %v1351_v50 = vpop.f32.mrb[70].mxu0  ;;  %v4514_v51 = vpop.f32.mrb[70].mxu1 }
 0x1b0   : > { %v2675_v52 = vmax.f32 %v2483_v44, 0.0  ;;  %v2689_v53 = vmax.f32 %v2497_v45, 0.0  ;;  %v2486_v54 = vadd.f32 %v5046_v30, %v1351_v50  ;;  %v2500_v55 = vadd.f32 %v4514_v51, %v5149_v6  ;;  %v1353_v56 = vpop.f32.mrb[71].mxu0  ;;  %v1677_v57 = vpop.f32.mrb[71].mxu1 }
 0x1b1   : > { %v2676_v58 = vmax.f32 %v2484_v48, 0.0  ;;  %v2683_v59 = vmax.f32 %v2491_v49, 0.0  ;;  %v2487_v60 = vadd.f32 %v5049_v31, %v1353_v56  ;;  %v2494_v61 = vadd.f32 %v5149_v6, %v1677_v57 }
 0x1b2   : > { %v4367_v62 = vpack.c.bf16 %v2689_v53, %v2689_v53  ;;  %v2678_v63 = vmax.f32 %v2486_v54, 0.0  ;;  %v2692_v0 = vmax.f32 %v2500_v55, 0.0 }
 0x1b3   : > { %v4358_v1 = vpack.c.bf16 %v2676_v58, %v2675_v52  ;;  %v4363_v26 = vpack.c.bf16 %v2683_v59, %v2683_v59  ;;  %v2679_v2 = vmax.f32 %v2487_v60, 0.0  ;;  %v2686_v3 = vmax.f32 %v2494_v61, 0.0 }
 0x1b4   : > { %3482 = vst [vmem:[%s5061_s12 + $0x1d0] sm:$0xf] %v4367_v62  ;;  %v4369_v4 = vpack.c.bf16 %v2692_v0, %v2692_v0 }
 0x1b5   : > { %3473 = vst [vmem:[%s5061_s12 + $0x198] sm:$0xff] %v4358_v1  ;;  %3478 = vst [vmem:[%s5061_s12 + $0x1b8] sm:$0xf] %v4363_v26  ;;  %v4360_v5 = vpack.c.bf16 %v2679_v2, %v2678_v63  ;;  %v4365_v7 = vpack.c.bf16 %v2686_v3, %v2686_v3  ;;  %v1357_v8 = vpop.f32.mrb[72].mxu0  ;;  %v4517_v9 = vpop.f32.mrb[72].mxu1 }
 0x1b6   : > { %3484 = vst [vmem:[%s5061_s12 + $0x1dc] sm:$0xf] %v4369_v4  ;;  %v2489_v10 = vadd.f32 %v5046_v30, %v1357_v8  ;;  %v2509_v11 = vadd.f32 %v4517_v9, %v5149_v6  ;;  %v1359_v12 = vpop.f32.mrb[73].mxu0  ;;  %v1690_v13 = vpop.f32.mrb[73].mxu1 }
 0x1b7   : > { %3475 = vst [vmem:[%s5061_s12 + $0x1a4] sm:$0xff] %v4360_v5  ;;  %3480 = vst [vmem:[%s5061_s12 + $0x1c4] sm:$0xf] %v4365_v7  ;;  %v2490_v14 = vadd.f32 %v5049_v31, %v1359_v12  ;;  %v2503_v15 = vadd.f32 %v5149_v6, %v1690_v13  ;;  %v1361_v16 = vpop.f32.mrb[74].mxu0  ;;  %v4518_v17 = vpop.f32.mrb[74].mxu1 }
 0x1b8   : > { %v2681_v18 = vmax.f32 %v2489_v10, 0.0  ;;  %v2701_v28 = vmax.f32 %v2509_v11, 0.0  ;;  %v2492_v19 = vadd.f32 %v5046_v30, %v1361_v16  ;;  %v2512_v20 = vadd.f32 %v4518_v17, %v5149_v6  ;;  %v1363_v21 = vpop.f32.mrb[75].mxu0  ;;  %v1693_v22 = vpop.f32.mrb[75].mxu1 }
 0x1b9   : > { %v2682_v23 = vmax.f32 %v2490_v14, 0.0  ;;  %v2695_v24 = vmax.f32 %v2503_v15, 0.0  ;;  %v2493_v25 = vadd.f32 %v5049_v31, %v1363_v21  ;;  %v2506_v27 = vadd.f32 %v5149_v6, %v1693_v22 }
 0x1ba   : > { %v4375_v29 = vpack.c.bf16 %v2701_v28, %v2701_v28  ;;  %v2684_v32 = vmax.f32 %v2492_v19, 0.0  ;;  %v2704_v33 = vmax.f32 %v2512_v20, 0.0 }
 0x1bb   : > { %v4362_v34 = vpack.c.bf16 %v2682_v23, %v2681_v18  ;;  %v4371_v35 = vpack.c.bf16 %v2695_v24, %v2695_v24  ;;  %v2685_v36 = vmax.f32 %v2493_v25, 0.0  ;;  %v2698_v37 = vmax.f32 %v2506_v27, 0.0 }
 0x1bc   : > { %3490 = vst [vmem:[%s5061_s12 + $0x200] sm:$0xf] %v4375_v29  ;;  %v4377_v38 = vpack.c.bf16 %v2704_v33, %v2704_v33 }
 0x1bd   : > { %3477 = vst [vmem:[%s5061_s12 + $0x1b0] sm:$0xff] %v4362_v34  ;;  %3486 = vst [vmem:[%s5061_s12 + $0x1e8] sm:$0xf] %v4371_v35  ;;  %v4364_v39 = vpack.c.bf16 %v2685_v36, %v2684_v32  ;;  %v4373_v40 = vpack.c.bf16 %v2698_v37, %v2698_v37  ;;  %v1367_v41 = vpop.f32.mrb[76].mxu0  ;;  %v4521_v42 = vpop.f32.mrb[76].mxu1 }
 0x1be   : > { %3492 = vst [vmem:[%s5061_s12 + $0x20c] sm:$0xf] %v4377_v38  ;;  %v2495_v43 = vadd.f32 %v5046_v30, %v1367_v41  ;;  %v2521_v44 = vadd.f32 %v4521_v42, %v5149_v6  ;;  %v1369_v45 = vpop.f32.mrb[77].mxu0  ;;  %v1706_v46 = vpop.f32.mrb[77].mxu1 }
 0x1bf   : > { %3479 = vst [vmem:[%s5061_s12 + $0x1bc] sm:$0xff] %v4364_v39  ;;  %3488 = vst [vmem:[%s5061_s12 + $0x1f4] sm:$0xf] %v4373_v40  ;;  %v2496_v47 = vadd.f32 %v5049_v31, %v1369_v45  ;;  %v2515_v48 = vadd.f32 %v5149_v6, %v1706_v46  ;;  %v1371_v49 = vpop.f32.mrb[78].mxu0  ;;  %v4522_v50 = vpop.f32.mrb[78].mxu1 }
 0x1c0   : > { %v2687_v51 = vmax.f32 %v2495_v43, 0.0  ;;  %v2713_v52 = vmax.f32 %v2521_v44, 0.0  ;;  %v2498_v53 = vadd.f32 %v5046_v30, %v1371_v49  ;;  %v2524_v54 = vadd.f32 %v4522_v50, %v5149_v6  ;;  %v1373_v55 = vpop.f32.mrb[79].mxu0  ;;  %v1709_v56 = vpop.f32.mrb[79].mxu1 }
 0x1c1   : > { %v2688_v57 = vmax.f32 %v2496_v47, 0.0  ;;  %v2707_v58 = vmax.f32 %v2515_v48, 0.0  ;;  %v2499_v59 = vadd.f32 %v5049_v31, %v1373_v55  ;;  %v2518_v60 = vadd.f32 %v5149_v6, %v1709_v56 }
 0x1c2   : > { %v4383_v61 = vpack.c.bf16 %v2713_v52, %v2713_v52  ;;  %v2690_v62 = vmax.f32 %v2498_v53, 0.0  ;;  %v2716_v63 = vmax.f32 %v2524_v54, 0.0 }
 0x1c3   : > { %v4366_v0 = vpack.c.bf16 %v2688_v57, %v2687_v51  ;;  %v4379_v1 = vpack.c.bf16 %v2707_v58, %v2707_v58  ;;  %v2691_v26 = vmax.f32 %v2499_v59, 0.0  ;;  %v2710_v2 = vmax.f32 %v2518_v60, 0.0 }
 0x1c4   : > { %3498 = vst [vmem:[%s5061_s12 + $0x230] sm:$0xf] %v4383_v61  ;;  %v4385_v3 = vpack.c.bf16 %v2716_v63, %v2716_v63 }
 0x1c5   : > { %3481 = vst [vmem:[%s5061_s12 + $0x1c8] sm:$0xff] %v4366_v0  ;;  %3494 = vst [vmem:[%s5061_s12 + $0x218] sm:$0xf] %v4379_v1  ;;  %v4368_v4 = vpack.c.bf16 %v2691_v26, %v2690_v62  ;;  %v4381_v5 = vpack.c.bf16 %v2710_v2, %v2710_v2  ;;  %v1377_v7 = vpop.f32.mrb[80].mxu0  ;;  %v4525_v8 = vpop.f32.mrb[80].mxu1 }
 0x1c6   : > { %3500 = vst [vmem:[%s5061_s12 + $0x23c] sm:$0xf] %v4385_v3  ;;  %v2501_v9 = vadd.f32 %v5046_v30, %v1377_v7  ;;  %v2533_v10 = vadd.f32 %v4525_v8, %v5149_v6  ;;  %v1379_v11 = vpop.f32.mrb[81].mxu0  ;;  %v1722_v12 = vpop.f32.mrb[81].mxu1 }
 0x1c7   : > { %3483 = vst [vmem:[%s5061_s12 + $0x1d4] sm:$0xff] %v4368_v4  ;;  %3496 = vst [vmem:[%s5061_s12 + $0x224] sm:$0xf] %v4381_v5  ;;  %v2502_v13 = vadd.f32 %v5049_v31, %v1379_v11  ;;  %v2527_v14 = vadd.f32 %v5149_v6, %v1722_v12  ;;  %v1381_v15 = vpop.f32.mrb[82].mxu0  ;;  %v4526_v16 = vpop.f32.mrb[82].mxu1 }
 0x1c8   : > { %v2693_v17 = vmax.f32 %v2501_v9, 0.0  ;;  %v2725_v18 = vmax.f32 %v2533_v10, 0.0  ;;  %v2504_v28 = vadd.f32 %v5046_v30, %v1381_v15  ;;  %v2536_v19 = vadd.f32 %v4526_v16, %v5149_v6  ;;  %v1383_v20 = vpop.f32.mrb[83].mxu0  ;;  %v1725_v21 = vpop.f32.mrb[83].mxu1 }
 0x1c9   : > { %v2694_v22 = vmax.f32 %v2502_v13, 0.0  ;;  %v2719_v23 = vmax.f32 %v2527_v14, 0.0  ;;  %v2505_v24 = vadd.f32 %v5049_v31, %v1383_v20  ;;  %v2530_v25 = vadd.f32 %v5149_v6, %v1725_v21 }
 0x1ca   : > { %v4391_v27 = vpack.c.bf16 %v2725_v18, %v2725_v18  ;;  %v2696_v29 = vmax.f32 %v2504_v28, 0.0  ;;  %v2728_v32 = vmax.f32 %v2536_v19, 0.0 }
 0x1cb   : > { %v4370_v33 = vpack.c.bf16 %v2694_v22, %v2693_v17  ;;  %v4387_v34 = vpack.c.bf16 %v2719_v23, %v2719_v23  ;;  %v2697_v35 = vmax.f32 %v2505_v24, 0.0  ;;  %v2722_v36 = vmax.f32 %v2530_v25, 0.0 }
 0x1cc   : > { %3506 = vst [vmem:[%s5061_s12 + $0x260] sm:$0xf] %v4391_v27  ;;  %v4393_v37 = vpack.c.bf16 %v2728_v32, %v2728_v32 }
 0x1cd   : > { %3485 = vst [vmem:[%s5061_s12 + $0x1e0] sm:$0xff] %v4370_v33  ;;  %3502 = vst [vmem:[%s5061_s12 + $0x248] sm:$0xf] %v4387_v34  ;;  %v4372_v38 = vpack.c.bf16 %v2697_v35, %v2696_v29  ;;  %v4389_v39 = vpack.c.bf16 %v2722_v36, %v2722_v36  ;;  %v1387_v40 = vpop.f32.mrb[84].mxu0  ;;  %v4529_v41 = vpop.f32.mrb[84].mxu1 }
 0x1ce   : > { %3508 = vst [vmem:[%s5061_s12 + $0x26c] sm:$0xf] %v4393_v37  ;;  %v2507_v42 = vadd.f32 %v5046_v30, %v1387_v40  ;;  %v2545_v43 = vadd.f32 %v4529_v41, %v5149_v6  ;;  %v1389_v44 = vpop.f32.mrb[85].mxu0  ;;  %v1738_v45 = vpop.f32.mrb[85].mxu1 }
 0x1cf   : > { %3487 = vst [vmem:[%s5061_s12 + $0x1ec] sm:$0xff] %v4372_v38  ;;  %3504 = vst [vmem:[%s5061_s12 + $0x254] sm:$0xf] %v4389_v39  ;;  %v2508_v46 = vadd.f32 %v5049_v31, %v1389_v44  ;;  %v2539_v47 = vadd.f32 %v5149_v6, %v1738_v45  ;;  %v1391_v48 = vpop.f32.mrb[86].mxu0  ;;  %v4530_v49 = vpop.f32.mrb[86].mxu1 }
 0x1d0   : > { %v2699_v50 = vmax.f32 %v2507_v42, 0.0  ;;  %v2737_v51 = vmax.f32 %v2545_v43, 0.0  ;;  %v2510_v52 = vadd.f32 %v5046_v30, %v1391_v48  ;;  %v2548_v53 = vadd.f32 %v4530_v49, %v5149_v6  ;;  %v1393_v54 = vpop.f32.mrb[87].mxu0  ;;  %v1741_v55 = vpop.f32.mrb[87].mxu1 }
 0x1d1   : > { %v2700_v56 = vmax.f32 %v2508_v46, 0.0  ;;  %v2731_v57 = vmax.f32 %v2539_v47, 0.0  ;;  %v2511_v58 = vadd.f32 %v5049_v31, %v1393_v54  ;;  %v2542_v59 = vadd.f32 %v5149_v6, %v1741_v55 }
 0x1d2   : > { %v4399_v60 = vpack.c.bf16 %v2737_v51, %v2737_v51  ;;  %v2702_v61 = vmax.f32 %v2510_v52, 0.0  ;;  %v2740_v62 = vmax.f32 %v2548_v53, 0.0 }
 0x1d3   : > { %v4374_v63 = vpack.c.bf16 %v2700_v56, %v2699_v50  ;;  %v4395_v0 = vpack.c.bf16 %v2731_v57, %v2731_v57  ;;  %v2703_v1 = vmax.f32 %v2511_v58, 0.0  ;;  %v2734_v26 = vmax.f32 %v2542_v59, 0.0 }
 0x1d4   : > { %3514 = vst [vmem:[%s5061_s12 + $0x290] sm:$0xf] %v4399_v60  ;;  %v4401_v2 = vpack.c.bf16 %v2740_v62, %v2740_v62 }
 0x1d5   : > { %3489 = vst [vmem:[%s5061_s12 + $0x1f8] sm:$0xff] %v4374_v63  ;;  %3510 = vst [vmem:[%s5061_s12 + $0x278] sm:$0xf] %v4395_v0  ;;  %v4376_v3 = vpack.c.bf16 %v2703_v1, %v2702_v61  ;;  %v4397_v4 = vpack.c.bf16 %v2734_v26, %v2734_v26  ;;  %v1397_v5 = vpop.f32.mrb[88].mxu0  ;;  %v4533_v7 = vpop.f32.mrb[88].mxu1 }
 0x1d6   : > { %3516 = vst [vmem:[%s5061_s12 + $0x29c] sm:$0xf] %v4401_v2  ;;  %v2513_v8 = vadd.f32 %v5046_v30, %v1397_v5  ;;  %v2557_v9 = vadd.f32 %v4533_v7, %v5149_v6  ;;  %v1399_v10 = vpop.f32.mrb[89].mxu0  ;;  %v1754_v11 = vpop.f32.mrb[89].mxu1  ;;  %v3568_v5 = vld [vmem:[%s5061_s12 + $0x30] sm:$0xff] (%p4759_p6)  ;;  %v3570_v7 = vld [vmem:[%s5061_s12 + $0x3c] sm:$0xff] (%p4759_p6) }
 0x1d7   : > { %3491 = vst [vmem:[%s5061_s12 + $0x204] sm:$0xff] %v4376_v3  ;;  %3512 = vst [vmem:[%s5061_s12 + $0x284] sm:$0xf] %v4397_v4  ;;  %v2514_v12 = vadd.f32 %v5049_v31, %v1399_v10  ;;  %v2551_v13 = vadd.f32 %v5149_v6, %v1754_v11  ;;  %v1401_v14 = vpop.f32.mrb[90].mxu0  ;;  %v4534_v15 = vpop.f32.mrb[90].mxu1  ;;  %v3564_v3 = vld [vmem:[%s5061_s12 + $0x18] sm:$0xff] (%p4759_p6) }
 0x1d8   : > { %v2705_v16 = vmax.f32 %v2513_v8, 0.0  ;;  %v2749_v17 = vmax.f32 %v2557_v9, 0.0  ;;  %v2516_v18 = vadd.f32 %v5046_v30, %v1401_v14  ;;  %v2560_v28 = vadd.f32 %v4534_v15, %v5149_v6  ;;  %v1403_v19 = vpop.f32.mrb[91].mxu0  ;;  %v1757_v20 = vpop.f32.mrb[91].mxu1  ;;  %v3566_v4 = vld [vmem:[%s5061_s12 + $0x24] sm:$0xff] (%p4759_p6)  ;;  %v3574_v9 = vld [vmem:[%s5061_s12 + $0x54] sm:$0xff] (%p4759_p6) }
 0x1d9   : > { %v2706_v21 = vmax.f32 %v2514_v12, 0.0  ;;  %v2743_v22 = vmax.f32 %v2551_v13, 0.0  ;;  %v2517_v23 = vadd.f32 %v5049_v31, %v1403_v19  ;;  %v2554_v24 = vadd.f32 %v5149_v6, %v1757_v20  ;;  %v3572_v8 = vld [vmem:[%s5061_s12 + $0x48] sm:$0xff] (%p4759_p6)  ;;  %v3576_v10 = vld [vmem:[%s5061_s12 + $0x60] sm:$0xff] (%p4759_p6)  ;;  %3565 = vst [vmem:[%s5391_s4 + $0x30] sm:$0xff] (%p4759_p6), %v3564_v3  ;;  %3567 = vst [vmem:[%s5391_s4 + $0x48] sm:$0xff] (%p4759_p6), %v3566_v4 }
 0x1da   : > { %v4407_v25 = vpack.c.bf16 %v2749_v17, %v2749_v17  ;;  %v2708_v27 = vmax.f32 %v2516_v18, 0.0  ;;  %v2752_v29 = vmax.f32 %v2560_v28, 0.0  ;;  %3569 = vst [vmem:[%s5391_s4 + $0x60] sm:$0xff] (%p4759_p6), %v3568_v5  ;;  %3571 = vst [vmem:[%s5391_s4 + $0x78] sm:$0xff] (%p4759_p6), %v3570_v7  ;;  %v3578_v11 = vld [vmem:[%s5061_s12 + $0x6c] sm:$0xff] (%p4759_p6)  ;;  %v3580_v12 = vld [vmem:[%s5061_s12 + $0x78] sm:$0xff] (%p4759_p6) }
 0x1db   : > { %v4378_v32 = vpack.c.bf16 %v2706_v21, %v2705_v16  ;;  %v4403_v33 = vpack.c.bf16 %v2743_v22, %v2743_v22  ;;  %v2709_v34 = vmax.f32 %v2517_v23, 0.0  ;;  %v2746_v35 = vmax.f32 %v2554_v24, 0.0  ;;  %3573 = vst [vmem:[%s5391_s4 + $0x90] sm:$0xff] (%p4759_p6), %v3572_v8  ;;  %3575 = vst [vmem:[%s5391_s4 + $0xa8] sm:$0xff] (%p4759_p6), %v3574_v9  ;;  %v3582_v13 = vld [vmem:[%s5061_s12 + $0x84] sm:$0xff] (%p4759_p6)  ;;  %v3584_v14 = vld [vmem:[%s5061_s12 + $0x90] sm:$0xff] (%p4759_p6) }
 0x1dc   : > { %3522 = vst [vmem:[%s5061_s12 + $0x2c0] sm:$0xf] %v4407_v25  ;;  %v4409_v36 = vpack.c.bf16 %v2752_v29, %v2752_v29  ;;  %3577 = vst [vmem:[%s5391_s4 + $0xc0] sm:$0xff] (%p4759_p6), %v3576_v10  ;;  %v3586_v15 = vld [vmem:[%s5061_s12 + $0x9c] sm:$0xff] (%p4759_p6)  ;;  %v3588_v16 = vld [vmem:[%s5061_s12 + $0xa8] sm:$0xff] (%p4759_p6) }
 0x1dd   : > { %3493 = vst [vmem:[%s5061_s12 + $0x210] sm:$0xff] %v4378_v32  ;;  %3518 = vst [vmem:[%s5061_s12 + $0x2a8] sm:$0xf] %v4403_v33  ;;  %v4380_v37 = vpack.c.bf16 %v2709_v34, %v2708_v27  ;;  %v4405_v38 = vpack.c.bf16 %v2746_v35, %v2746_v35  ;;  %v1407_v39 = vpop.f32.mrb[92].mxu0  ;;  %v4537_v40 = vpop.f32.mrb[92].mxu1  ;;  %v3590_v17 = vld [vmem:[%s5061_s12 + $0xb4] sm:$0xff] (%p4759_p6) }
 0x1de   : > { %3524 = vst [vmem:[%s5061_s12 + $0x2cc] sm:$0xf] %v4409_v36  ;;  %v2519_v41 = vadd.f32 %v5046_v30, %v1407_v39  ;;  %v2569_v42 = vadd.f32 %v4537_v40, %v5149_v6  ;;  %v1409_v43 = vpop.f32.mrb[93].mxu0  ;;  %v1770_v44 = vpop.f32.mrb[93].mxu1  ;;  %3579 = vst [vmem:[%s5391_s4 + $0xd8] sm:$0xff] (%p4759_p6), %v3578_v11  ;;  %v3592_v18 = vld [vmem:[%s5061_s12 + $0xc0] sm:$0xff] (%p4759_p6) }
 0x1df   : > { %3495 = vst [vmem:[%s5061_s12 + $0x21c] sm:$0xff] %v4380_v37  ;;  %3520 = vst [vmem:[%s5061_s12 + $0x2b4] sm:$0xf] %v4405_v38  ;;  %v2520_v45 = vadd.f32 %v5049_v31, %v1409_v43  ;;  %v2563_v46 = vadd.f32 %v5149_v6, %v1770_v44  ;;  %v1411_v47 = vpop.f32.mrb[94].mxu0  ;;  %v4538_v48 = vpop.f32.mrb[94].mxu1  ;;  %v3594_v28 = vld [vmem:[%s5061_s12 + $0xcc] sm:$0xff] (%p4759_p6) }
 0x1e0   : > { %v2711_v49 = vmax.f32 %v2519_v41, 0.0  ;;  %v2761_v50 = vmax.f32 %v2569_v42, 0.0  ;;  %v2522_v51 = vadd.f32 %v5046_v30, %v1411_v47  ;;  %v2572_v52 = vadd.f32 %v4538_v48, %v5149_v6  ;;  %v1413_v53 = vpop.f32.mrb[95].mxu0  ;;  %v1773_v54 = vpop.f32.mrb[95].mxu1  ;;  %3581 = vst [vmem:[%s5391_s4 + $0xf0] sm:$0xff] (%p4759_p6), %v3580_v12  ;;  %3583 = vst [vmem:[%s5391_s4 + $0x108] sm:$0xff] (%p4759_p6), %v3582_v13 }
 0x1e1   : > { %v2712_v55 = vmax.f32 %v2520_v45, 0.0  ;;  %v2755_v56 = vmax.f32 %v2563_v46, 0.0  ;;  %v2523_v57 = vadd.f32 %v5049_v31, %v1413_v53  ;;  %v2566_v58 = vadd.f32 %v5149_v6, %v1773_v54  ;;  %3539 = sbr.rel (!%p4759_p6) target bundleno = 551 (0x227), region = 70  ;;  %v3560_v31 = vld [vmem:[%s5061_s12] sm:$0xff] (%p4759_p6)  ;;  %v3562_v6 = vld [vmem:[%s5061_s12 + $0xc] sm:$0xff] (%p4759_p6)  ;;  %3585 = vst [vmem:[%s5391_s4 + $0x120] sm:$0xff] (%p4759_p6), %v3584_v14 }
 0x1e2   : > { %v4415_v59 = vpack.c.bf16 %v2761_v50, %v2761_v50  ;;  %v2714_v60 = vmax.f32 %v2522_v51, 0.0  ;;  %v2764_v61 = vmax.f32 %v2572_v52, 0.0  ;;  %3561 = vst [vmem:[%s5391_s4] sm:$0xff] (%p4759_p6), %v3560_v31  ;;  %3563 = vst [vmem:[%s5391_s4 + $0x18] sm:$0xff] (%p4759_p6), %v3562_v6  ;;  %v3596_v19 = vld [vmem:[%s5061_s12 + $0xd8] sm:$0xff] (%p4759_p6)  ;;  %v3598_v20 = vld [vmem:[%s5061_s12 + $0xe4] sm:$0xff] (%p4759_p6) }
 0x1e3   : > { %v4382_v62 = vpack.c.bf16 %v2712_v55, %v2711_v49  ;;  %v4411_v30 = vpack.c.bf16 %v2755_v56, %v2755_v56  ;;  %v2715_v63 = vmax.f32 %v2523_v57, 0.0  ;;  %v2758_v0 = vmax.f32 %v2566_v58, 0.0  ;;  %3587 = vst [vmem:[%s5391_s4 + $0x138] sm:$0xff] (%p4759_p6), %v3586_v15  ;;  %3589 = vst [vmem:[%s5391_s4 + $0x150] sm:$0xff] (%p4759_p6), %v3588_v16  ;;  %v3600_v21 = vld [vmem:[%s5061_s12 + $0xf0] sm:$0xff] (%p4759_p6)  ;;  %v3602_v22 = vld [vmem:[%s5061_s12 + $0xfc] sm:$0xff] (%p4759_p6) }
 0x1e4   : > { %3530 = vst [vmem:[%s5061_s12 + $0x2f0] sm:$0xf] %v4415_v59  ;;  %v4417_v1 = vpack.c.bf16 %v2764_v61, %v2764_v61  ;;  %3591 = vst [vmem:[%s5391_s4 + $0x168] sm:$0xff] (%p4759_p6), %v3590_v17  ;;  %v3604_v23 = vld [vmem:[%s5061_s12 + $0x108] sm:$0xff] (%p4759_p6)  ;;  %v3606_v24 = vld [vmem:[%s5061_s12 + $0x114] sm:$0xff] (%p4759_p6) }
 0x1e5   : > { %3497 = vst [vmem:[%s5061_s12 + $0x228] sm:$0xff] %v4382_v62  ;;  %3526 = vst [vmem:[%s5061_s12 + $0x2d8] sm:$0xf] %v4411_v30  ;;  %v4384_v26 = vpack.c.bf16 %v2715_v63, %v2714_v60  ;;  %v4413_v2 = vpack.c.bf16 %v2758_v0, %v2758_v0  ;;  %v3608_v25 = vld [vmem:[%s5061_s12 + $0x120] sm:$0xff] (%p4759_p6)  ;;  %v3610_v27 = vld [vmem:[%s5061_s12 + $0x12c] sm:$0xff] (%p4759_p6) }
 0x1e6   : > { %3532 = vst [vmem:[%s5061_s12 + $0x2fc] sm:$0xf] %v4417_v1  ;;  %3593 = vst [vmem:[%s5391_s4 + $0x180] sm:$0xff] (%p4759_p6), %v3592_v18  ;;  %v3612_v29 = vld [vmem:[%s5061_s12 + $0x138] sm:$0xff] (%p4759_p6)  ;;  %v3614_v32 = vld [vmem:[%s5061_s12 + $0x144] sm:$0xff] (%p4759_p6) }
 0x1e7   : > { %3499 = vst [vmem:[%s5061_s12 + $0x234] sm:$0xff] %v4384_v26  ;;  %3528 = vst [vmem:[%s5061_s12 + $0x2e4] sm:$0xf] %v4413_v2  ;;  %v3616_v33 = vld [vmem:[%s5061_s12 + $0x150] sm:$0xff] (%p4759_p6)  ;;  %v3618_v34 = vld [vmem:[%s5061_s12 + $0x15c] sm:$0xff] (%p4759_p6) }
 0x1e8   : > { %3595 = vst [vmem:[%s5391_s4 + $0x198] sm:$0xff] %v3594_v28  ;;  %3597 = vst [vmem:[%s5391_s4 + $0x1b0] sm:$0xff] %v3596_v19  ;;  %v3620_v35 = vld [vmem:[%s5061_s12 + $0x168] sm:$0xff]  ;;  %v3622_v36 = vld [vmem:[%s5061_s12 + $0x174] sm:$0xff] }
 0x1e9   : > { %3599 = vst [vmem:[%s5391_s4 + $0x1c8] sm:$0xff] %v3598_v20  ;;  %3601 = vst [vmem:[%s5391_s4 + $0x1e0] sm:$0xff] %v3600_v21  ;;  %v3624_v37 = vld [vmem:[%s5061_s12 + $0x180] sm:$0xff]  ;;  %v3626_v38 = vld [vmem:[%s5061_s12 + $0x18c] sm:$0xff] }
 0x1ea   : > { %3603 = vst [vmem:[%s5391_s4 + $0x1f8] sm:$0xff] %v3602_v22  ;;  %3605 = vst [vmem:[%s5391_s4 + $0x210] sm:$0xff] %v3604_v23  ;;  %v3628_v39 = vld [vmem:[%s5061_s12 + $0x198] sm:$0xff]  ;;  %v3630_v40 = vld [vmem:[%s5061_s12 + $0x1a4] sm:$0xff] }
 0x1eb   : > { %3607 = vst [vmem:[%s5391_s4 + $0x228] sm:$0xff] %v3606_v24  ;;  %3609 = vst [vmem:[%s5391_s4 + $0x240] sm:$0xff] %v3608_v25  ;;  %v3632_v41 = vld [vmem:[%s5061_s12 + $0x1b0] sm:$0xff]  ;;  %v3634_v42 = vld [vmem:[%s5061_s12 + $0x1bc] sm:$0xff] }
 0x1ec   : > { %3611 = vst [vmem:[%s5391_s4 + $0x258] sm:$0xff] %v3610_v27  ;;  %3613 = vst [vmem:[%s5391_s4 + $0x270] sm:$0xff] %v3612_v29  ;;  %v3636_v43 = vld [vmem:[%s5061_s12 + $0x1c8] sm:$0xff]  ;;  %v3638_v44 = vld [vmem:[%s5061_s12 + $0x1d4] sm:$0xff] }
 0x1ed   : > { %3615 = vst [vmem:[%s5391_s4 + $0x288] sm:$0xff] %v3614_v32  ;;  %3617 = vst [vmem:[%s5391_s4 + $0x2a0] sm:$0xff] %v3616_v33  ;;  %v3640_v45 = vld [vmem:[%s5061_s12 + $0x1e0] sm:$0xff]  ;;  %v3642_v46 = vld [vmem:[%s5061_s12 + $0x1ec] sm:$0xff] }
 0x1ee   : > { %3619 = vst [vmem:[%s5391_s4 + $0x2b8] sm:$0xff] %v3618_v34  ;;  %3621 = vst [vmem:[%s5391_s4 + $0x2d0] sm:$0xff] %v3620_v35  ;;  %v3644_v47 = vld [vmem:[%s5061_s12 + $0x1f8] sm:$0xff]  ;;  %v3646_v48 = vld [vmem:[%s5061_s12 + $0x204] sm:$0xff] }
 0x1ef   : > { %3623 = vst [vmem:[%s5391_s4 + $0x2e8] sm:$0xff] %v3622_v36  ;;  %3625 = vst [vmem:[%s5391_s4 + $0x300] sm:$0xff] %v3624_v37  ;;  %v3648_v49 = vld [vmem:[%s5061_s12 + $0x210] sm:$0xff]  ;;  %v3650_v50 = vld [vmem:[%s5061_s12 + $0x21c] sm:$0xff] }
 0x1f0   : > { %3627 = vst [vmem:[%s5391_s4 + $0x318] sm:$0xff] %v3626_v38  ;;  %3629 = vst [vmem:[%s5391_s4 + $0x330] sm:$0xff] %v3628_v39  ;;  %v3652_v51 = vld [vmem:[%s5061_s12 + $0x228] sm:$0xff]  ;;  %v3654_v52 = vld [vmem:[%s5061_s12 + $0x234] sm:$0xff] }
 0x1f1   : > { %3631 = vst [vmem:[%s5391_s4 + $0x348] sm:$0xff] %v3630_v40  ;;  %3633 = vst [vmem:[%s5391_s4 + $0x360] sm:$0xff] %v3632_v41  ;;  %v3656_v53 = vld [vmem:[%s5061_s12 + $0x240] sm:$0xff]  ;;  %v3658_v54 = vld [vmem:[%s5061_s12 + $0x24c] sm:$0xff] }
 0x1f2   : > { %3635 = vst [vmem:[%s5391_s4 + $0x378] sm:$0xff] %v3634_v42  ;;  %3637 = vst [vmem:[%s5391_s4 + $0x390] sm:$0xff] %v3636_v43  ;;  %v3660_v55 = vld [vmem:[%s5061_s12 + $0x258] sm:$0xff]  ;;  %v3662_v56 = vld [vmem:[%s5061_s12 + $0x264] sm:$0xff] }
 0x1f3   : > { %3639 = vst [vmem:[%s5391_s4 + $0x3a8] sm:$0xff] %v3638_v44  ;;  %3641 = vst [vmem:[%s5391_s4 + $0x3c0] sm:$0xff] %v3640_v45  ;;  %v3664_v57 = vld [vmem:[%s5061_s12 + $0x270] sm:$0xff]  ;;  %v3666_v58 = vld [vmem:[%s5061_s12 + $0x27c] sm:$0xff] }
 0x1f4   : > { %3643 = vst [vmem:[%s5391_s4 + $0x3d8] sm:$0xff] %v3642_v46  ;;  %3645 = vst [vmem:[%s5391_s4 + $0x3f0] sm:$0xff] %v3644_v47  ;;  %v3668_v59 = vld [vmem:[%s5061_s12 + $0x288] sm:$0xff]  ;;  %v3670_v60 = vld [vmem:[%s5061_s12 + $0x294] sm:$0xff] }
 0x1f5   : > { %3647 = vst [vmem:[%s5391_s4 + $0x408] sm:$0xff] %v3646_v48  ;;  %3649 = vst [vmem:[%s5391_s4 + $0x420] sm:$0xff] %v3648_v49  ;;  %v3672_v61 = vld [vmem:[%s5061_s12 + $0x2a0] sm:$0xff]  ;;  %v3674_v62 = vld [vmem:[%s5061_s12 + $0x2ac] sm:$0xff] }
 0x1f6   : > { %3651 = vst [vmem:[%s5391_s4 + $0x438] sm:$0xff] %v3650_v50  ;;  %3653 = vst [vmem:[%s5391_s4 + $0x450] sm:$0xff] %v3652_v51  ;;  %v3676_v30 = vld [vmem:[%s5061_s12 + $0x2b8] sm:$0xff]  ;;  %v3678_v63 = vld [vmem:[%s5061_s12 + $0x2c4] sm:$0xff] }
 0x1f7   : > { %3655 = vst [vmem:[%s5391_s4 + $0x468] sm:$0xff] %v3654_v52  ;;  %3657 = vst [vmem:[%s5391_s4 + $0x480] sm:$0xff] %v3656_v53  ;;  %v3680_v0 = vld [vmem:[%s5061_s12 + $0x2d0] sm:$0xff]  ;;  %v3682_v1 = vld [vmem:[%s5061_s12 + $0x2dc] sm:$0xff] }
 0x1f8   : > { %3659 = vst [vmem:[%s5391_s4 + $0x498] sm:$0xff] %v3658_v54  ;;  %3661 = vst [vmem:[%s5391_s4 + $0x4b0] sm:$0xff] %v3660_v55  ;;  %v3684_v26 = vld [vmem:[%s5061_s12 + $0x2e8] sm:$0xff]  ;;  %v3686_v2 = vld [vmem:[%s5061_s12 + $0x2f4] sm:$0xff] }
 0x1f9   : > { %3663 = vst [vmem:[%s5391_s4 + $0x4c8] sm:$0xff] %v3662_v56  ;;  %3665 = vst [vmem:[%s5391_s4 + $0x4e0] sm:$0xff] %v3664_v57  ;;  %v4159_v31 = vld [vmem:[%s5061_s12 + $0x8] sm:$0xf]  ;;  %v4161_v6 = vld [vmem:[%s5061_s12 + $0x14] sm:$0xf] }
 0x1fa   : > { %3667 = vst [vmem:[%s5391_s4 + $0x4f8] sm:$0xff] %v3666_v58  ;;  %3669 = vst [vmem:[%s5391_s4 + $0x510] sm:$0xff] %v3668_v59  ;;  %v4163_v3 = vld [vmem:[%s5061_s12 + $0x20] sm:$0xf]  ;;  %v4165_v4 = vld [vmem:[%s5061_s12 + $0x2c] sm:$0xf] }
 0x1fb   : > { %3671 = vst [vmem:[%s5391_s4 + $0x528] sm:$0xff] %v3670_v60  ;;  %3673 = vst [vmem:[%s5391_s4 + $0x540] sm:$0xff] %v3672_v61  ;;  %v4167_v5 = vld [vmem:[%s5061_s12 + $0x38] sm:$0xf]  ;;  %v4169_v7 = vld [vmem:[%s5061_s12 + $0x44] sm:$0xf] }
 0x1fc   : > { %3675 = vst [vmem:[%s5391_s4 + $0x558] sm:$0xff] %v3674_v62  ;;  %3677 = vst [vmem:[%s5391_s4 + $0x570] sm:$0xff] %v3676_v30  ;;  %v4171_v8 = vld [vmem:[%s5061_s12 + $0x50] sm:$0xf]  ;;  %v4173_v9 = vld [vmem:[%s5061_s12 + $0x5c] sm:$0xf] }
 0x1fd   : > { %3679 = vst [vmem:[%s5391_s4 + $0x588] sm:$0xff] %v3678_v63  ;;  %3681 = vst [vmem:[%s5391_s4 + $0x5a0] sm:$0xff] %v3680_v0  ;;  %v4175_v10 = vld [vmem:[%s5061_s12 + $0x68] sm:$0xf]  ;;  %v4177_v11 = vld [vmem:[%s5061_s12 + $0x74] sm:$0xf] }
 0x1fe   : > { %3683 = vst [vmem:[%s5391_s4 + $0x5b8] sm:$0xff] %v3682_v1  ;;  %3685 = vst [vmem:[%s5391_s4 + $0x5d0] sm:$0xff] %v3684_v26  ;;  %v4179_v12 = vld [vmem:[%s5061_s12 + $0x80] sm:$0xf]  ;;  %v4181_v13 = vld [vmem:[%s5061_s12 + $0x8c] sm:$0xf] }
 0x1ff   : > { %3687 = vst [vmem:[%s5391_s4 + $0x5e8] sm:$0xff] %v3686_v2  ;;  %4160 = vst [vmem:[%s5391_s4 + $0x8] sm:$0xf] %v4159_v31  ;;  %v4183_v14 = vld [vmem:[%s5061_s12 + $0x98] sm:$0xf] }
 0x200   : > { %4162 = vst [vmem:[%s5391_s4 + $0x20] sm:$0xf] %v4161_v6  ;;  %4164 = vst [vmem:[%s5391_s4 + $0x38] sm:$0xf] %v4163_v3  ;;  %v4185_v15 = vld [vmem:[%s5061_s12 + $0xa4] sm:$0xf] }
 0x201   : > { %4166 = vst [vmem:[%s5391_s4 + $0x50] sm:$0xf] %v4165_v4  ;;  %4168 = vst [vmem:[%s5391_s4 + $0x68] sm:$0xf] %v4167_v5  ;;  %v4187_v16 = vld [vmem:[%s5061_s12 + $0xb0] sm:$0xf] }
 0x202   : > { %4170 = vst [vmem:[%s5391_s4 + $0x80] sm:$0xf] %v4169_v7  ;;  %4172 = vst [vmem:[%s5391_s4 + $0x98] sm:$0xf] %v4171_v8  ;;  %v4189_v17 = vld [vmem:[%s5061_s12 + $0xbc] sm:$0xf] }
 0x203   : > { %4174 = vst [vmem:[%s5391_s4 + $0xb0] sm:$0xf] %v4173_v9  ;;  %4176 = vst [vmem:[%s5391_s4 + $0xc8] sm:$0xf] %v4175_v10  ;;  %v4191_v18 = vld [vmem:[%s5061_s12 + $0xc8] sm:$0xf] }
 0x204   : > { %4178 = vst [vmem:[%s5391_s4 + $0xe0] sm:$0xf] %v4177_v11  ;;  %4180 = vst [vmem:[%s5391_s4 + $0xf8] sm:$0xf] %v4179_v12  ;;  %v4193_v28 = vld [vmem:[%s5061_s12 + $0xd4] sm:$0xf] }
 0x205   : > { %4182 = vst [vmem:[%s5391_s4 + $0x110] sm:$0xf] %v4181_v13  ;;  %4184 = vst [vmem:[%s5391_s4 + $0x128] sm:$0xf] %v4183_v14  ;;  %v4195_v19 = vld [vmem:[%s5061_s12 + $0xe0] sm:$0xf] }
 0x206   : > { %4186 = vst [vmem:[%s5391_s4 + $0x140] sm:$0xf] %v4185_v15  ;;  %4188 = vst [vmem:[%s5391_s4 + $0x158] sm:$0xf] %v4187_v16  ;;  %v4197_v20 = vld [vmem:[%s5061_s12 + $0xec] sm:$0xf] }
 0x207   : > { %4190 = vst [vmem:[%s5391_s4 + $0x170] sm:$0xf] %v4189_v17  ;;  %4192 = vst [vmem:[%s5391_s4 + $0x188] sm:$0xf] %v4191_v18  ;;  %v4199_v21 = vld [vmem:[%s5061_s12 + $0xf8] sm:$0xf] }
 0x208   : > { %4194 = vst [vmem:[%s5391_s4 + $0x1a0] sm:$0xf] %v4193_v28  ;;  %4196 = vst [vmem:[%s5391_s4 + $0x1b8] sm:$0xf] %v4195_v19  ;;  %v4201_v22 = vld [vmem:[%s5061_s12 + $0x104] sm:$0xf] }
 0x209   : > { %4198 = vst [vmem:[%s5391_s4 + $0x1d0] sm:$0xf] %v4197_v20  ;;  %v4203_v23 = vld [vmem:[%s5061_s12 + $0x110] sm:$0xf]  ;;  %4200 = vst [vmem:[%s5391_s4 + $0x1e8] sm:$0xf] %v4199_v21 }
 0x20a   : > { %4202 = vst [vmem:[%s5391_s4 + $0x200] sm:$0xf] %v4201_v22  ;;  %4204 = vst [vmem:[%s5391_s4 + $0x218] sm:$0xf] %v4203_v23  ;;  %v4205_v24 = vld [vmem:[%s5061_s12 + $0x11c] sm:$0xf] }
 0x20b   : > { %v4207_v25 = vld [vmem:[%s5061_s12 + $0x128] sm:$0xf]  ;;  %v4209_v27 = vld [vmem:[%s5061_s12 + $0x134] sm:$0xf]  ;;  %4206 = vst [vmem:[%s5391_s4 + $0x230] sm:$0xf] %v4205_v24 }
 0x20c   : > { %4208 = vst [vmem:[%s5391_s4 + $0x248] sm:$0xf] %v4207_v25  ;;  %4210 = vst [vmem:[%s5391_s4 + $0x260] sm:$0xf] %v4209_v27  ;;  %v4211_v29 = vld [vmem:[%s5061_s12 + $0x140] sm:$0xf] }
 0x20d   : > { %v4213_v32 = vld [vmem:[%s5061_s12 + $0x14c] sm:$0xf]  ;;  %v4215_v33 = vld [vmem:[%s5061_s12 + $0x158] sm:$0xf]  ;;  %4212 = vst [vmem:[%s5391_s4 + $0x278] sm:$0xf] %v4211_v29 }
 0x20e   : > { %4214 = vst [vmem:[%s5391_s4 + $0x290] sm:$0xf] %v4213_v32  ;;  %4216 = vst [vmem:[%s5391_s4 + $0x2a8] sm:$0xf] %v4215_v33  ;;  %v4217_v34 = vld [vmem:[%s5061_s12 + $0x164] sm:$0xf] }
 0x20f   : > { %v4219_v35 = vld [vmem:[%s5061_s12 + $0x170] sm:$0xf]  ;;  %v4221_v36 = vld [vmem:[%s5061_s12 + $0x17c] sm:$0xf]  ;;  %4218 = vst [vmem:[%s5391_s4 + $0x2c0] sm:$0xf] %v4217_v34 }
 0x210   : > { %4220 = vst [vmem:[%s5391_s4 + $0x2d8] sm:$0xf] %v4219_v35  ;;  %4222 = vst [vmem:[%s5391_s4 + $0x2f0] sm:$0xf] %v4221_v36  ;;  %v4223_v37 = vld [vmem:[%s5061_s12 + $0x188] sm:$0xf] }
 0x211   : > { %v4225_v38 = vld [vmem:[%s5061_s12 + $0x194] sm:$0xf]  ;;  %v4227_v39 = vld [vmem:[%s5061_s12 + $0x1a0] sm:$0xf]  ;;  %4224 = vst [vmem:[%s5391_s4 + $0x308] sm:$0xf] %v4223_v37 }
 0x212   : > { %4226 = vst [vmem:[%s5391_s4 + $0x320] sm:$0xf] %v4225_v38  ;;  %4228 = vst [vmem:[%s5391_s4 + $0x338] sm:$0xf] %v4227_v39  ;;  %v4229_v40 = vld [vmem:[%s5061_s12 + $0x1ac] sm:$0xf] }
 0x213   : > { %v4231_v41 = vld [vmem:[%s5061_s12 + $0x1b8] sm:$0xf]  ;;  %v4233_v42 = vld [vmem:[%s5061_s12 + $0x1c4] sm:$0xf]  ;;  %4230 = vst [vmem:[%s5391_s4 + $0x350] sm:$0xf] %v4229_v40 }
 0x214   : > { %4232 = vst [vmem:[%s5391_s4 + $0x368] sm:$0xf] %v4231_v41  ;;  %4234 = vst [vmem:[%s5391_s4 + $0x380] sm:$0xf] %v4233_v42  ;;  %v4235_v43 = vld [vmem:[%s5061_s12 + $0x1d0] sm:$0xf] }
 0x215   : > { %v4237_v44 = vld [vmem:[%s5061_s12 + $0x1dc] sm:$0xf]  ;;  %v4239_v45 = vld [vmem:[%s5061_s12 + $0x1e8] sm:$0xf]  ;;  %4236 = vst [vmem:[%s5391_s4 + $0x398] sm:$0xf] %v4235_v43 }
 0x216   : > { %4238 = vst [vmem:[%s5391_s4 + $0x3b0] sm:$0xf] %v4237_v44  ;;  %4240 = vst [vmem:[%s5391_s4 + $0x3c8] sm:$0xf] %v4239_v45  ;;  %v4241_v46 = vld [vmem:[%s5061_s12 + $0x1f4] sm:$0xf] }
 0x217   : > { %v4243_v47 = vld [vmem:[%s5061_s12 + $0x200] sm:$0xf]  ;;  %v4245_v48 = vld [vmem:[%s5061_s12 + $0x20c] sm:$0xf]  ;;  %4242 = vst [vmem:[%s5391_s4 + $0x3e0] sm:$0xf] %v4241_v46 }
 0x218   : > { %4244 = vst [vmem:[%s5391_s4 + $0x3f8] sm:$0xf] %v4243_v47  ;;  %4246 = vst [vmem:[%s5391_s4 + $0x410] sm:$0xf] %v4245_v48  ;;  %v4247_v49 = vld [vmem:[%s5061_s12 + $0x218] sm:$0xf] }
 0x219   : > { %v4249_v50 = vld [vmem:[%s5061_s12 + $0x224] sm:$0xf]  ;;  %v4251_v51 = vld [vmem:[%s5061_s12 + $0x230] sm:$0xf]  ;;  %4248 = vst [vmem:[%s5391_s4 + $0x428] sm:$0xf] %v4247_v49 }
 0x21a   : > { %4250 = vst [vmem:[%s5391_s4 + $0x440] sm:$0xf] %v4249_v50  ;;  %4252 = vst [vmem:[%s5391_s4 + $0x458] sm:$0xf] %v4251_v51  ;;  %v4253_v52 = vld [vmem:[%s5061_s12 + $0x23c] sm:$0xf] }
 0x21b   : > { %v4255_v53 = vld [vmem:[%s5061_s12 + $0x248] sm:$0xf]  ;;  %v4257_v54 = vld [vmem:[%s5061_s12 + $0x254] sm:$0xf]  ;;  %4254 = vst [vmem:[%s5391_s4 + $0x470] sm:$0xf] %v4253_v52 }
 0x21c   : > { %4256 = vst [vmem:[%s5391_s4 + $0x488] sm:$0xf] %v4255_v53  ;;  %4258 = vst [vmem:[%s5391_s4 + $0x4a0] sm:$0xf] %v4257_v54  ;;  %v4259_v55 = vld [vmem:[%s5061_s12 + $0x260] sm:$0xf] }
 0x21d   : > { %v4261_v56 = vld [vmem:[%s5061_s12 + $0x26c] sm:$0xf]  ;;  %v4263_v57 = vld [vmem:[%s5061_s12 + $0x278] sm:$0xf]  ;;  %4260 = vst [vmem:[%s5391_s4 + $0x4b8] sm:$0xf] %v4259_v55 }
 0x21e   : > { %4262 = vst [vmem:[%s5391_s4 + $0x4d0] sm:$0xf] %v4261_v56  ;;  %4264 = vst [vmem:[%s5391_s4 + $0x4e8] sm:$0xf] %v4263_v57  ;;  %v4265_v58 = vld [vmem:[%s5061_s12 + $0x284] sm:$0xf] }
 0x21f   : > { %v4267_v59 = vld [vmem:[%s5061_s12 + $0x290] sm:$0xf]  ;;  %v4269_v60 = vld [vmem:[%s5061_s12 + $0x29c] sm:$0xf]  ;;  %4266 = vst [vmem:[%s5391_s4 + $0x500] sm:$0xf] %v4265_v58 }
 0x220   : > { %4268 = vst [vmem:[%s5391_s4 + $0x518] sm:$0xf] %v4267_v59  ;;  %4270 = vst [vmem:[%s5391_s4 + $0x530] sm:$0xf] %v4269_v60  ;;  %v4271_v61 = vld [vmem:[%s5061_s12 + $0x2a8] sm:$0xf] }
 0x221   : > { %v4273_v62 = vld [vmem:[%s5061_s12 + $0x2b4] sm:$0xf]  ;;  %v4275_v30 = vld [vmem:[%s5061_s12 + $0x2c0] sm:$0xf]  ;;  %4272 = vst [vmem:[%s5391_s4 + $0x548] sm:$0xf] %v4271_v61 }
 0x222   : > { %4274 = vst [vmem:[%s5391_s4 + $0x560] sm:$0xf] %v4273_v62  ;;  %4276 = vst [vmem:[%s5391_s4 + $0x578] sm:$0xf] %v4275_v30  ;;  %v4277_v63 = vld [vmem:[%s5061_s12 + $0x2cc] sm:$0xf] }
 0x223   : > { %v4279_v0 = vld [vmem:[%s5061_s12 + $0x2d8] sm:$0xf]  ;;  %v4281_v1 = vld [vmem:[%s5061_s12 + $0x2e4] sm:$0xf]  ;;  %4278 = vst [vmem:[%s5391_s4 + $0x590] sm:$0xf] %v4277_v63 }
 0x224   : > { %4280 = vst [vmem:[%s5391_s4 + $0x5a8] sm:$0xf] %v4279_v0  ;;  %4282 = vst [vmem:[%s5391_s4 + $0x5c0] sm:$0xf] %v4281_v1  ;;  %v4283_v26 = vld [vmem:[%s5061_s12 + $0x2f0] sm:$0xf] }
 0x225   : > { %v4285_v2 = vld [vmem:[%s5061_s12 + $0x2fc] sm:$0xf]  ;;  %4284 = vst [vmem:[%s5391_s4 + $0x5d8] sm:$0xf] %v4283_v26 }
 0x226   : > { %4286 = vst [vmem:[%s5391_s4 + $0x5f0] sm:$0xf] %v4285_v2 }
 0x227 PF: > { %s13_s16 = sadd.s32 1, %s4701_s16   ;;  %s5663_s12 = smov %s4689_s13 }
 0x228   : > { %p10_p12 = scmp.ge.s32.totalorder %s13_s16, 4   ;;  %s5664_s13 = smov %s4764_s22 }
 0x229   : > { %s5665_s14 = smov %s4697_s15  ;;  %s5666_s15 = smov %s5668_s17 }
 0x22a   :  { %12 = sbr.rel (!%p10_p12) target bundleno = 3 (0x3), region = 145 }

// kernel: reduction_b.8
= control target key start
LH: loop header
LB: loop body
LE: loop exit
PB: predicated region body
PF: predicated region fallthrough
CT: control target
= control target key end

     0   :  { %s2362_s12 = smov 0   ;;  %s2364_s13 = smov 0   ;;  %s2835_s0 = inlined_call_operand.vmem [shape: bf16[112,2304], index: 0, kind: input, shape index: {}]   ;;  %s2836_s1 = inlined_call_operand.vmem [shape: bf16[2304,384], index: 1, kind: input, shape index: {}]   ;;  %s2837_s2 = inlined_call_operand.vmem [shape: f32[1,384], index: 2, kind: input, shape index: {}]   ;;  %s2838_s3 = inlined_call_operand.vmem [shape: f32[112,384], index: 3, kind: output, shape index: {}]  }
   0x1   :  { %s2366_s14 = smov 0   ;;  %s2368_s15 = smov 0  }
   0x2   :  { %s2370_s16 = smov 0  }
   0x3 LB: > { %s25_s17 = sadd.s32 1, %s2332_s15  ;;  %p48_p1 = scmp.ne.s32.totalorder %s2324_s13, %s2320_s12  ;;  %s2336_s16 = sphi %s2370_s16, %s13_s16   ;;  %s2332_s15 = sphi %s2368_s15, %s2842_s15   ;;  %s2328_s14 = sphi %s2366_s14, %s2841_s14   ;;  %s2324_s13 = sphi %s2364_s13, %s2840_s13   ;;  %s2320_s12 = sphi %s2362_s12, %s2839_s12  }
   0x4   : > { %p26_p0 = scmp.ge.s32.totalorder %s25_s17, 6  ;;  %p49_p2 = scmp.eq.s32.totalorder %s2336_s16, 0 }
   0x5   : > { %s41_s19 = sadd.s32 1, %s2324_s13  ;;  %p1850_p5 = scmp.ge.s32.totalorder %s2336_s16, 6 }
   0x6   : > { %s2844_s17 = smov (%p26_p0, %s25_s17), 0  ;;  %p50_p3 = por %p49_p2, %p48_p1 }
   0x7   : > { %s37_s18 = ssub.s32 %s2332_s15, %s2844_s17  ;;  %164 = sbr.rel (%p1850_p5) target bundleno = 35 (0x23), region = 20 }
   0x8   : > { %p39_p4 = scmp.eq.s32.totalorder %s37_s18, 0 }
   0xa   : > { %s2397_s20 = scalar_select %p39_p4, %s2324_s13, %s41_s19  }
   0xe   : > { %167 = sbr.rel (!%p50_p3) target bundleno = 35 (0x23), region = 24  ;;  %s169_s21 = sand.u32 (%p50_p3), 1, %s2324_s13  }
   0xf   : > { %s1981_s22 = smul.u32 (%p50_p3), 12, %s2332_s15 }
  0x10   : > { %s2127_s23 = smul.u32 (%p50_p3), 168, %s169_s21 }
  0x11   : > { %s2405_s26 = scalar_lea.vmem (%p50_p3), %s2835_s0, %s1981_s22 }
  0x12   : > { %v192_v0 = vld [vmem:[%s2405_s26] sm:$0xff] (%p50_p3)  ;;  %v194_v1 = vld [vmem:[%s2405_s26 + $0x48] sm:$0xff] (%p50_p3)  ;;  %v196_v2 = vld [vmem:[%s2405_s26 + $0x90] sm:$0xff] (%p50_p3)  ;;  %s2410_s27 = scalar_lea.vmem (%p50_p3), [#allocation3], %s2127_s23 }
  0x13   : > { %193 = vst [vmem:[%s2410_s27] sm:$0xff] (%p50_p3), %v192_v0  ;;  %195 = vst [vmem:[%s2410_s27 + $0xc] sm:$0xff] (%p50_p3), %v194_v1  ;;  %v198_v3 = vld [vmem:[%s2405_s26 + $0xd8] sm:$0xff] (%p50_p3)  ;;  %v200_v4 = vld [vmem:[%s2405_s26 + $0x120] sm:$0xff] (%p50_p3) }
  0x14   : > { %197 = vst [vmem:[%s2410_s27 + $0x18] sm:$0xff] (%p50_p3), %v196_v2  ;;  %v202_v5 = vld [vmem:[%s2405_s26 + $0x168] sm:$0xff] (%p50_p3)  ;;  %199 = vst [vmem:[%s2410_s27 + $0x24] sm:$0xff] (%p50_p3), %v198_v3  ;;  %v204_v6 = vld [vmem:[%s2405_s26 + $0x1b0] sm:$0xff] (%p50_p3) }
  0x15   : > { %201 = vst [vmem:[%s2410_s27 + $0x30] sm:$0xff] %v200_v4  ;;  %203 = vst [vmem:[%s2410_s27 + $0x3c] sm:$0xff] %v202_v5  ;;  %v206_v7 = vld [vmem:[%s2405_s26 + $0x1f8] sm:$0xff]  ;;  %v208_v8 = vld [vmem:[%s2405_s26 + $0x240] sm:$0xff] }
  0x16   : > { %205 = vst [vmem:[%s2410_s27 + $0x48] sm:$0xff] %v204_v6  ;;  %207 = vst [vmem:[%s2410_s27 + $0x54] sm:$0xff] %v206_v7  ;;  %v210_v9 = vld [vmem:[%s2405_s26 + $0x288] sm:$0xff]  ;;  %v212_v10 = vld [vmem:[%s2405_s26 + $0x2d0] sm:$0xff] }
  0x17   : > { %209 = vst [vmem:[%s2410_s27 + $0x60] sm:$0xff] %v208_v8  ;;  %v214_v11 = vld [vmem:[%s2405_s26 + $0x318] sm:$0xff]  ;;  %211 = vst [vmem:[%s2410_s27 + $0x6c] sm:$0xff] %v210_v9  ;;  %v216_v12 = vld [vmem:[%s2405_s26 + $0x360] sm:$0xff] }
  0x18   : > { %213 = vst [vmem:[%s2410_s27 + $0x78] sm:$0xff] %v212_v10  ;;  %215 = vst [vmem:[%s2410_s27 + $0x84] sm:$0xff] %v214_v11  ;;  %v218_v13 = vld [vmem:[%s2405_s26 + $0x3a8] sm:$0xff]  ;;  %v1854_v15 = vld [vmem:[%s2405_s26 + $0x50] sm:$0xf] }
  0x19   : > { %v1852_v14 = vld [vmem:[%s2405_s26 + $0x8] sm:$0xf]  ;;  %217 = vst [vmem:[%s2410_s27 + $0x90] sm:$0xff] %v216_v12  ;;  %219 = vst [vmem:[%s2410_s27 + $0x9c] sm:$0xff] %v218_v13  ;;  %v1856_v16 = vld [vmem:[%s2405_s26 + $0x98] sm:$0xf] }
  0x1a   : > { %1853 = vst [vmem:[%s2410_s27 + $0x8] sm:$0xf] %v1852_v14  ;;  %v1858_v17 = vld [vmem:[%s2405_s26 + $0xe0] sm:$0xf]  ;;  %1855 = vst [vmem:[%s2410_s27 + $0x14] sm:$0xf] %v1854_v15 }
  0x1b   : > { %1857 = vst [vmem:[%s2410_s27 + $0x20] sm:$0xf] %v1856_v16  ;;  %1859 = vst [vmem:[%s2410_s27 + $0x2c] sm:$0xf] %v1858_v17  ;;  %v1860_v18 = vld [vmem:[%s2405_s26 + $0x128] sm:$0xf] }
  0x1c   : > { %v1862_v19 = vld [vmem:[%s2405_s26 + $0x170] sm:$0xf]  ;;  %v1864_v20 = vld [vmem:[%s2405_s26 + $0x1b8] sm:$0xf]  ;;  %1861 = vst [vmem:[%s2410_s27 + $0x38] sm:$0xf] %v1860_v18 }
  0x1d   : > { %1863 = vst [vmem:[%s2410_s27 + $0x44] sm:$0xf] %v1862_v19  ;;  %1865 = vst [vmem:[%s2410_s27 + $0x50] sm:$0xf] %v1864_v20  ;;  %v1866_v21 = vld [vmem:[%s2405_s26 + $0x200] sm:$0xf] }
  0x1e   : > { %v1868_v22 = vld [vmem:[%s2405_s26 + $0x248] sm:$0xf]  ;;  %v1870_v23 = vld [vmem:[%s2405_s26 + $0x290] sm:$0xf]  ;;  %1867 = vst [vmem:[%s2410_s27 + $0x5c] sm:$0xf] %v1866_v21 }
  0x1f   : > { %1869 = vst [vmem:[%s2410_s27 + $0x68] sm:$0xf] %v1868_v22  ;;  %1871 = vst [vmem:[%s2410_s27 + $0x74] sm:$0xf] %v1870_v23  ;;  %v1872_v24 = vld [vmem:[%s2405_s26 + $0x2d8] sm:$0xf] }
  0x20   : > { %v1874_v25 = vld [vmem:[%s2405_s26 + $0x320] sm:$0xf]  ;;  %v1876_v26 = vld [vmem:[%s2405_s26 + $0x368] sm:$0xf]  ;;  %1873 = vst [vmem:[%s2410_s27 + $0x80] sm:$0xf] %v1872_v24 }
  0x21   : > { %1875 = vst [vmem:[%s2410_s27 + $0x8c] sm:$0xf] %v1874_v25  ;;  %1877 = vst [vmem:[%s2410_s27 + $0x98] sm:$0xf] %v1876_v26  ;;  %v1878_v27 = vld [vmem:[%s2405_s26 + $0x3b0] sm:$0xf] }
  0x22   : > { %1879 = vst [vmem:[%s2410_s27 + $0xa4] sm:$0xf] %v1878_v27 }
  0x23 PF: > { %p1880_p6 = scmp.ge.s32.totalorder %s2336_s16, 1  ;;  %p274_p7 = scmp.lt.s32.totalorder %s2336_s16, 7 }
  0x25   : > { %p275_p8 = pnand %p1880_p6, %p274_p7 }
  0x26   : > { %s281_s28 = sand.u32 (!%p275_p8), 1, %s2320_s12   ;;  %s325_s29 = smul.u32 (!%p275_p8), 48, %s2328_s14 }
  0x27   : > { %278 = sbr.rel (%p275_p8) target bundleno = 469 (0x1d5), region = 54  ;;  %p1882_p10 = scmp.ne.s32.totalorder (!%p275_p8), %s2328_s14, 0 }
  0x28   : > { %s2128_s30 = smul.u32 (!%p275_p8), 168, %s281_s28  ;;  %p327_p9 = scmp.lt.s32.totalorder (!%p275_p8), %s325_s29, 287 }
  0x2a   : > { %s2474_s8 = scalar_lea.vmem (!%p275_p8), [#allocation3], %s2128_s30 }
  0x2e   : > { %s2846_s29 = smov (!%p327_p9, %s325_s29), 287  ;;  %358 = sbr.rel (%p1882_p10) target bundleno = 69 (0x45), region = 62 }
  0x2f   : > { %s2129_s4 = smul.u32 12, %s2846_s29  ;;  %v2338_v28 = vmov (!%p1882_p10), 0.0  }
  0x30   : > { %359 = vst [vmem:[#allocation2] sm:$0xff] (!%p1882_p10), %v2338_v28  ;;  %360 = vst [vmem:[#allocation2 + $0x8] sm:$0xff] (!%p1882_p10), %v2338_v28 }
  0x31   : > { %s2472_s7 = scalar_lea.vmem %s2836_s1, %s2129_s4  ;;  %361 = vst [vmem:[#allocation2 + $0x10] sm:$0xff] (!%p1882_p10), %v2338_v28  ;;  %362 = vst [vmem:[#allocation2 + $0x18] sm:$0xff] (!%p1882_p10), %v2338_v28 }
  0x32   : > { %363 = vst [vmem:[#allocation2 + $0x20] sm:$0xff] (!%p1882_p10), %v2338_v28  ;;  %364 = vst [vmem:[#allocation2 + $0x28] sm:$0xff] (!%p1882_p10), %v2338_v28 }
  0x33   : > { %365 = vst [vmem:[#allocation2 + $0x30] sm:$0xff] (!%p1882_p10), %v2338_v28  ;;  %366 = vst [vmem:[#allocation2 + $0x38] sm:$0xff] (!%p1882_p10), %v2338_v28 }
  0x34   : > { %367 = vst [vmem:[#allocation2 + $0x40] sm:$0xff] (!%p1882_p10), %v2338_v28  ;;  %368 = vst [vmem:[#allocation2 + $0x48] sm:$0xff] (!%p1882_p10), %v2338_v28 }
  0x35   : > { %369 = vst [vmem:[#allocation2 + $0x50] sm:$0xff] %v2338_v28  ;;  %370 = vst [vmem:[#allocation2 + $0x58] sm:$0xff] %v2338_v28 }
  0x36   : > { %371 = vst [vmem:[#allocation2 + $0x60] sm:$0xff] %v2338_v28  ;;  %372 = vst [vmem:[#allocation2 + $0x68] sm:$0xff] %v2338_v28 }
  0x37   : > { %373 = vst [vmem:[#allocation2 + $0x70] sm:$0xff] %v2338_v28  ;;  %374 = vst [vmem:[#allocation2 + $0x78] sm:$0xff] %v2338_v28 }
  0x38   : > { %375 = vst [vmem:[#allocation2 + $0x80] sm:$0xff] %v2338_v28  ;;  %376 = vst [vmem:[#allocation2 + $0x88] sm:$0xff] %v2338_v28 }
  0x39   : > { %377 = vst [vmem:[#allocation2 + $0x90] sm:$0xff] %v2338_v28  ;;  %378 = vst [vmem:[#allocation2 + $0x98] sm:$0xff] %v2338_v28 }
  0x3a   : > { %379 = vst [vmem:[#allocation2 + $0xa0] sm:$0xff] %v2338_v28  ;;  %380 = vst [vmem:[#allocation2 + $0xa8] sm:$0xff] %v2338_v28 }
  0x3b   : > { %381 = vst [vmem:[#allocation2 + $0xb0] sm:$0xff] %v2338_v28  ;;  %382 = vst [vmem:[#allocation2 + $0xb8] sm:$0xff] %v2338_v28 }
  0x3c   : > { %383 = vst [vmem:[#allocation2 + $0xc0] sm:$0xff] %v2338_v28  ;;  %384 = vst [vmem:[#allocation2 + $0xc8] sm:$0xff] %v2338_v28 }
  0x3d   : > { %385 = vst [vmem:[#allocation2 + $0xd0] sm:$0xff] %v2338_v28  ;;  %386 = vst [vmem:[#allocation2 + $0xd8] sm:$0xff] %v2338_v28 }
  0x3e   : > { %387 = vst [vmem:[#allocation2 + $0xe0] sm:$0xff] %v2338_v28  ;;  %388 = vst [vmem:[#allocation2 + $0xe8] sm:$0xff] %v2338_v28 }
  0x3f   : > { %389 = vst [vmem:[#allocation2 + $0xf0] sm:$0xff] %v2338_v28  ;;  %390 = vst [vmem:[#allocation2 + $0xf8] sm:$0xff] %v2338_v28 }
  0x40   : > { %391 = vst [vmem:[#allocation2 + $0x100] sm:$0xff] %v2338_v28  ;;  %392 = vst [vmem:[#allocation2 + $0x108] sm:$0xff] %v2338_v28 }
  0x41   : > { %393 = vst [vmem:[#allocation2 + $0x110] sm:$0xff] %v2338_v28  ;;  %394 = vst [vmem:[#allocation2 + $0x118] sm:$0xff] %v2338_v28 }
  0x42   : > { %395 = vst [vmem:[#allocation2 + $0x120] sm:$0xff] %v2338_v28  ;;  %396 = vst [vmem:[#allocation2 + $0x128] sm:$0xff] %v2338_v28 }
  0x43   : > { %397 = vst [vmem:[#allocation2 + $0x130] sm:$0xff] %v2338_v28  ;;  %398 = vst [vmem:[#allocation2 + $0x138] sm:$0xff] %v2338_v28 }
  0x44   : > { %399 = vst [vmem:[#allocation2 + $0x140] sm:$0xff] %v2338_v28  ;;  %400 = vst [vmem:[#allocation2 + $0x148] sm:$0xff] %v2338_v28 }
  0x45 PF: > { %v2174_v29 = vld [vmem:[%s2472_s7 + $0x4] ss:$12 sps:$4 sm:$0xff]   ;;  %v2176_v30 = vld [vmem:[%s2472_s7 + $0xc8] ss:$12 sps:$4 sm:$0xff]   ;;  %v2177_v31 = vld [vmem:[%s2472_s7] ss:$12 sps:$4 sm:$0xff]  }
  0x46   : > { %1063 = vmatprep.subr.bf16.mxu0 %v2174_v29  ;;  %1982 = vmatprep.subr.bf16.mxu1 %v2176_v30  ;;  %v2178_v32 = vld [vmem:[%s2472_s7 + $0x8] ss:$12 sps:$4 sm:$0xff]   ;;  %v2181_v34 = vld [vmem:[%s2472_s7 + $0xe0] ss:$12 sps:$4 sm:$0xff]   ;;  %v2182_v35 = vld [vmem:[%s2472_s7 + $0x18] ss:$12 sps:$4 sm:$0xff]  }
  0x47   : > { %1064 = vmatpush1.bf16.msra.mxu0 %v2177_v31  ;;  %v2179_v33 = vld [vmem:[%s2472_s7 + $0x1c] ss:$12 sps:$4 sm:$0xff]   ;;  %1983 = vmatpush3.bf16.msra.mxu1 %v2178_v32  ;;  %v2183_v36 = vld [vmem:[%s2472_s7 + $0x20] ss:$12 sps:$4 sm:$0xff]   ;;  %v2186_v38 = vld [vmem:[%s2472_s7 + $0xf8] ss:$12 sps:$4 sm:$0xff]  }
  0x48   : > { %1065 = vmatprep.subr.bf16.mxu0 %v2179_v33  ;;  %1984 = vmatprep.subr.bf16.mxu1 %v2181_v34  ;;  %v2184_v37 = vld [vmem:[%s2472_s7 + $0x34] ss:$12 sps:$4 sm:$0xff]   ;;  %v2187_v39 = vld [vmem:[%s2472_s7 + $0x30] ss:$12 sps:$4 sm:$0xff]   ;;  %v2188_v40 = vld [vmem:[%s2472_s7 + $0x38] ss:$12 sps:$4 sm:$0xff]  }
  0x49   : > { %v2189_v41 = vld [vmem:[%s2472_s7 + $0x4c] ss:$12 sps:$4 sm:$0xff]   ;;  %v2191_v42 = vld [vmem:[%s2472_s7 + $0x110] ss:$12 sps:$4 sm:$0xff]   ;;  %v2192_v43 = vld [vmem:[%s2472_s7 + $0x48] ss:$12 sps:$4 sm:$0xff]  }
  0x4a   : > { %v2193_v44 = vld [vmem:[%s2472_s7 + $0x50] ss:$12 sps:$4 sm:$0xff]   ;;  %v2196_v46 = vld [vmem:[%s2472_s7 + $0x128] ss:$12 sps:$4 sm:$0xff]   ;;  %v2197_v47 = vld [vmem:[%s2472_s7 + $0x60] ss:$12 sps:$4 sm:$0xff]  }
  0x4b   : > { %1066 = vmatpush1.bf16.msra.mxu0 %v2182_v35  ;;  %1985 = vmatpush3.bf16.msra.mxu1 %v2183_v36  ;;  %v2194_v45 = vld [vmem:[%s2472_s7 + $0x64] ss:$12 sps:$4 sm:$0xff]   ;;  %v2198_v48 = vld [vmem:[%s2472_s7 + $0x68] ss:$12 sps:$4 sm:$0xff]   ;;  %v2201_v50 = vld [vmem:[%s2472_s7 + $0x140] ss:$12 sps:$4 sm:$0xff]  }
  0x4c   : > { %1067 = vmatprep.subr.bf16.mxu0 %v2184_v37  ;;  %1986 = vmatprep.subr.bf16.mxu1 %v2186_v38  ;;  %v2199_v49 = vld [vmem:[%s2472_s7 + $0x7c] ss:$12 sps:$4 sm:$0xff]   ;;  %v2202_v51 = vld [vmem:[%s2472_s7 + $0x78] ss:$12 sps:$4 sm:$0xff]   ;;  %v2203_v52 = vld [vmem:[%s2472_s7 + $0x80] ss:$12 sps:$4 sm:$0xff]  }
  0x4d   : > { %v2204_v53 = vld [vmem:[%s2472_s7 + $0x94] ss:$12 sps:$4 sm:$0xff]   ;;  %v2206_v54 = vld [vmem:[%s2472_s7 + $0x158] ss:$12 sps:$4 sm:$0xff]   ;;  %v2207_v55 = vld [vmem:[%s2472_s7 + $0x90] ss:$12 sps:$4 sm:$0xff]  }
  0x4e   : > { %v2208_v56 = vld [vmem:[%s2472_s7 + $0x98] ss:$12 sps:$4 sm:$0xff]   ;;  %v2211_v58 = vld [vmem:[%s2472_s7 + $0x170] ss:$12 sps:$4 sm:$0xff]   ;;  %v2212_v59 = vld [vmem:[%s2472_s7 + $0xa8] ss:$12 sps:$4 sm:$0xff]  }
  0x4f   : > { %1068 = vmatpush1.bf16.msra.mxu0 %v2187_v39  ;;  %1987 = vmatpush3.bf16.msra.mxu1 %v2188_v40  ;;  %v2209_v57 = vld [vmem:[%s2472_s7 + $0xac] ss:$12 sps:$4 sm:$0xff]   ;;  %v2216_v60 = vld [vmem:[%s2474_s8 + $0x4] ss:$12 sps:$4 sm:$0xff]   ;;  %v2217_v62 = vld [vmem:[%s2472_s7 + $0xc4] ss:$12 sps:$4 sm:$0xff]  }
  0x50   : > { %1069 = vmatprep.subr.bf16.mxu0 %v2189_v41  ;;  %1988 = vmatprep.subr.bf16.mxu1 %v2191_v42  ;;  %v2213_v61 = vld [vmem:[%s2472_s7 + $0xb0] ss:$12 sps:$4 sm:$0xff]   ;;  %v2219_v0 = vld [vmem:[%s2472_s7 + $0xc0] ss:$12 sps:$4 sm:$0xff]   ;;  %v2339_v3 = vmov 0.0   ;;  %vm2340_vm0 = vmmov 0  }
  0x51   : > { %1301 = vmatprep.mubr.bf16.mxu1 %v2216_v60  ;;  %v2512_v63 = vld [vmem:[%s2474_s8] ss:$12 sps:$4 sm:$0xff]   ;;  %1095 = vmatprep.mubr.bf16.mxu0 %v2216_v60  ;;  %v2517_v2 = vld [vmem:[%s2474_s8 + $0x1c] ss:$12 sps:$4 sm:$0xff]   ;;  %v2525_v6 = vld [vmem:[%s2474_s8 + $0x18] ss:$12 sps:$4 sm:$0xff]  }
  0x52   : > { %v2220_v1 = vld [vmem:[%s2472_s7 + $0xdc] ss:$12 sps:$4 sm:$0xff]   ;;  %v2222_v4 = vld [vmem:[%s2472_s7 + $0xd8] ss:$12 sps:$4 sm:$0xff]   ;;  %v2225_v5 = vld [vmem:[%s2472_s7 + $0xf4] ss:$12 sps:$4 sm:$0xff]  }
  0x53   : > { %1070 = vmatpush1.bf16.msra.mxu0 %v2192_v43  ;;  %1989 = vmatpush3.bf16.msra.mxu1 %v2193_v44  ;;  %v2228_v7 = vld [vmem:[%s2472_s7 + $0xf0] ss:$12 sps:$4 sm:$0xff]   ;;  %v2229_v8 = vld [vmem:[%s2472_s7 + $0x10c] ss:$12 sps:$4 sm:$0xff]   ;;  %v2247_v10 = vld [vmem:[%s2472_s7 + $0x188] ss:$12 sps:$4 sm:$0xff]  }
  0x54   : > { %1071 = vmatprep.subr.bf16.mxu0 %v2194_v45  ;;  %1990 = vmatprep.subr.bf16.mxu1 %v2196_v46  ;;  %v2530_v9 = vld [vmem:[%s2474_s8 + $0x34] ss:$12 sps:$4 sm:$0xff]   ;;  %v2231_v11 = vld [vmem:[%s2472_s7 + $0x108] ss:$12 sps:$4 sm:$0xff]   ;;  %p1976_p11 = scmp.ne.s32.totalorder %s2328_s14, 5 }
  0x55   : > { %v2234_v12 = vld [vmem:[%s2472_s7 + $0x124] ss:$12 sps:$4 sm:$0xff]   ;;  %v2538_v13 = vld [vmem:[%s2474_s8 + $0x30] ss:$12 sps:$4 sm:$0xff]  }
  0x56   : > { %v2251_v14 = vld [vmem:[%s2472_s7 + $0x1a0] ss:$12 sps:$4 sm:$0xff]   ;;  %v2238_v16 = vld [vmem:[%s2472_s7 + $0x13c] ss:$12 sps:$4 sm:$0xff]   ;;  %v2258_v18 = vld [vmem:[%s2472_s7 + $0x1b8] ss:$12 sps:$4 sm:$0xff]  }
  0x57   : > { %1072 = vmatpush1.bf16.msra.mxu0 %v2197_v47  ;;  %1991 = vmatpush3.bf16.msra.mxu1 %v2198_v48  ;;  %v2237_v15 = vld [vmem:[%s2472_s7 + $0x120] ss:$12 sps:$4 sm:$0xff]   ;;  %v2545_v17 = vld [vmem:[%s2474_s8 + $0x4c] ss:$12 sps:$4 sm:$0xff]  }
  0x58   : > { %1073 = vmatprep.subr.bf16.mxu0 %v2199_v49  ;;  %1992 = vmatprep.subr.bf16.mxu1 %v2201_v50  ;;  %v2240_v19 = vld [vmem:[%s2472_s7 + $0x138] ss:$12 sps:$4 sm:$0xff]   ;;  %v2243_v20 = vld [vmem:[%s2472_s7 + $0x154] ss:$12 sps:$4 sm:$0xff]   ;;  %v2259_v21 = vld [vmem:[%s2472_s7 + $0x1d0] ss:$12 sps:$4 sm:$0xff]  }
  0x59   : > { %v2555_v22 = vld [vmem:[%s2474_s8 + $0x48] ss:$12 sps:$4 sm:$0xff]   ;;  %v2246_v23 = vld [vmem:[%s2472_s7 + $0x150] ss:$12 sps:$4 sm:$0xff]   ;;  %v2266_v26 = vld [vmem:[%s2472_s7 + $0x1e8] ss:$12 sps:$4 sm:$0xff]  }
  0x5a   : > { %v2248_v24 = vld [vmem:[%s2472_s7 + $0x16c] ss:$12 sps:$4 sm:$0xff]   ;;  %v2561_v25 = vld [vmem:[%s2474_s8 + $0x64] ss:$12 sps:$4 sm:$0xff]   ;;  %v2256_v28 = vld [vmem:[%s2472_s7 + $0x184] ss:$12 sps:$4 sm:$0xff]  }
  0x5b   : > { %1074 = vmatpush1.bf16.msra.mxu0 %v2202_v51  ;;  %1993 = vmatpush3.bf16.msra.mxu1 %v2203_v52  ;;  %v2250_v27 = vld [vmem:[%s2472_s7 + $0x168] ss:$12 sps:$4 sm:$0xff]   ;;  %v2267_v29 = vld [vmem:[%s2472_s7 + $0x200] ss:$12 sps:$4 sm:$0xff]   ;;  %v2257_v31 = vld [vmem:[%s2474_s8 + $0x60] ss:$12 sps:$4 sm:$0xff]  }
  0x5c   : > { %1075 = vmatprep.subr.bf16.mxu0 %v2204_v53  ;;  %1994 = vmatprep.subr.bf16.mxu1 %v2206_v54  ;;  %v2254_v30 = vld [vmem:[%s2472_s7 + $0x180] ss:$12 sps:$4 sm:$0xff]   ;;  %v2262_v32 = vld [vmem:[%s2472_s7 + $0x19c] ss:$12 sps:$4 sm:$0xff]   ;;  %v2274_v34 = vld [vmem:[%s2472_s7 + $0x218] ss:$12 sps:$4 sm:$0xff]  }
  0x5d   : > { %v2263_v33 = vld [vmem:[%s2474_s8 + $0x7c] ss:$12 sps:$4 sm:$0xff]   ;;  %v2278_v37 = vld [vmem:[%s2472_s7 + $0x230] ss:$12 sps:$4 sm:$0xff]  }
  0x5e   : > { %v2260_v35 = vld [vmem:[%s2472_s7 + $0x198] ss:$12 sps:$4 sm:$0xff]   ;;  %v2270_v36 = vld [vmem:[%s2472_s7 + $0x1b4] ss:$12 sps:$4 sm:$0xff]   ;;  %v2268_v39 = vld [vmem:[%s2472_s7 + $0x1b0] ss:$12 sps:$4 sm:$0xff]  }
  0x5f   : > { %1076 = vmatpush1.bf16.msra.mxu0 %v2207_v55  ;;  %1995 = vmatpush3.bf16.msra.mxu1 %v2208_v56  ;;  %v2265_v38 = vld [vmem:[%s2474_s8 + $0x78] ss:$12 sps:$4 sm:$0xff]   ;;  %v2271_v40 = vld [vmem:[%s2474_s8 + $0x94] ss:$12 sps:$4 sm:$0xff]   ;;  %v2273_v44 = vld [vmem:[%s2474_s8 + $0x90] ss:$12 sps:$4 sm:$0xff]  }
  0x60   : > { %1077 = vmatprep.subr.bf16.mxu0 %v2209_v57  ;;  %1996 = vmatprep.subr.bf16.mxu1 %v2211_v58  ;;  %v2277_v41 = vld [vmem:[%s2472_s7 + $0x1cc] ss:$12 sps:$4 sm:$0xff]   ;;  %v2275_v42 = vld [vmem:[%s2472_s7 + $0x1c8] ss:$12 sps:$4 sm:$0xff]   ;;  %v2282_v43 = vld [vmem:[%s2472_s7 + $0x1e4] ss:$12 sps:$4 sm:$0xff]  }
  0x61   : > { %v2280_v45 = vld [vmem:[%s2472_s7 + $0x1e0] ss:$12 sps:$4 sm:$0xff]   ;;  %v2286_v46 = vld [vmem:[%s2472_s7 + $0x1fc] ss:$12 sps:$4 sm:$0xff]   ;;  %v2284_v47 = vld [vmem:[%s2472_s7 + $0x1f8] ss:$12 sps:$4 sm:$0xff]  }
  0x62   : > { %v2290_v48 = vld [vmem:[%s2472_s7 + $0x214] ss:$12 sps:$4 sm:$0xff]   ;;  %v2288_v50 = vld [vmem:[%s2472_s7 + $0x210] ss:$12 sps:$4 sm:$0xff]   ;;  %v2294_v51 = vld [vmem:[%s2472_s7 + $0x22c] ss:$12 sps:$4 sm:$0xff]  }
  0x63   : > { %1078 = vmatpush1.bf16.msra.mxu0 %v2212_v59  ;;  %1997 = vmatpush3.bf16.msra.mxu1 %v2213_v61  ;;  %v2279_v49 = vld [vmem:[%s2474_s8 + $0x8] ss:$12 sps:$4 sm:$0xff]   ;;  %v2292_v52 = vld [vmem:[%s2472_s7 + $0x228] ss:$12 sps:$4 sm:$0xff]   ;;  %v2283_v53 = vld [vmem:[%s2474_s8 + $0x20] ss:$12 sps:$4 sm:$0xff]  }
  0x64   : > { %1079 = vmatprep.subr.bf16.mxu0 %v2217_v62  ;;  %2055 = vmatprep.subr.bf16.mxu1 %v2339_v3  ;;  %v2287_v54 = vld [vmem:[%s2474_s8 + $0x38] ss:$12 sps:$4 sm:$0xff]   ;;  %v2291_v55 = vld [vmem:[%s2474_s8 + $0x50] ss:$12 sps:$4 sm:$0xff]   ;;  %v2341_v56 = vmov 0  }
  0x65   : > { %v2295_v57 = vld [vmem:[%s2474_s8 + $0x68] ss:$12 sps:$4 sm:$0xff]   ;;  %v2296_v58 = vld [vmem:[%s2474_s8 + $0x80] ss:$12 sps:$4 sm:$0xff]   ;;  %v2297_v59 = vld [vmem:[%s2474_s8 + $0x98] ss:$12 sps:$4 sm:$0xff]  }
  0x66   : > { %1302 = vmatmul.mubr.bf16.vlgmr.msra.gmra.mrb[0].mxu1 %v2512_v63 }
  0x67   : > { %1080 = vmatpush1.bf16.msra.mxu0 %v2219_v0  ;;  %1309 = vmatprep.mubr.bf16.mxu1 %v2517_v2 }
  0x68   : > { %1081 = vmatprep.subr.bf16.mxu0 %v2220_v1  ;;  %2056 = vmatpush3.bf16.msra.mxu1 %v2247_v10 }
  0x69   : > { %2057 = vmatprep.subr.bf16.mxu1 %v2339_v3 }
  0x6b   : > { %1082 = vmatpush1.bf16.msra.mxu0 %v2222_v4 }
  0x6c   : > { %1083 = vmatprep.subr.bf16.mxu0 %v2225_v5  ;;  %2058 = vmatpush3.bf16.msra.mxu1 %v2251_v14 }
  0x6d   : > { %2059 = vmatprep.subr.bf16.mxu1 %v2339_v3 }
  0x6e   : > { %1310 = vmatmul.mubr.bf16.gmra.mrb[4].mxu1 %v2525_v6 }
  0x6f   : > { %1084 = vmatpush1.bf16.msra.mxu0 %v2228_v7  ;;  %1317 = vmatprep.mubr.bf16.mxu1 %v2530_v9 }
  0x70   : > { %1085 = vmatprep.subr.bf16.mxu0 %v2229_v8  ;;  %2060 = vmatpush3.bf16.msra.mxu1 %v2258_v18 }
  0x71   : > { %2061 = vmatprep.subr.bf16.mxu1 %v2339_v3 }
  0x73   : > { %1086 = vmatpush1.bf16.msra.mxu0 %v2231_v11 }
  0x74   : > { %1087 = vmatprep.subr.bf16.mxu0 %v2234_v12  ;;  %2062 = vmatpush3.bf16.msra.mxu1 %v2259_v21 }
  0x75   : > { %2063 = vmatprep.subr.bf16.mxu1 %v2339_v3 }
  0x76   : > { %1318 = vmatmul.mubr.bf16.gmra.mrb[8].mxu1 %v2538_v13 }
  0x77   : > { %1088 = vmatpush1.bf16.msra.mxu0 %v2237_v15  ;;  %1325 = vmatprep.mubr.bf16.mxu1 %v2545_v17 }
  0x78   : > { %1089 = vmatprep.subr.bf16.mxu0 %v2238_v16  ;;  %2064 = vmatpush3.bf16.msra.mxu1 %v2266_v26 }
  0x79   : > { %2065 = vmatprep.subr.bf16.mxu1 %v2339_v3 }
  0x7b   : > { %1090 = vmatpush1.bf16.msra.mxu0 %v2240_v19 }
  0x7c   : > { %1091 = vmatprep.subr.bf16.mxu0 %v2243_v20  ;;  %2066 = vmatpush3.bf16.msra.mxu1 %v2267_v29 }
  0x7d   : > { %2067 = vmatprep.subr.bf16.mxu1 %v2339_v3 }
  0x7e   : > { %1326 = vmatmul.mubr.bf16.gmra.mrb[12].mxu1 %v2555_v22 }
  0x7f   : > { %1092 = vmatpush1.bf16.msra.mxu0 %v2246_v23  ;;  %1333 = vmatprep.mubr.bf16.mxu1 %v2561_v25 }
  0x80   : > { %1093 = vmatprep.subr.bf16.mxu0 %v2248_v24  ;;  %2068 = vmatpush3.bf16.msra.mxu1 %v2274_v34 }
  0x81   : > { %2069 = vmatprep.subr.bf16.mxu1 %v2339_v3 }
  0x83   : > { %1094 = vmatpush1.bf16.msra.mxu0 %v2250_v27 }
  0x84   : > { %1166 = vmatprep.subr.bf16.mxu0 %v2256_v28  ;;  %2070 = vmatpush3.bf16.msra.mxu1 %v2278_v37 }
  0x86   : > { %1096 = vmatmul.mubr.bf16.vlgmr.msra.gmra.mrb[0].mxu0 %v2512_v63  ;;  %1334 = vmatmul.mubr.bf16.gmra.mrb[16].mxu1 %v2257_v31 }
  0x87   : > { %1167 = vmatpush1.bf16.msra.mxu0 %v2254_v30  ;;  %1105 = vmatprep.mubr.bf16.mxu0 %v2517_v2 }
  0x88   : > { %1168 = vmatprep.subr.bf16.mxu0 %v2262_v32  ;;  %1341 = vmatprep.mubr.bf16.mxu1 %v2263_v33 }
  0x8b   : > { %1169 = vmatpush1.bf16.msra.mxu0 %v2260_v35 }
  0x8c   : > { %1170 = vmatprep.subr.bf16.mxu0 %v2270_v36 }
  0x8e   : > { %1106 = vmatmul.mubr.bf16.gmra.mrb[4].mxu0 %v2525_v6  ;;  %1342 = vmatmul.mubr.bf16.gmra.mrb[20].mxu1 %v2265_v38 }
  0x8f   : > { %1115 = vmatprep.mubr.bf16.mxu0 %v2530_v9  ;;  %1171 = vmatpush1.bf16.msra.mxu0 %v2268_v39 }
  0x90   : > { %1349 = vmatprep.mubr.bf16.mxu1 %v2271_v40  ;;  %1172 = vmatprep.subr.bf16.mxu0 %v2277_v41 }
  0x93   : > { %1173 = vmatpush1.bf16.msra.mxu0 %v2275_v42  ;;  %v406_v42 = vld [vmem:[#allocation2 + $0x28] sm:$0xff] }
  0x94   : > { %1174 = vmatprep.subr.bf16.mxu0 %v2282_v43 }
  0x96   : > { %1116 = vmatmul.mubr.bf16.gmra.mrb[8].mxu0 %v2538_v13  ;;  %1350 = vmatmul.mubr.bf16.gmra.mrb[24].mxu1 %v2273_v44 }
  0x97   : > { %1125 = vmatprep.mubr.bf16.mxu0 %v2545_v17  ;;  %2071 = vmatprep.mubr.msk.bf16.mxu1 %vm2340_vm0, %v2339_v3 }
  0x98   : > { %1175 = vmatpush1.bf16.msra.mxu0 %v2280_v45 }
  0x99   : > { %1176 = vmatprep.subr.bf16.mxu0 %v2286_v46 }
  0x9c   : > { %1177 = vmatpush1.bf16.msra.mxu0 %v2284_v47 }
  0x9d   : > { %1178 = vmatprep.subr.bf16.mxu0 %v2290_v48  ;;  %v409_v48 = vld [vmem:[#allocation2 + $0x40] sm:$0xff] }
  0x9e   : > { %1126 = vmatmul.mubr.bf16.gmra.mrb[12].mxu0 %v2555_v22  ;;  %2072 = vmatmul.mubr.bf16.vlgmr.msra.gmra.mrb[28].mxu1 %v2279_v49 }
  0x9f   : > { %1135 = vmatprep.mubr.bf16.mxu0 %v2561_v25  ;;  %2075 = vmatprep.mubr.msk.bf16.mxu1 %vm2340_vm0, %v2339_v3 }
  0xa0   : > { %1179 = vmatpush1.bf16.msra.mxu0 %v2288_v50 }
  0xa1   : > { %1180 = vmatprep.subr.bf16.mxu0 %v2294_v51 }
  0xa4   : > { %1181 = vmatpush1.bf16.msra.mxu0 %v2292_v52  ;;  %v412_v52 = vld [vmem:[#allocation2 + $0x58] sm:$0xff] }
  0xa6   : > { %1136 = vmatmul.mubr.bf16.gmra.mrb[16].mxu0 %v2257_v31  ;;  %2076 = vmatmul.mubr.bf16.gmra.mrb[32].mxu1 %v2283_v53 }
  0xa7   : > { %1145 = vmatprep.mubr.bf16.mxu0 %v2263_v33  ;;  %2079 = vmatprep.mubr.msk.bf16.mxu1 %vm2340_vm0, %v2339_v3 }
  0xae   : > { %1146 = vmatmul.mubr.bf16.gmra.mrb[20].mxu0 %v2265_v38  ;;  %2080 = vmatmul.mubr.bf16.gmra.mrb[36].mxu1 %v2287_v54  ;;  %v403_v38 = vld [vmem:[#allocation2 + $0x10] sm:$0xff] }
  0xaf   : > { %1155 = vmatprep.mubr.bf16.mxu0 %v2271_v40  ;;  %2083 = vmatprep.mubr.msk.bf16.mxu1 %vm2340_vm0, %v2339_v3 }
  0xb6   : > { %1156 = vmatmul.mubr.bf16.gmra.mrb[24].mxu0 %v2273_v44  ;;  %2084 = vmatmul.mubr.bf16.gmra.mrb[40].mxu1 %v2291_v55 }
  0xb7   : > { %1198 = vmatprep.mubr.bf16.mxu0 %v2341_v56  ;;  %2087 = vmatprep.mubr.msk.bf16.mxu1 %vm2340_vm0, %v2339_v3 }
  0xbe   : > { %1199 = vmatmul.mubr.bf16.vlgmr.msra.gmra.mrb[0].mxu0 %v2279_v49  ;;  %2088 = vmatmul.mubr.bf16.gmra.mrb[44].mxu1 %v2295_v57 }
  0xbf   : > { %1208 = vmatprep.mubr.bf16.mxu0 %v2341_v56  ;;  %2091 = vmatprep.mubr.msk.bf16.mxu1 %vm2340_vm0, %v2339_v3 }
  0xc6   : > { %1209 = vmatmul.mubr.bf16.gmra.mrb[4].mxu0 %v2283_v53  ;;  %2092 = vmatmul.mubr.bf16.gmra.mrb[48].mxu1 %v2296_v58 }
  0xc7   : > { %1218 = vmatprep.mubr.bf16.mxu0 %v2341_v56  ;;  %2095 = vmatprep.mubr.msk.bf16.mxu1 %vm2340_vm0, %v2339_v3 }
  0xce   : > { %1219 = vmatmul.mubr.bf16.gmra.mrb[8].mxu0 %v2287_v54  ;;  %2096 = vmatmul.mubr.bf16.gmra.mrb[52].mxu1 %v2297_v59 }
  0xcf   : > { %1228 = vmatprep.mubr.bf16.mxu0 %v2341_v56 }
  0xd6   : > { %1229 = vmatmul.mubr.bf16.gmra.mrb[12].mxu0 %v2291_v55 }
  0xd7   : > { %1238 = vmatprep.mubr.bf16.mxu0 %v2341_v56 }
  0xde   : > { %1239 = vmatmul.mubr.bf16.gmra.mrb[16].mxu0 %v2295_v57 }
  0xdf   : > { %1248 = vmatprep.mubr.bf16.mxu0 %v2341_v56 }
  0xe6   : > { %1249 = vmatmul.mubr.bf16.gmra.mrb[20].mxu0 %v2296_v58  ;;  %v415_v58 = vld [vmem:[#allocation2 + $0x70] sm:$0xff] }
  0xe7   : > { %1258 = vmatprep.mubr.bf16.mxu0 %v2341_v56 }
  0xee   : > { %1259 = vmatmul.mubr.bf16.gmra.mrb[24].mxu0 %v2297_v59 }
 0x139   : > { %v1998_v60 = vpop.f32.mrb[0].mxu1 }
 0x13a   : > { %v1999_v61 = vpop.f32.mrb[1].mxu1 }
 0x13b   : > { %v2000_v62 = vadd.f32 %v1999_v61, %v1998_v60  ;;  %v2001_v63 = vpop.f32.mrb[2].mxu1 }
 0x13c   : > { %v2002_v0 = vpop.f32.mrb[3].mxu1 }
 0x13d   : > { %v2003_v1 = vadd.f32 %v2002_v0, %v2001_v63 }
 0x141   : > { %v2004_v2 = vpop.f32.mrb[4].mxu1 }
 0x142   : > { %v2005_v4 = vpop.f32.mrb[5].mxu1 }
 0x143   : > { %v2006_v3 = vadd.f32 %v2005_v4, %v2004_v2  ;;  %v2007_v5 = vpop.f32.mrb[6].mxu1 }
 0x144   : > { %v2008_v6 = vpop.f32.mrb[7].mxu1 }
 0x145   : > { %v2009_v7 = vadd.f32 %v2008_v6, %v2007_v5 }
 0x149   : > { %v2010_v8 = vpop.f32.mrb[8].mxu1 }
 0x14a   : > { %v2011_v9 = vpop.f32.mrb[9].mxu1 }
 0x14b   : > { %v2012_v10 = vadd.f32 %v2011_v9, %v2010_v8  ;;  %v2013_v11 = vpop.f32.mrb[10].mxu1  ;;  %v424_v8 = vld [vmem:[#allocation2 + $0xb8] sm:$0xff] }
 0x14c   : > { %v2014_v12 = vpop.f32.mrb[11].mxu1 }
 0x14d   : > { %v2015_v13 = vadd.f32 %v2014_v12, %v2013_v11 }
 0x151   : > { %v2016_v14 = vpop.f32.mrb[12].mxu1 }
 0x152   : > { %v2017_v15 = vpop.f32.mrb[13].mxu1 }
 0x153   : > { %v2018_v16 = vadd.f32 %v2017_v15, %v2016_v14  ;;  %v2019_v17 = vpop.f32.mrb[14].mxu1  ;;  %v401_v15 = vld [vmem:[#allocation2] sm:$0xff] }
 0x154   : > { %v2020_v18 = vpop.f32.mrb[15].mxu1 }
 0x155   : > { %v2021_v19 = vadd.f32 %v2020_v18, %v2019_v17  ;;  %v402_v17 = vld [vmem:[#allocation2 + $0x8] sm:$0xff] }
 0x159   : > { %v2022_v20 = vpop.f32.mrb[16].mxu1 }
 0x15a   : > { %v2023_v21 = vpop.f32.mrb[17].mxu1 }
 0x15b   : > { %v2624_v22 = vadd.f32 %v2023_v21, %v2022_v20  ;;  %v2025_v23 = vpop.f32.mrb[18].mxu1  ;;  %v427_v21 = vld [vmem:[#allocation2 + $0xd0] sm:$0xff] }
 0x15c   : > { %v2026_v24 = vpop.f32.mrb[19].mxu1 }
 0x15d   : > { %v2626_v25 = vadd.f32 %v2026_v24, %v2025_v23 }
 0x161   : > { %v2028_v26 = vpop.f32.mrb[20].mxu1 }
 0x162   : > { %v2029_v27 = vpop.f32.mrb[21].mxu1 }
 0x163   : > { %v2628_v28 = vadd.f32 %v2029_v27, %v2028_v26  ;;  %v2031_v29 = vpop.f32.mrb[22].mxu1  ;;  %v405_v26 = vld [vmem:[#allocation2 + $0x20] sm:$0xff] }
 0x164   : > { %v2032_v30 = vpop.f32.mrb[23].mxu1 }
 0x165   : > { %v2630_v31 = vadd.f32 %v2032_v30, %v2031_v29 }
 0x169   : > { %v2034_v32 = vpop.f32.mrb[24].mxu1 }
 0x16a   : > { %v2035_v33 = vpop.f32.mrb[25].mxu1 }
 0x16b   : > { %v2632_v34 = vadd.f32 %v2035_v33, %v2034_v32  ;;  %v2037_v35 = vpop.f32.mrb[26].mxu1  ;;  %v430_v32 = vld [vmem:[#allocation2 + $0xe8] sm:$0xff] }
 0x16c   : > { %v2038_v36 = vpop.f32.mrb[27].mxu1 }
 0x16d   : > { %v2634_v37 = vadd.f32 %v2038_v36, %v2037_v35 }
 0x171   : > { %v1392_v39 = vpop.f32.mrb[28].mxu1 }
 0x172   : > { %v1393_v40 = vadd.f32 %v2000_v62, %v1392_v39  ;;  %v2073_v41 = vpop.f32.mrb[29].mxu1  ;;  %v418_v62 = vld [vmem:[#allocation2 + $0x88] sm:$0xff] }
 0x173   : > { %v1395_v43 = vpop.f32.mrb[30].mxu1 }
 0x174   : > { %v1449_v44 = vadd.f32 %v1393_v40, %v403_v38  ;;  %v1396_v45 = vadd.f32 %v2003_v1, %v1395_v43  ;;  %v2074_v46 = vpop.f32.mrb[31].mxu1 }
 0x175   : > { %v433_v46 = vld [vmem:[#allocation2 + $0x100] sm:$0xff] }
 0x176   : > { %1491 = vst [vmem:[#allocation2 + $0x10] sm:$0xff] %v1449_v44  ;;  %v1452_v47 = vadd.f32 %v1396_v45, %v406_v42  ;;  %v407_v42 = vld [vmem:[#allocation2 + $0x30] sm:$0xff]  ;;  %v410_v44 = vld [vmem:[#allocation2 + $0x48] sm:$0xff] }
 0x178   : > { %1494 = vst [vmem:[#allocation2 + $0x28] sm:$0xff] %v1452_v47 }
 0x179   : > { %v1400_v49 = vpop.f32.mrb[32].mxu1 }
 0x17a   : > { %v1401_v50 = vadd.f32 %v2006_v3, %v1400_v49  ;;  %v2077_v51 = vpop.f32.mrb[33].mxu1  ;;  %v421_v3 = vld [vmem:[#allocation2 + $0xa0] sm:$0xff]  ;;  %v411_v49 = vld [vmem:[#allocation2 + $0x50] sm:$0xff] }
 0x17b   : > { %v1403_v53 = vpop.f32.mrb[34].mxu1 }
 0x17c   : > { %v1455_v54 = vadd.f32 %v1401_v50, %v409_v48  ;;  %v1404_v55 = vadd.f32 %v2009_v7, %v1403_v53  ;;  %v2078_v56 = vpop.f32.mrb[35].mxu1 }
 0x17e   : > { %1497 = vst [vmem:[#allocation2 + $0x40] sm:$0xff] %v1455_v54  ;;  %v1458_v57 = vadd.f32 %v1404_v55, %v412_v52  ;;  %v436_v54 = vld [vmem:[#allocation2 + $0x118] sm:$0xff] }
 0x180   : > { %1500 = vst [vmem:[#allocation2 + $0x58] sm:$0xff] %v1458_v57 }
 0x181   : > { %v1408_v59 = vpop.f32.mrb[36].mxu1 }
 0x182   : > { %v1409_v60 = vadd.f32 %v2012_v10, %v1408_v59  ;;  %v2081_v61 = vpop.f32.mrb[37].mxu1 }
 0x183   : > { %v1411_v63 = vpop.f32.mrb[38].mxu1 }
 0x184   : > { %v1461_v0 = vadd.f32 %v1409_v60, %v415_v58  ;;  %v1412_v1 = vadd.f32 %v2015_v13, %v1411_v63  ;;  %v2082_v2 = vpop.f32.mrb[39].mxu1  ;;  %v404_v13 = vld [vmem:[#allocation2 + $0x18] sm:$0xff] }
 0x185   : > { %v439_v2 = vld [vmem:[#allocation2 + $0x130] sm:$0xff] }
 0x186   : > { %1503 = vst [vmem:[#allocation2 + $0x70] sm:$0xff] %v1461_v0  ;;  %v1464_v4 = vadd.f32 %v1412_v1, %v418_v62  ;;  %v413_v62 = vld [vmem:[#allocation2 + $0x60] sm:$0xff]  ;;  %v416_v0 = vld [vmem:[#allocation2 + $0x78] sm:$0xff] }
 0x188   : > { %1506 = vst [vmem:[#allocation2 + $0x88] sm:$0xff] %v1464_v4 }
 0x189   : > { %v1416_v5 = vpop.f32.mrb[40].mxu1 }
 0x18a   : > { %v1417_v6 = vadd.f32 %v2018_v16, %v1416_v5  ;;  %v2085_v7 = vpop.f32.mrb[41].mxu1  ;;  %v417_v5 = vld [vmem:[#allocation2 + $0x80] sm:$0xff] }
 0x18b   : > { %v1419_v9 = vpop.f32.mrb[42].mxu1 }
 0x18c   : > { %v1467_v11 = vadd.f32 %v1417_v6, %v421_v3  ;;  %v1420_v12 = vadd.f32 %v2021_v19, %v1419_v9  ;;  %v2086_v14 = vpop.f32.mrb[43].mxu1 }
 0x18e   : > { %1509 = vst [vmem:[#allocation2 + $0xa0] sm:$0xff] %v1467_v11  ;;  %v1470_v10 = vadd.f32 %v1420_v12, %v424_v8  ;;  %v442_v11 = vld [vmem:[#allocation2 + $0x148] sm:$0xff] }
 0x190   : > { %1512 = vst [vmem:[#allocation2 + $0xb8] sm:$0xff] %v1470_v10 }
 0x191   : > { %v1200_v18 = vpop.f32.mrb[0].mxu0  ;;  %v1424_v23 = vpop.f32.mrb[44].mxu1 }
 0x192   : > { %v1447_v20 = vadd.f32 %v1200_v18, %v401_v15  ;;  %v1202_v24 = vpop.f32.mrb[1].mxu0  ;;  %v1425_v16 = vadd.f32 %v2624_v22, %v1424_v23  ;;  %v2089_v29 = vpop.f32.mrb[45].mxu1  ;;  %v408_v22 = vld [vmem:[#allocation2 + $0x38] sm:$0xff]  ;;  %v422_v23 = vld [vmem:[#allocation2 + $0xa8] sm:$0xff] }
 0x193   : > { %v1448_v27 = vadd.f32 %v1202_v24, %v402_v17  ;;  %v1204_v30 = vpop.f32.mrb[2].mxu0  ;;  %v1427_v33 = vpop.f32.mrb[46].mxu1 }
 0x194   : > { %1489 = vst [vmem:[#allocation2] sm:$0xff] %v1447_v20  ;;  %v1450_v19 = vadd.f32 %v1204_v30, %v404_v13  ;;  %v1206_v35 = vpop.f32.mrb[3].mxu0  ;;  %v1473_v36 = vadd.f32 %v1425_v16, %v427_v21  ;;  %v1428_v38 = vadd.f32 %v2626_v25, %v1427_v33  ;;  %v2090_v40 = vpop.f32.mrb[47].mxu1  ;;  %v419_v20 = vld [vmem:[#allocation2 + $0x90] sm:$0xff]  ;;  %v426_v33 = vld [vmem:[#allocation2 + $0xc8] sm:$0xff] }
 0x195   : > { %1490 = vst [vmem:[#allocation2 + $0x8] sm:$0xff] %v1448_v27  ;;  %v1451_v39 = vadd.f32 %v1206_v35, %v405_v26  ;;  %v423_v16 = vld [vmem:[#allocation2 + $0xb0] sm:$0xff]  ;;  %v429_v40 = vld [vmem:[#allocation2 + $0xe0] sm:$0xff] }
 0x196   : > { %1492 = vst [vmem:[#allocation2 + $0x18] sm:$0xff] %v1450_v19  ;;  %1515 = vst [vmem:[#allocation2 + $0xd0] sm:$0xff] %v1473_v36  ;;  %v1476_v41 = vadd.f32 %v1428_v38, %v430_v32  ;;  %v425_v32 = vld [vmem:[#allocation2 + $0xc0] sm:$0xff]  ;;  %v428_v36 = vld [vmem:[#allocation2 + $0xd8] sm:$0xff] }
 0x197   : > { %1493 = vst [vmem:[#allocation2 + $0x20] sm:$0xff] %v1451_v39 }
 0x198   : > { %1518 = vst [vmem:[#allocation2 + $0xe8] sm:$0xff] %v1476_v41 }
 0x199   : > { %v1210_v43 = vpop.f32.mrb[4].mxu0  ;;  %v1432_v47 = vpop.f32.mrb[48].mxu1 }
 0x19a   : > { %v1453_v45 = vadd.f32 %v1210_v43, %v407_v42  ;;  %v1212_v48 = vpop.f32.mrb[5].mxu0  ;;  %v1433_v50 = vadd.f32 %v2628_v28, %v1432_v47  ;;  %v2093_v25 = vpop.f32.mrb[49].mxu1  ;;  %v414_v28 = vld [vmem:[#allocation2 + $0x68] sm:$0xff] }
 0x19b   : > { %v1454_v51 = vadd.f32 %v1212_v48, %v408_v22  ;;  %v1214_v52 = vpop.f32.mrb[6].mxu0  ;;  %v1435_v55 = vpop.f32.mrb[50].mxu1  ;;  %v434_v48 = vld [vmem:[#allocation2 + $0x108] sm:$0xff] }
 0x19c   : > { %1495 = vst [vmem:[#allocation2 + $0x30] sm:$0xff] %v1453_v45  ;;  %v1456_v53 = vadd.f32 %v1214_v52, %v410_v44  ;;  %v1216_v56 = vpop.f32.mrb[7].mxu0  ;;  %v1479_v57 = vadd.f32 %v1433_v50, %v433_v46  ;;  %v1436_v58 = vadd.f32 %v2630_v31, %v1435_v55  ;;  %v2094_v60 = vpop.f32.mrb[51].mxu1  ;;  %v431_v45 = vld [vmem:[#allocation2 + $0xf0] sm:$0xff]  ;;  %v432_v46 = vld [vmem:[#allocation2 + $0xf8] sm:$0xff] }
 0x19d   : > { %1496 = vst [vmem:[#allocation2 + $0x38] sm:$0xff] %v1454_v51  ;;  %v1457_v59 = vadd.f32 %v1216_v56, %v411_v49  ;;  %v435_v51 = vld [vmem:[#allocation2 + $0x110] sm:$0xff]  ;;  %v437_v56 = vld [vmem:[#allocation2 + $0x120] sm:$0xff] }
 0x19e   : > { %1498 = vst [vmem:[#allocation2 + $0x48] sm:$0xff] %v1456_v53  ;;  %1521 = vst [vmem:[#allocation2 + $0x100] sm:$0xff] %v1479_v57  ;;  %v1482_v61 = vadd.f32 %v1436_v58, %v436_v54  ;;  %v438_v57 = vld [vmem:[#allocation2 + $0x128] sm:$0xff] }
 0x19f   : > { %1499 = vst [vmem:[#allocation2 + $0x50] sm:$0xff] %v1457_v59  ;;  %v440_v59 = vld [vmem:[#allocation2 + $0x138] sm:$0xff] }
 0x1a0   : > { %1524 = vst [vmem:[#allocation2 + $0x118] sm:$0xff] %v1482_v61 }
 0x1a1   : > { %v1220_v63 = vpop.f32.mrb[8].mxu0  ;;  %v1440_v4 = vpop.f32.mrb[52].mxu1 }
 0x1a2   : > { %v1459_v1 = vadd.f32 %v1220_v63, %v413_v62  ;;  %v1222_v3 = vpop.f32.mrb[9].mxu0  ;;  %v1441_v6 = vadd.f32 %v2632_v34, %v1440_v4  ;;  %v2097_v31 = vpop.f32.mrb[53].mxu1  ;;  %v420_v34 = vld [vmem:[#allocation2 + $0x98] sm:$0xff]  ;;  %v441_v62 = vld [vmem:[#allocation2 + $0x140] sm:$0xff]  ;;  %v1579_v4 = vlaneseq (!%p1976_p11) }
 0x1a3   : > { %v1460_v7 = vadd.f32 %v1222_v3, %v414_v28  ;;  %v1224_v8 = vpop.f32.mrb[10].mxu0  ;;  %v1443_v12 = vpop.f32.mrb[54].mxu1  ;;  %v1536_v31 = vld [vmem:[#allocation2 + $0x8] sm:$0xff] (!%p1976_p11) }
 0x1a4   : > { %1501 = vst [vmem:[#allocation2 + $0x60] sm:$0xff] %v1459_v1  ;;  %v1462_v9 = vadd.f32 %v1224_v8, %v416_v0  ;;  %v1226_v14 = vpop.f32.mrb[11].mxu0  ;;  %v1485_v10 = vadd.f32 %v1441_v6, %v439_v2  ;;  %v1444_v15 = vadd.f32 %v2634_v37, %v1443_v12  ;;  %v2098_v18 = vpop.f32.mrb[55].mxu1  ;;  %v1580_v3 = vshrl.u32 (!%p1976_p11), %v1579_v4, 7  ;;  %v1535_v6 = vld [vmem:[#allocation2] sm:$0xff] (!%p1976_p11)  ;;  %v1538_v12 = vld [vmem:[#allocation2 + $0x18] sm:$0xff] (!%p1976_p11) }
 0x1a5   : > { %1502 = vst [vmem:[#allocation2 + $0x68] sm:$0xff] %v1460_v7  ;;  %v1463_v17 = vadd.f32 %v1226_v14, %v417_v5  ;;  %v1577_v5 = vld [vmem:[%s2837_s2] sm:$0x7] (!%p1976_p11)  ;;  %v1540_v18 = vld [vmem:[#allocation2 + $0x28] sm:$0xff] (!%p1976_p11) }
 0x1a6   : > { %1504 = vst [vmem:[#allocation2 + $0x78] sm:$0xff] %v1462_v9  ;;  %1527 = vst [vmem:[#allocation2 + $0x130] sm:$0xff] %v1485_v10  ;;  %v1488_v13 = vadd.f32 %v1444_v15, %v442_v11  ;;  %v1581_v7 = vsub.s32 (!%p1976_p11), 0, %v1580_v3  ;;  %v1585_v8 = vsub.s32 (!%p1976_p11), 1, %v1580_v3  ;;  %v1589_v9 = vsub.s32 (!%p1976_p11), 2, %v1580_v3  ;;  %v1537_v11 = vld [vmem:[#allocation2 + $0x10] sm:$0xff] (!%p1976_p11) }
 0x1a7   : > { %1505 = vst [vmem:[#allocation2 + $0x80] sm:$0xff] %v1463_v17  ;;  %v1539_v14 = vld [vmem:[#allocation2 + $0x20] sm:$0xff] (!%p1976_p11) }
 0x1a8   : > { %1530 = vst [vmem:[#allocation2 + $0x148] sm:$0xff] %v1488_v13  ;;  %v2646_v10 = vrot.slane (!%p1976_p11), %v1577_v5, %v1581_v7  ;;  %v2648_v15 = vrot.slane (!%p1976_p11), %v1577_v5, %v1585_v8  ;;  %v2650_v17 = vrot.slane (!%p1976_p11), %v1577_v5, %v1589_v9  ;;  %v1541_v13 = vld [vmem:[#allocation2 + $0x30] sm:$0xff] (!%p1976_p11) }
 0x1a9   : > { %v1230_v21 = vpop.f32.mrb[12].mxu0  ;;  %v1561_v9 = vld [vmem:[#allocation2 + $0xd0] sm:$0xff] (!%p1976_p11) }
 0x1aa   : > { %v1465_v24 = vadd.f32 %v1230_v21, %v419_v20  ;;  %v1232_v26 = vpop.f32.mrb[13].mxu0  ;;  %v1542_v20 = vld [vmem:[#allocation2 + $0x38] sm:$0xff] (!%p1976_p11)  ;;  %v1595_v21 = vadd.f32 (!%p1976_p11), %v2648_v15, %v1536_v31 }
 0x1ab   : > { %v1466_v27 = vadd.f32 %v1232_v26, %v420_v34  ;;  %v1234_v29 = vpop.f32.mrb[14].mxu0  ;;  %v1594_v34 = vadd.f32 (!%p1976_p11), %v2646_v10, %v1535_v6  ;;  %v1543_v26 = vld [vmem:[#allocation2 + $0x40] sm:$0xff] (!%p1976_p11) }
 0x1ac   : > { %1507 = vst [vmem:[#allocation2 + $0x90] sm:$0xff] %v1465_v24  ;;  %v1468_v30 = vadd.f32 %v1234_v29, %v422_v23  ;;  %v1236_v19 = vpop.f32.mrb[15].mxu0  ;;  %v1596_v23 = vadd.f32 (!%p1976_p11), %v2650_v17, %v1537_v11  ;;  %v1597_v24 = vadd.f32 (!%p1976_p11), %v2646_v10, %v1538_v12  ;;  %v1598_v29 = vadd.f32 (!%p1976_p11), %v2648_v15, %v1539_v14 }
 0x1ad   : > { %1508 = vst [vmem:[#allocation2 + $0x98] sm:$0xff] %v1466_v27  ;;  %v1469_v37 = vadd.f32 %v1236_v19, %v423_v16  ;;  %v1544_v16 = vld [vmem:[#allocation2 + $0x48] sm:$0xff] (!%p1976_p11)  ;;  %v1545_v27 = vld [vmem:[#allocation2 + $0x50] sm:$0xff] (!%p1976_p11)  ;;  %v1600_v19 = vadd.f32 (!%p1976_p11), %v2646_v10, %v1541_v13 }
 0x1ae   : > { %1510 = vst [vmem:[#allocation2 + $0xa8] sm:$0xff] %v1468_v30  ;;  %v1599_v30 = vadd.f32 (!%p1976_p11), %v2650_v17, %v1540_v18 }
 0x1af   : > { %1511 = vst [vmem:[#allocation2 + $0xb0] sm:$0xff] %v1469_v37  ;;  %v1601_v37 = vadd.f32 (!%p1976_p11), %v2648_v15, %v1542_v20 }
 0x1b1   : > { %v1240_v35 = vpop.f32.mrb[16].mxu0 }
 0x1b2   : > { %v1471_v38 = vadd.f32 %v1240_v35, %v425_v32  ;;  %v1242_v39 = vpop.f32.mrb[17].mxu0  ;;  %v1546_v32 = vld [vmem:[#allocation2 + $0x58] sm:$0xff] (!%p1976_p11)  ;;  %v1548_v35 = vld [vmem:[#allocation2 + $0x68] sm:$0xff] (!%p1976_p11) }
 0x1b3   : > { %v1472_v41 = vadd.f32 %v1242_v39, %v426_v33  ;;  %v1244_v42 = vpop.f32.mrb[18].mxu0  ;;  %v1547_v33 = vld [vmem:[#allocation2 + $0x60] sm:$0xff] (!%p1976_p11)  ;;  %v1638_v39 = vmax.f32 (!%p1976_p11), %v1596_v23, 0.0 }
 0x1b4   : > { %1513 = vst [vmem:[#allocation2 + $0xc0] sm:$0xff] %v1471_v38  ;;  %v1474_v22 = vadd.f32 %v1244_v42, %v428_v36  ;;  %v1246_v43 = vpop.f32.mrb[19].mxu0  ;;  %v1636_v36 = vmax.f32 (!%p1976_p11), %v1594_v34, 0.0  ;;  %v1637_v38 = vmax.f32 (!%p1976_p11), %v1595_v21, 0.0  ;;  %v1550_v42 = vld [vmem:[#allocation2 + $0x78] sm:$0xff] (!%p1976_p11)  ;;  %v1564_v34 = vld [vmem:[#allocation2 + $0xe8] sm:$0xff] (!%p1976_p11) }
 0x1b5   : > { %1514 = vst [vmem:[#allocation2 + $0xc8] sm:$0xff] %v1472_v41  ;;  %v1475_v44 = vadd.f32 %v1246_v43, %v429_v40  ;;  %v1639_v40 = vmax.f32 (!%p1976_p11), %v1597_v24, 0.0  ;;  %v1549_v41 = vld [vmem:[#allocation2 + $0x70] sm:$0xff] (!%p1976_p11)  ;;  %v1641_v43 = vmax.f32 (!%p1976_p11), %v1599_v30, 0.0  ;;  %1680 = vst [vmem:[%s2838_s3 + $0x10] sm:$0xff] (!%p1976_p11), %v1638_v39 }
 0x1b6   : > { %1516 = vst [vmem:[#allocation2 + $0xd8] sm:$0xff] %v1474_v22  ;;  %v1640_v22 = vmax.f32 (!%p1976_p11), %v1598_v29, 0.0  ;;  %1678 = vst [vmem:[%s2838_s3] sm:$0xff] (!%p1976_p11), %v1636_v36 }
 0x1b7   : > { %1517 = vst [vmem:[#allocation2 + $0xe0] sm:$0xff] %v1475_v44  ;;  %v1642_v44 = vmax.f32 (!%p1976_p11), %v1600_v19, 0.0  ;;  %1679 = vst [vmem:[%s2838_s3 + $0x8] sm:$0xff] (!%p1976_p11), %v1637_v38  ;;  %v1567_v38 = vld [vmem:[#allocation2 + $0x100] sm:$0xff] (!%p1976_p11) }
 0x1b8   : > { %1681 = vst [vmem:[%s2838_s3 + $0x18] sm:$0xff] (!%p1976_p11), %v1639_v40  ;;  %1682 = vst [vmem:[%s2838_s3 + $0x20] sm:$0xff] (!%p1976_p11), %v1640_v22 }
 0x1b9   : > { %v1250_v47 = vpop.f32.mrb[20].mxu0  ;;  %1683 = vst [vmem:[%s2838_s3 + $0x28] sm:$0xff] (!%p1976_p11), %v1641_v43  ;;  %1684 = vst [vmem:[%s2838_s3 + $0x30] sm:$0xff] (!%p1976_p11), %v1642_v44  ;;  %v1570_v44 = vld [vmem:[#allocation2 + $0x118] sm:$0xff] (!%p1976_p11) }
 0x1ba   : > { %v1477_v49 = vadd.f32 %v1250_v47, %v431_v45  ;;  %v1252_v50 = vpop.f32.mrb[21].mxu0  ;;  %v1643_v45 = vmax.f32 (!%p1976_p11), %v1601_v37, 0.0  ;;  %v1603_v47 = vadd.f32 (!%p1976_p11), %v2646_v10, %v1544_v16 }
 0x1bb   : > { %v1478_v25 = vadd.f32 %v1252_v50, %v432_v46  ;;  %v1254_v52 = vpop.f32.mrb[22].mxu0  ;;  %v1602_v46 = vadd.f32 (!%p1976_p11), %v2650_v17, %v1543_v26  ;;  %v1551_v50 = vld [vmem:[#allocation2 + $0x80] sm:$0xff] (!%p1976_p11) }
 0x1bc   : > { %1519 = vst [vmem:[#allocation2 + $0xf0] sm:$0xff] %v1477_v49  ;;  %v1480_v53 = vadd.f32 %v1254_v52, %v434_v48  ;;  %v1256_v54 = vpop.f32.mrb[23].mxu0  ;;  %v1604_v48 = vadd.f32 (!%p1976_p11), %v2648_v15, %v1545_v27  ;;  %v1605_v49 = vadd.f32 (!%p1976_p11), %v2650_v17, %v1546_v32  ;;  %1685 = vst [vmem:[%s2838_s3 + $0x38] sm:$0xff] (!%p1976_p11), %v1643_v45  ;;  %v1559_v31 = vld [vmem:[#allocation2 + $0xc0] sm:$0xff] (!%p1976_p11)  ;;  %v1560_v8 = vld [vmem:[#allocation2 + $0xc8] sm:$0xff] (!%p1976_p11) }
 0x1bd   : > { %1520 = vst [vmem:[#allocation2 + $0xf8] sm:$0xff] %v1478_v25  ;;  %v1481_v55 = vadd.f32 %v1256_v54, %v435_v51  ;;  %v1552_v51 = vld [vmem:[#allocation2 + $0x88] sm:$0xff] (!%p1976_p11)  ;;  %v1553_v25 = vld [vmem:[#allocation2 + $0x90] sm:$0xff] (!%p1976_p11)  ;;  %v1606_v52 = vadd.f32 (!%p1976_p11), %v2646_v10, %v1547_v33  ;;  %v1608_v54 = vadd.f32 (!%p1976_p11), %v2650_v17, %v1549_v41  ;;  %v1610_v3 = vadd.f32 (!%p1976_p11), %v2648_v15, %v1551_v50  ;;  %v1562_v13 = vld [vmem:[#allocation2 + $0xd8] sm:$0xff] (!%p1976_p11) }
 0x1be   : > { %1522 = vst [vmem:[#allocation2 + $0x108] sm:$0xff] %v1480_v53  ;;  %v1607_v53 = vadd.f32 (!%p1976_p11), %v2648_v15, %v1548_v35  ;;  %v1611_v5 = vadd.f32 (!%p1976_p11), %v2650_v17, %v1552_v51  ;;  %v1612_v6 = vadd.f32 (!%p1976_p11), %v2646_v10, %v1553_v25  ;;  %v1563_v20 = vld [vmem:[#allocation2 + $0xe0] sm:$0xff] (!%p1976_p11)  ;;  %v1618_v32 = vadd.f32 (!%p1976_p11), %v2646_v10, %v1559_v31  ;;  %v1573_v51 = vld [vmem:[#allocation2 + $0x130] sm:$0xff] (!%p1976_p11) }
 0x1bf   : > { %1523 = vst [vmem:[#allocation2 + $0x110] sm:$0xff] %v1481_v55  ;;  %v1609_v55 = vadd.f32 (!%p1976_p11), %v2646_v10, %v1550_v42  ;;  %v1652_v21 = vmax.f32 (!%p1976_p11), %v1610_v3, 0.0  ;;  %v1619_v33 = vadd.f32 (!%p1976_p11), %v2648_v15, %v1560_v8  ;;  %v1620_v35 = vadd.f32 (!%p1976_p11), %v2650_v17, %v1561_v9 }
 0x1c0   : > { %v1653_v23 = vmax.f32 (!%p1976_p11), %v1611_v5, 0.0  ;;  %v1654_v24 = vmax.f32 (!%p1976_p11), %v1612_v6, 0.0  ;;  %v1621_v36 = vadd.f32 (!%p1976_p11), %v2646_v10, %v1562_v13  ;;  %v1622_v41 = vadd.f32 (!%p1976_p11), %v2648_v15, %v1563_v20 }
 0x1c1   : > { %v1260_v58 = vpop.f32.mrb[24].mxu0  ;;  %1534 = sbr.rel (%p1976_p11) target bundleno = 469 (0x1d5), region = 66  ;;  %v1651_v4 = vmax.f32 (!%p1976_p11), %v1609_v55, 0.0  ;;  %1694 = vst [vmem:[%s2838_s3 + $0x80] sm:$0xff] (!%p1976_p11), %v1652_v21  ;;  %v1623_v42 = vadd.f32 (!%p1976_p11), %v2650_v17, %v1564_v34 }
 0x1c2   : > { %v1483_v60 = vadd.f32 %v1260_v58, %v437_v56  ;;  %v1262_v61 = vpop.f32.mrb[25].mxu0  ;;  %v1554_v56 = vld [vmem:[#allocation2 + $0x98] sm:$0xff] (!%p1976_p11)  ;;  %v1556_v58 = vld [vmem:[#allocation2 + $0xa8] sm:$0xff] (!%p1976_p11)  ;;  %1695 = vst [vmem:[%s2838_s3 + $0x88] sm:$0xff] (!%p1976_p11), %v1653_v23  ;;  %1696 = vst [vmem:[%s2838_s3 + $0x90] sm:$0xff] (!%p1976_p11), %v1654_v24  ;;  %v1663_v50 = vmax.f32 (!%p1976_p11), %v1621_v36, 0.0 }
 0x1c3   : > { %v1484_v28 = vadd.f32 %v1262_v61, %v438_v57  ;;  %v1264_v63 = vpop.f32.mrb[26].mxu0  ;;  %v1555_v57 = vld [vmem:[#allocation2 + $0xa0] sm:$0xff] (!%p1976_p11)  ;;  %v1646_v61 = vmax.f32 (!%p1976_p11), %v1604_v48, 0.0  ;;  %v1613_v7 = vadd.f32 (!%p1976_p11), %v2648_v15, %v1554_v56  ;;  %1693 = vst [vmem:[%s2838_s3 + $0x78] sm:$0xff] (!%p1976_p11), %v1651_v4  ;;  %v1615_v12 = vadd.f32 (!%p1976_p11), %v2646_v10, %v1556_v58  ;;  %v1565_v16 = vld [vmem:[#allocation2 + $0xf0] sm:$0xff] (!%p1976_p11) }
 0x1c4   : > { %1525 = vst [vmem:[#allocation2 + $0x120] sm:$0xff] %v1483_v60  ;;  %v1486_v0 = vadd.f32 %v1264_v63, %v440_v59  ;;  %v1266_v1 = vpop.f32.mrb[27].mxu0  ;;  %v1644_v59 = vmax.f32 (!%p1976_p11), %v1602_v46, 0.0  ;;  %v1645_v60 = vmax.f32 (!%p1976_p11), %v1603_v47, 0.0  ;;  %v1558_v63 = vld [vmem:[#allocation2 + $0xb8] sm:$0xff] (!%p1976_p11)  ;;  %v1614_v11 = vadd.f32 (!%p1976_p11), %v2650_v17, %v1555_v57  ;;  %1705 = vst [vmem:[%s2838_s3 + $0xd8] sm:$0xff] (!%p1976_p11), %v1663_v50 }
 0x1c5   : > { %1526 = vst [vmem:[#allocation2 + $0x128] sm:$0xff] %v1484_v28  ;;  %v1487_v2 = vadd.f32 %v1266_v1, %v441_v62  ;;  %v1647_v62 = vmax.f32 (!%p1976_p11), %v1605_v49, 0.0  ;;  %v1557_v28 = vld [vmem:[#allocation2 + $0xb0] sm:$0xff] (!%p1976_p11)  ;;  %v1649_v1 = vmax.f32 (!%p1976_p11), %v1607_v53, 0.0  ;;  %1688 = vst [vmem:[%s2838_s3 + $0x50] sm:$0xff] (!%p1976_p11), %v1646_v61  ;;  %v1617_v18 = vadd.f32 (!%p1976_p11), %v2650_v17, %v1558_v63  ;;  %v1566_v27 = vld [vmem:[#allocation2 + $0xf8] sm:$0xff] (!%p1976_p11) }
 0x1c6   : > { %1528 = vst [vmem:[#allocation2 + $0x138] sm:$0xff] %v1486_v0  ;;  %v1648_v0 = vmax.f32 (!%p1976_p11), %v1606_v52, 0.0  ;;  %1686 = vst [vmem:[%s2838_s3 + $0x40] sm:$0xff] (!%p1976_p11), %v1644_v59  ;;  %v1616_v14 = vadd.f32 (!%p1976_p11), %v2648_v15, %v1557_v28  ;;  %v1655_v26 = vmax.f32 (!%p1976_p11), %v1613_v7, 0.0  ;;  %v1656_v29 = vmax.f32 (!%p1976_p11), %v1614_v11, 0.0  ;;  %v1568_v39 = vld [vmem:[#allocation2 + $0x108] sm:$0xff] (!%p1976_p11) }
 0x1c7   : > { %1529 = vst [vmem:[#allocation2 + $0x140] sm:$0xff] %v1487_v2  ;;  %v1650_v2 = vmax.f32 (!%p1976_p11), %v1608_v54, 0.0  ;;  %1687 = vst [vmem:[%s2838_s3 + $0x48] sm:$0xff] (!%p1976_p11), %v1645_v60  ;;  %v1657_v30 = vmax.f32 (!%p1976_p11), %v1615_v12, 0.0  ;;  %v1659_v37 = vmax.f32 (!%p1976_p11), %v1617_v18, 0.0  ;;  %v1569_v40 = vld [vmem:[#allocation2 + $0x110] sm:$0xff] (!%p1976_p11)  ;;  %v1624_v22 = vadd.f32 (!%p1976_p11), %v2646_v10, %v1565_v16 }
 0x1c8   : > { %1689 = vst [vmem:[%s2838_s3 + $0x58] sm:$0xff] %v1647_v62  ;;  %1690 = vst [vmem:[%s2838_s3 + $0x60] sm:$0xff] %v1648_v0  ;;  %v1658_v19 = vmax.f32 %v1616_v14, 0.0  ;;  %v1625_v43 = vadd.f32 %v2648_v15, %v1566_v27  ;;  %v1660_v47 = vmax.f32 %v1618_v32, 0.0  ;;  %v1661_v48 = vmax.f32 %v1619_v33, 0.0  ;;  %v1576_v0 = vld [vmem:[#allocation2 + $0x148] sm:$0xff] }
 0x1c9   : > { %1691 = vst [vmem:[%s2838_s3 + $0x68] sm:$0xff] %v1649_v1  ;;  %1692 = vst [vmem:[%s2838_s3 + $0x70] sm:$0xff] %v1650_v2  ;;  %v1662_v49 = vmax.f32 %v1620_v35, 0.0  ;;  %v1664_v52 = vmax.f32 %v1622_v41, 0.0  ;;  %v1665_v53 = vmax.f32 %v1623_v42, 0.0  ;;  %v1666_v54 = vmax.f32 %v1624_v22, 0.0 }
 0x1ca   : > { %1697 = vst [vmem:[%s2838_s3 + $0x98] sm:$0xff] %v1655_v26  ;;  %1698 = vst [vmem:[%s2838_s3 + $0xa0] sm:$0xff] %v1656_v29  ;;  %v1667_v55 = vmax.f32 %v1625_v43, 0.0  ;;  %v1626_v56 = vadd.f32 %v2650_v17, %v1567_v38  ;;  %v1627_v57 = vadd.f32 %v2646_v10, %v1568_v39  ;;  %v1628_v58 = vadd.f32 %v2648_v15, %v1569_v40 }
 0x1cb   : > { %1699 = vst [vmem:[%s2838_s3 + $0xa8] sm:$0xff] %v1657_v30  ;;  %1700 = vst [vmem:[%s2838_s3 + $0xb0] sm:$0xff] %v1658_v19  ;;  %v1571_v45 = vld [vmem:[#allocation2 + $0x120] sm:$0xff]  ;;  %v1629_v59 = vadd.f32 %v2650_v17, %v1570_v44  ;;  %v1632_v62 = vadd.f32 %v2650_v17, %v1573_v51  ;;  %v1635_v8 = vadd.f32 %v2650_v17, %v1576_v0 }
 0x1cc   : > { %1701 = vst [vmem:[%s2838_s3 + $0xb8] sm:$0xff] %v1659_v37  ;;  %v1572_v46 = vld [vmem:[#allocation2 + $0x128] sm:$0xff]  ;;  %1702 = vst [vmem:[%s2838_s3 + $0xc0] sm:$0xff] %v1660_v47  ;;  %v1630_v60 = vadd.f32 %v2646_v10, %v1571_v45  ;;  %v1668_v1 = vmax.f32 %v1626_v56, 0.0  ;;  %v1669_v2 = vmax.f32 %v1627_v57, 0.0  ;;  %v1670_v4 = vmax.f32 %v1628_v58, 0.0 }
 0x1cd   : > { %v1574_v25 = vld [vmem:[#allocation2 + $0x138] sm:$0xff]  ;;  %1703 = vst [vmem:[%s2838_s3 + $0xc8] sm:$0xff] %v1661_v48  ;;  %1704 = vst [vmem:[%s2838_s3 + $0xd0] sm:$0xff] %v1662_v49  ;;  %v1631_v61 = vadd.f32 %v2648_v15, %v1572_v46  ;;  %v1671_v3 = vmax.f32 %v1629_v59, 0.0  ;;  %v1674_v7 = vmax.f32 %v1632_v62, 0.0 }
 0x1ce   : > { %1706 = vst [vmem:[%s2838_s3 + $0xe0] sm:$0xff] %v1664_v52  ;;  %1707 = vst [vmem:[%s2838_s3 + $0xe8] sm:$0xff] %v1665_v53  ;;  %v1633_v28 = vadd.f32 %v2646_v10, %v1574_v25  ;;  %v1575_v63 = vld [vmem:[#allocation2 + $0x140] sm:$0xff]  ;;  %v1672_v5 = vmax.f32 %v1630_v60, 0.0 }
 0x1cf   : > { %1708 = vst [vmem:[%s2838_s3 + $0xf0] sm:$0xff] %v1666_v54  ;;  %1709 = vst [vmem:[%s2838_s3 + $0xf8] sm:$0xff] %v1667_v55  ;;  %v1673_v6 = vmax.f32 %v1631_v61, 0.0  ;;  %v1634_v10 = vadd.f32 %v2648_v15, %v1575_v63  ;;  %v1677_v15 = vmax.f32 %v1635_v8, 0.0 }
 0x1d0   : > { %v1675_v31 = vmax.f32 %v1633_v28, 0.0  ;;  %1710 = vst [vmem:[%s2838_s3 + $0x100] sm:$0xff] %v1668_v1  ;;  %1711 = vst [vmem:[%s2838_s3 + $0x108] sm:$0xff] %v1669_v2 }
 0x1d1   : > { %1712 = vst [vmem:[%s2838_s3 + $0x110] sm:$0xff] %v1670_v4  ;;  %1713 = vst [vmem:[%s2838_s3 + $0x118] sm:$0xff] %v1671_v3  ;;  %v1676_v9 = vmax.f32 %v1634_v10, 0.0 }
 0x1d2   : > { %1714 = vst [vmem:[%s2838_s3 + $0x120] sm:$0xff] %v1672_v5  ;;  %1715 = vst [vmem:[%s2838_s3 + $0x128] sm:$0xff] %v1673_v6 }
 0x1d3   : > { %1716 = vst [vmem:[%s2838_s3 + $0x130] sm:$0xff] %v1674_v7  ;;  %1717 = vst [vmem:[%s2838_s3 + $0x138] sm:$0xff] %v1675_v31 }
 0x1d4   : > { %1718 = vst [vmem:[%s2838_s3 + $0x140] sm:$0xff] %v1676_v9  ;;  %1719 = vst [vmem:[%s2838_s3 + $0x148] sm:$0xff] %v1677_v15 }
 0x1d5 PF: > { %s13_s16 = sadd.s32 1, %s2336_s16   ;;  %s2839_s12 = smov %s2324_s13 }
 0x1d6   : > { %p10_p12 = scmp.ge.s32.totalorder %s13_s16, 8   ;;  %s2840_s13 = smov %s2397_s20 }
 0x1d7   : > { %s2841_s14 = smov %s2332_s15  ;;  %s2842_s15 = smov %s2844_s17 }
 0x1d8   :  { %12 = sbr.rel (!%p10_p12) target bundleno = 3 (0x3), region = 113 }

// kernel: reduction_b.9
= control target key start
LH: loop header
LB: loop body
LE: loop exit
PB: predicated region body
PF: predicated region fallthrough
CT: control target
= control target key end

     0   :  { %s1707_s12 = smov 0   ;;  %s1709_s13 = smov 0   ;;  %s2048_s0 = inlined_call_operand.vmem [shape: bf16[112,2304], index: 0, kind: input, shape index: {}]   ;;  %s2049_s1 = inlined_call_operand.vmem [shape: bf16[2304,256], index: 1, kind: input, shape index: {}]   ;;  %s2050_s2 = inlined_call_operand.vmem [shape: f32[1,256], index: 2, kind: input, shape index: {}]   ;;  %s2051_s3 = inlined_call_operand.vmem [shape: f32[112,256], index: 3, kind: output, shape index: {}]  }
   0x1   :  { %s1711_s14 = smov 0   ;;  %s1713_s15 = smov 0  }
   0x2   :  { %s1715_s16 = smov 0  }
   0x3 LB: > { %s25_s17 = sadd.s32 1, %s1679_s15  ;;  %p48_p1 = scmp.ne.s32.totalorder %s1671_s13, %s1667_s12  ;;  %s1683_s16 = sphi %s1715_s16, %s13_s16   ;;  %s1679_s15 = sphi %s1713_s15, %s2055_s15   ;;  %s1675_s14 = sphi %s1711_s14, %s2054_s14   ;;  %s1671_s13 = sphi %s1709_s13, %s2053_s13   ;;  %s1667_s12 = sphi %s1707_s12, %s2052_s12  }
   0x4   : > { %p26_p0 = scmp.ge.s32.totalorder %s25_s17, 6  ;;  %p49_p2 = scmp.eq.s32.totalorder %s1683_s16, 0 }
   0x5   : > { %s41_s19 = sadd.s32 1, %s1671_s13  ;;  %p1363_p5 = scmp.ge.s32.totalorder %s1683_s16, 6 }
   0x6   : > { %s2057_s17 = smov (%p26_p0, %s25_s17), 0  ;;  %p50_p3 = por %p49_p2, %p48_p1 }
   0x7   : > { %s37_s18 = ssub.s32 %s1679_s15, %s2057_s17  ;;  %164 = sbr.rel (%p1363_p5) target bundleno = 35 (0x23), region = 20 }
   0x8   : > { %p39_p4 = scmp.eq.s32.totalorder %s37_s18, 0 }
   0xa   : > { %s1742_s20 = scalar_select %p39_p4, %s1671_s13, %s41_s19  }
   0xe   : > { %167 = sbr.rel (!%p50_p3) target bundleno = 35 (0x23), region = 24  ;;  %s169_s21 = sand.u32 (%p50_p3), 1, %s1671_s13  }
   0xf   : > { %s1471_s22 = smul.u32 (%p50_p3), 12, %s1679_s15 }
  0x10   : > { %s1501_s23 = smul.u32 (%p50_p3), 168, %s169_s21 }
  0x11   : > { %s1750_s26 = scalar_lea.vmem (%p50_p3), %s2048_s0, %s1471_s22 }
  0x12   : > { %v192_v0 = vld [vmem:[%s1750_s26] sm:$0xff] (%p50_p3)  ;;  %v194_v1 = vld [vmem:[%s1750_s26 + $0x48] sm:$0xff] (%p50_p3)  ;;  %v196_v2 = vld [vmem:[%s1750_s26 + $0x90] sm:$0xff] (%p50_p3)  ;;  %s1755_s27 = scalar_lea.vmem (%p50_p3), [#allocation3], %s1501_s23 }
  0x13   : > { %193 = vst [vmem:[%s1755_s27] sm:$0xff] (%p50_p3), %v192_v0  ;;  %195 = vst [vmem:[%s1755_s27 + $0xc] sm:$0xff] (%p50_p3), %v194_v1  ;;  %v198_v3 = vld [vmem:[%s1750_s26 + $0xd8] sm:$0xff] (%p50_p3)  ;;  %v200_v4 = vld [vmem:[%s1750_s26 + $0x120] sm:$0xff] (%p50_p3) }
  0x14   : > { %197 = vst [vmem:[%s1755_s27 + $0x18] sm:$0xff] (%p50_p3), %v196_v2  ;;  %v202_v5 = vld [vmem:[%s1750_s26 + $0x168] sm:$0xff] (%p50_p3)  ;;  %199 = vst [vmem:[%s1755_s27 + $0x24] sm:$0xff] (%p50_p3), %v198_v3  ;;  %v204_v6 = vld [vmem:[%s1750_s26 + $0x1b0] sm:$0xff] (%p50_p3) }
  0x15   : > { %201 = vst [vmem:[%s1755_s27 + $0x30] sm:$0xff] %v200_v4  ;;  %203 = vst [vmem:[%s1755_s27 + $0x3c] sm:$0xff] %v202_v5  ;;  %v206_v7 = vld [vmem:[%s1750_s26 + $0x1f8] sm:$0xff]  ;;  %v208_v8 = vld [vmem:[%s1750_s26 + $0x240] sm:$0xff] }
  0x16   : > { %205 = vst [vmem:[%s1755_s27 + $0x48] sm:$0xff] %v204_v6  ;;  %207 = vst [vmem:[%s1755_s27 + $0x54] sm:$0xff] %v206_v7  ;;  %v210_v9 = vld [vmem:[%s1750_s26 + $0x288] sm:$0xff]  ;;  %v212_v10 = vld [vmem:[%s1750_s26 + $0x2d0] sm:$0xff] }
  0x17   : > { %209 = vst [vmem:[%s1755_s27 + $0x60] sm:$0xff] %v208_v8  ;;  %v214_v11 = vld [vmem:[%s1750_s26 + $0x318] sm:$0xff]  ;;  %211 = vst [vmem:[%s1755_s27 + $0x6c] sm:$0xff] %v210_v9  ;;  %v216_v12 = vld [vmem:[%s1750_s26 + $0x360] sm:$0xff] }
  0x18   : > { %213 = vst [vmem:[%s1755_s27 + $0x78] sm:$0xff] %v212_v10  ;;  %215 = vst [vmem:[%s1755_s27 + $0x84] sm:$0xff] %v214_v11  ;;  %v218_v13 = vld [vmem:[%s1750_s26 + $0x3a8] sm:$0xff]  ;;  %v1367_v15 = vld [vmem:[%s1750_s26 + $0x50] sm:$0xf] }
  0x19   : > { %v1365_v14 = vld [vmem:[%s1750_s26 + $0x8] sm:$0xf]  ;;  %217 = vst [vmem:[%s1755_s27 + $0x90] sm:$0xff] %v216_v12  ;;  %219 = vst [vmem:[%s1755_s27 + $0x9c] sm:$0xff] %v218_v13  ;;  %v1369_v16 = vld [vmem:[%s1750_s26 + $0x98] sm:$0xf] }
  0x1a   : > { %1366 = vst [vmem:[%s1755_s27 + $0x8] sm:$0xf] %v1365_v14  ;;  %v1371_v17 = vld [vmem:[%s1750_s26 + $0xe0] sm:$0xf]  ;;  %1368 = vst [vmem:[%s1755_s27 + $0x14] sm:$0xf] %v1367_v15 }
  0x1b   : > { %1370 = vst [vmem:[%s1755_s27 + $0x20] sm:$0xf] %v1369_v16  ;;  %1372 = vst [vmem:[%s1755_s27 + $0x2c] sm:$0xf] %v1371_v17  ;;  %v1373_v18 = vld [vmem:[%s1750_s26 + $0x128] sm:$0xf] }
  0x1c   : > { %v1375_v19 = vld [vmem:[%s1750_s26 + $0x170] sm:$0xf]  ;;  %v1377_v20 = vld [vmem:[%s1750_s26 + $0x1b8] sm:$0xf]  ;;  %1374 = vst [vmem:[%s1755_s27 + $0x38] sm:$0xf] %v1373_v18 }
  0x1d   : > { %1376 = vst [vmem:[%s1755_s27 + $0x44] sm:$0xf] %v1375_v19  ;;  %1378 = vst [vmem:[%s1755_s27 + $0x50] sm:$0xf] %v1377_v20  ;;  %v1379_v21 = vld [vmem:[%s1750_s26 + $0x200] sm:$0xf] }
  0x1e   : > { %v1381_v22 = vld [vmem:[%s1750_s26 + $0x248] sm:$0xf]  ;;  %v1383_v23 = vld [vmem:[%s1750_s26 + $0x290] sm:$0xf]  ;;  %1380 = vst [vmem:[%s1755_s27 + $0x5c] sm:$0xf] %v1379_v21 }
  0x1f   : > { %1382 = vst [vmem:[%s1755_s27 + $0x68] sm:$0xf] %v1381_v22  ;;  %1384 = vst [vmem:[%s1755_s27 + $0x74] sm:$0xf] %v1383_v23  ;;  %v1385_v24 = vld [vmem:[%s1750_s26 + $0x2d8] sm:$0xf] }
  0x20   : > { %v1387_v25 = vld [vmem:[%s1750_s26 + $0x320] sm:$0xf]  ;;  %v1389_v26 = vld [vmem:[%s1750_s26 + $0x368] sm:$0xf]  ;;  %1386 = vst [vmem:[%s1755_s27 + $0x80] sm:$0xf] %v1385_v24 }
  0x21   : > { %1388 = vst [vmem:[%s1755_s27 + $0x8c] sm:$0xf] %v1387_v25  ;;  %1390 = vst [vmem:[%s1755_s27 + $0x98] sm:$0xf] %v1389_v26  ;;  %v1391_v27 = vld [vmem:[%s1750_s26 + $0x3b0] sm:$0xf] }
  0x22   : > { %1392 = vst [vmem:[%s1755_s27 + $0xa4] sm:$0xf] %v1391_v27 }
  0x23 PF: > { %p1393_p6 = scmp.ge.s32.totalorder %s1683_s16, 1  ;;  %p274_p7 = scmp.lt.s32.totalorder %s1683_s16, 7 }
  0x25   : > { %p275_p8 = pnand %p1393_p6, %p274_p7 }
  0x26   : > { %s281_s28 = sand.u32 (!%p275_p8), 1, %s1667_s12   ;;  %s325_s29 = smul.u32 (!%p275_p8), 48, %s1675_s14 }
  0x27   : > { %278 = sbr.rel (%p275_p8) target bundleno = 407 (0x197), region = 54  ;;  %p1396_p10 = scmp.ne.s32.totalorder (!%p275_p8), %s1675_s14, 0 }
  0x28   : > { %s1502_s30 = smul.u32 (!%p275_p8), 168, %s281_s28  ;;  %p327_p9 = scmp.lt.s32.totalorder (!%p275_p8), %s325_s29, 287 }
  0x2a   : > { %s1819_s8 = scalar_lea.vmem (!%p275_p8), [#allocation3], %s1502_s30 }
  0x2e   : > { %s2059_s29 = smov (!%p327_p9, %s325_s29), 287  ;;  %358 = sbr.rel (%p1396_p10) target bundleno = 62 (0x3e), region = 62 }
  0x2f   : > { %s1472_s4 = sshll.u32 %s2059_s29, 3  ;;  %v1685_v28 = vmov (!%p1396_p10), 0.0  }
  0x30   : > { %s1817_s7 = scalar_lea.vmem %s2049_s1, %s1472_s4  ;;  %359 = vst [vmem:[#allocation2] sm:$0xff] (!%p1396_p10), %v1685_v28  ;;  %360 = vst [vmem:[#allocation2 + $0x8] sm:$0xff] (!%p1396_p10), %v1685_v28 }
  0x31   : > { %361 = vst [vmem:[#allocation2 + $0x10] sm:$0xff] (!%p1396_p10), %v1685_v28  ;;  %362 = vst [vmem:[#allocation2 + $0x18] sm:$0xff] (!%p1396_p10), %v1685_v28 }
  0x32   : > { %363 = vst [vmem:[#allocation2 + $0x20] sm:$0xff] (!%p1396_p10), %v1685_v28  ;;  %364 = vst [vmem:[#allocation2 + $0x28] sm:$0xff] (!%p1396_p10), %v1685_v28 }
  0x33   : > { %365 = vst [vmem:[#allocation2 + $0x30] sm:$0xff] (!%p1396_p10), %v1685_v28  ;;  %366 = vst [vmem:[#allocation2 + $0x38] sm:$0xff] (!%p1396_p10), %v1685_v28 }
  0x34   : > { %367 = vst [vmem:[#allocation2 + $0x40] sm:$0xff] (!%p1396_p10), %v1685_v28  ;;  %368 = vst [vmem:[#allocation2 + $0x48] sm:$0xff] (!%p1396_p10), %v1685_v28 }
  0x35   : > { %369 = vst [vmem:[#allocation2 + $0x50] sm:$0xff] %v1685_v28  ;;  %370 = vst [vmem:[#allocation2 + $0x58] sm:$0xff] %v1685_v28 }
  0x36   : > { %371 = vst [vmem:[#allocation2 + $0x60] sm:$0xff] %v1685_v28  ;;  %372 = vst [vmem:[#allocation2 + $0x68] sm:$0xff] %v1685_v28 }
  0x37   : > { %373 = vst [vmem:[#allocation2 + $0x70] sm:$0xff] %v1685_v28  ;;  %374 = vst [vmem:[#allocation2 + $0x78] sm:$0xff] %v1685_v28 }
  0x38   : > { %375 = vst [vmem:[#allocation2 + $0x80] sm:$0xff] %v1685_v28  ;;  %376 = vst [vmem:[#allocation2 + $0x88] sm:$0xff] %v1685_v28 }
  0x39   : > { %377 = vst [vmem:[#allocation2 + $0x90] sm:$0xff] %v1685_v28  ;;  %378 = vst [vmem:[#allocation2 + $0x98] sm:$0xff] %v1685_v28 }
  0x3a   : > { %379 = vst [vmem:[#allocation2 + $0xa0] sm:$0xff] %v1685_v28  ;;  %380 = vst [vmem:[#allocation2 + $0xa8] sm:$0xff] %v1685_v28 }
  0x3b   : > { %381 = vst [vmem:[#allocation2 + $0xb0] sm:$0xff] %v1685_v28  ;;  %382 = vst [vmem:[#allocation2 + $0xb8] sm:$0xff] %v1685_v28 }
  0x3c   : > { %383 = vst [vmem:[#allocation2 + $0xc0] sm:$0xff] %v1685_v28  ;;  %384 = vst [vmem:[#allocation2 + $0xc8] sm:$0xff] %v1685_v28 }
  0x3d   : > { %385 = vst [vmem:[#allocation2 + $0xd0] sm:$0xff] %v1685_v28  ;;  %386 = vst [vmem:[#allocation2 + $0xd8] sm:$0xff] %v1685_v28 }
  0x3e PF: > { %v1545_v29 = vld [vmem:[%s1817_s7 + $0x4] ss:$8 sps:$4 sm:$0xff]   ;;  %v1547_v30 = vld [vmem:[%s1817_s7] ss:$8 sps:$4 sm:$0xff]   ;;  %v1686_v31 = vmov 0   ;;  %p1466_p11 = scmp.ne.s32.totalorder %s1675_s14, 5 }
  0x3f   : > { %978 = vmatprep.mubr.bf16.mxu0 %v1686_v31  ;;  %843 = vmatprep.subr.bf16.mxu1 %v1545_v29  ;;  %v1548_v32 = vld [vmem:[%s1817_s7 + $0x14] ss:$8 sps:$4 sm:$0xff]   ;;  %v1550_v33 = vld [vmem:[%s1817_s7 + $0x10] ss:$8 sps:$4 sm:$0xff]   ;;  %v1551_v34 = vld [vmem:[%s1817_s7 + $0x24] ss:$8 sps:$4 sm:$0xff]  }
  0x40   : > { %844 = vmatpush1.bf16.msra.mxu1 %v1547_v30  ;;  %v1553_v35 = vld [vmem:[%s1817_s7 + $0x20] ss:$8 sps:$4 sm:$0xff]   ;;  %v1554_v36 = vld [vmem:[%s1817_s7 + $0x34] ss:$8 sps:$4 sm:$0xff]   ;;  %v1556_v37 = vld [vmem:[%s1817_s7 + $0x30] ss:$8 sps:$4 sm:$0xff]  }
  0x41   : > { %845 = vmatprep.subr.bf16.mxu1 %v1548_v32  ;;  %v1569_v38 = vld [vmem:[%s1817_s7 + $0x104] ss:$8 sps:$4 sm:$0xff]   ;;  %v1571_v39 = vld [vmem:[%s1817_s7 + $0x100] ss:$8 sps:$4 sm:$0xff]   ;;  %v1575_v41 = vld [vmem:[%s1817_s7 + $0x114] ss:$8 sps:$4 sm:$0xff]  }
  0x42   : > { %v1557_v40 = vld [vmem:[%s1817_s7 + $0x44] ss:$8 sps:$4 sm:$0xff]   ;;  %946 = vmatprep.subr.bf16.mxu0 %v1569_v38  ;;  %v1577_v42 = vld [vmem:[%s1817_s7 + $0x110] ss:$8 sps:$4 sm:$0xff]   ;;  %v1559_v43 = vld [vmem:[%s1817_s7 + $0x40] ss:$8 sps:$4 sm:$0xff]  }
  0x43   : > { %947 = vmatpush1.bf16.msra.mxu0 %v1571_v39  ;;  %v1560_v44 = vld [vmem:[%s1817_s7 + $0x54] ss:$8 sps:$4 sm:$0xff]   ;;  %v1581_v45 = vld [vmem:[%s1817_s7 + $0x124] ss:$8 sps:$4 sm:$0xff]   ;;  %v1583_v46 = vld [vmem:[%s1817_s7 + $0x120] ss:$8 sps:$4 sm:$0xff]  }
  0x44   : > { %846 = vmatpush1.bf16.msra.mxu1 %v1550_v33  ;;  %948 = vmatprep.subr.bf16.mxu0 %v1575_v41  ;;  %v1562_v47 = vld [vmem:[%s1817_s7 + $0x50] ss:$8 sps:$4 sm:$0xff]   ;;  %v1587_v48 = vld [vmem:[%s1817_s7 + $0x134] ss:$8 sps:$4 sm:$0xff]   ;;  %v1563_v49 = vld [vmem:[%s1817_s7 + $0x64] ss:$8 sps:$4 sm:$0xff]  }
  0x45   : > { %847 = vmatprep.subr.bf16.mxu1 %v1551_v34  ;;  %v1589_v50 = vld [vmem:[%s1817_s7 + $0x130] ss:$8 sps:$4 sm:$0xff]   ;;  %v1565_v51 = vld [vmem:[%s1817_s7 + $0x60] ss:$8 sps:$4 sm:$0xff]   ;;  %v1593_v52 = vld [vmem:[%s1817_s7 + $0x144] ss:$8 sps:$4 sm:$0xff]  }
  0x46   : > { %v1566_v53 = vld [vmem:[%s1817_s7 + $0x74] ss:$8 sps:$4 sm:$0xff]   ;;  %v1595_v54 = vld [vmem:[%s1817_s7 + $0x140] ss:$8 sps:$4 sm:$0xff]   ;;  %v1568_v55 = vld [vmem:[%s1817_s7 + $0x70] ss:$8 sps:$4 sm:$0xff]  }
  0x47   : > { %949 = vmatpush1.bf16.msra.mxu0 %v1577_v42  ;;  %v1599_v56 = vld [vmem:[%s1817_s7 + $0x154] ss:$8 sps:$4 sm:$0xff]   ;;  %v1572_v57 = vld [vmem:[%s1817_s7 + $0x84] ss:$8 sps:$4 sm:$0xff]   ;;  %v1601_v58 = vld [vmem:[%s1817_s7 + $0x150] ss:$8 sps:$4 sm:$0xff]  }
  0x48   : > { %848 = vmatpush1.bf16.msra.mxu1 %v1553_v35  ;;  %950 = vmatprep.subr.bf16.mxu0 %v1581_v45  ;;  %v1574_v59 = vld [vmem:[%s1817_s7 + $0x80] ss:$8 sps:$4 sm:$0xff]   ;;  %v1605_v60 = vld [vmem:[%s1817_s7 + $0x164] ss:$8 sps:$4 sm:$0xff]   ;;  %v1578_v61 = vld [vmem:[%s1817_s7 + $0x94] ss:$8 sps:$4 sm:$0xff]  }
  0x49   : > { %849 = vmatprep.subr.bf16.mxu1 %v1554_v36  ;;  %v1580_v62 = vld [vmem:[%s1817_s7 + $0x90] ss:$8 sps:$4 sm:$0xff]   ;;  %v1607_v63 = vld [vmem:[%s1817_s7 + $0x160] ss:$8 sps:$4 sm:$0xff]   ;;  %v1611_v1 = vld [vmem:[%s1817_s7 + $0x174] ss:$8 sps:$4 sm:$0xff]  }
  0x4a   : > { %v1620_v0 = vld [vmem:[%s1819_s8 + $0x4] ss:$12 sps:$4 sm:$0xff]   ;;  %v1586_v4 = vld [vmem:[%s1817_s7 + $0xa0] ss:$8 sps:$4 sm:$0xff]   ;;  %v1590_v5 = vld [vmem:[%s1817_s7 + $0xb4] ss:$8 sps:$4 sm:$0xff]  }
  0x4b   : > { %951 = vmatpush1.bf16.msra.mxu0 %v1583_v46  ;;  %v1584_v2 = vld [vmem:[%s1817_s7 + $0xa4] ss:$8 sps:$4 sm:$0xff]   ;;  %875 = vmatprep.mubr.bf16.mxu1 %v1620_v0  ;;  %v1613_v3 = vld [vmem:[%s1817_s7 + $0x170] ss:$8 sps:$4 sm:$0xff]   ;;  %v1598_v9 = vld [vmem:[%s1817_s7 + $0xc0] ss:$8 sps:$4 sm:$0xff]  }
  0x4c   : > { %850 = vmatpush1.bf16.msra.mxu1 %v1556_v37  ;;  %952 = vmatprep.subr.bf16.mxu0 %v1587_v48  ;;  %v1617_v6 = vld [vmem:[%s1819_s8 + $0x8] ss:$12 sps:$4 sm:$0xff]   ;;  %v1596_v8 = vld [vmem:[%s1817_s7 + $0xc4] ss:$8 sps:$4 sm:$0xff]  }
  0x4d   : > { %851 = vmatprep.subr.bf16.mxu1 %v1557_v40  ;;  %v1592_v7 = vld [vmem:[%s1817_s7 + $0xb0] ss:$8 sps:$4 sm:$0xff]   ;;  %v1602_v10 = vld [vmem:[%s1817_s7 + $0xd4] ss:$8 sps:$4 sm:$0xff]   ;;  %v1608_v13 = vld [vmem:[%s1817_s7 + $0xe4] ss:$8 sps:$4 sm:$0xff]  }
  0x4e   : > { %v1621_v11 = vld [vmem:[%s1819_s8 + $0x20] ss:$12 sps:$4 sm:$0xff]   ;;  %v1604_v12 = vld [vmem:[%s1817_s7 + $0xd0] ss:$8 sps:$4 sm:$0xff]  }
  0x4f   : > { %953 = vmatpush1.bf16.msra.mxu0 %v1589_v50  ;;  %v1610_v14 = vld [vmem:[%s1817_s7 + $0xe0] ss:$8 sps:$4 sm:$0xff]   ;;  %v1614_v15 = vld [vmem:[%s1817_s7 + $0xf4] ss:$8 sps:$4 sm:$0xff]   ;;  %v1616_v17 = vld [vmem:[%s1817_s7 + $0xf0] ss:$8 sps:$4 sm:$0xff]  }
  0x50   : > { %852 = vmatpush1.bf16.msra.mxu1 %v1559_v43  ;;  %954 = vmatprep.subr.bf16.mxu0 %v1593_v52  ;;  %v1625_v16 = vld [vmem:[%s1819_s8 + $0x38] ss:$12 sps:$4 sm:$0xff]   ;;  %v1618_v18 = vld [vmem:[%s1819_s8] ss:$12 sps:$4 sm:$0xff]   ;;  %v1622_v19 = vld [vmem:[%s1819_s8 + $0x1c] ss:$12 sps:$4 sm:$0xff]  }
  0x51   : > { %853 = vmatprep.subr.bf16.mxu1 %v1560_v44  ;;  %v1629_v20 = vld [vmem:[%s1819_s8 + $0x50] ss:$12 sps:$4 sm:$0xff]   ;;  %v1624_v21 = vld [vmem:[%s1819_s8 + $0x18] ss:$12 sps:$4 sm:$0xff]   ;;  %v1626_v22 = vld [vmem:[%s1819_s8 + $0x34] ss:$12 sps:$4 sm:$0xff]  }
  0x52   : > { %v1633_v23 = vld [vmem:[%s1819_s8 + $0x68] ss:$12 sps:$4 sm:$0xff]   ;;  %v1628_v24 = vld [vmem:[%s1819_s8 + $0x30] ss:$12 sps:$4 sm:$0xff]   ;;  %v1630_v25 = vld [vmem:[%s1819_s8 + $0x4c] ss:$12 sps:$4 sm:$0xff]  }
  0x53   : > { %955 = vmatpush1.bf16.msra.mxu0 %v1595_v54  ;;  %v1637_v26 = vld [vmem:[%s1819_s8 + $0x80] ss:$12 sps:$4 sm:$0xff]   ;;  %v1632_v27 = vld [vmem:[%s1819_s8 + $0x48] ss:$12 sps:$4 sm:$0xff]   ;;  %v1634_v28 = vld [vmem:[%s1819_s8 + $0x64] ss:$12 sps:$4 sm:$0xff]  }
  0x54   : > { %854 = vmatpush1.bf16.msra.mxu1 %v1562_v47  ;;  %956 = vmatprep.subr.bf16.mxu0 %v1599_v56  ;;  %v1641_v29 = vld [vmem:[%s1819_s8 + $0x98] ss:$12 sps:$4 sm:$0xff]   ;;  %v1636_v30 = vld [vmem:[%s1819_s8 + $0x60] ss:$12 sps:$4 sm:$0xff]   ;;  %v1638_v32 = vld [vmem:[%s1819_s8 + $0x7c] ss:$12 sps:$4 sm:$0xff]  }
  0x55   : > { %855 = vmatprep.subr.bf16.mxu1 %v1563_v49  ;;  %v1640_v33 = vld [vmem:[%s1819_s8 + $0x78] ss:$12 sps:$4 sm:$0xff]   ;;  %v1642_v34 = vld [vmem:[%s1819_s8 + $0x94] ss:$12 sps:$4 sm:$0xff]   ;;  %v1644_v35 = vld [vmem:[%s1819_s8 + $0x90] ss:$12 sps:$4 sm:$0xff]  }
  0x56   : > { %v387_v47 = vld [vmem:[#allocation2] sm:$0xff]  ;;  %v388_v50 = vld [vmem:[#allocation2 + $0x8] sm:$0xff] }
  0x57   : > { %957 = vmatpush1.bf16.msra.mxu0 %v1601_v58 }
  0x58   : > { %856 = vmatpush1.bf16.msra.mxu1 %v1565_v51  ;;  %958 = vmatprep.subr.bf16.mxu0 %v1605_v60 }
  0x59   : > { %857 = vmatprep.subr.bf16.mxu1 %v1566_v53  ;;  %v389_v53 = vld [vmem:[#allocation2 + $0x10] sm:$0xff] }
  0x5b   : > { %959 = vmatpush1.bf16.msra.mxu0 %v1607_v63 }
  0x5c   : > { %858 = vmatpush1.bf16.msra.mxu1 %v1568_v55  ;;  %960 = vmatprep.subr.bf16.mxu0 %v1611_v1 }
  0x5d   : > { %859 = vmatprep.subr.bf16.mxu1 %v1572_v57  ;;  %v390_v57 = vld [vmem:[#allocation2 + $0x18] sm:$0xff] }
  0x5f   : > { %961 = vmatpush1.bf16.msra.mxu0 %v1613_v3  ;;  %v391_v3 = vld [vmem:[#allocation2 + $0x20] sm:$0xff] }
  0x60   : > { %860 = vmatpush1.bf16.msra.mxu1 %v1574_v59 }
  0x61   : > { %861 = vmatprep.subr.bf16.mxu1 %v1578_v61 }
  0x62   : > { %979 = vmatmul.mubr.bf16.vlgmr.msra.gmra.mrb[0].mxu0 %v1617_v6  ;;  %v392_v6 = vld [vmem:[#allocation2 + $0x28] sm:$0xff] }
  0x63   : > { %988 = vmatprep.mubr.bf16.mxu0 %v1686_v31 }
  0x64   : > { %862 = vmatpush1.bf16.msra.mxu1 %v1580_v62 }
  0x65   : > { %863 = vmatprep.subr.bf16.mxu1 %v1584_v2 }
  0x68   : > { %864 = vmatpush1.bf16.msra.mxu1 %v1586_v4 }
  0x69   : > { %865 = vmatprep.subr.bf16.mxu1 %v1590_v5 }
  0x6a   : > { %989 = vmatmul.mubr.bf16.gmra.mrb[4].mxu0 %v1621_v11 }
  0x6b   : > { %998 = vmatprep.mubr.bf16.mxu0 %v1686_v31 }
  0x6c   : > { %866 = vmatpush1.bf16.msra.mxu1 %v1592_v7 }
  0x6d   : > { %867 = vmatprep.subr.bf16.mxu1 %v1596_v8 }
  0x70   : > { %868 = vmatpush1.bf16.msra.mxu1 %v1598_v9  ;;  %v393_v9 = vld [vmem:[#allocation2 + $0x30] sm:$0xff] }
  0x71   : > { %869 = vmatprep.subr.bf16.mxu1 %v1602_v10 }
  0x72   : > { %999 = vmatmul.mubr.bf16.gmra.mrb[8].mxu0 %v1625_v16 }
  0x73   : > { %1008 = vmatprep.mubr.bf16.mxu0 %v1686_v31 }
  0x74   : > { %870 = vmatpush1.bf16.msra.mxu1 %v1604_v12 }
  0x75   : > { %871 = vmatprep.subr.bf16.mxu1 %v1608_v13  ;;  %v394_v13 = vld [vmem:[#allocation2 + $0x38] sm:$0xff] }
  0x78   : > { %872 = vmatpush1.bf16.msra.mxu1 %v1610_v14 }
  0x79   : > { %873 = vmatprep.subr.bf16.mxu1 %v1614_v15 }
  0x7a   : > { %1009 = vmatmul.mubr.bf16.gmra.mrb[12].mxu0 %v1629_v20 }
  0x7b   : > { %1018 = vmatprep.mubr.bf16.mxu0 %v1686_v31 }
  0x7c   : > { %874 = vmatpush1.bf16.msra.mxu1 %v1616_v17 }
  0x7f   : > { %876 = vmatmul.mubr.bf16.vlgmr.msra.gmra.mrb[0].mxu1 %v1618_v18 }
  0x80   : > { %885 = vmatprep.mubr.bf16.mxu1 %v1622_v19 }
  0x82   : > { %1019 = vmatmul.mubr.bf16.gmra.mrb[16].mxu0 %v1633_v23  ;;  %v395_v23 = vld [vmem:[#allocation2 + $0x40] sm:$0xff] }
  0x83   : > { %1028 = vmatprep.mubr.bf16.mxu0 %v1686_v31 }
  0x87   : > { %886 = vmatmul.mubr.bf16.gmra.mrb[4].mxu1 %v1624_v21 }
  0x88   : > { %895 = vmatprep.mubr.bf16.mxu1 %v1626_v22 }
  0x8a   : > { %1029 = vmatmul.mubr.bf16.gmra.mrb[20].mxu0 %v1637_v26  ;;  %v396_v26 = vld [vmem:[#allocation2 + $0x48] sm:$0xff] }
  0x8b   : > { %1038 = vmatprep.mubr.bf16.mxu0 %v1686_v31 }
  0x8f   : > { %896 = vmatmul.mubr.bf16.gmra.mrb[8].mxu1 %v1628_v24 }
  0x90   : > { %905 = vmatprep.mubr.bf16.mxu1 %v1630_v25 }
  0x92   : > { %1039 = vmatmul.mubr.bf16.gmra.mrb[24].mxu0 %v1641_v29  ;;  %v397_v29 = vld [vmem:[#allocation2 + $0x50] sm:$0xff] }
  0x97   : > { %906 = vmatmul.mubr.bf16.gmra.mrb[12].mxu1 %v1632_v27 }
  0x98   : > { %915 = vmatprep.mubr.bf16.mxu1 %v1634_v28 }
  0x9f   : > { %916 = vmatmul.mubr.bf16.gmra.mrb[16].mxu1 %v1636_v30 }
  0xa0   : > { %925 = vmatprep.mubr.bf16.mxu1 %v1638_v32 }
  0xa7   : > { %926 = vmatmul.mubr.bf16.gmra.mrb[20].mxu1 %v1640_v33 }
  0xa8   : > { %935 = vmatprep.mubr.bf16.mxu1 %v1642_v34  ;;  %v398_v34 = vld [vmem:[#allocation2 + $0x58] sm:$0xff] }
  0xaf   : > { %936 = vmatmul.mubr.bf16.gmra.mrb[24].mxu1 %v1644_v35 }
 0x135   : > { %v980_v36 = vpop.f32.mrb[0].mxu0 }
 0x136   : > { %v982_v37 = vpop.f32.mrb[1].mxu0 }
 0x137   : > { %v984_v38 = vpop.f32.mrb[2].mxu0 }
 0x138   : > { %v986_v39 = vpop.f32.mrb[3].mxu0 }
 0x13d   : > { %v990_v31 = vpop.f32.mrb[4].mxu0 }
 0x13e   : > { %v992_v40 = vpop.f32.mrb[5].mxu0 }
 0x13f   : > { %v994_v41 = vpop.f32.mrb[6].mxu0 }
 0x140   : > { %v996_v42 = vpop.f32.mrb[7].mxu0 }
 0x145   : > { %v1000_v43 = vpop.f32.mrb[8].mxu0 }
 0x146   : > { %v1002_v44 = vpop.f32.mrb[9].mxu0 }
 0x147   : > { %v1004_v45 = vpop.f32.mrb[10].mxu0 }
 0x148   : > { %v1898_v46 = vpop.f32.mrb[11].mxu0 }
 0x14d   : > { %v1010_v59 = vpop.f32.mrb[12].mxu0 }
 0x14e   : > { %v1012_v62 = vpop.f32.mrb[13].mxu0 }
 0x14f   : > { %v1900_v0 = vpop.f32.mrb[14].mxu0 }
 0x150   : > { %v1902_v2 = vpop.f32.mrb[15].mxu0 }
 0x152   : > { %v877_v48 = vpop.f32.mrb[0].mxu1 }
 0x153   : > { %v981_v49 = vadd.f32 %v980_v36, %v877_v48  ;;  %v879_v51 = vpop.f32.mrb[1].mxu1  ;;  %v400_v48 = vld [vmem:[#allocation2 + $0x68] sm:$0xff] }
 0x154   : > { %v983_v52 = vadd.f32 %v982_v37, %v879_v51  ;;  %v881_v54 = vpop.f32.mrb[2].mxu1 }
 0x155   : > { %v1049_v55 = vadd.f32 %v981_v49, %v387_v47  ;;  %v985_v56 = vadd.f32 %v984_v38, %v881_v54  ;;  %v883_v58 = vpop.f32.mrb[3].mxu1  ;;  %v1020_v15 = vpop.f32.mrb[16].mxu0 }
 0x156   : > { %v1050_v60 = vadd.f32 %v983_v52, %v388_v50  ;;  %v987_v61 = vadd.f32 %v986_v39, %v883_v58  ;;  %v1022_v18 = vpop.f32.mrb[17].mxu0  ;;  %v401_v50 = vld [vmem:[#allocation2 + $0x70] sm:$0xff] }
 0x157   : > { %1077 = vst [vmem:[#allocation2] sm:$0xff] %v1049_v55  ;;  %v1051_v63 = vadd.f32 %v985_v56, %v389_v53  ;;  %v1904_v20 = vpop.f32.mrb[18].mxu0  ;;  %v402_v53 = vld [vmem:[#allocation2 + $0x78] sm:$0xff] }
 0x158   : > { %1078 = vst [vmem:[#allocation2 + $0x8] sm:$0xff] %v1050_v60  ;;  %v1052_v1 = vadd.f32 %v987_v61, %v390_v57  ;;  %v1906_v22 = vpop.f32.mrb[19].mxu0 }
 0x159   : > { %1079 = vst [vmem:[#allocation2 + $0x10] sm:$0xff] %v1051_v63 }
 0x15a   : > { %1080 = vst [vmem:[#allocation2 + $0x18] sm:$0xff] %v1052_v1  ;;  %v887_v4 = vpop.f32.mrb[4].mxu1 }
 0x15b   : > { %v991_v5 = vadd.f32 %v990_v31, %v887_v4  ;;  %v889_v7 = vpop.f32.mrb[5].mxu1  ;;  %v404_v4 = vld [vmem:[#allocation2 + $0x88] sm:$0xff] }
 0x15c   : > { %v993_v8 = vadd.f32 %v992_v40, %v889_v7  ;;  %v891_v10 = vpop.f32.mrb[6].mxu1 }
 0x15d   : > { %v1053_v11 = vadd.f32 %v991_v5, %v391_v3  ;;  %v995_v12 = vadd.f32 %v994_v41, %v891_v10  ;;  %v893_v14 = vpop.f32.mrb[7].mxu1  ;;  %v1030_v36 = vpop.f32.mrb[20].mxu0 }
 0x15e   : > { %v1054_v16 = vadd.f32 %v993_v8, %v392_v6  ;;  %v997_v17 = vadd.f32 %v996_v42, %v893_v14  ;;  %v1032_v39 = vpop.f32.mrb[21].mxu0  ;;  %v405_v6 = vld [vmem:[#allocation2 + $0x90] sm:$0xff] }
 0x15f   : > { %1081 = vst [vmem:[#allocation2 + $0x20] sm:$0xff] %v1053_v11  ;;  %v1055_v19 = vadd.f32 %v995_v12, %v393_v9  ;;  %v1034_v40 = vpop.f32.mrb[22].mxu0  ;;  %v406_v9 = vld [vmem:[#allocation2 + $0x98] sm:$0xff] }
 0x160   : > { %1082 = vst [vmem:[#allocation2 + $0x28] sm:$0xff] %v1054_v16  ;;  %v1056_v21 = vadd.f32 %v997_v17, %v394_v13  ;;  %v1036_v42 = vpop.f32.mrb[23].mxu0 }
 0x161   : > { %1083 = vst [vmem:[#allocation2 + $0x30] sm:$0xff] %v1055_v19 }
 0x162   : > { %1084 = vst [vmem:[#allocation2 + $0x38] sm:$0xff] %v1056_v21  ;;  %v897_v24 = vpop.f32.mrb[8].mxu1 }
 0x163   : > { %v1001_v25 = vadd.f32 %v1000_v43, %v897_v24  ;;  %v899_v27 = vpop.f32.mrb[9].mxu1  ;;  %v399_v43 = vld [vmem:[#allocation2 + $0x60] sm:$0xff] }
 0x164   : > { %v1003_v28 = vadd.f32 %v1002_v44, %v899_v27  ;;  %v901_v30 = vpop.f32.mrb[10].mxu1 }
 0x165   : > { %v1057_v32 = vadd.f32 %v1001_v25, %v395_v23  ;;  %v1005_v33 = vadd.f32 %v1004_v45, %v901_v30  ;;  %v903_v35 = vpop.f32.mrb[11].mxu1  ;;  %v1040_v55 = vpop.f32.mrb[24].mxu0  ;;  %v409_v23 = vld [vmem:[#allocation2 + $0xb0] sm:$0xff] }
 0x166   : > { %v1058_v37 = vadd.f32 %v1003_v28, %v396_v26  ;;  %v1007_v38 = vadd.f32 %v1898_v46, %v903_v35  ;;  %v1042_v58 = vpop.f32.mrb[25].mxu0  ;;  %v410_v26 = vld [vmem:[#allocation2 + $0xb8] sm:$0xff]  ;;  %v412_v35 = vld [vmem:[#allocation2 + $0xc8] sm:$0xff] }
 0x167   : > { %1085 = vst [vmem:[#allocation2 + $0x40] sm:$0xff] %v1057_v32  ;;  %v1059_v31 = vadd.f32 %v1005_v33, %v397_v29  ;;  %v1044_v61 = vpop.f32.mrb[26].mxu0  ;;  %v411_v32 = vld [vmem:[#allocation2 + $0xc0] sm:$0xff] }
 0x168   : > { %1086 = vst [vmem:[#allocation2 + $0x48] sm:$0xff] %v1058_v37  ;;  %v1060_v41 = vadd.f32 %v1007_v38, %v398_v34  ;;  %v1046_v63 = vpop.f32.mrb[27].mxu0  ;;  %v413_v38 = vld [vmem:[#allocation2 + $0xd0] sm:$0xff] }
 0x169   : > { %1087 = vst [vmem:[#allocation2 + $0x50] sm:$0xff] %v1059_v31 }
 0x16a   : > { %1088 = vst [vmem:[#allocation2 + $0x58] sm:$0xff] %v1060_v41  ;;  %v907_v44 = vpop.f32.mrb[12].mxu1  ;;  %v414_v41 = vld [vmem:[#allocation2 + $0xd8] sm:$0xff] }
 0x16b   : > { %v1011_v47 = vadd.f32 %v1010_v59, %v907_v44  ;;  %v909_v45 = vpop.f32.mrb[13].mxu1 }
 0x16c   : > { %v1013_v49 = vadd.f32 %v1012_v62, %v909_v45  ;;  %v911_v51 = vpop.f32.mrb[14].mxu1  ;;  %v403_v62 = vld [vmem:[#allocation2 + $0x80] sm:$0xff]  ;;  %v1139_v45 = vlaneseq (!%p1466_p11) }
 0x16d   : > { %v1061_v52 = vadd.f32 %v1011_v47, %v399_v43  ;;  %v1015_v46 = vadd.f32 %v1900_v0, %v911_v51  ;;  %v913_v54 = vpop.f32.mrb[15].mxu1  ;;  %v1109_v51 = vld [vmem:[#allocation2] sm:$0xff] (!%p1466_p11) }
 0x16e   : > { %v1062_v56 = vadd.f32 %v1013_v49, %v400_v48  ;;  %v1017_v57 = vadd.f32 %v1902_v2, %v913_v54  ;;  %v1140_v49 = vshrl.u32 (!%p1466_p11), %v1139_v45, 7  ;;  %v1111_v54 = vld [vmem:[#allocation2 + $0x10] sm:$0xff] (!%p1466_p11) }
 0x16f   : > { %1089 = vst [vmem:[#allocation2 + $0x60] sm:$0xff] %v1061_v52  ;;  %v1063_v60 = vadd.f32 %v1015_v46, %v401_v50  ;;  %v1137_v50 = vld [vmem:[%s2050_s2] sm:$0x3] (!%p1466_p11)  ;;  %v1110_v46 = vld [vmem:[#allocation2 + $0x8] sm:$0xff] (!%p1466_p11) }
 0x170   : > { %1090 = vst [vmem:[#allocation2 + $0x68] sm:$0xff] %v1062_v56  ;;  %v1064_v59 = vadd.f32 %v1017_v57, %v402_v53  ;;  %v1141_v52 = vsub.s32 (!%p1466_p11), 0, %v1140_v49  ;;  %v1145_v53 = vsub.s32 (!%p1466_p11), 1, %v1140_v49  ;;  %v1113_v56 = vld [vmem:[#allocation2 + $0x20] sm:$0xff] (!%p1466_p11) }
 0x171   : > { %1091 = vst [vmem:[#allocation2 + $0x70] sm:$0xff] %v1063_v60  ;;  %v1114_v60 = vld [vmem:[#allocation2 + $0x28] sm:$0xff] (!%p1466_p11) }
 0x172   : > { %1092 = vst [vmem:[#allocation2 + $0x78] sm:$0xff] %v1064_v59  ;;  %v917_v1 = vpop.f32.mrb[16].mxu1  ;;  %v1917_v57 = vrot.slane (!%p1466_p11), %v1137_v50, %v1141_v52  ;;  %v1116_v59 = vld [vmem:[#allocation2 + $0x38] sm:$0xff] (!%p1466_p11) }
 0x173   : > { %v1021_v3 = vadd.f32 %v1020_v15, %v917_v1  ;;  %v919_v0 = vpop.f32.mrb[17].mxu1  ;;  %v407_v15 = vld [vmem:[#allocation2 + $0xa0] sm:$0xff] }
 0x174   : > { %v1023_v5 = vadd.f32 %v1022_v18, %v919_v0  ;;  %v921_v7 = vpop.f32.mrb[18].mxu1  ;;  %v408_v18 = vld [vmem:[#allocation2 + $0xa8] sm:$0xff]  ;;  %v1151_v1 = vadd.f32 (!%p1466_p11), %v1917_v57, %v1111_v54 }
 0x175   : > { %v1065_v8 = vadd.f32 %v1021_v3, %v403_v62  ;;  %v1025_v2 = vadd.f32 %v1904_v20, %v921_v7  ;;  %v923_v10 = vpop.f32.mrb[19].mxu1  ;;  %v1118_v0 = vld [vmem:[#allocation2 + $0x48] sm:$0xff] (!%p1466_p11) }
 0x176   : > { %v1066_v11 = vadd.f32 %v1023_v5, %v404_v4  ;;  %v1027_v12 = vadd.f32 %v1906_v22, %v923_v10  ;;  %v1117_v4 = vld [vmem:[#allocation2 + $0x40] sm:$0xff] (!%p1466_p11)  ;;  %v1119_v5 = vld [vmem:[#allocation2 + $0x50] sm:$0xff] (!%p1466_p11) }
 0x177   : > { %1093 = vst [vmem:[#allocation2 + $0x80] sm:$0xff] %v1065_v8  ;;  %v1067_v13 = vadd.f32 %v1025_v2, %v405_v6  ;;  %v1153_v6 = vadd.f32 (!%p1466_p11), %v1917_v57, %v1113_v56  ;;  %v1121_v10 = vld [vmem:[#allocation2 + $0x60] sm:$0xff] (!%p1466_p11) }
 0x178   : > { %1094 = vst [vmem:[#allocation2 + $0x88] sm:$0xff] %v1066_v11  ;;  %v1068_v14 = vadd.f32 %v1027_v12, %v406_v9  ;;  %v1120_v9 = vld [vmem:[#allocation2 + $0x58] sm:$0xff] (!%p1466_p11)  ;;  %v1122_v11 = vld [vmem:[#allocation2 + $0x68] sm:$0xff] (!%p1466_p11) }
 0x179   : > { %1095 = vst [vmem:[#allocation2 + $0x90] sm:$0xff] %v1067_v13 }
 0x17a   : > { %1096 = vst [vmem:[#allocation2 + $0x98] sm:$0xff] %v1068_v14  ;;  %v927_v16 = vpop.f32.mrb[20].mxu1  ;;  %v1179_v14 = vmax.f32 (!%p1466_p11), %v1151_v1, 0.0 }
 0x17b   : > { %v1031_v17 = vadd.f32 %v1030_v36, %v927_v16  ;;  %v929_v19 = vpop.f32.mrb[21].mxu1  ;;  %v1123_v16 = vld [vmem:[#allocation2 + $0x70] sm:$0xff] (!%p1466_p11) }
 0x17c   : > { %v1033_v21 = vadd.f32 %v1032_v39, %v929_v19  ;;  %v931_v24 = vpop.f32.mrb[22].mxu1  ;;  %1207 = vst [vmem:[%s2051_s3 + $0x10] sm:$0xff] (!%p1466_p11), %v1179_v14 }
 0x17d   : > { %v1069_v20 = vadd.f32 %v1031_v17, %v407_v15  ;;  %v1035_v25 = vadd.f32 %v1034_v40, %v931_v24  ;;  %v933_v27 = vpop.f32.mrb[23].mxu1  ;;  %v1124_v17 = vld [vmem:[#allocation2 + $0x78] sm:$0xff] (!%p1466_p11)  ;;  %v1157_v24 = vadd.f32 (!%p1466_p11), %v1917_v57, %v1117_v4 }
 0x17e   : > { %v1070_v28 = vadd.f32 %v1033_v21, %v408_v18  ;;  %v1037_v22 = vadd.f32 %v1036_v42, %v933_v27  ;;  %v1181_v18 = vmax.f32 (!%p1466_p11), %v1153_v6, 0.0  ;;  %v1125_v27 = vld [vmem:[#allocation2 + $0x80] sm:$0xff] (!%p1466_p11) }
 0x17f   : > { %1097 = vst [vmem:[#allocation2 + $0xa0] sm:$0xff] %v1069_v20  ;;  %v1071_v29 = vadd.f32 %v1035_v25, %v409_v23  ;;  %v1159_v25 = vadd.f32 (!%p1466_p11), %v1917_v57, %v1119_v5 }
 0x180   : > { %1098 = vst [vmem:[#allocation2 + $0xa8] sm:$0xff] %v1070_v28  ;;  %v1072_v30 = vadd.f32 %v1037_v22, %v410_v26  ;;  %v1126_v28 = vld [vmem:[#allocation2 + $0x88] sm:$0xff] (!%p1466_p11)  ;;  %v1127_v22 = vld [vmem:[#allocation2 + $0x90] sm:$0xff] (!%p1466_p11)  ;;  %1209 = vst [vmem:[%s2051_s3 + $0x20] sm:$0xff] (!%p1466_p11), %v1181_v18 }
 0x181   : > { %1099 = vst [vmem:[#allocation2 + $0xb0] sm:$0xff] %v1071_v29  ;;  %v1161_v29 = vadd.f32 (!%p1466_p11), %v1917_v57, %v1121_v10  ;;  %v1167_v49 = vadd.f32 (!%p1466_p11), %v1917_v57, %v1127_v22 }
 0x182   : > { %1100 = vst [vmem:[#allocation2 + $0xb8] sm:$0xff] %v1072_v30  ;;  %v937_v33 = vpop.f32.mrb[24].mxu1 }
 0x183   : > { %v1041_v34 = vadd.f32 %v1040_v55, %v937_v33  ;;  %v939_v36 = vpop.f32.mrb[25].mxu1  ;;  %v1112_v55 = vld [vmem:[#allocation2 + $0x18] sm:$0xff] (!%p1466_p11) }
 0x184   : > { %v1043_v37 = vadd.f32 %v1042_v58, %v939_v36  ;;  %v941_v39 = vpop.f32.mrb[26].mxu1  ;;  %1108 = sbr.rel (%p1466_p11) target bundleno = 407 (0x197), region = 66  ;;  %v1919_v58 = vrot.slane (!%p1466_p11), %v1137_v50, %v1145_v53 }
 0x185   : > { %v1073_v31 = vadd.f32 %v1041_v34, %v411_v32  ;;  %v1045_v40 = vadd.f32 %v1044_v61, %v941_v39  ;;  %v943_v43 = vpop.f32.mrb[27].mxu1  ;;  %v1115_v61 = vld [vmem:[#allocation2 + $0x30] sm:$0xff] (!%p1466_p11)  ;;  %v1163_v32 = vadd.f32 (!%p1466_p11), %v1917_v57, %v1123_v16  ;;  %v1128_v34 = vld [vmem:[#allocation2 + $0x98] sm:$0xff] (!%p1466_p11)  ;;  %v1187_v39 = vmax.f32 (!%p1466_p11), %v1159_v25, 0.0 }
 0x186   : > { %v1074_v44 = vadd.f32 %v1043_v37, %v412_v35  ;;  %v1047_v42 = vadd.f32 %v1046_v63, %v943_v43  ;;  %v1149_v63 = vadd.f32 (!%p1466_p11), %v1917_v57, %v1109_v51  ;;  %v1150_v62 = vadd.f32 (!%p1466_p11), %v1919_v58, %v1110_v46  ;;  %v1129_v35 = vld [vmem:[#allocation2 + $0xa0] sm:$0xff] (!%p1466_p11) }
 0x187   : > { %1101 = vst [vmem:[#allocation2 + $0xc0] sm:$0xff] %v1073_v31  ;;  %v1075_v47 = vadd.f32 %v1045_v40, %v413_v38  ;;  %v1152_v3 = vadd.f32 (!%p1466_p11), %v1919_v58, %v1112_v55  ;;  %v1154_v7 = vadd.f32 (!%p1466_p11), %v1919_v58, %v1114_v60  ;;  %v1155_v8 = vadd.f32 (!%p1466_p11), %v1917_v57, %v1115_v61  ;;  %v1130_v36 = vld [vmem:[#allocation2 + $0xa8] sm:$0xff] (!%p1466_p11) }
 0x188   : > { %1102 = vst [vmem:[#allocation2 + $0xc8] sm:$0xff] %v1074_v44  ;;  %v1076_v48 = vadd.f32 %v1047_v42, %v414_v41  ;;  %v1156_v2 = vadd.f32 (!%p1466_p11), %v1919_v58, %v1116_v59  ;;  %v1177_v12 = vmax.f32 (!%p1466_p11), %v1149_v63, 0.0  ;;  %v1178_v13 = vmax.f32 (!%p1466_p11), %v1150_v62, 0.0  ;;  %v1131_v40 = vld [vmem:[#allocation2 + $0xb0] sm:$0xff] (!%p1466_p11)  ;;  %1215 = vst [vmem:[%s2051_s3 + $0x50] sm:$0xff] (!%p1466_p11), %v1187_v39 }
 0x189   : > { %1103 = vst [vmem:[#allocation2 + $0xd0] sm:$0xff] %v1075_v47  ;;  %v1180_v15 = vmax.f32 (!%p1466_p11), %v1152_v3, 0.0  ;;  %v1182_v19 = vmax.f32 (!%p1466_p11), %v1154_v7, 0.0  ;;  %v1183_v21 = vmax.f32 (!%p1466_p11), %v1155_v8, 0.0  ;;  %v1158_v20 = vadd.f32 (!%p1466_p11), %v1919_v58, %v1118_v0  ;;  %v1132_v41 = vld [vmem:[#allocation2 + $0xb8] sm:$0xff] (!%p1466_p11) }
 0x18a   : > { %1104 = vst [vmem:[#allocation2 + $0xd8] sm:$0xff] %v1076_v48  ;;  %v1184_v23 = vmax.f32 (!%p1466_p11), %v1156_v2, 0.0  ;;  %1205 = vst [vmem:[%s2051_s3] sm:$0xff] (!%p1466_p11), %v1177_v12  ;;  %v1160_v26 = vadd.f32 (!%p1466_p11), %v1919_v58, %v1120_v9  ;;  %v1162_v30 = vadd.f32 (!%p1466_p11), %v1919_v58, %v1122_v11  ;;  %v1164_v33 = vadd.f32 (!%p1466_p11), %v1919_v58, %v1124_v17 }
 0x18b   : > { %1206 = vst [vmem:[%s2051_s3 + $0x8] sm:$0xff] %v1178_v13  ;;  %1208 = vst [vmem:[%s2051_s3 + $0x18] sm:$0xff] %v1180_v15  ;;  %v1185_v37 = vmax.f32 %v1157_v24, 0.0  ;;  %v1186_v38 = vmax.f32 %v1158_v20, 0.0  ;;  %v1189_v43 = vmax.f32 %v1161_v29, 0.0  ;;  %v1191_v42 = vmax.f32 %v1163_v32, 0.0 }
 0x18c   : > { %1210 = vst [vmem:[%s2051_s3 + $0x28] sm:$0xff] %v1182_v19  ;;  %1211 = vst [vmem:[%s2051_s3 + $0x30] sm:$0xff] %v1183_v21  ;;  %v1188_v31 = vmax.f32 %v1160_v26, 0.0  ;;  %v1190_v44 = vmax.f32 %v1162_v30, 0.0  ;;  %v1192_v47 = vmax.f32 %v1164_v33, 0.0  ;;  %v1165_v48 = vadd.f32 %v1917_v57, %v1125_v27 }
 0x18d   : > { %1212 = vst [vmem:[%s2051_s3 + $0x38] sm:$0xff] %v1184_v23  ;;  %1213 = vst [vmem:[%s2051_s3 + $0x40] sm:$0xff] %v1185_v37  ;;  %v1166_v45 = vadd.f32 %v1919_v58, %v1126_v28  ;;  %v1168_v50 = vadd.f32 %v1919_v58, %v1128_v34  ;;  %v1169_v52 = vadd.f32 %v1917_v57, %v1129_v35  ;;  %v1195_v63 = vmax.f32 %v1167_v49, 0.0 }
 0x18e   : > { %1214 = vst [vmem:[%s2051_s3 + $0x48] sm:$0xff] %v1186_v38  ;;  %1216 = vst [vmem:[%s2051_s3 + $0x58] sm:$0xff] %v1188_v31  ;;  %v1133_v51 = vld [vmem:[#allocation2 + $0xc0] sm:$0xff]  ;;  %v1170_v46 = vadd.f32 %v1919_v58, %v1130_v36  ;;  %v1171_v53 = vadd.f32 %v1917_v57, %v1131_v40  ;;  %v1172_v54 = vadd.f32 %v1919_v58, %v1132_v41  ;;  %v1193_v61 = vmax.f32 %v1165_v48, 0.0 }
 0x18f   : > { %1217 = vst [vmem:[%s2051_s3 + $0x60] sm:$0xff] %v1189_v43  ;;  %1218 = vst [vmem:[%s2051_s3 + $0x68] sm:$0xff] %v1190_v44  ;;  %v1134_v55 = vld [vmem:[#allocation2 + $0xc8] sm:$0xff]  ;;  %v1194_v59 = vmax.f32 %v1166_v45, 0.0  ;;  %v1196_v62 = vmax.f32 %v1168_v50, 0.0  ;;  %v1197_v1 = vmax.f32 %v1169_v52, 0.0  ;;  %v1173_v5 = vadd.f32 %v1917_v57, %v1133_v51 }
 0x190   : > { %1219 = vst [vmem:[%s2051_s3 + $0x70] sm:$0xff] %v1191_v42  ;;  %1220 = vst [vmem:[%s2051_s3 + $0x78] sm:$0xff] %v1192_v47  ;;  %v1135_v56 = vld [vmem:[#allocation2 + $0xd0] sm:$0xff]  ;;  %v1198_v3 = vmax.f32 %v1170_v46, 0.0  ;;  %v1199_v4 = vmax.f32 %v1171_v53, 0.0  ;;  %v1200_v0 = vmax.f32 %v1172_v54, 0.0  ;;  %v1174_v6 = vadd.f32 %v1919_v58, %v1134_v55 }
 0x191   : > { %v1136_v60 = vld [vmem:[#allocation2 + $0xd8] sm:$0xff]  ;;  %1221 = vst [vmem:[%s2051_s3 + $0x80] sm:$0xff] %v1193_v61  ;;  %1222 = vst [vmem:[%s2051_s3 + $0x88] sm:$0xff] %v1194_v59  ;;  %v1175_v7 = vadd.f32 %v1917_v57, %v1135_v56  ;;  %v1201_v2 = vmax.f32 %v1173_v5, 0.0 }
 0x192   : > { %1223 = vst [vmem:[%s2051_s3 + $0x90] sm:$0xff] %v1195_v63  ;;  %1224 = vst [vmem:[%s2051_s3 + $0x98] sm:$0xff] %v1196_v62  ;;  %v1176_v8 = vadd.f32 %v1919_v58, %v1136_v60  ;;  %v1202_v57 = vmax.f32 %v1174_v6, 0.0 }
 0x193   : > { %1225 = vst [vmem:[%s2051_s3 + $0xa0] sm:$0xff] %v1197_v1  ;;  %1226 = vst [vmem:[%s2051_s3 + $0xa8] sm:$0xff] %v1198_v3  ;;  %v1203_v9 = vmax.f32 %v1175_v7, 0.0 }
 0x194   : > { %1227 = vst [vmem:[%s2051_s3 + $0xb0] sm:$0xff] %v1199_v4  ;;  %1228 = vst [vmem:[%s2051_s3 + $0xb8] sm:$0xff] %v1200_v0  ;;  %v1204_v58 = vmax.f32 %v1176_v8, 0.0 }
 0x195   : > { %1229 = vst [vmem:[%s2051_s3 + $0xc0] sm:$0xff] %v1201_v2  ;;  %1230 = vst [vmem:[%s2051_s3 + $0xc8] sm:$0xff] %v1202_v57 }
 0x196   : > { %1231 = vst [vmem:[%s2051_s3 + $0xd0] sm:$0xff] %v1203_v9  ;;  %1232 = vst [vmem:[%s2051_s3 + $0xd8] sm:$0xff] %v1204_v58 }
 0x197 PF: > { %s13_s16 = sadd.s32 1, %s1683_s16   ;;  %s2052_s12 = smov %s1671_s13 }
 0x198   : > { %p10_p12 = scmp.ge.s32.totalorder %s13_s16, 8   ;;  %s2053_s13 = smov %s1742_s20 }
 0x199   : > { %s2054_s14 = smov %s1679_s15  ;;  %s2055_s15 = smov %s2057_s17 }
 0x19a   :  { %12 = sbr.rel (!%p10_p12) target bundleno = 3 (0x3), region = 113 }

// kernel: reduction_b.6
= control target key start
LH: loop header
LB: loop body
LE: loop exit
PB: predicated region body
PF: predicated region fallthrough
CT: control target
= control target key end

     0   :  { %vm87_vm0 = vcmask 25600   ;;  %s2246_s0 = inlined_call_operand.vmem [shape: f32[16,16,2,4], index: 0, kind: input, shape index: {}]   ;;  %s2247_s1 = inlined_call_operand.vmem [shape: f32[7,7,2,4], index: 1, kind: output, shape index: {}]  }
   0x1   :  { %v8_v0 = vld [vmem:[%s2246_s0] sm:$0x3]  ;;  %v9_v1 = vld [vmem:[%s2246_s0 + $0x2] sm:$0x3]  ;;  %v10_v2 = vld [vmem:[%s2246_s0 + $0x4] sm:$0x3] }
   0x2   :  { %v747_v3 = vld [vmem:[%s2246_s0 + $0x20] sm:$0x3]  ;;  %v748_v4 = vld [vmem:[%s2246_s0 + $0x22] sm:$0x3]  ;;  %v749_v5 = vld [vmem:[%s2246_s0 + $0x24] sm:$0x3] }
   0x3   :  { %v39_v6 = vmax.f32 %v8_v0, %v747_v3  ;;  %v40_v7 = vmax.f32 %v9_v1, %v748_v4  ;;  %v41_v8 = vmax.f32 %v10_v2, %v749_v5  ;;  %v762_v9 = vld [vmem:[%s2246_s0 + $0x40] sm:$0x3]  ;;  %v763_v10 = vld [vmem:[%s2246_s0 + $0x42] sm:$0x3]  ;;  %v764_v11 = vld [vmem:[%s2246_s0 + $0x44] sm:$0x3] }
   0x4   :  { %v11_v12 = vld [vmem:[%s2246_s0 + $0x6] sm:$0x3]  ;;  %v12_v13 = vld [vmem:[%s2246_s0 + $0x8] sm:$0x3]  ;;  %v13_v23 = vld [vmem:[%s2246_s0 + $0xa] sm:$0x3] }
   0x5   :  { %v750_v14 = vld [vmem:[%s2246_s0 + $0x26] sm:$0x3]  ;;  %v70_v15 = vmax.f32 %v39_v6, %v762_v9  ;;  %v71_v16 = vmax.f32 %v40_v7, %v763_v10  ;;  %v72_v17 = vmax.f32 %v41_v8, %v764_v11  ;;  %v751_v18 = vld [vmem:[%s2246_s0 + $0x28] sm:$0x3]  ;;  %v14_v24 = vld [vmem:[%s2246_s0 + $0xc] sm:$0x3] }
   0x6   :  { %v42_v19 = vmax.f32 %v11_v12, %v750_v14  ;;  %v765_v20 = vld [vmem:[%s2246_s0 + $0x46] sm:$0x3]  ;;  %v766_v21 = vld [vmem:[%s2246_s0 + $0x48] sm:$0x3]  ;;  %v43_v22 = vmax.f32 %v12_v13, %v751_v18  ;;  %v752_v25 = vld [vmem:[%s2246_s0 + $0x2a] sm:$0x3] }
   0x7   :  { %v85_v26 = vmax.f32 %v70_v15, %v71_v16  ;;  %v753_v28 = vld [vmem:[%s2246_s0 + $0x2c] sm:$0x3]  ;;  %v44_v29 = vmax.f32 %v13_v23, %v752_v25  ;;  %v767_v30 = vld [vmem:[%s2246_s0 + $0x4a] sm:$0x3]  ;;  %v15_v34 = vld [vmem:[%s2246_s0 + $0xe] sm:$0x3] }
   0x8   :  { %v73_v27 = vmax.f32 %v42_v19, %v765_v20  ;;  %v768_v31 = vld [vmem:[%s2246_s0 + $0x4c] sm:$0x3]  ;;  %v74_v32 = vmax.f32 %v43_v22, %v766_v21  ;;  %v45_v33 = vmax.f32 %v14_v24, %v753_v28  ;;  %v16_v35 = vld [vmem:[%s2246_s0 + $0x10] sm:$0x3]  ;;  %v754_v36 = vld [vmem:[%s2246_s0 + $0x2e] sm:$0x3] }
   0x9   :  { %v86_v37 = vmax.f32 %v85_v26, %v72_v17  ;;  %v75_v39 = vmax.f32 %v44_v29, %v767_v30  ;;  %v755_v40 = vld [vmem:[%s2246_s0 + $0x30] sm:$0x3]  ;;  %v46_v41 = vmax.f32 %v15_v34, %v754_v36  ;;  %v769_v42 = vld [vmem:[%s2246_s0 + $0x4e] sm:$0x3]  ;;  %v17_v46 = vld [vmem:[%s2246_s0 + $0x12] sm:$0x3] }
   0xa   :  { %v89_v38 = vmax.f32 %v72_v17, %v73_v27  ;;  %v770_v43 = vld [vmem:[%s2246_s0 + $0x50] sm:$0x3]  ;;  %v76_v44 = vmax.f32 %v45_v33, %v768_v31  ;;  %v47_v45 = vmax.f32 %v16_v35, %v755_v40  ;;  %v18_v47 = vld [vmem:[%s2246_s0 + $0x14] sm:$0x3]  ;;  %v756_v48 = vld [vmem:[%s2246_s0 + $0x32] sm:$0x3] }
   0xb   :  { %88 = vst.msk [vmem:[%s2247_s1] sm:$0x3] %vm87_vm0, %v86_v37  ;;  %v93_v50 = vmax.f32 %v74_v32, %v75_v39  ;;  %v77_v51 = vmax.f32 %v46_v41, %v769_v42  ;;  %v757_v52 = vld [vmem:[%s2246_s0 + $0x34] sm:$0x3]  ;;  %v48_v53 = vmax.f32 %v17_v46, %v756_v48  ;;  %v771_v54 = vld [vmem:[%s2246_s0 + $0x52] sm:$0x3] }
   0xc   :  { %v90_v49 = vmax.f32 %v89_v38, %v74_v32  ;;  %v772_v55 = vld [vmem:[%s2246_s0 + $0x54] sm:$0x3]  ;;  %v78_v56 = vmax.f32 %v47_v45, %v770_v43  ;;  %v49_v57 = vmax.f32 %v18_v47, %v757_v52  ;;  %v19_v58 = vld [vmem:[%s2246_s0 + $0x16] sm:$0x3]  ;;  %v20_v59 = vld [vmem:[%s2246_s0 + $0x18] sm:$0x3] }
   0xd   :  { %v758_v60 = vld [vmem:[%s2246_s0 + $0x36] sm:$0x3]  ;;  %v94_v61 = vmax.f32 %v93_v50, %v76_v44  ;;  %v97_v62 = vmax.f32 %v76_v44, %v77_v51  ;;  %v79_v63 = vmax.f32 %v48_v53, %v771_v54  ;;  %v759_v0 = vld [vmem:[%s2246_s0 + $0x38] sm:$0x3]  ;;  %v21_v6 = vld [vmem:[%s2246_s0 + $0x1a] sm:$0x3] }
   0xe   :  { %777 = vst.msk [vmem:[%s2247_s1 + $0x2] sm:$0x3] %vm87_vm0, %v90_v49  ;;  %v50_v1 = vmax.f32 %v19_v58, %v758_v60  ;;  %v773_v2 = vld [vmem:[%s2246_s0 + $0x56] sm:$0x3]  ;;  %v774_v3 = vld [vmem:[%s2246_s0 + $0x58] sm:$0x3]  ;;  %v80_v4 = vmax.f32 %v49_v57, %v772_v55  ;;  %v51_v5 = vmax.f32 %v20_v59, %v759_v0 }
   0xf   :  { %v22_v7 = vld [vmem:[%s2246_s0 + $0x1c] sm:$0x3]  ;;  %v760_v8 = vld [vmem:[%s2246_s0 + $0x3a] sm:$0x3]  ;;  %778 = vst.msk [vmem:[%s2247_s1 + $0x4] sm:$0x3] %vm87_vm0, %v94_v61  ;;  %v98_v9 = vmax.f32 %v97_v62, %v78_v56  ;;  %v101_v10 = vmax.f32 %v78_v56, %v79_v63 }
  0x10   :  { %v81_v11 = vmax.f32 %v50_v1, %v773_v2  ;;  %v761_v12 = vld [vmem:[%s2246_s0 + $0x3c] sm:$0x3]  ;;  %v52_v13 = vmax.f32 %v21_v6, %v760_v8  ;;  %v775_v14 = vld [vmem:[%s2246_s0 + $0x5a] sm:$0x3]  ;;  %v82_v16 = vmax.f32 %v51_v5, %v774_v3  ;;  %v783_v18 = vld [vmem:[%s2246_s0 + $0x40] sm:$0x3] }
  0x11   :  { %v776_v15 = vld [vmem:[%s2246_s0 + $0x5c] sm:$0x3]  ;;  %v53_v17 = vmax.f32 %v22_v7, %v761_v12  ;;  %v784_v19 = vld [vmem:[%s2246_s0 + $0x42] sm:$0x3]  ;;  %v785_v20 = vld [vmem:[%s2246_s0 + $0x44] sm:$0x3]  ;;  %v102_v21 = vmax.f32 %v101_v10, %v80_v4 }
  0x12   :  { %779 = vst.msk [vmem:[%s2247_s1 + $0x6] sm:$0x3] %vm87_vm0, %v98_v9  ;;  %v105_v22 = vmax.f32 %v80_v4, %v81_v11  ;;  %v83_v23 = vmax.f32 %v52_v13, %v775_v14  ;;  %v798_v24 = vld [vmem:[%s2246_s0 + $0x60] sm:$0x3]  ;;  %v799_v25 = vld [vmem:[%s2246_s0 + $0x62] sm:$0x3] }
  0x13   :  { %v800_v26 = vld [vmem:[%s2246_s0 + $0x64] sm:$0x3]  ;;  %v84_v27 = vmax.f32 %v53_v17, %v776_v15  ;;  %v144_v28 = vmax.f32 %v783_v18, %v798_v24  ;;  %v145_v29 = vmax.f32 %v784_v19, %v799_v25  ;;  %v813_v31 = vld [vmem:[%s2246_s0 + $0x80] sm:$0x3]  ;;  %v814_v32 = vld [vmem:[%s2246_s0 + $0x82] sm:$0x3] }
  0x14   :  { %v146_v30 = vmax.f32 %v785_v20, %v800_v26  ;;  %v815_v33 = vld [vmem:[%s2246_s0 + $0x84] sm:$0x3]  ;;  %780 = vst.msk [vmem:[%s2247_s1 + $0x8] sm:$0x3] %vm87_vm0, %v102_v21  ;;  %v106_v34 = vmax.f32 %v105_v22, %v82_v16  ;;  %v109_v35 = vmax.f32 %v82_v16, %v83_v23  ;;  %v786_v36 = vld [vmem:[%s2246_s0 + $0x46] sm:$0x3] }
  0x15   :  { %v787_v37 = vld [vmem:[%s2246_s0 + $0x48] sm:$0x3]  ;;  %v801_v38 = vld [vmem:[%s2246_s0 + $0x66] sm:$0x3]  ;;  %v175_v39 = vmax.f32 %v144_v28, %v813_v31  ;;  %v176_v40 = vmax.f32 %v145_v29, %v814_v32  ;;  %v788_v48 = vld [vmem:[%s2246_s0 + $0x4a] sm:$0x3] }
  0x16   :  { %v177_v41 = vmax.f32 %v146_v30, %v815_v33  ;;  %v802_v42 = vld [vmem:[%s2246_s0 + $0x68] sm:$0x3]  ;;  %v147_v43 = vmax.f32 %v786_v36, %v801_v38  ;;  %v816_v44 = vld [vmem:[%s2246_s0 + $0x86] sm:$0x3]  ;;  %781 = vst.msk [vmem:[%s2247_s1 + $0xa] sm:$0x3] %vm87_vm0, %v106_v34  ;;  %v110_v46 = vmax.f32 %v109_v35, %v84_v27 }
  0x17   :  { %v817_v45 = vld [vmem:[%s2246_s0 + $0x88] sm:$0x3]  ;;  %v148_v47 = vmax.f32 %v787_v37, %v802_v42  ;;  %v789_v49 = vld [vmem:[%s2246_s0 + $0x4c] sm:$0x3]  ;;  %v803_v50 = vld [vmem:[%s2246_s0 + $0x6a] sm:$0x3]  ;;  %v190_v51 = vmax.f32 %v175_v39, %v176_v40 }
  0x18   :  { %v178_v52 = vmax.f32 %v147_v43, %v816_v44  ;;  %v804_v53 = vld [vmem:[%s2246_s0 + $0x6c] sm:$0x3]  ;;  %v149_v54 = vmax.f32 %v788_v48, %v803_v50  ;;  %v818_v55 = vld [vmem:[%s2246_s0 + $0x8a] sm:$0x3]  ;;  %782 = vst.msk [vmem:[%s2247_s1 + $0xc] sm:$0x3] %vm87_vm0, %v110_v46 }
  0x19   :  { %v819_v56 = vld [vmem:[%s2246_s0 + $0x8c] sm:$0x3]  ;;  %v179_v57 = vmax.f32 %v148_v47, %v817_v45  ;;  %v150_v58 = vmax.f32 %v789_v49, %v804_v53  ;;  %v790_v59 = vld [vmem:[%s2246_s0 + $0x4e] sm:$0x3]  ;;  %v791_v60 = vld [vmem:[%s2246_s0 + $0x50] sm:$0x3]  ;;  %v191_v62 = vmax.f32 %v190_v51, %v177_v41 }
  0x1a   :  { %v805_v61 = vld [vmem:[%s2246_s0 + $0x6e] sm:$0x3]  ;;  %v194_v63 = vmax.f32 %v177_v41, %v178_v52  ;;  %v180_v0 = vmax.f32 %v149_v54, %v818_v55  ;;  %v806_v1 = vld [vmem:[%s2246_s0 + $0x70] sm:$0x3]  ;;  %v792_v7 = vld [vmem:[%s2246_s0 + $0x52] sm:$0x3] }
  0x1b   :  { %v151_v2 = vmax.f32 %v790_v59, %v805_v61  ;;  %v820_v3 = vld [vmem:[%s2246_s0 + $0x8e] sm:$0x3]  ;;  %v821_v4 = vld [vmem:[%s2246_s0 + $0x90] sm:$0x3]  ;;  %v181_v5 = vmax.f32 %v150_v58, %v819_v56  ;;  %v152_v6 = vmax.f32 %v791_v60, %v806_v1  ;;  %v793_v8 = vld [vmem:[%s2246_s0 + $0x54] sm:$0x3] }
  0x1c   :  { %v807_v9 = vld [vmem:[%s2246_s0 + $0x72] sm:$0x3]  ;;  %828 = vst.msk [vmem:[%s2247_s1 + $0xe] sm:$0x3] %vm87_vm0, %v191_v62  ;;  %v195_v10 = vmax.f32 %v194_v63, %v179_v57  ;;  %v198_v11 = vmax.f32 %v179_v57, %v180_v0  ;;  %v808_v13 = vld [vmem:[%s2246_s0 + $0x74] sm:$0x3] }
  0x1d   :  { %v182_v12 = vmax.f32 %v151_v2, %v820_v3  ;;  %v153_v14 = vmax.f32 %v792_v7, %v807_v9  ;;  %v822_v15 = vld [vmem:[%s2246_s0 + $0x92] sm:$0x3]  ;;  %v823_v16 = vld [vmem:[%s2246_s0 + $0x94] sm:$0x3]  ;;  %v183_v17 = vmax.f32 %v152_v6, %v821_v4  ;;  %v154_v18 = vmax.f32 %v793_v8, %v808_v13  ;;  %v794_v19 = vld [vmem:[%s2246_s0 + $0x56] sm:$0x3] }
  0x1e   :  { %v795_v20 = vld [vmem:[%s2246_s0 + $0x58] sm:$0x3]  ;;  %v809_v21 = vld [vmem:[%s2246_s0 + $0x76] sm:$0x3]  ;;  %829 = vst.msk [vmem:[%s2247_s1 + $0x10] sm:$0x3] %vm87_vm0, %v195_v10  ;;  %v199_v22 = vmax.f32 %v198_v11, %v181_v5 }
  0x1f   :  { %v202_v23 = vmax.f32 %v181_v5, %v182_v12  ;;  %v184_v24 = vmax.f32 %v153_v14, %v822_v15  ;;  %v810_v25 = vld [vmem:[%s2246_s0 + $0x78] sm:$0x3]  ;;  %v155_v26 = vmax.f32 %v794_v19, %v809_v21  ;;  %v824_v27 = vld [vmem:[%s2246_s0 + $0x96] sm:$0x3]  ;;  %v185_v29 = vmax.f32 %v154_v18, %v823_v16  ;;  %v796_v31 = vld [vmem:[%s2246_s0 + $0x5a] sm:$0x3] }
  0x20   :  { %v825_v28 = vld [vmem:[%s2246_s0 + $0x98] sm:$0x3]  ;;  %v156_v30 = vmax.f32 %v795_v20, %v810_v25  ;;  %v797_v32 = vld [vmem:[%s2246_s0 + $0x5c] sm:$0x3]  ;;  %v811_v33 = vld [vmem:[%s2246_s0 + $0x7a] sm:$0x3] }
  0x21   :  { %830 = vst.msk [vmem:[%s2247_s1 + $0x12] sm:$0x3] %vm87_vm0, %v199_v22  ;;  %v203_v34 = vmax.f32 %v202_v23, %v183_v17  ;;  %v206_v35 = vmax.f32 %v183_v17, %v184_v24  ;;  %v186_v36 = vmax.f32 %v155_v26, %v824_v27  ;;  %v812_v37 = vld [vmem:[%s2246_s0 + $0x7c] sm:$0x3]  ;;  %v157_v38 = vmax.f32 %v796_v31, %v811_v33  ;;  %v826_v39 = vld [vmem:[%s2246_s0 + $0x9a] sm:$0x3] }
  0x22   :  { %v827_v40 = vld [vmem:[%s2246_s0 + $0x9c] sm:$0x3]  ;;  %v187_v41 = vmax.f32 %v156_v30, %v825_v28  ;;  %v158_v42 = vmax.f32 %v797_v32, %v812_v37  ;;  %v835_v43 = vld [vmem:[%s2246_s0 + $0x80] sm:$0x3]  ;;  %v836_v44 = vld [vmem:[%s2246_s0 + $0x82] sm:$0x3] }
  0x23   :  { %v837_v45 = vld [vmem:[%s2246_s0 + $0x84] sm:$0x3]  ;;  %831 = vst.msk [vmem:[%s2247_s1 + $0x14] sm:$0x3] %vm87_vm0, %v203_v34  ;;  %v207_v46 = vmax.f32 %v206_v35, %v185_v29  ;;  %v210_v47 = vmax.f32 %v185_v29, %v186_v36  ;;  %v188_v48 = vmax.f32 %v157_v38, %v826_v39  ;;  %v850_v49 = vld [vmem:[%s2246_s0 + $0xa0] sm:$0x3] }
  0x24   :  { %v851_v50 = vld [vmem:[%s2246_s0 + $0xa2] sm:$0x3]  ;;  %v852_v51 = vld [vmem:[%s2246_s0 + $0xa4] sm:$0x3]  ;;  %v189_v52 = vmax.f32 %v158_v42, %v827_v40  ;;  %v249_v53 = vmax.f32 %v835_v43, %v850_v49  ;;  %v865_v56 = vld [vmem:[%s2246_s0 + $0xc0] sm:$0x3] }
  0x25   :  { %v250_v54 = vmax.f32 %v836_v44, %v851_v50  ;;  %v251_v55 = vmax.f32 %v837_v45, %v852_v51  ;;  %v866_v57 = vld [vmem:[%s2246_s0 + $0xc2] sm:$0x3]  ;;  %v867_v58 = vld [vmem:[%s2246_s0 + $0xc4] sm:$0x3]  ;;  %832 = vst.msk [vmem:[%s2247_s1 + $0x16] sm:$0x3] %vm87_vm0, %v207_v46  ;;  %v211_v59 = vmax.f32 %v210_v47, %v187_v41  ;;  %v214_v60 = vmax.f32 %v187_v41, %v188_v48 }
  0x26   :  { %v838_v61 = vld [vmem:[%s2246_s0 + $0x86] sm:$0x3]  ;;  %v839_v62 = vld [vmem:[%s2246_s0 + $0x88] sm:$0x3]  ;;  %v280_v0 = vmax.f32 %v249_v53, %v865_v56  ;;  %v840_v9 = vld [vmem:[%s2246_s0 + $0x8a] sm:$0x3] }
  0x27   :  { %v853_v63 = vld [vmem:[%s2246_s0 + $0xa6] sm:$0x3]  ;;  %v281_v1 = vmax.f32 %v250_v54, %v866_v57  ;;  %v282_v2 = vmax.f32 %v251_v55, %v867_v58  ;;  %v854_v3 = vld [vmem:[%s2246_s0 + $0xa8] sm:$0x3]  ;;  %833 = vst.msk [vmem:[%s2247_s1 + $0x18] sm:$0x3] %vm87_vm0, %v211_v59  ;;  %v215_v7 = vmax.f32 %v214_v60, %v189_v52 }
  0x28   :  { %v252_v4 = vmax.f32 %v838_v61, %v853_v63  ;;  %v868_v5 = vld [vmem:[%s2246_s0 + $0xc6] sm:$0x3]  ;;  %v869_v6 = vld [vmem:[%s2246_s0 + $0xc8] sm:$0x3]  ;;  %v253_v8 = vmax.f32 %v839_v62, %v854_v3  ;;  %v841_v10 = vld [vmem:[%s2246_s0 + $0x8c] sm:$0x3] }
  0x29   :  { %v855_v11 = vld [vmem:[%s2246_s0 + $0xaa] sm:$0x3]  ;;  %v295_v12 = vmax.f32 %v280_v0, %v281_v1  ;;  %v856_v14 = vld [vmem:[%s2246_s0 + $0xac] sm:$0x3]  ;;  %834 = vst.msk [vmem:[%s2247_s1 + $0x1a] sm:$0x3] %vm87_vm0, %v215_v7 }
  0x2a   :  { %v283_v13 = vmax.f32 %v252_v4, %v868_v5  ;;  %v254_v15 = vmax.f32 %v840_v9, %v855_v11  ;;  %v870_v16 = vld [vmem:[%s2246_s0 + $0xca] sm:$0x3]  ;;  %v871_v17 = vld [vmem:[%s2246_s0 + $0xcc] sm:$0x3]  ;;  %v284_v18 = vmax.f32 %v253_v8, %v869_v6  ;;  %v255_v19 = vmax.f32 %v841_v10, %v856_v14  ;;  %v842_v20 = vld [vmem:[%s2246_s0 + $0x8e] sm:$0x3] }
  0x2b   :  { %v843_v21 = vld [vmem:[%s2246_s0 + $0x90] sm:$0x3]  ;;  %v857_v22 = vld [vmem:[%s2246_s0 + $0xae] sm:$0x3]  ;;  %v296_v23 = vmax.f32 %v295_v12, %v282_v2  ;;  %v844_v32 = vld [vmem:[%s2246_s0 + $0x92] sm:$0x3] }
  0x2c   :  { %v299_v24 = vmax.f32 %v282_v2, %v283_v13  ;;  %v285_v25 = vmax.f32 %v254_v15, %v870_v16  ;;  %v858_v26 = vld [vmem:[%s2246_s0 + $0xb0] sm:$0x3]  ;;  %v256_v27 = vmax.f32 %v842_v20, %v857_v22  ;;  %v872_v28 = vld [vmem:[%s2246_s0 + $0xce] sm:$0x3]  ;;  %v286_v30 = vmax.f32 %v255_v19, %v871_v17  ;;  %v845_v33 = vld [vmem:[%s2246_s0 + $0x94] sm:$0x3] }
  0x2d   :  { %v873_v29 = vld [vmem:[%s2246_s0 + $0xd0] sm:$0x3]  ;;  %v257_v31 = vmax.f32 %v843_v21, %v858_v26  ;;  %v859_v34 = vld [vmem:[%s2246_s0 + $0xb2] sm:$0x3]  ;;  %880 = vst.msk [vmem:[%s2247_s1 + $0x1c] sm:$0x3] %vm87_vm0, %v296_v23 }
  0x2e   :  { %v300_v35 = vmax.f32 %v299_v24, %v284_v18  ;;  %v303_v36 = vmax.f32 %v284_v18, %v285_v25  ;;  %v287_v37 = vmax.f32 %v256_v27, %v872_v28  ;;  %v860_v38 = vld [vmem:[%s2246_s0 + $0xb4] sm:$0x3]  ;;  %v258_v39 = vmax.f32 %v844_v32, %v859_v34  ;;  %v874_v40 = vld [vmem:[%s2246_s0 + $0xd2] sm:$0x3]  ;;  %v846_v44 = vld [vmem:[%s2246_s0 + $0x96] sm:$0x3] }
  0x2f   :  { %v875_v41 = vld [vmem:[%s2246_s0 + $0xd4] sm:$0x3]  ;;  %v288_v42 = vmax.f32 %v257_v31, %v873_v29  ;;  %v259_v43 = vmax.f32 %v845_v33, %v860_v38  ;;  %v847_v45 = vld [vmem:[%s2246_s0 + $0x98] sm:$0x3]  ;;  %v861_v46 = vld [vmem:[%s2246_s0 + $0xb6] sm:$0x3] }
  0x30   :  { %881 = vst.msk [vmem:[%s2247_s1 + $0x1e] sm:$0x3] %vm87_vm0, %v300_v35  ;;  %v304_v47 = vmax.f32 %v303_v36, %v286_v30  ;;  %v307_v48 = vmax.f32 %v286_v30, %v287_v37  ;;  %v289_v49 = vmax.f32 %v258_v39, %v874_v40  ;;  %v862_v50 = vld [vmem:[%s2246_s0 + $0xb8] sm:$0x3]  ;;  %v260_v51 = vmax.f32 %v846_v44, %v861_v46  ;;  %v876_v52 = vld [vmem:[%s2246_s0 + $0xd6] sm:$0x3] }
  0x31   :  { %v877_v53 = vld [vmem:[%s2246_s0 + $0xd8] sm:$0x3]  ;;  %v290_v54 = vmax.f32 %v259_v43, %v875_v41  ;;  %v261_v55 = vmax.f32 %v847_v45, %v862_v50  ;;  %v848_v56 = vld [vmem:[%s2246_s0 + $0x9a] sm:$0x3]  ;;  %v849_v57 = vld [vmem:[%s2246_s0 + $0x9c] sm:$0x3] }
  0x32   :  { %v863_v58 = vld [vmem:[%s2246_s0 + $0xba] sm:$0x3]  ;;  %882 = vst.msk [vmem:[%s2247_s1 + $0x20] sm:$0x3] %vm87_vm0, %v304_v47  ;;  %v308_v59 = vmax.f32 %v307_v48, %v288_v42  ;;  %v311_v60 = vmax.f32 %v288_v42, %v289_v49  ;;  %v291_v61 = vmax.f32 %v260_v51, %v876_v52  ;;  %v864_v62 = vld [vmem:[%s2246_s0 + $0xbc] sm:$0x3] }
  0x33   :  { %v262_v63 = vmax.f32 %v848_v56, %v863_v58  ;;  %v878_v0 = vld [vmem:[%s2246_s0 + $0xda] sm:$0x3]  ;;  %v879_v1 = vld [vmem:[%s2246_s0 + $0xdc] sm:$0x3]  ;;  %v292_v2 = vmax.f32 %v261_v55, %v877_v53  ;;  %v263_v3 = vmax.f32 %v849_v57, %v864_v62  ;;  %v887_v4 = vld [vmem:[%s2246_s0 + $0xc0] sm:$0x3] }
  0x34   :  { %v888_v5 = vld [vmem:[%s2246_s0 + $0xc2] sm:$0x3]  ;;  %v889_v6 = vld [vmem:[%s2246_s0 + $0xc4] sm:$0x3]  ;;  %883 = vst.msk [vmem:[%s2247_s1 + $0x22] sm:$0x3] %vm87_vm0, %v308_v59  ;;  %v312_v7 = vmax.f32 %v311_v60, %v290_v54  ;;  %v315_v8 = vmax.f32 %v290_v54, %v291_v61 }
  0x35   :  { %v293_v9 = vmax.f32 %v262_v63, %v878_v0  ;;  %v902_v10 = vld [vmem:[%s2246_s0 + $0xe0] sm:$0x3]  ;;  %v903_v11 = vld [vmem:[%s2246_s0 + $0xe2] sm:$0x3]  ;;  %v904_v12 = vld [vmem:[%s2246_s0 + $0xe4] sm:$0x3]  ;;  %v294_v13 = vmax.f32 %v263_v3, %v879_v1 }
  0x36   :  { %v354_v14 = vmax.f32 %v887_v4, %v902_v10  ;;  %v355_v15 = vmax.f32 %v888_v5, %v903_v11  ;;  %v356_v16 = vmax.f32 %v889_v6, %v904_v12  ;;  %v917_v17 = vld [vmem:[%s2246_s0 + $0x100] sm:$0x3]  ;;  %v918_v18 = vld [vmem:[%s2246_s0 + $0x102] sm:$0x3]  ;;  %v919_v19 = vld [vmem:[%s2246_s0 + $0x104] sm:$0x3]  ;;  %v316_v20 = vmax.f32 %v315_v8, %v292_v2 }
  0x37   :  { %884 = vst.msk [vmem:[%s2247_s1 + $0x24] sm:$0x3] %vm87_vm0, %v312_v7  ;;  %v319_v21 = vmax.f32 %v292_v2, %v293_v9  ;;  %v890_v22 = vld [vmem:[%s2246_s0 + $0xc6] sm:$0x3]  ;;  %v891_v23 = vld [vmem:[%s2246_s0 + $0xc8] sm:$0x3] }
  0x38   :  { %v905_v24 = vld [vmem:[%s2246_s0 + $0xe6] sm:$0x3]  ;;  %v385_v25 = vmax.f32 %v354_v14, %v917_v17  ;;  %v386_v26 = vmax.f32 %v355_v15, %v918_v18  ;;  %v387_v27 = vmax.f32 %v356_v16, %v919_v19  ;;  %v906_v28 = vld [vmem:[%s2246_s0 + $0xe8] sm:$0x3]  ;;  %885 = vst.msk [vmem:[%s2247_s1 + $0x26] sm:$0x3] %vm87_vm0, %v316_v20 }
  0x39   :  { %v357_v29 = vmax.f32 %v890_v22, %v905_v24  ;;  %v920_v30 = vld [vmem:[%s2246_s0 + $0x106] sm:$0x3]  ;;  %v921_v31 = vld [vmem:[%s2246_s0 + $0x108] sm:$0x3]  ;;  %v320_v32 = vmax.f32 %v319_v21, %v294_v13  ;;  %v358_v33 = vmax.f32 %v891_v23, %v906_v28  ;;  %v892_v34 = vld [vmem:[%s2246_s0 + $0xca] sm:$0x3] }
  0x3a   :  { %v893_v35 = vld [vmem:[%s2246_s0 + $0xcc] sm:$0x3]  ;;  %v907_v36 = vld [vmem:[%s2246_s0 + $0xea] sm:$0x3]  ;;  %v400_v37 = vmax.f32 %v385_v25, %v386_v26  ;;  %v894_v45 = vld [vmem:[%s2246_s0 + $0xce] sm:$0x3] }
  0x3b   :  { %v388_v38 = vmax.f32 %v357_v29, %v920_v30  ;;  %v908_v39 = vld [vmem:[%s2246_s0 + $0xec] sm:$0x3]  ;;  %v359_v40 = vmax.f32 %v892_v34, %v907_v36  ;;  %v922_v41 = vld [vmem:[%s2246_s0 + $0x10a] sm:$0x3]  ;;  %886 = vst.msk [vmem:[%s2247_s1 + $0x28] sm:$0x3] %vm87_vm0, %v320_v32  ;;  %v389_v43 = vmax.f32 %v358_v33, %v921_v31 }
  0x3c   :  { %v923_v42 = vld [vmem:[%s2246_s0 + $0x10c] sm:$0x3]  ;;  %v360_v44 = vmax.f32 %v893_v35, %v908_v39  ;;  %v895_v46 = vld [vmem:[%s2246_s0 + $0xd0] sm:$0x3]  ;;  %v909_v47 = vld [vmem:[%s2246_s0 + $0xee] sm:$0x3]  ;;  %v401_v48 = vmax.f32 %v400_v37, %v387_v27 }
  0x3d   :  { %v404_v49 = vmax.f32 %v387_v27, %v388_v38  ;;  %v390_v50 = vmax.f32 %v359_v40, %v922_v41  ;;  %v910_v51 = vld [vmem:[%s2246_s0 + $0xf0] sm:$0x3]  ;;  %v361_v52 = vmax.f32 %v894_v45, %v909_v47  ;;  %v924_v53 = vld [vmem:[%s2246_s0 + $0x10e] sm:$0x3]  ;;  %v896_v57 = vld [vmem:[%s2246_s0 + $0xd2] sm:$0x3] }
  0x3e   :  { %v925_v54 = vld [vmem:[%s2246_s0 + $0x110] sm:$0x3]  ;;  %v391_v55 = vmax.f32 %v360_v44, %v923_v42  ;;  %v362_v56 = vmax.f32 %v895_v46, %v910_v51  ;;  %v897_v58 = vld [vmem:[%s2246_s0 + $0xd4] sm:$0x3]  ;;  %v911_v59 = vld [vmem:[%s2246_s0 + $0xf2] sm:$0x3] }
  0x3f   :  { %932 = vst.msk [vmem:[%s2247_s1 + $0x2a] sm:$0x3] %vm87_vm0, %v401_v48  ;;  %v405_v60 = vmax.f32 %v404_v49, %v389_v43  ;;  %v408_v61 = vmax.f32 %v389_v43, %v390_v50  ;;  %v392_v62 = vmax.f32 %v361_v52, %v924_v53  ;;  %v912_v63 = vld [vmem:[%s2246_s0 + $0xf4] sm:$0x3]  ;;  %v363_v0 = vmax.f32 %v896_v57, %v911_v59  ;;  %v926_v1 = vld [vmem:[%s2246_s0 + $0x112] sm:$0x3] }
  0x40   :  { %v927_v2 = vld [vmem:[%s2246_s0 + $0x114] sm:$0x3]  ;;  %v393_v3 = vmax.f32 %v362_v56, %v925_v54  ;;  %v364_v4 = vmax.f32 %v897_v58, %v912_v63  ;;  %v898_v5 = vld [vmem:[%s2246_s0 + $0xd6] sm:$0x3]  ;;  %v899_v6 = vld [vmem:[%s2246_s0 + $0xd8] sm:$0x3] }
  0x41   :  { %v913_v7 = vld [vmem:[%s2246_s0 + $0xf6] sm:$0x3]  ;;  %933 = vst.msk [vmem:[%s2247_s1 + $0x2c] sm:$0x3] %vm87_vm0, %v405_v60  ;;  %v409_v8 = vmax.f32 %v408_v61, %v391_v55  ;;  %v412_v9 = vmax.f32 %v391_v55, %v392_v62  ;;  %v394_v10 = vmax.f32 %v363_v0, %v926_v1  ;;  %v914_v11 = vld [vmem:[%s2246_s0 + $0xf8] sm:$0x3] }
  0x42   :  { %v365_v12 = vmax.f32 %v898_v5, %v913_v7  ;;  %v928_v13 = vld [vmem:[%s2246_s0 + $0x116] sm:$0x3]  ;;  %v929_v14 = vld [vmem:[%s2246_s0 + $0x118] sm:$0x3]  ;;  %v395_v15 = vmax.f32 %v364_v4, %v927_v2  ;;  %v366_v16 = vmax.f32 %v899_v6, %v914_v11  ;;  %v900_v17 = vld [vmem:[%s2246_s0 + $0xda] sm:$0x3] }
  0x43   :  { %v901_v18 = vld [vmem:[%s2246_s0 + $0xdc] sm:$0x3]  ;;  %v915_v19 = vld [vmem:[%s2246_s0 + $0xfa] sm:$0x3]  ;;  %934 = vst.msk [vmem:[%s2247_s1 + $0x2e] sm:$0x3] %vm87_vm0, %v409_v8  ;;  %v413_v20 = vmax.f32 %v412_v9, %v393_v3  ;;  %v416_v21 = vmax.f32 %v393_v3, %v394_v10 }
  0x44   :  { %v396_v22 = vmax.f32 %v365_v12, %v928_v13  ;;  %v916_v23 = vld [vmem:[%s2246_s0 + $0xfc] sm:$0x3]  ;;  %v367_v24 = vmax.f32 %v900_v17, %v915_v19  ;;  %v930_v25 = vld [vmem:[%s2246_s0 + $0x11a] sm:$0x3]  ;;  %v397_v27 = vmax.f32 %v366_v16, %v929_v14  ;;  %v939_v29 = vld [vmem:[%s2246_s0 + $0x100] sm:$0x3] }
  0x45   :  { %v931_v26 = vld [vmem:[%s2246_s0 + $0x11c] sm:$0x3]  ;;  %v368_v28 = vmax.f32 %v901_v18, %v916_v23  ;;  %v940_v30 = vld [vmem:[%s2246_s0 + $0x102] sm:$0x3]  ;;  %v941_v31 = vld [vmem:[%s2246_s0 + $0x104] sm:$0x3]  ;;  %v417_v32 = vmax.f32 %v416_v21, %v395_v15 }
  0x46   :  { %935 = vst.msk [vmem:[%s2247_s1 + $0x30] sm:$0x3] %vm87_vm0, %v413_v20  ;;  %v420_v33 = vmax.f32 %v395_v15, %v396_v22  ;;  %v398_v34 = vmax.f32 %v367_v24, %v930_v25  ;;  %v954_v35 = vld [vmem:[%s2246_s0 + $0x120] sm:$0x3]  ;;  %v955_v36 = vld [vmem:[%s2246_s0 + $0x122] sm:$0x3] }
  0x47   :  { %v956_v37 = vld [vmem:[%s2246_s0 + $0x124] sm:$0x3]  ;;  %v399_v38 = vmax.f32 %v368_v28, %v931_v26  ;;  %v459_v39 = vmax.f32 %v939_v29, %v954_v35  ;;  %v460_v40 = vmax.f32 %v940_v30, %v955_v36  ;;  %v969_v42 = vld [vmem:[%s2246_s0 + $0x140] sm:$0x3]  ;;  %v970_v43 = vld [vmem:[%s2246_s0 + $0x142] sm:$0x3] }
  0x48   :  { %v461_v41 = vmax.f32 %v941_v31, %v956_v37  ;;  %v971_v44 = vld [vmem:[%s2246_s0 + $0x144] sm:$0x3]  ;;  %936 = vst.msk [vmem:[%s2247_s1 + $0x32] sm:$0x3] %vm87_vm0, %v417_v32  ;;  %v421_v45 = vmax.f32 %v420_v33, %v397_v27  ;;  %v424_v46 = vmax.f32 %v397_v27, %v398_v34  ;;  %v942_v47 = vld [vmem:[%s2246_s0 + $0x106] sm:$0x3] }
  0x49   :  { %v943_v48 = vld [vmem:[%s2246_s0 + $0x108] sm:$0x3]  ;;  %v957_v49 = vld [vmem:[%s2246_s0 + $0x126] sm:$0x3]  ;;  %v490_v50 = vmax.f32 %v459_v39, %v969_v42  ;;  %v491_v51 = vmax.f32 %v460_v40, %v970_v43  ;;  %v944_v59 = vld [vmem:[%s2246_s0 + $0x10a] sm:$0x3] }
  0x4a   :  { %v492_v52 = vmax.f32 %v461_v41, %v971_v44  ;;  %v958_v53 = vld [vmem:[%s2246_s0 + $0x128] sm:$0x3]  ;;  %v462_v54 = vmax.f32 %v942_v47, %v957_v49  ;;  %v972_v55 = vld [vmem:[%s2246_s0 + $0x146] sm:$0x3]  ;;  %937 = vst.msk [vmem:[%s2247_s1 + $0x34] sm:$0x3] %vm87_vm0, %v421_v45  ;;  %v425_v57 = vmax.f32 %v424_v46, %v399_v38 }
  0x4b   :  { %v973_v56 = vld [vmem:[%s2246_s0 + $0x148] sm:$0x3]  ;;  %v463_v58 = vmax.f32 %v943_v48, %v958_v53  ;;  %v945_v60 = vld [vmem:[%s2246_s0 + $0x10c] sm:$0x3]  ;;  %v959_v61 = vld [vmem:[%s2246_s0 + $0x12a] sm:$0x3]  ;;  %v505_v62 = vmax.f32 %v490_v50, %v491_v51 }
  0x4c   :  { %v493_v63 = vmax.f32 %v462_v54, %v972_v55  ;;  %v960_v0 = vld [vmem:[%s2246_s0 + $0x12c] sm:$0x3]  ;;  %v464_v1 = vmax.f32 %v944_v59, %v959_v61  ;;  %v974_v2 = vld [vmem:[%s2246_s0 + $0x14a] sm:$0x3]  ;;  %938 = vst.msk [vmem:[%s2247_s1 + $0x36] sm:$0x3] %vm87_vm0, %v425_v57 }
  0x4d   :  { %v975_v3 = vld [vmem:[%s2246_s0 + $0x14c] sm:$0x3]  ;;  %v494_v4 = vmax.f32 %v463_v58, %v973_v56  ;;  %v465_v5 = vmax.f32 %v945_v60, %v960_v0  ;;  %v946_v6 = vld [vmem:[%s2246_s0 + $0x10e] sm:$0x3]  ;;  %v947_v7 = vld [vmem:[%s2246_s0 + $0x110] sm:$0x3]  ;;  %v506_v9 = vmax.f32 %v505_v62, %v492_v52 }
  0x4e   :  { %v961_v8 = vld [vmem:[%s2246_s0 + $0x12e] sm:$0x3]  ;;  %v509_v10 = vmax.f32 %v492_v52, %v493_v63  ;;  %v495_v11 = vmax.f32 %v464_v1, %v974_v2  ;;  %v962_v12 = vld [vmem:[%s2246_s0 + $0x130] sm:$0x3]  ;;  %v948_v18 = vld [vmem:[%s2246_s0 + $0x112] sm:$0x3] }
  0x4f   :  { %v466_v13 = vmax.f32 %v946_v6, %v961_v8  ;;  %v976_v14 = vld [vmem:[%s2246_s0 + $0x14e] sm:$0x3]  ;;  %v977_v15 = vld [vmem:[%s2246_s0 + $0x150] sm:$0x3]  ;;  %v496_v16 = vmax.f32 %v465_v5, %v975_v3  ;;  %v467_v17 = vmax.f32 %v947_v7, %v962_v12  ;;  %v949_v19 = vld [vmem:[%s2246_s0 + $0x114] sm:$0x3] }
  0x50   :  { %v963_v20 = vld [vmem:[%s2246_s0 + $0x132] sm:$0x3]  ;;  %984 = vst.msk [vmem:[%s2247_s1 + $0x38] sm:$0x3] %vm87_vm0, %v506_v9  ;;  %v510_v21 = vmax.f32 %v509_v10, %v494_v4  ;;  %v513_v22 = vmax.f32 %v494_v4, %v495_v11  ;;  %v964_v24 = vld [vmem:[%s2246_s0 + $0x134] sm:$0x3] }
  0x51   :  { %v497_v23 = vmax.f32 %v466_v13, %v976_v14  ;;  %v468_v25 = vmax.f32 %v948_v18, %v963_v20  ;;  %v978_v26 = vld [vmem:[%s2246_s0 + $0x152] sm:$0x3]  ;;  %v979_v27 = vld [vmem:[%s2246_s0 + $0x154] sm:$0x3]  ;;  %v498_v28 = vmax.f32 %v467_v17, %v977_v15  ;;  %v469_v29 = vmax.f32 %v949_v19, %v964_v24  ;;  %v950_v30 = vld [vmem:[%s2246_s0 + $0x116] sm:$0x3] }
  0x52   :  { %v951_v31 = vld [vmem:[%s2246_s0 + $0x118] sm:$0x3]  ;;  %v965_v32 = vld [vmem:[%s2246_s0 + $0x136] sm:$0x3]  ;;  %985 = vst.msk [vmem:[%s2247_s1 + $0x3a] sm:$0x3] %vm87_vm0, %v510_v21  ;;  %v514_v33 = vmax.f32 %v513_v22, %v496_v16 }
  0x53   :  { %v517_v34 = vmax.f32 %v496_v16, %v497_v23  ;;  %v499_v35 = vmax.f32 %v468_v25, %v978_v26  ;;  %v966_v36 = vld [vmem:[%s2246_s0 + $0x138] sm:$0x3]  ;;  %v470_v37 = vmax.f32 %v950_v30, %v965_v32  ;;  %v980_v38 = vld [vmem:[%s2246_s0 + $0x156] sm:$0x3]  ;;  %v500_v40 = vmax.f32 %v469_v29, %v979_v27  ;;  %v952_v42 = vld [vmem:[%s2246_s0 + $0x11a] sm:$0x3] }
  0x54   :  { %v981_v39 = vld [vmem:[%s2246_s0 + $0x158] sm:$0x3]  ;;  %v471_v41 = vmax.f32 %v951_v31, %v966_v36  ;;  %v953_v43 = vld [vmem:[%s2246_s0 + $0x11c] sm:$0x3]  ;;  %v967_v44 = vld [vmem:[%s2246_s0 + $0x13a] sm:$0x3] }
  0x55   :  { %986 = vst.msk [vmem:[%s2247_s1 + $0x3c] sm:$0x3] %vm87_vm0, %v514_v33  ;;  %v518_v45 = vmax.f32 %v517_v34, %v498_v28  ;;  %v521_v46 = vmax.f32 %v498_v28, %v499_v35  ;;  %v501_v47 = vmax.f32 %v470_v37, %v980_v38  ;;  %v968_v48 = vld [vmem:[%s2246_s0 + $0x13c] sm:$0x3]  ;;  %v472_v49 = vmax.f32 %v952_v42, %v967_v44  ;;  %v982_v50 = vld [vmem:[%s2246_s0 + $0x15a] sm:$0x3] }
  0x56   :  { %v983_v51 = vld [vmem:[%s2246_s0 + $0x15c] sm:$0x3]  ;;  %v502_v52 = vmax.f32 %v471_v41, %v981_v39  ;;  %v473_v53 = vmax.f32 %v953_v43, %v968_v48  ;;  %v991_v54 = vld [vmem:[%s2246_s0 + $0x140] sm:$0x3]  ;;  %v992_v55 = vld [vmem:[%s2246_s0 + $0x142] sm:$0x3] }
  0x57   :  { %v993_v56 = vld [vmem:[%s2246_s0 + $0x144] sm:$0x3]  ;;  %987 = vst.msk [vmem:[%s2247_s1 + $0x3e] sm:$0x3] %vm87_vm0, %v518_v45  ;;  %v522_v57 = vmax.f32 %v521_v46, %v500_v40  ;;  %v525_v58 = vmax.f32 %v500_v40, %v501_v47  ;;  %v503_v59 = vmax.f32 %v472_v49, %v982_v50  ;;  %v1006_v60 = vld [vmem:[%s2246_s0 + $0x160] sm:$0x3] }
  0x58   :  { %v1007_v61 = vld [vmem:[%s2246_s0 + $0x162] sm:$0x3]  ;;  %v1008_v62 = vld [vmem:[%s2246_s0 + $0x164] sm:$0x3]  ;;  %v504_v63 = vmax.f32 %v473_v53, %v983_v51  ;;  %v564_v0 = vmax.f32 %v991_v54, %v1006_v60  ;;  %v1021_v3 = vld [vmem:[%s2246_s0 + $0x180] sm:$0x3] }
  0x59   :  { %v565_v1 = vmax.f32 %v992_v55, %v1007_v61  ;;  %v566_v2 = vmax.f32 %v993_v56, %v1008_v62  ;;  %v1022_v4 = vld [vmem:[%s2246_s0 + $0x182] sm:$0x3]  ;;  %v1023_v5 = vld [vmem:[%s2246_s0 + $0x184] sm:$0x3]  ;;  %988 = vst.msk [vmem:[%s2247_s1 + $0x40] sm:$0x3] %vm87_vm0, %v522_v57  ;;  %v526_v6 = vmax.f32 %v525_v58, %v502_v52  ;;  %v529_v7 = vmax.f32 %v502_v52, %v503_v59 }
  0x5a   :  { %v994_v8 = vld [vmem:[%s2246_s0 + $0x146] sm:$0x3]  ;;  %v995_v9 = vld [vmem:[%s2246_s0 + $0x148] sm:$0x3]  ;;  %v595_v11 = vmax.f32 %v564_v0, %v1021_v3  ;;  %v996_v20 = vld [vmem:[%s2246_s0 + $0x14a] sm:$0x3] }
  0x5b   :  { %v1009_v10 = vld [vmem:[%s2246_s0 + $0x166] sm:$0x3]  ;;  %v596_v12 = vmax.f32 %v565_v1, %v1022_v4  ;;  %v597_v13 = vmax.f32 %v566_v2, %v1023_v5  ;;  %v1010_v14 = vld [vmem:[%s2246_s0 + $0x168] sm:$0x3]  ;;  %989 = vst.msk [vmem:[%s2247_s1 + $0x42] sm:$0x3] %vm87_vm0, %v526_v6  ;;  %v530_v18 = vmax.f32 %v529_v7, %v504_v63 }
  0x5c   :  { %v567_v15 = vmax.f32 %v994_v8, %v1009_v10  ;;  %v1024_v16 = vld [vmem:[%s2246_s0 + $0x186] sm:$0x3]  ;;  %v1025_v17 = vld [vmem:[%s2246_s0 + $0x188] sm:$0x3]  ;;  %v568_v19 = vmax.f32 %v995_v9, %v1010_v14  ;;  %v997_v21 = vld [vmem:[%s2246_s0 + $0x14c] sm:$0x3] }
  0x5d   :  { %v1011_v22 = vld [vmem:[%s2246_s0 + $0x16a] sm:$0x3]  ;;  %v610_v23 = vmax.f32 %v595_v11, %v596_v12  ;;  %v1012_v25 = vld [vmem:[%s2246_s0 + $0x16c] sm:$0x3]  ;;  %990 = vst.msk [vmem:[%s2247_s1 + $0x44] sm:$0x3] %vm87_vm0, %v530_v18 }
  0x5e   :  { %v598_v24 = vmax.f32 %v567_v15, %v1024_v16  ;;  %v569_v26 = vmax.f32 %v996_v20, %v1011_v22  ;;  %v1026_v27 = vld [vmem:[%s2246_s0 + $0x18a] sm:$0x3]  ;;  %v1027_v28 = vld [vmem:[%s2246_s0 + $0x18c] sm:$0x3]  ;;  %v599_v29 = vmax.f32 %v568_v19, %v1025_v17  ;;  %v570_v30 = vmax.f32 %v997_v21, %v1012_v25  ;;  %v998_v31 = vld [vmem:[%s2246_s0 + $0x14e] sm:$0x3] }
  0x5f   :  { %v999_v32 = vld [vmem:[%s2246_s0 + $0x150] sm:$0x3]  ;;  %v1013_v33 = vld [vmem:[%s2246_s0 + $0x16e] sm:$0x3]  ;;  %v611_v34 = vmax.f32 %v610_v23, %v597_v13  ;;  %v1000_v43 = vld [vmem:[%s2246_s0 + $0x152] sm:$0x3] }
  0x60   :  { %v614_v35 = vmax.f32 %v597_v13, %v598_v24  ;;  %v600_v36 = vmax.f32 %v569_v26, %v1026_v27  ;;  %v1014_v37 = vld [vmem:[%s2246_s0 + $0x170] sm:$0x3]  ;;  %v571_v38 = vmax.f32 %v998_v31, %v1013_v33  ;;  %v1028_v39 = vld [vmem:[%s2246_s0 + $0x18e] sm:$0x3]  ;;  %v601_v41 = vmax.f32 %v570_v30, %v1027_v28  ;;  %v1001_v44 = vld [vmem:[%s2246_s0 + $0x154] sm:$0x3] }
  0x61   :  { %v1029_v40 = vld [vmem:[%s2246_s0 + $0x190] sm:$0x3]  ;;  %v572_v42 = vmax.f32 %v999_v32, %v1014_v37  ;;  %v1015_v45 = vld [vmem:[%s2246_s0 + $0x172] sm:$0x3]  ;;  %1036 = vst.msk [vmem:[%s2247_s1 + $0x46] sm:$0x3] %vm87_vm0, %v611_v34 }
  0x62   :  { %v615_v46 = vmax.f32 %v614_v35, %v599_v29  ;;  %v618_v47 = vmax.f32 %v599_v29, %v600_v36  ;;  %v602_v48 = vmax.f32 %v571_v38, %v1028_v39  ;;  %v1016_v49 = vld [vmem:[%s2246_s0 + $0x174] sm:$0x3]  ;;  %v573_v50 = vmax.f32 %v1000_v43, %v1015_v45  ;;  %v1030_v51 = vld [vmem:[%s2246_s0 + $0x192] sm:$0x3]  ;;  %v1002_v55 = vld [vmem:[%s2246_s0 + $0x156] sm:$0x3] }
  0x63   :  { %v1031_v52 = vld [vmem:[%s2246_s0 + $0x194] sm:$0x3]  ;;  %v603_v53 = vmax.f32 %v572_v42, %v1029_v40  ;;  %v574_v54 = vmax.f32 %v1001_v44, %v1016_v49  ;;  %v1003_v56 = vld [vmem:[%s2246_s0 + $0x158] sm:$0x3]  ;;  %v1017_v57 = vld [vmem:[%s2246_s0 + $0x176] sm:$0x3] }
  0x64   :  { %1037 = vst.msk [vmem:[%s2247_s1 + $0x48] sm:$0x3] %vm87_vm0, %v615_v46  ;;  %v619_v58 = vmax.f32 %v618_v47, %v601_v41  ;;  %v622_v59 = vmax.f32 %v601_v41, %v602_v48  ;;  %v604_v60 = vmax.f32 %v573_v50, %v1030_v51  ;;  %v1018_v61 = vld [vmem:[%s2246_s0 + $0x178] sm:$0x3]  ;;  %v575_v62 = vmax.f32 %v1002_v55, %v1017_v57  ;;  %v1032_v63 = vld [vmem:[%s2246_s0 + $0x196] sm:$0x3] }
  0x65   :  { %v1033_v0 = vld [vmem:[%s2246_s0 + $0x198] sm:$0x3]  ;;  %v605_v1 = vmax.f32 %v574_v54, %v1031_v52  ;;  %v576_v2 = vmax.f32 %v1003_v56, %v1018_v61  ;;  %v1004_v3 = vld [vmem:[%s2246_s0 + $0x15a] sm:$0x3]  ;;  %v1005_v4 = vld [vmem:[%s2246_s0 + $0x15c] sm:$0x3] }
  0x66   :  { %v1019_v5 = vld [vmem:[%s2246_s0 + $0x17a] sm:$0x3]  ;;  %1038 = vst.msk [vmem:[%s2247_s1 + $0x4a] sm:$0x3] %vm87_vm0, %v619_v58  ;;  %v623_v6 = vmax.f32 %v622_v59, %v603_v53  ;;  %v626_v7 = vmax.f32 %v603_v53, %v604_v60  ;;  %v606_v8 = vmax.f32 %v575_v62, %v1032_v63  ;;  %v1020_v9 = vld [vmem:[%s2246_s0 + $0x17c] sm:$0x3] }
  0x67   :  { %v577_v10 = vmax.f32 %v1004_v3, %v1019_v5  ;;  %v1034_v11 = vld [vmem:[%s2246_s0 + $0x19a] sm:$0x3]  ;;  %v1035_v12 = vld [vmem:[%s2246_s0 + $0x19c] sm:$0x3]  ;;  %v607_v13 = vmax.f32 %v576_v2, %v1033_v0  ;;  %v578_v14 = vmax.f32 %v1005_v4, %v1020_v9  ;;  %v1043_v15 = vld [vmem:[%s2246_s0 + $0x180] sm:$0x3] }
  0x68   :  { %v1044_v16 = vld [vmem:[%s2246_s0 + $0x182] sm:$0x3]  ;;  %v1045_v17 = vld [vmem:[%s2246_s0 + $0x184] sm:$0x3]  ;;  %1039 = vst.msk [vmem:[%s2247_s1 + $0x4c] sm:$0x3] %vm87_vm0, %v623_v6  ;;  %v627_v18 = vmax.f32 %v626_v7, %v605_v1  ;;  %v630_v19 = vmax.f32 %v605_v1, %v606_v8 }
  0x69   :  { %v608_v20 = vmax.f32 %v577_v10, %v1034_v11  ;;  %v1058_v21 = vld [vmem:[%s2246_s0 + $0x1a0] sm:$0x3]  ;;  %v1059_v22 = vld [vmem:[%s2246_s0 + $0x1a2] sm:$0x3]  ;;  %v1060_v23 = vld [vmem:[%s2246_s0 + $0x1a4] sm:$0x3]  ;;  %v609_v24 = vmax.f32 %v578_v14, %v1035_v12 }
  0x6a   :  { %v669_v25 = vmax.f32 %v1043_v15, %v1058_v21  ;;  %v670_v26 = vmax.f32 %v1044_v16, %v1059_v22  ;;  %v671_v27 = vmax.f32 %v1045_v17, %v1060_v23  ;;  %v1073_v28 = vld [vmem:[%s2246_s0 + $0x1c0] sm:$0x3]  ;;  %v1074_v29 = vld [vmem:[%s2246_s0 + $0x1c2] sm:$0x3]  ;;  %v1075_v30 = vld [vmem:[%s2246_s0 + $0x1c4] sm:$0x3]  ;;  %v631_v31 = vmax.f32 %v630_v19, %v607_v13 }
  0x6b   :  { %1040 = vst.msk [vmem:[%s2247_s1 + $0x4e] sm:$0x3] %vm87_vm0, %v627_v18  ;;  %v634_v32 = vmax.f32 %v607_v13, %v608_v20  ;;  %v1046_v33 = vld [vmem:[%s2246_s0 + $0x186] sm:$0x3]  ;;  %v1047_v34 = vld [vmem:[%s2246_s0 + $0x188] sm:$0x3] }
  0x6c   :  { %v1061_v35 = vld [vmem:[%s2246_s0 + $0x1a6] sm:$0x3]  ;;  %v700_v36 = vmax.f32 %v669_v25, %v1073_v28  ;;  %v701_v37 = vmax.f32 %v670_v26, %v1074_v29  ;;  %v702_v38 = vmax.f32 %v671_v27, %v1075_v30  ;;  %v1062_v39 = vld [vmem:[%s2246_s0 + $0x1a8] sm:$0x3]  ;;  %1041 = vst.msk [vmem:[%s2247_s1 + $0x50] sm:$0x3] %vm87_vm0, %v631_v31 }
  0x6d   :  { %v672_v40 = vmax.f32 %v1046_v33, %v1061_v35  ;;  %v1076_v41 = vld [vmem:[%s2246_s0 + $0x1c6] sm:$0x3]  ;;  %v1077_v42 = vld [vmem:[%s2246_s0 + $0x1c8] sm:$0x3]  ;;  %v635_v43 = vmax.f32 %v634_v32, %v609_v24  ;;  %v673_v44 = vmax.f32 %v1047_v34, %v1062_v39  ;;  %v1048_v45 = vld [vmem:[%s2246_s0 + $0x18a] sm:$0x3] }
  0x6e   :  { %v1049_v46 = vld [vmem:[%s2246_s0 + $0x18c] sm:$0x3]  ;;  %v1063_v47 = vld [vmem:[%s2246_s0 + $0x1aa] sm:$0x3]  ;;  %v715_v48 = vmax.f32 %v700_v36, %v701_v37  ;;  %v1050_v56 = vld [vmem:[%s2246_s0 + $0x18e] sm:$0x3] }
  0x6f   :  { %v703_v49 = vmax.f32 %v672_v40, %v1076_v41  ;;  %v1064_v50 = vld [vmem:[%s2246_s0 + $0x1ac] sm:$0x3]  ;;  %v674_v51 = vmax.f32 %v1048_v45, %v1063_v47  ;;  %v1078_v52 = vld [vmem:[%s2246_s0 + $0x1ca] sm:$0x3]  ;;  %1042 = vst.msk [vmem:[%s2247_s1 + $0x52] sm:$0x3] %vm87_vm0, %v635_v43  ;;  %v704_v54 = vmax.f32 %v673_v44, %v1077_v42 }
  0x70   :  { %v1079_v53 = vld [vmem:[%s2246_s0 + $0x1cc] sm:$0x3]  ;;  %v675_v55 = vmax.f32 %v1049_v46, %v1064_v50  ;;  %v1051_v57 = vld [vmem:[%s2246_s0 + $0x190] sm:$0x3]  ;;  %v1065_v58 = vld [vmem:[%s2246_s0 + $0x1ae] sm:$0x3]  ;;  %v716_v59 = vmax.f32 %v715_v48, %v702_v38 }
  0x71   :  { %v719_v60 = vmax.f32 %v702_v38, %v703_v49  ;;  %v705_v61 = vmax.f32 %v674_v51, %v1078_v52  ;;  %v1066_v62 = vld [vmem:[%s2246_s0 + $0x1b0] sm:$0x3]  ;;  %v676_v63 = vmax.f32 %v1050_v56, %v1065_v58  ;;  %v1080_v0 = vld [vmem:[%s2246_s0 + $0x1ce] sm:$0x3]  ;;  %v1052_v4 = vld [vmem:[%s2246_s0 + $0x192] sm:$0x3] }
  0x72   :  { %v1081_v1 = vld [vmem:[%s2246_s0 + $0x1d0] sm:$0x3]  ;;  %v706_v2 = vmax.f32 %v675_v55, %v1079_v53  ;;  %v677_v3 = vmax.f32 %v1051_v57, %v1066_v62  ;;  %v1053_v5 = vld [vmem:[%s2246_s0 + $0x194] sm:$0x3]  ;;  %v1067_v6 = vld [vmem:[%s2246_s0 + $0x1b2] sm:$0x3] }
  0x73   :  { %1088 = vst.msk [vmem:[%s2247_s1 + $0x54] sm:$0x3] %vm87_vm0, %v716_v59  ;;  %v720_v7 = vmax.f32 %v719_v60, %v704_v54  ;;  %v723_v8 = vmax.f32 %v704_v54, %v705_v61  ;;  %v707_v9 = vmax.f32 %v676_v63, %v1080_v0  ;;  %v1068_v10 = vld [vmem:[%s2246_s0 + $0x1b4] sm:$0x3]  ;;  %v678_v11 = vmax.f32 %v1052_v4, %v1067_v6  ;;  %v1082_v12 = vld [vmem:[%s2246_s0 + $0x1d2] sm:$0x3] }
  0x74   :  { %v1083_v13 = vld [vmem:[%s2246_s0 + $0x1d4] sm:$0x3]  ;;  %v708_v14 = vmax.f32 %v677_v3, %v1081_v1  ;;  %v679_v15 = vmax.f32 %v1053_v5, %v1068_v10  ;;  %v1054_v16 = vld [vmem:[%s2246_s0 + $0x196] sm:$0x3]  ;;  %v1055_v17 = vld [vmem:[%s2246_s0 + $0x198] sm:$0x3] }
  0x75   :  { %v1069_v18 = vld [vmem:[%s2246_s0 + $0x1b6] sm:$0x3]  ;;  %1089 = vst.msk [vmem:[%s2247_s1 + $0x56] sm:$0x3] %vm87_vm0, %v720_v7  ;;  %v724_v19 = vmax.f32 %v723_v8, %v706_v2  ;;  %v727_v20 = vmax.f32 %v706_v2, %v707_v9  ;;  %v709_v21 = vmax.f32 %v678_v11, %v1082_v12  ;;  %v1070_v22 = vld [vmem:[%s2246_s0 + $0x1b8] sm:$0x3] }
  0x76   :  { %v680_v23 = vmax.f32 %v1054_v16, %v1069_v18  ;;  %v1084_v24 = vld [vmem:[%s2246_s0 + $0x1d6] sm:$0x3]  ;;  %v1085_v25 = vld [vmem:[%s2246_s0 + $0x1d8] sm:$0x3]  ;;  %v710_v26 = vmax.f32 %v679_v15, %v1083_v13  ;;  %v681_v27 = vmax.f32 %v1055_v17, %v1070_v22  ;;  %v1056_v28 = vld [vmem:[%s2246_s0 + $0x19a] sm:$0x3] }
  0x77   :  { %v1057_v29 = vld [vmem:[%s2246_s0 + $0x19c] sm:$0x3]  ;;  %v1071_v30 = vld [vmem:[%s2246_s0 + $0x1ba] sm:$0x3]  ;;  %1090 = vst.msk [vmem:[%s2247_s1 + $0x58] sm:$0x3] %vm87_vm0, %v724_v19  ;;  %v728_v31 = vmax.f32 %v727_v20, %v708_v14  ;;  %v731_v32 = vmax.f32 %v708_v14, %v709_v21 }
  0x78   :  { %v711_v33 = vmax.f32 %v680_v23, %v1084_v24  ;;  %v1072_v34 = vld [vmem:[%s2246_s0 + $0x1bc] sm:$0x3]  ;;  %v682_v35 = vmax.f32 %v1056_v28, %v1071_v30  ;;  %v1086_v36 = vld [vmem:[%s2246_s0 + $0x1da] sm:$0x3]  ;;  %v712_v38 = vmax.f32 %v681_v27, %v1085_v25 }
  0x79   :  { %v1087_v37 = vld [vmem:[%s2246_s0 + $0x1dc] sm:$0x3]  ;;  %v683_v39 = vmax.f32 %v1057_v29, %v1072_v34  ;;  %1091 = vst.msk [vmem:[%s2247_s1 + $0x5a] sm:$0x3] %vm87_vm0, %v728_v31  ;;  %v732_v40 = vmax.f32 %v731_v32, %v710_v26 }
  0x7a   :  { %v735_v41 = vmax.f32 %v710_v26, %v711_v33  ;;  %v713_v42 = vmax.f32 %v682_v35, %v1086_v36 }
  0x7b   :  { %v714_v43 = vmax.f32 %v683_v39, %v1087_v37  ;;  %1092 = vst.msk [vmem:[%s2247_s1 + $0x5c] sm:$0x3] %vm87_vm0, %v732_v40 }
  0x7c   :  { %v736_v44 = vmax.f32 %v735_v41, %v712_v38  ;;  %v739_v45 = vmax.f32 %v712_v38, %v713_v42 }
  0x7e   :  { %1093 = vst.msk [vmem:[%s2247_s1 + $0x5e] sm:$0x3] %vm87_vm0, %v736_v44  ;;  %v740_v46 = vmax.f32 %v739_v45, %v714_v43 }
  0x80   :  { %1094 = vst.msk [vmem:[%s2247_s1 + $0x60] sm:$0x3] %vm87_vm0, %v740_v46 }

// kernel: reduction_b.10
= control target key start
LH: loop header
LB: loop body
LE: loop exit
PB: predicated region body
PF: predicated region fallthrough
CT: control target
= control target key end

     0   :  { %s4530_s12 = smov 0   ;;  %s4532_s13 = smov 0   ;;  %s5696_s0 = inlined_call_operand.vmem [shape: bf16[512,2304], index: 0, kind: input, shape index: {}]   ;;  %s5697_s1 = inlined_call_operand.vmem [shape: bf16[2304,256], index: 1, kind: input, shape index: {}]   ;;  %s5698_s2 = inlined_call_operand.vmem [shape: f32[1,256], index: 2, kind: input, shape index: {}]   ;;  %s5699_s3 = inlined_call_operand.vmem [shape: bf16[512,256], index: 3, kind: output, shape index: {}]  }
   0x1   :  { %s4534_s14 = smov 0   ;;  %s4536_s15 = smov 0  }
   0x2   :  { %s4538_s16 = smov 0  }
   0x3 LB: > { %s25_s17 = sadd.s32 1, %s4502_s15  ;;  %p48_p1 = scmp.ne.s32.totalorder %s4494_s13, %s4490_s12  ;;  %s4506_s16 = sphi %s4538_s16, %s13_s16   ;;  %s4502_s15 = sphi %s4536_s15, %s5703_s15   ;;  %s4498_s14 = sphi %s4534_s14, %s5702_s14   ;;  %s4494_s13 = sphi %s4532_s13, %s5701_s13   ;;  %s4490_s12 = sphi %s4530_s12, %s5700_s12  }
   0x4   : > { %p26_p0 = scmp.ge.s32.totalorder %s25_s17, 6  ;;  %p49_p2 = scmp.eq.s32.totalorder %s4506_s16, 0 }
   0x5   : > { %s41_s19 = sadd.s32 1, %s4494_s13  ;;  %p3683_p5 = scmp.ge.s32.totalorder %s4506_s16, 6 }
   0x6   : > { %s5705_s17 = smov (%p26_p0, %s25_s17), 0  ;;  %p50_p3 = por %p49_p2, %p48_p1 }
   0x7   : > { %s37_s18 = ssub.s32 %s4502_s15, %s5705_s17  ;;  %164 = sbr.rel (%p3683_p5) target bundleno = 93 (0x5d), region = 20 }
   0x8   : > { %p39_p4 = scmp.eq.s32.totalorder %s37_s18, 0 }
   0xa   : > { %s4565_s20 = scalar_select %p39_p4, %s4494_s13, %s41_s19  }
   0xe   : > { %167 = sbr.rel (!%p50_p3) target bundleno = 93 (0x5d), region = 24  ;;  %s169_s21 = sand.u32 (%p50_p3), 1, %s4494_s13  }
   0xf   : > { %s4030_s22 = smul.u32 (%p50_p3), 12, %s4502_s15 }
  0x10   : > { %s4224_s23 = smul.u32 (%p50_p3), 768, %s169_s21 }
  0x11   : > { %s4573_s26 = scalar_lea.vmem (%p50_p3), %s5696_s0, %s4030_s22 }
  0x12   : > { %v192_v0 = vld [vmem:[%s4573_s26] sm:$0xff] (%p50_p3)  ;;  %v194_v1 = vld [vmem:[%s4573_s26 + $0x48] sm:$0xff] (%p50_p3)  ;;  %v196_v2 = vld [vmem:[%s4573_s26 + $0x90] sm:$0xff] (%p50_p3)  ;;  %s4578_s27 = scalar_lea.vmem (%p50_p3), [#allocation3], %s4224_s23 }
  0x13   : > { %193 = vst [vmem:[%s4578_s27] sm:$0xff] (%p50_p3), %v192_v0  ;;  %195 = vst [vmem:[%s4578_s27 + $0xc] sm:$0xff] (%p50_p3), %v194_v1  ;;  %v198_v3 = vld [vmem:[%s4573_s26 + $0xd8] sm:$0xff] (%p50_p3)  ;;  %v200_v4 = vld [vmem:[%s4573_s26 + $0x120] sm:$0xff] (%p50_p3) }
  0x14   : > { %197 = vst [vmem:[%s4578_s27 + $0x18] sm:$0xff] (%p50_p3), %v196_v2  ;;  %v202_v5 = vld [vmem:[%s4573_s26 + $0x168] sm:$0xff] (%p50_p3)  ;;  %199 = vst [vmem:[%s4578_s27 + $0x24] sm:$0xff] (%p50_p3), %v198_v3  ;;  %v204_v6 = vld [vmem:[%s4573_s26 + $0x1b0] sm:$0xff] (%p50_p3) }
  0x15   : > { %201 = vst [vmem:[%s4578_s27 + $0x30] sm:$0xff] %v200_v4  ;;  %203 = vst [vmem:[%s4578_s27 + $0x3c] sm:$0xff] %v202_v5  ;;  %v206_v7 = vld [vmem:[%s4573_s26 + $0x1f8] sm:$0xff]  ;;  %v208_v8 = vld [vmem:[%s4573_s26 + $0x240] sm:$0xff] }
  0x16   : > { %205 = vst [vmem:[%s4578_s27 + $0x48] sm:$0xff] %v204_v6  ;;  %207 = vst [vmem:[%s4578_s27 + $0x54] sm:$0xff] %v206_v7  ;;  %v210_v9 = vld [vmem:[%s4573_s26 + $0x288] sm:$0xff]  ;;  %v212_v10 = vld [vmem:[%s4573_s26 + $0x2d0] sm:$0xff] }
  0x17   : > { %209 = vst [vmem:[%s4578_s27 + $0x60] sm:$0xff] %v208_v8  ;;  %v214_v11 = vld [vmem:[%s4573_s26 + $0x318] sm:$0xff]  ;;  %211 = vst [vmem:[%s4578_s27 + $0x6c] sm:$0xff] %v210_v9  ;;  %v216_v12 = vld [vmem:[%s4573_s26 + $0x360] sm:$0xff] }
  0x18   : > { %213 = vst [vmem:[%s4578_s27 + $0x78] sm:$0xff] %v212_v10  ;;  %215 = vst [vmem:[%s4578_s27 + $0x84] sm:$0xff] %v214_v11  ;;  %v218_v13 = vld [vmem:[%s4573_s26 + $0x3a8] sm:$0xff]  ;;  %v220_v14 = vld [vmem:[%s4573_s26 + $0x3f0] sm:$0xff] }
  0x19   : > { %217 = vst [vmem:[%s4578_s27 + $0x90] sm:$0xff] %v216_v12  ;;  %219 = vst [vmem:[%s4578_s27 + $0x9c] sm:$0xff] %v218_v13  ;;  %v222_v15 = vld [vmem:[%s4573_s26 + $0x438] sm:$0xff]  ;;  %v224_v16 = vld [vmem:[%s4573_s26 + $0x480] sm:$0xff] }
  0x1a   : > { %221 = vst [vmem:[%s4578_s27 + $0xa8] sm:$0xff] %v220_v14  ;;  %v226_v17 = vld [vmem:[%s4573_s26 + $0x4c8] sm:$0xff]  ;;  %223 = vst [vmem:[%s4578_s27 + $0xb4] sm:$0xff] %v222_v15  ;;  %v228_v18 = vld [vmem:[%s4573_s26 + $0x510] sm:$0xff] }
  0x1b   : > { %225 = vst [vmem:[%s4578_s27 + $0xc0] sm:$0xff] %v224_v16  ;;  %227 = vst [vmem:[%s4578_s27 + $0xcc] sm:$0xff] %v226_v17  ;;  %v230_v19 = vld [vmem:[%s4573_s26 + $0x558] sm:$0xff]  ;;  %v232_v20 = vld [vmem:[%s4573_s26 + $0x5a0] sm:$0xff] }
  0x1c   : > { %229 = vst [vmem:[%s4578_s27 + $0xd8] sm:$0xff] %v228_v18  ;;  %231 = vst [vmem:[%s4578_s27 + $0xe4] sm:$0xff] %v230_v19  ;;  %v234_v21 = vld [vmem:[%s4573_s26 + $0x5e8] sm:$0xff]  ;;  %v236_v22 = vld [vmem:[%s4573_s26 + $0x630] sm:$0xff] }
  0x1d   : > { %233 = vst [vmem:[%s4578_s27 + $0xf0] sm:$0xff] %v232_v20  ;;  %v238_v23 = vld [vmem:[%s4573_s26 + $0x678] sm:$0xff]  ;;  %235 = vst [vmem:[%s4578_s27 + $0xfc] sm:$0xff] %v234_v21  ;;  %v240_v24 = vld [vmem:[%s4573_s26 + $0x6c0] sm:$0xff] }
  0x1e   : > { %237 = vst [vmem:[%s4578_s27 + $0x108] sm:$0xff] %v236_v22  ;;  %239 = vst [vmem:[%s4578_s27 + $0x114] sm:$0xff] %v238_v23  ;;  %v242_v25 = vld [vmem:[%s4573_s26 + $0x708] sm:$0xff]  ;;  %v244_v26 = vld [vmem:[%s4573_s26 + $0x750] sm:$0xff] }
  0x1f   : > { %241 = vst [vmem:[%s4578_s27 + $0x120] sm:$0xff] %v240_v24  ;;  %243 = vst [vmem:[%s4578_s27 + $0x12c] sm:$0xff] %v242_v25  ;;  %v246_v27 = vld [vmem:[%s4573_s26 + $0x798] sm:$0xff]  ;;  %v248_v28 = vld [vmem:[%s4573_s26 + $0x7e0] sm:$0xff] }
  0x20   : > { %245 = vst [vmem:[%s4578_s27 + $0x138] sm:$0xff] %v244_v26  ;;  %v250_v29 = vld [vmem:[%s4573_s26 + $0x828] sm:$0xff]  ;;  %247 = vst [vmem:[%s4578_s27 + $0x144] sm:$0xff] %v246_v27  ;;  %v252_v30 = vld [vmem:[%s4573_s26 + $0x870] sm:$0xff] }
  0x21   : > { %249 = vst [vmem:[%s4578_s27 + $0x150] sm:$0xff] %v248_v28  ;;  %251 = vst [vmem:[%s4578_s27 + $0x15c] sm:$0xff] %v250_v29  ;;  %v254_v31 = vld [vmem:[%s4573_s26 + $0x8b8] sm:$0xff]  ;;  %v256_v32 = vld [vmem:[%s4573_s26 + $0x900] sm:$0xff] }
  0x22   : > { %253 = vst [vmem:[%s4578_s27 + $0x168] sm:$0xff] %v252_v30  ;;  %255 = vst [vmem:[%s4578_s27 + $0x174] sm:$0xff] %v254_v31  ;;  %v258_v33 = vld [vmem:[%s4573_s26 + $0x948] sm:$0xff]  ;;  %v260_v34 = vld [vmem:[%s4573_s26 + $0x990] sm:$0xff] }
  0x23   : > { %257 = vst [vmem:[%s4578_s27 + $0x180] sm:$0xff] %v256_v32  ;;  %v262_v35 = vld [vmem:[%s4573_s26 + $0x9d8] sm:$0xff]  ;;  %259 = vst [vmem:[%s4578_s27 + $0x18c] sm:$0xff] %v258_v33  ;;  %v264_v36 = vld [vmem:[%s4573_s26 + $0xa20] sm:$0xff] }
  0x24   : > { %261 = vst [vmem:[%s4578_s27 + $0x198] sm:$0xff] %v260_v34  ;;  %263 = vst [vmem:[%s4578_s27 + $0x1a4] sm:$0xff] %v262_v35  ;;  %v266_v37 = vld [vmem:[%s4573_s26 + $0xa68] sm:$0xff]  ;;  %v268_v38 = vld [vmem:[%s4573_s26 + $0xab0] sm:$0xff] }
  0x25   : > { %265 = vst [vmem:[%s4578_s27 + $0x1b0] sm:$0xff] %v264_v36  ;;  %267 = vst [vmem:[%s4578_s27 + $0x1bc] sm:$0xff] %v266_v37  ;;  %v270_v39 = vld [vmem:[%s4573_s26 + $0xaf8] sm:$0xff]  ;;  %v272_v40 = vld [vmem:[%s4573_s26 + $0xb40] sm:$0xff] }
  0x26   : > { %269 = vst [vmem:[%s4578_s27 + $0x1c8] sm:$0xff] %v268_v38  ;;  %v274_v41 = vld [vmem:[%s4573_s26 + $0xb88] sm:$0xff]  ;;  %271 = vst [vmem:[%s4578_s27 + $0x1d4] sm:$0xff] %v270_v39  ;;  %v276_v42 = vld [vmem:[%s4573_s26 + $0xbd0] sm:$0xff] }
  0x27   : > { %273 = vst [vmem:[%s4578_s27 + $0x1e0] sm:$0xff] %v272_v40  ;;  %275 = vst [vmem:[%s4578_s27 + $0x1ec] sm:$0xff] %v274_v41  ;;  %v278_v43 = vld [vmem:[%s4573_s26 + $0xc18] sm:$0xff]  ;;  %v280_v44 = vld [vmem:[%s4573_s26 + $0xc60] sm:$0xff] }
  0x28   : > { %277 = vst [vmem:[%s4578_s27 + $0x1f8] sm:$0xff] %v276_v42  ;;  %279 = vst [vmem:[%s4578_s27 + $0x204] sm:$0xff] %v278_v43  ;;  %v282_v45 = vld [vmem:[%s4573_s26 + $0xca8] sm:$0xff]  ;;  %v284_v46 = vld [vmem:[%s4573_s26 + $0xcf0] sm:$0xff] }
  0x29   : > { %281 = vst [vmem:[%s4578_s27 + $0x210] sm:$0xff] %v280_v44  ;;  %v286_v47 = vld [vmem:[%s4573_s26 + $0xd38] sm:$0xff]  ;;  %283 = vst [vmem:[%s4578_s27 + $0x21c] sm:$0xff] %v282_v45  ;;  %v288_v48 = vld [vmem:[%s4573_s26 + $0xd80] sm:$0xff] }
  0x2a   : > { %285 = vst [vmem:[%s4578_s27 + $0x228] sm:$0xff] %v284_v46  ;;  %287 = vst [vmem:[%s4578_s27 + $0x234] sm:$0xff] %v286_v47  ;;  %v290_v49 = vld [vmem:[%s4573_s26 + $0xdc8] sm:$0xff]  ;;  %v292_v50 = vld [vmem:[%s4573_s26 + $0xe10] sm:$0xff] }
  0x2b   : > { %289 = vst [vmem:[%s4578_s27 + $0x240] sm:$0xff] %v288_v48  ;;  %291 = vst [vmem:[%s4578_s27 + $0x24c] sm:$0xff] %v290_v49  ;;  %v294_v51 = vld [vmem:[%s4573_s26 + $0xe58] sm:$0xff]  ;;  %v296_v52 = vld [vmem:[%s4573_s26 + $0xea0] sm:$0xff] }
  0x2c   : > { %293 = vst [vmem:[%s4578_s27 + $0x258] sm:$0xff] %v292_v50  ;;  %v298_v53 = vld [vmem:[%s4573_s26 + $0xee8] sm:$0xff]  ;;  %295 = vst [vmem:[%s4578_s27 + $0x264] sm:$0xff] %v294_v51  ;;  %v300_v54 = vld [vmem:[%s4573_s26 + $0xf30] sm:$0xff] }
  0x2d   : > { %297 = vst [vmem:[%s4578_s27 + $0x270] sm:$0xff] %v296_v52  ;;  %299 = vst [vmem:[%s4578_s27 + $0x27c] sm:$0xff] %v298_v53  ;;  %v302_v55 = vld [vmem:[%s4573_s26 + $0xf78] sm:$0xff]  ;;  %v304_v56 = vld [vmem:[%s4573_s26 + $0xfc0] sm:$0xff] }
  0x2e   : > { %301 = vst [vmem:[%s4578_s27 + $0x288] sm:$0xff] %v300_v54  ;;  %303 = vst [vmem:[%s4578_s27 + $0x294] sm:$0xff] %v302_v55  ;;  %v306_v57 = vld [vmem:[%s4573_s26 + $0x1008] sm:$0xff]  ;;  %v308_v58 = vld [vmem:[%s4573_s26 + $0x1050] sm:$0xff] }
  0x2f   : > { %305 = vst [vmem:[%s4578_s27 + $0x2a0] sm:$0xff] %v304_v56  ;;  %v310_v59 = vld [vmem:[%s4573_s26 + $0x1098] sm:$0xff]  ;;  %307 = vst [vmem:[%s4578_s27 + $0x2ac] sm:$0xff] %v306_v57  ;;  %v312_v60 = vld [vmem:[%s4573_s26 + $0x10e0] sm:$0xff] }
  0x30   : > { %309 = vst [vmem:[%s4578_s27 + $0x2b8] sm:$0xff] %v308_v58  ;;  %311 = vst [vmem:[%s4578_s27 + $0x2c4] sm:$0xff] %v310_v59  ;;  %v314_v61 = vld [vmem:[%s4573_s26 + $0x1128] sm:$0xff]  ;;  %v316_v62 = vld [vmem:[%s4573_s26 + $0x1170] sm:$0xff] }
  0x31   : > { %313 = vst [vmem:[%s4578_s27 + $0x2d0] sm:$0xff] %v312_v60  ;;  %315 = vst [vmem:[%s4578_s27 + $0x2dc] sm:$0xff] %v314_v61  ;;  %v318_v63 = vld [vmem:[%s4573_s26 + $0x11b8] sm:$0xff]  ;;  %v3685_v0 = vld [vmem:[%s4573_s26 + $0x8] sm:$0xf] }
  0x32   : > { %317 = vst [vmem:[%s4578_s27 + $0x2e8] sm:$0xff] %v316_v62  ;;  %v3687_v1 = vld [vmem:[%s4573_s26 + $0x50] sm:$0xf]  ;;  %319 = vst [vmem:[%s4578_s27 + $0x2f4] sm:$0xff] %v318_v63  ;;  %v3689_v2 = vld [vmem:[%s4573_s26 + $0x98] sm:$0xf] }
  0x33   : > { %3686 = vst [vmem:[%s4578_s27 + $0x8] sm:$0xf] %v3685_v0  ;;  %3688 = vst [vmem:[%s4578_s27 + $0x14] sm:$0xf] %v3687_v1  ;;  %v3691_v3 = vld [vmem:[%s4573_s26 + $0xe0] sm:$0xf] }
  0x34   : > { %v3693_v4 = vld [vmem:[%s4573_s26 + $0x128] sm:$0xf]  ;;  %3690 = vst [vmem:[%s4578_s27 + $0x20] sm:$0xf] %v3689_v2  ;;  %3692 = vst [vmem:[%s4578_s27 + $0x2c] sm:$0xf] %v3691_v3 }
  0x35   : > { %3694 = vst [vmem:[%s4578_s27 + $0x38] sm:$0xf] %v3693_v4  ;;  %v3695_v5 = vld [vmem:[%s4573_s26 + $0x170] sm:$0xf]  ;;  %v3697_v6 = vld [vmem:[%s4573_s26 + $0x1b8] sm:$0xf] }
  0x36   : > { %v3699_v7 = vld [vmem:[%s4573_s26 + $0x200] sm:$0xf]  ;;  %3696 = vst [vmem:[%s4578_s27 + $0x44] sm:$0xf] %v3695_v5  ;;  %3698 = vst [vmem:[%s4578_s27 + $0x50] sm:$0xf] %v3697_v6 }
  0x37   : > { %3700 = vst [vmem:[%s4578_s27 + $0x5c] sm:$0xf] %v3699_v7  ;;  %v3701_v8 = vld [vmem:[%s4573_s26 + $0x248] sm:$0xf]  ;;  %v3703_v9 = vld [vmem:[%s4573_s26 + $0x290] sm:$0xf] }
  0x38   : > { %v3705_v10 = vld [vmem:[%s4573_s26 + $0x2d8] sm:$0xf]  ;;  %3702 = vst [vmem:[%s4578_s27 + $0x68] sm:$0xf] %v3701_v8  ;;  %3704 = vst [vmem:[%s4578_s27 + $0x74] sm:$0xf] %v3703_v9 }
  0x39   : > { %3706 = vst [vmem:[%s4578_s27 + $0x80] sm:$0xf] %v3705_v10  ;;  %v3707_v11 = vld [vmem:[%s4573_s26 + $0x320] sm:$0xf]  ;;  %v3709_v12 = vld [vmem:[%s4573_s26 + $0x368] sm:$0xf] }
  0x3a   : > { %v3711_v13 = vld [vmem:[%s4573_s26 + $0x3b0] sm:$0xf]  ;;  %3708 = vst [vmem:[%s4578_s27 + $0x8c] sm:$0xf] %v3707_v11  ;;  %3710 = vst [vmem:[%s4578_s27 + $0x98] sm:$0xf] %v3709_v12 }
  0x3b   : > { %3712 = vst [vmem:[%s4578_s27 + $0xa4] sm:$0xf] %v3711_v13  ;;  %v3713_v14 = vld [vmem:[%s4573_s26 + $0x3f8] sm:$0xf]  ;;  %v3715_v15 = vld [vmem:[%s4573_s26 + $0x440] sm:$0xf] }
  0x3c   : > { %v3717_v16 = vld [vmem:[%s4573_s26 + $0x488] sm:$0xf]  ;;  %3714 = vst [vmem:[%s4578_s27 + $0xb0] sm:$0xf] %v3713_v14  ;;  %3716 = vst [vmem:[%s4578_s27 + $0xbc] sm:$0xf] %v3715_v15 }
  0x3d   : > { %3718 = vst [vmem:[%s4578_s27 + $0xc8] sm:$0xf] %v3717_v16  ;;  %v3719_v17 = vld [vmem:[%s4573_s26 + $0x4d0] sm:$0xf]  ;;  %v3721_v18 = vld [vmem:[%s4573_s26 + $0x518] sm:$0xf] }
  0x3e   : > { %v3723_v19 = vld [vmem:[%s4573_s26 + $0x560] sm:$0xf]  ;;  %3720 = vst [vmem:[%s4578_s27 + $0xd4] sm:$0xf] %v3719_v17  ;;  %3722 = vst [vmem:[%s4578_s27 + $0xe0] sm:$0xf] %v3721_v18 }
  0x3f   : > { %3724 = vst [vmem:[%s4578_s27 + $0xec] sm:$0xf] %v3723_v19  ;;  %v3725_v20 = vld [vmem:[%s4573_s26 + $0x5a8] sm:$0xf]  ;;  %v3727_v21 = vld [vmem:[%s4573_s26 + $0x5f0] sm:$0xf] }
  0x40   : > { %v3729_v22 = vld [vmem:[%s4573_s26 + $0x638] sm:$0xf]  ;;  %3726 = vst [vmem:[%s4578_s27 + $0xf8] sm:$0xf] %v3725_v20  ;;  %3728 = vst [vmem:[%s4578_s27 + $0x104] sm:$0xf] %v3727_v21 }
  0x41   : > { %3730 = vst [vmem:[%s4578_s27 + $0x110] sm:$0xf] %v3729_v22  ;;  %v3731_v23 = vld [vmem:[%s4573_s26 + $0x680] sm:$0xf]  ;;  %v3733_v24 = vld [vmem:[%s4573_s26 + $0x6c8] sm:$0xf] }
  0x42   : > { %v3735_v25 = vld [vmem:[%s4573_s26 + $0x710] sm:$0xf]  ;;  %3732 = vst [vmem:[%s4578_s27 + $0x11c] sm:$0xf] %v3731_v23  ;;  %3734 = vst [vmem:[%s4578_s27 + $0x128] sm:$0xf] %v3733_v24 }
  0x43   : > { %3736 = vst [vmem:[%s4578_s27 + $0x134] sm:$0xf] %v3735_v25  ;;  %v3737_v26 = vld [vmem:[%s4573_s26 + $0x758] sm:$0xf]  ;;  %v3739_v27 = vld [vmem:[%s4573_s26 + $0x7a0] sm:$0xf] }
  0x44   : > { %v3741_v28 = vld [vmem:[%s4573_s26 + $0x7e8] sm:$0xf]  ;;  %3738 = vst [vmem:[%s4578_s27 + $0x140] sm:$0xf] %v3737_v26  ;;  %3740 = vst [vmem:[%s4578_s27 + $0x14c] sm:$0xf] %v3739_v27 }
  0x45   : > { %3742 = vst [vmem:[%s4578_s27 + $0x158] sm:$0xf] %v3741_v28  ;;  %v3743_v29 = vld [vmem:[%s4573_s26 + $0x830] sm:$0xf]  ;;  %v3745_v30 = vld [vmem:[%s4573_s26 + $0x878] sm:$0xf] }
  0x46   : > { %v3747_v31 = vld [vmem:[%s4573_s26 + $0x8c0] sm:$0xf]  ;;  %3744 = vst [vmem:[%s4578_s27 + $0x164] sm:$0xf] %v3743_v29  ;;  %3746 = vst [vmem:[%s4578_s27 + $0x170] sm:$0xf] %v3745_v30 }
  0x47   : > { %3748 = vst [vmem:[%s4578_s27 + $0x17c] sm:$0xf] %v3747_v31  ;;  %v3749_v32 = vld [vmem:[%s4573_s26 + $0x908] sm:$0xf]  ;;  %v3751_v33 = vld [vmem:[%s4573_s26 + $0x950] sm:$0xf] }
  0x48   : > { %v3753_v34 = vld [vmem:[%s4573_s26 + $0x998] sm:$0xf]  ;;  %3750 = vst [vmem:[%s4578_s27 + $0x188] sm:$0xf] %v3749_v32  ;;  %3752 = vst [vmem:[%s4578_s27 + $0x194] sm:$0xf] %v3751_v33 }
  0x49   : > { %3754 = vst [vmem:[%s4578_s27 + $0x1a0] sm:$0xf] %v3753_v34  ;;  %v3755_v35 = vld [vmem:[%s4573_s26 + $0x9e0] sm:$0xf]  ;;  %v3757_v36 = vld [vmem:[%s4573_s26 + $0xa28] sm:$0xf] }
  0x4a   : > { %v3759_v37 = vld [vmem:[%s4573_s26 + $0xa70] sm:$0xf]  ;;  %3756 = vst [vmem:[%s4578_s27 + $0x1ac] sm:$0xf] %v3755_v35  ;;  %3758 = vst [vmem:[%s4578_s27 + $0x1b8] sm:$0xf] %v3757_v36 }
  0x4b   : > { %3760 = vst [vmem:[%s4578_s27 + $0x1c4] sm:$0xf] %v3759_v37  ;;  %v3761_v38 = vld [vmem:[%s4573_s26 + $0xab8] sm:$0xf]  ;;  %v3763_v39 = vld [vmem:[%s4573_s26 + $0xb00] sm:$0xf] }
  0x4c   : > { %v3765_v40 = vld [vmem:[%s4573_s26 + $0xb48] sm:$0xf]  ;;  %3762 = vst [vmem:[%s4578_s27 + $0x1d0] sm:$0xf] %v3761_v38  ;;  %3764 = vst [vmem:[%s4578_s27 + $0x1dc] sm:$0xf] %v3763_v39 }
  0x4d   : > { %3766 = vst [vmem:[%s4578_s27 + $0x1e8] sm:$0xf] %v3765_v40  ;;  %v3767_v41 = vld [vmem:[%s4573_s26 + $0xb90] sm:$0xf]  ;;  %v3769_v42 = vld [vmem:[%s4573_s26 + $0xbd8] sm:$0xf] }
  0x4e   : > { %v3771_v43 = vld [vmem:[%s4573_s26 + $0xc20] sm:$0xf]  ;;  %3768 = vst [vmem:[%s4578_s27 + $0x1f4] sm:$0xf] %v3767_v41  ;;  %3770 = vst [vmem:[%s4578_s27 + $0x200] sm:$0xf] %v3769_v42 }
  0x4f   : > { %3772 = vst [vmem:[%s4578_s27 + $0x20c] sm:$0xf] %v3771_v43  ;;  %v3773_v44 = vld [vmem:[%s4573_s26 + $0xc68] sm:$0xf]  ;;  %v3775_v45 = vld [vmem:[%s4573_s26 + $0xcb0] sm:$0xf] }
  0x50   : > { %v3777_v46 = vld [vmem:[%s4573_s26 + $0xcf8] sm:$0xf]  ;;  %3774 = vst [vmem:[%s4578_s27 + $0x218] sm:$0xf] %v3773_v44  ;;  %3776 = vst [vmem:[%s4578_s27 + $0x224] sm:$0xf] %v3775_v45 }
  0x51   : > { %3778 = vst [vmem:[%s4578_s27 + $0x230] sm:$0xf] %v3777_v46  ;;  %v3779_v47 = vld [vmem:[%s4573_s26 + $0xd40] sm:$0xf]  ;;  %v3781_v48 = vld [vmem:[%s4573_s26 + $0xd88] sm:$0xf] }
  0x52   : > { %v3783_v49 = vld [vmem:[%s4573_s26 + $0xdd0] sm:$0xf]  ;;  %3780 = vst [vmem:[%s4578_s27 + $0x23c] sm:$0xf] %v3779_v47  ;;  %3782 = vst [vmem:[%s4578_s27 + $0x248] sm:$0xf] %v3781_v48 }
  0x53   : > { %3784 = vst [vmem:[%s4578_s27 + $0x254] sm:$0xf] %v3783_v49  ;;  %v3785_v50 = vld [vmem:[%s4573_s26 + $0xe18] sm:$0xf]  ;;  %v3787_v51 = vld [vmem:[%s4573_s26 + $0xe60] sm:$0xf] }
  0x54   : > { %v3789_v52 = vld [vmem:[%s4573_s26 + $0xea8] sm:$0xf]  ;;  %3786 = vst [vmem:[%s4578_s27 + $0x260] sm:$0xf] %v3785_v50  ;;  %3788 = vst [vmem:[%s4578_s27 + $0x26c] sm:$0xf] %v3787_v51 }
  0x55   : > { %3790 = vst [vmem:[%s4578_s27 + $0x278] sm:$0xf] %v3789_v52  ;;  %v3791_v53 = vld [vmem:[%s4573_s26 + $0xef0] sm:$0xf]  ;;  %v3793_v54 = vld [vmem:[%s4573_s26 + $0xf38] sm:$0xf] }
  0x56   : > { %v3795_v55 = vld [vmem:[%s4573_s26 + $0xf80] sm:$0xf]  ;;  %3792 = vst [vmem:[%s4578_s27 + $0x284] sm:$0xf] %v3791_v53  ;;  %3794 = vst [vmem:[%s4578_s27 + $0x290] sm:$0xf] %v3793_v54 }
  0x57   : > { %3796 = vst [vmem:[%s4578_s27 + $0x29c] sm:$0xf] %v3795_v55  ;;  %v3797_v56 = vld [vmem:[%s4573_s26 + $0xfc8] sm:$0xf]  ;;  %v3799_v57 = vld [vmem:[%s4573_s26 + $0x1010] sm:$0xf] }
  0x58   : > { %v3801_v58 = vld [vmem:[%s4573_s26 + $0x1058] sm:$0xf]  ;;  %3798 = vst [vmem:[%s4578_s27 + $0x2a8] sm:$0xf] %v3797_v56  ;;  %3800 = vst [vmem:[%s4578_s27 + $0x2b4] sm:$0xf] %v3799_v57 }
  0x59   : > { %3802 = vst [vmem:[%s4578_s27 + $0x2c0] sm:$0xf] %v3801_v58  ;;  %v3803_v59 = vld [vmem:[%s4573_s26 + $0x10a0] sm:$0xf]  ;;  %v3805_v60 = vld [vmem:[%s4573_s26 + $0x10e8] sm:$0xf] }
  0x5a   : > { %v3807_v61 = vld [vmem:[%s4573_s26 + $0x1130] sm:$0xf]  ;;  %3804 = vst [vmem:[%s4578_s27 + $0x2cc] sm:$0xf] %v3803_v59  ;;  %3806 = vst [vmem:[%s4578_s27 + $0x2d8] sm:$0xf] %v3805_v60 }
  0x5b   : > { %3808 = vst [vmem:[%s4578_s27 + $0x2e4] sm:$0xf] %v3807_v61  ;;  %v3809_v62 = vld [vmem:[%s4573_s26 + $0x1178] sm:$0xf]  ;;  %v3811_v63 = vld [vmem:[%s4573_s26 + $0x11c0] sm:$0xf] }
  0x5c   : > { %3810 = vst [vmem:[%s4578_s27 + $0x2f0] sm:$0xf] %v3809_v62  ;;  %3812 = vst [vmem:[%s4578_s27 + $0x2fc] sm:$0xf] %v3811_v63 }
  0x5d PF: > { %p3813_p6 = scmp.ge.s32.totalorder %s4506_s16, 1  ;;  %p474_p7 = scmp.lt.s32.totalorder %s4506_s16, 7 }
  0x5f   : > { %p475_p8 = pnand %p3813_p6, %p474_p7 }
  0x60   : > { %s481_s28 = sand.u32 (!%p475_p8), 1, %s4490_s12   ;;  %s525_s29 = smul.u32 (!%p475_p8), 48, %s4498_s14 }
  0x61   : > { %478 = sbr.rel (%p475_p8) target bundleno = 781 (0x30d), region = 54  ;;  %p3816_p10 = scmp.ne.s32.totalorder (!%p475_p8), %s4498_s14, 0 }
  0x62   : > { %s4225_s30 = smul.u32 (!%p475_p8), 768, %s481_s28  ;;  %p527_p9 = scmp.lt.s32.totalorder (!%p475_p8), %s525_s29, 287 }
  0x64   : > { %s4842_s8 = scalar_lea.vmem (!%p475_p8), [#allocation3], %s4225_s30 }
  0x68   : > { %s5707_s29 = smov (!%p527_p9, %s525_s29), 287  ;;  %558 = sbr.rel (%p3816_p10) target bundleno = 170 (0xaa), region = 62 }
  0x69   : > { %s4031_s4 = sshll.u32 %s5707_s29, 3  ;;  %v4508_v0 = vmov (!%p3816_p10), 0.0  }
  0x6a   : > { %s4840_s7 = scalar_lea.vmem %s5697_s1, %s4031_s4  ;;  %559 = vst [vmem:[#allocation2] sm:$0xff] (!%p3816_p10), %v4508_v0  ;;  %560 = vst [vmem:[#allocation2 + $0x8] sm:$0xff] (!%p3816_p10), %v4508_v0 }
  0x6b   : > { %561 = vst [vmem:[#allocation2 + $0x10] sm:$0xff] (!%p3816_p10), %v4508_v0  ;;  %562 = vst [vmem:[#allocation2 + $0x18] sm:$0xff] (!%p3816_p10), %v4508_v0 }
  0x6c   : > { %563 = vst [vmem:[#allocation2 + $0x20] sm:$0xff] (!%p3816_p10), %v4508_v0  ;;  %564 = vst [vmem:[#allocation2 + $0x28] sm:$0xff] (!%p3816_p10), %v4508_v0 }
  0x6d   : > { %565 = vst [vmem:[#allocation2 + $0x30] sm:$0xff] (!%p3816_p10), %v4508_v0  ;;  %566 = vst [vmem:[#allocation2 + $0x38] sm:$0xff] (!%p3816_p10), %v4508_v0 }
  0x6e   : > { %567 = vst [vmem:[#allocation2 + $0x40] sm:$0xff] (!%p3816_p10), %v4508_v0  ;;  %568 = vst [vmem:[#allocation2 + $0x48] sm:$0xff] (!%p3816_p10), %v4508_v0 }
  0x6f   : > { %569 = vst [vmem:[#allocation2 + $0x50] sm:$0xff] %v4508_v0  ;;  %570 = vst [vmem:[#allocation2 + $0x58] sm:$0xff] %v4508_v0 }
  0x70   : > { %571 = vst [vmem:[#allocation2 + $0x60] sm:$0xff] %v4508_v0  ;;  %572 = vst [vmem:[#allocation2 + $0x68] sm:$0xff] %v4508_v0 }
  0x71   : > { %573 = vst [vmem:[#allocation2 + $0x70] sm:$0xff] %v4508_v0  ;;  %574 = vst [vmem:[#allocation2 + $0x78] sm:$0xff] %v4508_v0 }
  0x72   : > { %575 = vst [vmem:[#allocation2 + $0x80] sm:$0xff] %v4508_v0  ;;  %576 = vst [vmem:[#allocation2 + $0x88] sm:$0xff] %v4508_v0 }
  0x73   : > { %577 = vst [vmem:[#allocation2 + $0x90] sm:$0xff] %v4508_v0  ;;  %578 = vst [vmem:[#allocation2 + $0x98] sm:$0xff] %v4508_v0 }
  0x74   : > { %579 = vst [vmem:[#allocation2 + $0xa0] sm:$0xff] %v4508_v0  ;;  %580 = vst [vmem:[#allocation2 + $0xa8] sm:$0xff] %v4508_v0 }
  0x75   : > { %581 = vst [vmem:[#allocation2 + $0xb0] sm:$0xff] %v4508_v0  ;;  %582 = vst [vmem:[#allocation2 + $0xb8] sm:$0xff] %v4508_v0 }
  0x76   : > { %583 = vst [vmem:[#allocation2 + $0xc0] sm:$0xff] %v4508_v0  ;;  %584 = vst [vmem:[#allocation2 + $0xc8] sm:$0xff] %v4508_v0 }
  0x77   : > { %585 = vst [vmem:[#allocation2 + $0xd0] sm:$0xff] %v4508_v0  ;;  %586 = vst [vmem:[#allocation2 + $0xd8] sm:$0xff] %v4508_v0 }
  0x78   : > { %587 = vst [vmem:[#allocation2 + $0xe0] sm:$0xff] %v4508_v0  ;;  %588 = vst [vmem:[#allocation2 + $0xe8] sm:$0xff] %v4508_v0 }
  0x79   : > { %589 = vst [vmem:[#allocation2 + $0xf0] sm:$0xff] %v4508_v0  ;;  %590 = vst [vmem:[#allocation2 + $0xf8] sm:$0xff] %v4508_v0 }
  0x7a   : > { %591 = vst [vmem:[#allocation2 + $0x100] sm:$0xff] %v4508_v0  ;;  %592 = vst [vmem:[#allocation2 + $0x108] sm:$0xff] %v4508_v0 }
  0x7b   : > { %593 = vst [vmem:[#allocation2 + $0x110] sm:$0xff] %v4508_v0  ;;  %594 = vst [vmem:[#allocation2 + $0x118] sm:$0xff] %v4508_v0 }
  0x7c   : > { %595 = vst [vmem:[#allocation2 + $0x120] sm:$0xff] %v4508_v0  ;;  %596 = vst [vmem:[#allocation2 + $0x128] sm:$0xff] %v4508_v0 }
  0x7d   : > { %597 = vst [vmem:[#allocation2 + $0x130] sm:$0xff] %v4508_v0  ;;  %598 = vst [vmem:[#allocation2 + $0x138] sm:$0xff] %v4508_v0 }
  0x7e   : > { %599 = vst [vmem:[#allocation2 + $0x140] sm:$0xff] %v4508_v0  ;;  %600 = vst [vmem:[#allocation2 + $0x148] sm:$0xff] %v4508_v0 }
  0x7f   : > { %601 = vst [vmem:[#allocation2 + $0x150] sm:$0xff] %v4508_v0  ;;  %602 = vst [vmem:[#allocation2 + $0x158] sm:$0xff] %v4508_v0 }
  0x80   : > { %603 = vst [vmem:[#allocation2 + $0x160] sm:$0xff] %v4508_v0  ;;  %604 = vst [vmem:[#allocation2 + $0x168] sm:$0xff] %v4508_v0 }
  0x81   : > { %605 = vst [vmem:[#allocation2 + $0x170] sm:$0xff] %v4508_v0  ;;  %606 = vst [vmem:[#allocation2 + $0x178] sm:$0xff] %v4508_v0 }
  0x82   : > { %607 = vst [vmem:[#allocation2 + $0x180] sm:$0xff] %v4508_v0  ;;  %608 = vst [vmem:[#allocation2 + $0x188] sm:$0xff] %v4508_v0 }
  0x83   : > { %609 = vst [vmem:[#allocation2 + $0x190] sm:$0xff] %v4508_v0  ;;  %610 = vst [vmem:[#allocation2 + $0x198] sm:$0xff] %v4508_v0 }
  0x84   : > { %611 = vst [vmem:[#allocation2 + $0x1a0] sm:$0xff] %v4508_v0  ;;  %612 = vst [vmem:[#allocation2 + $0x1a8] sm:$0xff] %v4508_v0 }
  0x85   : > { %613 = vst [vmem:[#allocation2 + $0x1b0] sm:$0xff] %v4508_v0  ;;  %614 = vst [vmem:[#allocation2 + $0x1b8] sm:$0xff] %v4508_v0 }
  0x86   : > { %615 = vst [vmem:[#allocation2 + $0x1c0] sm:$0xff] %v4508_v0  ;;  %616 = vst [vmem:[#allocation2 + $0x1c8] sm:$0xff] %v4508_v0 }
  0x87   : > { %617 = vst [vmem:[#allocation2 + $0x1d0] sm:$0xff] %v4508_v0  ;;  %618 = vst [vmem:[#allocation2 + $0x1d8] sm:$0xff] %v4508_v0 }
  0x88   : > { %619 = vst [vmem:[#allocation2 + $0x1e0] sm:$0xff] %v4508_v0  ;;  %620 = vst [vmem:[#allocation2 + $0x1e8] sm:$0xff] %v4508_v0 }
  0x89   : > { %621 = vst [vmem:[#allocation2 + $0x1f0] sm:$0xff] %v4508_v0  ;;  %622 = vst [vmem:[#allocation2 + $0x1f8] sm:$0xff] %v4508_v0 }
  0x8a   : > { %623 = vst [vmem:[#allocation2 + $0x200] sm:$0xff] %v4508_v0  ;;  %624 = vst [vmem:[#allocation2 + $0x208] sm:$0xff] %v4508_v0 }
  0x8b   : > { %625 = vst [vmem:[#allocation2 + $0x210] sm:$0xff] %v4508_v0  ;;  %626 = vst [vmem:[#allocation2 + $0x218] sm:$0xff] %v4508_v0 }
  0x8c   : > { %627 = vst [vmem:[#allocation2 + $0x220] sm:$0xff] %v4508_v0  ;;  %628 = vst [vmem:[#allocation2 + $0x228] sm:$0xff] %v4508_v0 }
  0x8d   : > { %629 = vst [vmem:[#allocation2 + $0x230] sm:$0xff] %v4508_v0  ;;  %630 = vst [vmem:[#allocation2 + $0x238] sm:$0xff] %v4508_v0 }
  0x8e   : > { %631 = vst [vmem:[#allocation2 + $0x240] sm:$0xff] %v4508_v0  ;;  %632 = vst [vmem:[#allocation2 + $0x248] sm:$0xff] %v4508_v0 }
  0x8f   : > { %633 = vst [vmem:[#allocation2 + $0x250] sm:$0xff] %v4508_v0  ;;  %634 = vst [vmem:[#allocation2 + $0x258] sm:$0xff] %v4508_v0 }
  0x90   : > { %635 = vst [vmem:[#allocation2 + $0x260] sm:$0xff] %v4508_v0  ;;  %636 = vst [vmem:[#allocation2 + $0x268] sm:$0xff] %v4508_v0 }
  0x91   : > { %637 = vst [vmem:[#allocation2 + $0x270] sm:$0xff] %v4508_v0  ;;  %638 = vst [vmem:[#allocation2 + $0x278] sm:$0xff] %v4508_v0 }
  0x92   : > { %639 = vst [vmem:[#allocation2 + $0x280] sm:$0xff] %v4508_v0  ;;  %640 = vst [vmem:[#allocation2 + $0x288] sm:$0xff] %v4508_v0 }
  0x93   : > { %641 = vst [vmem:[#allocation2 + $0x290] sm:$0xff] %v4508_v0  ;;  %642 = vst [vmem:[#allocation2 + $0x298] sm:$0xff] %v4508_v0 }
  0x94   : > { %643 = vst [vmem:[#allocation2 + $0x2a0] sm:$0xff] %v4508_v0  ;;  %644 = vst [vmem:[#allocation2 + $0x2a8] sm:$0xff] %v4508_v0 }
  0x95   : > { %645 = vst [vmem:[#allocation2 + $0x2b0] sm:$0xff] %v4508_v0  ;;  %646 = vst [vmem:[#allocation2 + $0x2b8] sm:$0xff] %v4508_v0 }
  0x96   : > { %647 = vst [vmem:[#allocation2 + $0x2c0] sm:$0xff] %v4508_v0  ;;  %648 = vst [vmem:[#allocation2 + $0x2c8] sm:$0xff] %v4508_v0 }
  0x97   : > { %649 = vst [vmem:[#allocation2 + $0x2d0] sm:$0xff] %v4508_v0  ;;  %650 = vst [vmem:[#allocation2 + $0x2d8] sm:$0xff] %v4508_v0 }
  0x98   : > { %651 = vst [vmem:[#allocation2 + $0x2e0] sm:$0xff] %v4508_v0  ;;  %652 = vst [vmem:[#allocation2 + $0x2e8] sm:$0xff] %v4508_v0 }
  0x99   : > { %653 = vst [vmem:[#allocation2 + $0x2f0] sm:$0xff] %v4508_v0  ;;  %654 = vst [vmem:[#allocation2 + $0x2f8] sm:$0xff] %v4508_v0 }
  0x9a   : > { %655 = vst [vmem:[#allocation2 + $0x300] sm:$0xff] %v4508_v0  ;;  %656 = vst [vmem:[#allocation2 + $0x308] sm:$0xff] %v4508_v0 }
  0x9b   : > { %657 = vst [vmem:[#allocation2 + $0x310] sm:$0xff] %v4508_v0  ;;  %658 = vst [vmem:[#allocation2 + $0x318] sm:$0xff] %v4508_v0 }
  0x9c   : > { %659 = vst [vmem:[#allocation2 + $0x320] sm:$0xff] %v4508_v0  ;;  %660 = vst [vmem:[#allocation2 + $0x328] sm:$0xff] %v4508_v0 }
  0x9d   : > { %661 = vst [vmem:[#allocation2 + $0x330] sm:$0xff] %v4508_v0  ;;  %662 = vst [vmem:[#allocation2 + $0x338] sm:$0xff] %v4508_v0 }
  0x9e   : > { %663 = vst [vmem:[#allocation2 + $0x340] sm:$0xff] %v4508_v0  ;;  %664 = vst [vmem:[#allocation2 + $0x348] sm:$0xff] %v4508_v0 }
  0x9f   : > { %665 = vst [vmem:[#allocation2 + $0x350] sm:$0xff] %v4508_v0  ;;  %666 = vst [vmem:[#allocation2 + $0x358] sm:$0xff] %v4508_v0 }
  0xa0   : > { %667 = vst [vmem:[#allocation2 + $0x360] sm:$0xff] %v4508_v0  ;;  %668 = vst [vmem:[#allocation2 + $0x368] sm:$0xff] %v4508_v0 }
  0xa1   : > { %669 = vst [vmem:[#allocation2 + $0x370] sm:$0xff] %v4508_v0  ;;  %670 = vst [vmem:[#allocation2 + $0x378] sm:$0xff] %v4508_v0 }
  0xa2   : > { %671 = vst [vmem:[#allocation2 + $0x380] sm:$0xff] %v4508_v0  ;;  %672 = vst [vmem:[#allocation2 + $0x388] sm:$0xff] %v4508_v0 }
  0xa3   : > { %673 = vst [vmem:[#allocation2 + $0x390] sm:$0xff] %v4508_v0  ;;  %674 = vst [vmem:[#allocation2 + $0x398] sm:$0xff] %v4508_v0 }
  0xa4   : > { %675 = vst [vmem:[#allocation2 + $0x3a0] sm:$0xff] %v4508_v0  ;;  %676 = vst [vmem:[#allocation2 + $0x3a8] sm:$0xff] %v4508_v0 }
  0xa5   : > { %677 = vst [vmem:[#allocation2 + $0x3b0] sm:$0xff] %v4508_v0  ;;  %678 = vst [vmem:[#allocation2 + $0x3b8] sm:$0xff] %v4508_v0 }
  0xa6   : > { %679 = vst [vmem:[#allocation2 + $0x3c0] sm:$0xff] %v4508_v0  ;;  %680 = vst [vmem:[#allocation2 + $0x3c8] sm:$0xff] %v4508_v0 }
  0xa7   : > { %681 = vst [vmem:[#allocation2 + $0x3d0] sm:$0xff] %v4508_v0  ;;  %682 = vst [vmem:[#allocation2 + $0x3d8] sm:$0xff] %v4508_v0 }
  0xa8   : > { %683 = vst [vmem:[#allocation2 + $0x3e0] sm:$0xff] %v4508_v0  ;;  %684 = vst [vmem:[#allocation2 + $0x3e8] sm:$0xff] %v4508_v0 }
  0xa9   : > { %685 = vst [vmem:[#allocation2 + $0x3f0] sm:$0xff] %v4508_v0  ;;  %686 = vst [vmem:[#allocation2 + $0x3f8] sm:$0xff] %v4508_v0 }
  0xaa PF: > { %v4268_v1 = vld [vmem:[%s4840_s7 + $0x4] ss:$8 sps:$4 sm:$0xff]   ;;  %v4270_v2 = vld [vmem:[%s4840_s7] ss:$8 sps:$4 sm:$0xff]   ;;  %v4509_v3 = vmov 0   ;;  %p3961_p11 = scmp.ne.s32.totalorder %s4498_s14, 5 }
  0xab   : > { %2128 = vmatprep.mubr.bf16.mxu0 %v4509_v3  ;;  %1743 = vmatprep.subr.bf16.mxu1 %v4268_v1  ;;  %v4271_v4 = vld [vmem:[%s4840_s7 + $0x14] ss:$8 sps:$4 sm:$0xff]   ;;  %v4273_v5 = vld [vmem:[%s4840_s7 + $0x10] ss:$8 sps:$4 sm:$0xff]   ;;  %v4274_v6 = vld [vmem:[%s4840_s7 + $0x24] ss:$8 sps:$4 sm:$0xff]  }
  0xac   : > { %1744 = vmatpush1.bf16.msra.mxu1 %v4270_v2  ;;  %v4276_v7 = vld [vmem:[%s4840_s7 + $0x20] ss:$8 sps:$4 sm:$0xff]   ;;  %v4277_v8 = vld [vmem:[%s4840_s7 + $0x34] ss:$8 sps:$4 sm:$0xff]   ;;  %v4279_v9 = vld [vmem:[%s4840_s7 + $0x30] ss:$8 sps:$4 sm:$0xff]  }
  0xad   : > { %1745 = vmatprep.subr.bf16.mxu1 %v4271_v4  ;;  %v4292_v10 = vld [vmem:[%s4840_s7 + $0x104] ss:$8 sps:$4 sm:$0xff]   ;;  %v4294_v11 = vld [vmem:[%s4840_s7 + $0x100] ss:$8 sps:$4 sm:$0xff]   ;;  %v4298_v13 = vld [vmem:[%s4840_s7 + $0x114] ss:$8 sps:$4 sm:$0xff]  }
  0xae   : > { %v4280_v12 = vld [vmem:[%s4840_s7 + $0x44] ss:$8 sps:$4 sm:$0xff]   ;;  %2096 = vmatprep.subr.bf16.mxu0 %v4292_v10  ;;  %v4300_v14 = vld [vmem:[%s4840_s7 + $0x110] ss:$8 sps:$4 sm:$0xff]   ;;  %v4282_v15 = vld [vmem:[%s4840_s7 + $0x40] ss:$8 sps:$4 sm:$0xff]  }
  0xaf   : > { %2097 = vmatpush1.bf16.msra.mxu0 %v4294_v11  ;;  %v4283_v16 = vld [vmem:[%s4840_s7 + $0x54] ss:$8 sps:$4 sm:$0xff]   ;;  %v4304_v17 = vld [vmem:[%s4840_s7 + $0x124] ss:$8 sps:$4 sm:$0xff]   ;;  %v4306_v18 = vld [vmem:[%s4840_s7 + $0x120] ss:$8 sps:$4 sm:$0xff]  }
  0xb0   : > { %1746 = vmatpush1.bf16.msra.mxu1 %v4273_v5  ;;  %2098 = vmatprep.subr.bf16.mxu0 %v4298_v13  ;;  %v4285_v19 = vld [vmem:[%s4840_s7 + $0x50] ss:$8 sps:$4 sm:$0xff]   ;;  %v4310_v20 = vld [vmem:[%s4840_s7 + $0x134] ss:$8 sps:$4 sm:$0xff]   ;;  %v4286_v21 = vld [vmem:[%s4840_s7 + $0x64] ss:$8 sps:$4 sm:$0xff]  }
  0xb1   : > { %1747 = vmatprep.subr.bf16.mxu1 %v4274_v6  ;;  %v4312_v22 = vld [vmem:[%s4840_s7 + $0x130] ss:$8 sps:$4 sm:$0xff]   ;;  %v4288_v23 = vld [vmem:[%s4840_s7 + $0x60] ss:$8 sps:$4 sm:$0xff]   ;;  %v4316_v24 = vld [vmem:[%s4840_s7 + $0x144] ss:$8 sps:$4 sm:$0xff]  }
  0xb2   : > { %v4289_v25 = vld [vmem:[%s4840_s7 + $0x74] ss:$8 sps:$4 sm:$0xff]   ;;  %v4318_v26 = vld [vmem:[%s4840_s7 + $0x140] ss:$8 sps:$4 sm:$0xff]   ;;  %v4291_v27 = vld [vmem:[%s4840_s7 + $0x70] ss:$8 sps:$4 sm:$0xff]  }
  0xb3   : > { %2099 = vmatpush1.bf16.msra.mxu0 %v4300_v14  ;;  %v4322_v28 = vld [vmem:[%s4840_s7 + $0x154] ss:$8 sps:$4 sm:$0xff]   ;;  %v4295_v29 = vld [vmem:[%s4840_s7 + $0x84] ss:$8 sps:$4 sm:$0xff]   ;;  %v4324_v30 = vld [vmem:[%s4840_s7 + $0x150] ss:$8 sps:$4 sm:$0xff]  }
  0xb4   : > { %1748 = vmatpush1.bf16.msra.mxu1 %v4276_v7  ;;  %2100 = vmatprep.subr.bf16.mxu0 %v4304_v17  ;;  %v4297_v31 = vld [vmem:[%s4840_s7 + $0x80] ss:$8 sps:$4 sm:$0xff]   ;;  %v4328_v32 = vld [vmem:[%s4840_s7 + $0x164] ss:$8 sps:$4 sm:$0xff]   ;;  %v4301_v33 = vld [vmem:[%s4840_s7 + $0x94] ss:$8 sps:$4 sm:$0xff]  }
  0xb5   : > { %1749 = vmatprep.subr.bf16.mxu1 %v4277_v8  ;;  %v4303_v34 = vld [vmem:[%s4840_s7 + $0x90] ss:$8 sps:$4 sm:$0xff]   ;;  %v4330_v35 = vld [vmem:[%s4840_s7 + $0x160] ss:$8 sps:$4 sm:$0xff]   ;;  %v4334_v37 = vld [vmem:[%s4840_s7 + $0x174] ss:$8 sps:$4 sm:$0xff]  }
  0xb6   : > { %v4343_v36 = vld [vmem:[%s4842_s8 + $0x4] ss:$12 sps:$4 sm:$0xff]   ;;  %v4309_v40 = vld [vmem:[%s4840_s7 + $0xa0] ss:$8 sps:$4 sm:$0xff]   ;;  %v4313_v41 = vld [vmem:[%s4840_s7 + $0xb4] ss:$8 sps:$4 sm:$0xff]  }
  0xb7   : > { %2101 = vmatpush1.bf16.msra.mxu0 %v4306_v18  ;;  %v4307_v38 = vld [vmem:[%s4840_s7 + $0xa4] ss:$8 sps:$4 sm:$0xff]   ;;  %1775 = vmatprep.mubr.bf16.mxu1 %v4343_v36  ;;  %v4336_v39 = vld [vmem:[%s4840_s7 + $0x170] ss:$8 sps:$4 sm:$0xff]   ;;  %v4340_v42 = vld [vmem:[%s4842_s8 + $0x8] ss:$12 sps:$4 sm:$0xff]  }
  0xb8   : > { %1750 = vmatpush1.bf16.msra.mxu1 %v4279_v9  ;;  %2102 = vmatprep.subr.bf16.mxu0 %v4310_v20  ;;  %v4315_v43 = vld [vmem:[%s4840_s7 + $0xb0] ss:$8 sps:$4 sm:$0xff]   ;;  %v4319_v44 = vld [vmem:[%s4840_s7 + $0xc4] ss:$8 sps:$4 sm:$0xff]   ;;  %v4321_v45 = vld [vmem:[%s4840_s7 + $0xc0] ss:$8 sps:$4 sm:$0xff]  }
  0xb9   : > { %1751 = vmatprep.subr.bf16.mxu1 %v4280_v12  ;;  %v4325_v46 = vld [vmem:[%s4840_s7 + $0xd4] ss:$8 sps:$4 sm:$0xff]   ;;  %v4344_v47 = vld [vmem:[%s4842_s8 + $0x20] ss:$12 sps:$4 sm:$0xff]   ;;  %v4327_v48 = vld [vmem:[%s4840_s7 + $0xd0] ss:$8 sps:$4 sm:$0xff]  }
  0xba   : > { %v4331_v49 = vld [vmem:[%s4840_s7 + $0xe4] ss:$8 sps:$4 sm:$0xff]   ;;  %v4333_v50 = vld [vmem:[%s4840_s7 + $0xe0] ss:$8 sps:$4 sm:$0xff]   ;;  %v4337_v51 = vld [vmem:[%s4840_s7 + $0xf4] ss:$8 sps:$4 sm:$0xff]  }
  0xbb   : > { %2103 = vmatpush1.bf16.msra.mxu0 %v4312_v22  ;;  %v4348_v52 = vld [vmem:[%s4842_s8 + $0x38] ss:$12 sps:$4 sm:$0xff]   ;;  %v4341_v54 = vld [vmem:[%s4842_s8] ss:$12 sps:$4 sm:$0xff]   ;;  %v4345_v55 = vld [vmem:[%s4842_s8 + $0x1c] ss:$12 sps:$4 sm:$0xff]  }
  0xbc   : > { %1752 = vmatpush1.bf16.msra.mxu1 %v4282_v15  ;;  %2104 = vmatprep.subr.bf16.mxu0 %v4316_v24  ;;  %v4339_v53 = vld [vmem:[%s4840_s7 + $0xf0] ss:$8 sps:$4 sm:$0xff]   ;;  %v4349_v58 = vld [vmem:[%s4842_s8 + $0x34] ss:$12 sps:$4 sm:$0xff]   ;;  %v4361_v4 = vld [vmem:[%s4842_s8 + $0x7c] ss:$12 sps:$4 sm:$0xff]  }
  0xbd   : > { %1753 = vmatprep.subr.bf16.mxu1 %v4283_v16  ;;  %v4352_v56 = vld [vmem:[%s4842_s8 + $0x50] ss:$12 sps:$4 sm:$0xff]   ;;  %v4347_v57 = vld [vmem:[%s4842_s8 + $0x18] ss:$12 sps:$4 sm:$0xff]   ;;  %v4356_v59 = vld [vmem:[%s4842_s8 + $0x68] ss:$12 sps:$4 sm:$0xff]  }
  0xbe   : > { %v4351_v60 = vld [vmem:[%s4842_s8 + $0x30] ss:$12 sps:$4 sm:$0xff]   ;;  %v4353_v61 = vld [vmem:[%s4842_s8 + $0x4c] ss:$12 sps:$4 sm:$0xff]   ;;  %v4355_v63 = vld [vmem:[%s4842_s8 + $0x48] ss:$12 sps:$4 sm:$0xff]  }
  0xbf   : > { %2105 = vmatpush1.bf16.msra.mxu0 %v4318_v26  ;;  %v4360_v62 = vld [vmem:[%s4842_s8 + $0x80] ss:$12 sps:$4 sm:$0xff]   ;;  %v4357_v0 = vld [vmem:[%s4842_s8 + $0x64] ss:$12 sps:$4 sm:$0xff]   ;;  %v4372_v8 = vld [vmem:[%s4842_s8 + $0xc8] ss:$12 sps:$4 sm:$0xff]  }
  0xc0   : > { %1754 = vmatpush1.bf16.msra.mxu1 %v4285_v19  ;;  %2106 = vmatprep.subr.bf16.mxu0 %v4322_v28  ;;  %v4364_v1 = vld [vmem:[%s4842_s8 + $0x98] ss:$12 sps:$4 sm:$0xff]   ;;  %v4359_v2 = vld [vmem:[%s4842_s8 + $0x60] ss:$12 sps:$4 sm:$0xff]   ;;  %v4368_v5 = vld [vmem:[%s4842_s8 + $0xb0] ss:$12 sps:$4 sm:$0xff]  }
  0xc1   : > { %1755 = vmatprep.subr.bf16.mxu1 %v4286_v21  ;;  %v4363_v6 = vld [vmem:[%s4842_s8 + $0x78] ss:$12 sps:$4 sm:$0xff]   ;;  %v4365_v7 = vld [vmem:[%s4842_s8 + $0x94] ss:$12 sps:$4 sm:$0xff]   ;;  %v4367_v9 = vld [vmem:[%s4842_s8 + $0x90] ss:$12 sps:$4 sm:$0xff]  }
  0xc2   : > { %v4369_v10 = vld [vmem:[%s4842_s8 + $0xac] ss:$12 sps:$4 sm:$0xff]   ;;  %v4371_v12 = vld [vmem:[%s4842_s8 + $0xa8] ss:$12 sps:$4 sm:$0xff]   ;;  %v4373_v13 = vld [vmem:[%s4842_s8 + $0xc4] ss:$12 sps:$4 sm:$0xff]  }
  0xc3   : > { %2107 = vmatpush1.bf16.msra.mxu0 %v4324_v30  ;;  %v4376_v11 = vld [vmem:[%s4842_s8 + $0xe0] ss:$12 sps:$4 sm:$0xff]   ;;  %v4380_v14 = vld [vmem:[%s4842_s8 + $0xf8] ss:$12 sps:$4 sm:$0xff]   ;;  %v4377_v16 = vld [vmem:[%s4842_s8 + $0xdc] ss:$12 sps:$4 sm:$0xff]  }
  0xc4   : > { %1756 = vmatpush1.bf16.msra.mxu1 %v4288_v23  ;;  %2108 = vmatprep.subr.bf16.mxu0 %v4328_v32  ;;  %v4375_v15 = vld [vmem:[%s4842_s8 + $0xc0] ss:$12 sps:$4 sm:$0xff]   ;;  %v4384_v17 = vld [vmem:[%s4842_s8 + $0x110] ss:$12 sps:$4 sm:$0xff]   ;;  %v4379_v18 = vld [vmem:[%s4842_s8 + $0xd8] ss:$12 sps:$4 sm:$0xff]  }
  0xc5   : > { %1757 = vmatprep.subr.bf16.mxu1 %v4289_v25  ;;  %v4381_v19 = vld [vmem:[%s4842_s8 + $0xf4] ss:$12 sps:$4 sm:$0xff]   ;;  %v4383_v21 = vld [vmem:[%s4842_s8 + $0xf0] ss:$12 sps:$4 sm:$0xff]   ;;  %v4385_v22 = vld [vmem:[%s4842_s8 + $0x10c] ss:$12 sps:$4 sm:$0xff]  }
  0xc6   : > { %v4388_v20 = vld [vmem:[%s4842_s8 + $0x128] ss:$12 sps:$4 sm:$0xff]   ;;  %v4392_v23 = vld [vmem:[%s4842_s8 + $0x140] ss:$12 sps:$4 sm:$0xff]   ;;  %v4389_v25 = vld [vmem:[%s4842_s8 + $0x124] ss:$12 sps:$4 sm:$0xff]  }
  0xc7   : > { %2109 = vmatpush1.bf16.msra.mxu0 %v4330_v35  ;;  %v4387_v24 = vld [vmem:[%s4842_s8 + $0x108] ss:$12 sps:$4 sm:$0xff]   ;;  %v4396_v26 = vld [vmem:[%s4842_s8 + $0x158] ss:$12 sps:$4 sm:$0xff]   ;;  %v4408_v35 = vld [vmem:[%s4842_s8 + $0x1a0] ss:$12 sps:$4 sm:$0xff]  }
  0xc8   : > { %1758 = vmatpush1.bf16.msra.mxu1 %v4291_v27  ;;  %2110 = vmatprep.subr.bf16.mxu0 %v4334_v37  ;;  %v4391_v27 = vld [vmem:[%s4842_s8 + $0x120] ss:$12 sps:$4 sm:$0xff]   ;;  %v4393_v28 = vld [vmem:[%s4842_s8 + $0x13c] ss:$12 sps:$4 sm:$0xff]   ;;  %v4395_v30 = vld [vmem:[%s4842_s8 + $0x138] ss:$12 sps:$4 sm:$0xff]  }
  0xc9   : > { %1759 = vmatprep.subr.bf16.mxu1 %v4295_v29  ;;  %v4400_v29 = vld [vmem:[%s4842_s8 + $0x170] ss:$12 sps:$4 sm:$0xff]   ;;  %v4404_v32 = vld [vmem:[%s4842_s8 + $0x188] ss:$12 sps:$4 sm:$0xff]  }
  0xca   : > { %v4403_v36 = vld [vmem:[%s4842_s8 + $0x168] ss:$12 sps:$4 sm:$0xff]   ;;  %v4405_v37 = vld [vmem:[%s4842_s8 + $0x184] ss:$12 sps:$4 sm:$0xff]  }
  0xcb   : > { %2111 = vmatpush1.bf16.msra.mxu0 %v4336_v39  ;;  %v4407_v39 = vld [vmem:[%s4842_s8 + $0x180] ss:$12 sps:$4 sm:$0xff]  }
  0xcc   : > { %1760 = vmatpush1.bf16.msra.mxu1 %v4297_v31  ;;  %v4397_v31 = vld [vmem:[%s4842_s8 + $0x154] ss:$12 sps:$4 sm:$0xff]  }
  0xcd   : > { %1761 = vmatprep.subr.bf16.mxu1 %v4301_v33  ;;  %v4399_v33 = vld [vmem:[%s4842_s8 + $0x150] ss:$12 sps:$4 sm:$0xff]  }
  0xce   : > { %2129 = vmatmul.mubr.bf16.vlgmr.msra.gmra.mrb[0].mxu0 %v4340_v42  ;;  %v4411_v42 = vld [vmem:[%s4842_s8 + $0x198] ss:$12 sps:$4 sm:$0xff]  }
  0xcf   : > { %2138 = vmatprep.mubr.bf16.mxu0 %v4509_v3 }
  0xd0   : > { %1762 = vmatpush1.bf16.msra.mxu1 %v4303_v34  ;;  %v4401_v34 = vld [vmem:[%s4842_s8 + $0x16c] ss:$12 sps:$4 sm:$0xff]  }
  0xd1   : > { %1763 = vmatprep.subr.bf16.mxu1 %v4307_v38  ;;  %v4412_v38 = vld [vmem:[%s4842_s8 + $0x1b8] ss:$12 sps:$4 sm:$0xff]  }
  0xd4   : > { %1764 = vmatpush1.bf16.msra.mxu1 %v4309_v40  ;;  %v4409_v40 = vld [vmem:[%s4842_s8 + $0x19c] ss:$12 sps:$4 sm:$0xff]  }
  0xd5   : > { %1765 = vmatprep.subr.bf16.mxu1 %v4313_v41  ;;  %v4416_v41 = vld [vmem:[%s4842_s8 + $0x1d0] ss:$12 sps:$4 sm:$0xff]  }
  0xd6   : > { %2139 = vmatmul.mubr.bf16.gmra.mrb[4].mxu0 %v4344_v47  ;;  %v4424_v47 = vld [vmem:[%s4842_s8 + $0x200] ss:$12 sps:$4 sm:$0xff]  }
  0xd7   : > { %2148 = vmatprep.mubr.bf16.mxu0 %v4509_v3 }
  0xd8   : > { %1766 = vmatpush1.bf16.msra.mxu1 %v4315_v43  ;;  %v4413_v43 = vld [vmem:[%s4842_s8 + $0x1b4] ss:$12 sps:$4 sm:$0xff]  }
  0xd9   : > { %1767 = vmatprep.subr.bf16.mxu1 %v4319_v44  ;;  %v4420_v44 = vld [vmem:[%s4842_s8 + $0x1e8] ss:$12 sps:$4 sm:$0xff]  }
  0xdc   : > { %1768 = vmatpush1.bf16.msra.mxu1 %v4321_v45  ;;  %v4415_v45 = vld [vmem:[%s4842_s8 + $0x1b0] ss:$12 sps:$4 sm:$0xff]  }
  0xdd   : > { %1769 = vmatprep.subr.bf16.mxu1 %v4325_v46  ;;  %v4417_v46 = vld [vmem:[%s4842_s8 + $0x1cc] ss:$12 sps:$4 sm:$0xff]  }
  0xde   : > { %2149 = vmatmul.mubr.bf16.gmra.mrb[8].mxu0 %v4348_v52  ;;  %v4425_v52 = vld [vmem:[%s4842_s8 + $0x1fc] ss:$12 sps:$4 sm:$0xff]  }
  0xdf   : > { %2158 = vmatprep.mubr.bf16.mxu0 %v4509_v3 }
  0xe0   : > { %1770 = vmatpush1.bf16.msra.mxu1 %v4327_v48  ;;  %v4419_v48 = vld [vmem:[%s4842_s8 + $0x1c8] ss:$12 sps:$4 sm:$0xff]  }
  0xe1   : > { %1771 = vmatprep.subr.bf16.mxu1 %v4331_v49  ;;  %v4421_v49 = vld [vmem:[%s4842_s8 + $0x1e4] ss:$12 sps:$4 sm:$0xff]  }
  0xe4   : > { %1772 = vmatpush1.bf16.msra.mxu1 %v4333_v50  ;;  %v4428_v50 = vld [vmem:[%s4842_s8 + $0x218] ss:$12 sps:$4 sm:$0xff]  }
  0xe5   : > { %1773 = vmatprep.subr.bf16.mxu1 %v4337_v51  ;;  %v4423_v51 = vld [vmem:[%s4842_s8 + $0x1e0] ss:$12 sps:$4 sm:$0xff]  }
  0xe6   : > { %2159 = vmatmul.mubr.bf16.gmra.mrb[12].mxu0 %v4352_v56  ;;  %v4436_v56 = vld [vmem:[%s4842_s8 + $0x248] ss:$12 sps:$4 sm:$0xff]  }
  0xe7   : > { %2168 = vmatprep.mubr.bf16.mxu0 %v4509_v3 }
  0xe8   : > { %1774 = vmatpush1.bf16.msra.mxu1 %v4339_v53  ;;  %v4432_v53 = vld [vmem:[%s4842_s8 + $0x230] ss:$12 sps:$4 sm:$0xff]  }
  0xeb   : > { %1776 = vmatmul.mubr.bf16.vlgmr.msra.gmra.mrb[0].mxu1 %v4341_v54  ;;  %v4427_v54 = vld [vmem:[%s4842_s8 + $0x1f8] ss:$12 sps:$4 sm:$0xff]  }
  0xec   : > { %1785 = vmatprep.mubr.bf16.mxu1 %v4345_v55  ;;  %v4429_v55 = vld [vmem:[%s4842_s8 + $0x214] ss:$12 sps:$4 sm:$0xff]  }
  0xee   : > { %2169 = vmatmul.mubr.bf16.gmra.mrb[16].mxu0 %v4356_v59  ;;  %v4440_v59 = vld [vmem:[%s4842_s8 + $0x260] ss:$12 sps:$4 sm:$0xff]  }
  0xef   : > { %2178 = vmatprep.mubr.bf16.mxu0 %v4509_v3 }
  0xf3   : > { %1786 = vmatmul.mubr.bf16.gmra.mrb[4].mxu1 %v4347_v57  ;;  %v4431_v57 = vld [vmem:[%s4842_s8 + $0x210] ss:$12 sps:$4 sm:$0xff]  }
  0xf4   : > { %1795 = vmatprep.mubr.bf16.mxu1 %v4349_v58  ;;  %v4433_v58 = vld [vmem:[%s4842_s8 + $0x22c] ss:$12 sps:$4 sm:$0xff]  }
  0xf6   : > { %2179 = vmatmul.mubr.bf16.gmra.mrb[20].mxu0 %v4360_v62  ;;  %v4444_v62 = vld [vmem:[%s4842_s8 + $0x278] ss:$12 sps:$4 sm:$0xff]  }
  0xf7   : > { %2188 = vmatprep.mubr.bf16.mxu0 %v4509_v3 }
  0xfb   : > { %1796 = vmatmul.mubr.bf16.gmra.mrb[8].mxu1 %v4351_v60  ;;  %v4435_v60 = vld [vmem:[%s4842_s8 + $0x228] ss:$12 sps:$4 sm:$0xff]  }
  0xfc   : > { %1805 = vmatprep.mubr.bf16.mxu1 %v4353_v61  ;;  %v4437_v61 = vld [vmem:[%s4842_s8 + $0x244] ss:$12 sps:$4 sm:$0xff]  }
  0xfe   : > { %2189 = vmatmul.mubr.bf16.gmra.mrb[24].mxu0 %v4364_v1 }
  0xff   : > { %2198 = vmatprep.mubr.bf16.mxu0 %v4509_v3 }
 0x103   : > { %1806 = vmatmul.mubr.bf16.gmra.mrb[12].mxu1 %v4355_v63  ;;  %v4439_v63 = vld [vmem:[%s4842_s8 + $0x240] ss:$12 sps:$4 sm:$0xff]  }
 0x104   : > { %1815 = vmatprep.mubr.bf16.mxu1 %v4357_v0  ;;  %v4441_v0 = vld [vmem:[%s4842_s8 + $0x25c] ss:$12 sps:$4 sm:$0xff]  }
 0x106   : > { %2199 = vmatmul.mubr.bf16.gmra.mrb[28].mxu0 %v4368_v5 }
 0x107   : > { %2208 = vmatprep.mubr.bf16.mxu0 %v4509_v3 }
 0x10b   : > { %1816 = vmatmul.mubr.bf16.gmra.mrb[16].mxu1 %v4359_v2 }
 0x10c   : > { %1825 = vmatprep.mubr.bf16.mxu1 %v4361_v4  ;;  %v4448_v4 = vld [vmem:[%s4842_s8 + $0x290] ss:$12 sps:$4 sm:$0xff]  }
 0x10e   : > { %2209 = vmatmul.mubr.bf16.gmra.mrb[32].mxu0 %v4372_v8  ;;  %v4445_v8 = vld [vmem:[%s4842_s8 + $0x274] ss:$12 sps:$4 sm:$0xff]  }
 0x10f   : > { %2218 = vmatprep.mubr.bf16.mxu0 %v4509_v3 }
 0x113   : > { %1826 = vmatmul.mubr.bf16.gmra.mrb[20].mxu1 %v4363_v6 }
 0x114   : > { %1835 = vmatprep.mubr.bf16.mxu1 %v4365_v7  ;;  %v4443_v7 = vld [vmem:[%s4842_s8 + $0x258] ss:$12 sps:$4 sm:$0xff]  }
 0x116   : > { %2219 = vmatmul.mubr.bf16.gmra.mrb[36].mxu0 %v4376_v11  ;;  %v4452_v11 = vld [vmem:[%s4842_s8 + $0x2a8] ss:$12 sps:$4 sm:$0xff]  }
 0x117   : > { %2228 = vmatprep.mubr.bf16.mxu0 %v4509_v3 }
 0x11b   : > { %1836 = vmatmul.mubr.bf16.gmra.mrb[24].mxu1 %v4367_v9 }
 0x11c   : > { %1845 = vmatprep.mubr.bf16.mxu1 %v4369_v10 }
 0x11e   : > { %2229 = vmatmul.mubr.bf16.gmra.mrb[40].mxu0 %v4380_v14  ;;  %v4447_v14 = vld [vmem:[%s4842_s8 + $0x270] ss:$12 sps:$4 sm:$0xff]  }
 0x11f   : > { %2238 = vmatprep.mubr.bf16.mxu0 %v4509_v3 }
 0x123   : > { %1846 = vmatmul.mubr.bf16.gmra.mrb[28].mxu1 %v4371_v12 }
 0x124   : > { %1855 = vmatprep.mubr.bf16.mxu1 %v4373_v13 }
 0x126   : > { %2239 = vmatmul.mubr.bf16.gmra.mrb[44].mxu0 %v4384_v17 }
 0x127   : > { %2248 = vmatprep.mubr.bf16.mxu0 %v4509_v3 }
 0x12b   : > { %1856 = vmatmul.mubr.bf16.gmra.mrb[32].mxu1 %v4375_v15  ;;  %v4449_v15 = vld [vmem:[%s4842_s8 + $0x28c] ss:$12 sps:$4 sm:$0xff]  }
 0x12c   : > { %1865 = vmatprep.mubr.bf16.mxu1 %v4377_v16 }
 0x12e   : > { %2249 = vmatmul.mubr.bf16.gmra.mrb[48].mxu0 %v4388_v20 }
 0x12f   : > { %2258 = vmatprep.mubr.bf16.mxu0 %v4509_v3 }
 0x133   : > { %1866 = vmatmul.mubr.bf16.gmra.mrb[36].mxu1 %v4379_v18  ;;  %v4456_v18 = vld [vmem:[%s4842_s8 + $0x2c0] ss:$12 sps:$4 sm:$0xff]  }
 0x134   : > { %1875 = vmatprep.mubr.bf16.mxu1 %v4381_v19 }
 0x136   : > { %2259 = vmatmul.mubr.bf16.gmra.mrb[52].mxu0 %v4392_v23 }
 0x137   : > { %2268 = vmatprep.mubr.bf16.mxu0 %v4509_v3 }
 0x13b   : > { %1876 = vmatmul.mubr.bf16.gmra.mrb[40].mxu1 %v4383_v21  ;;  %v687_v21 = vld [vmem:[#allocation2] sm:$0xff] }
 0x13c   : > { %1885 = vmatprep.mubr.bf16.mxu1 %v4385_v22 }
 0x13e   : > { %2269 = vmatmul.mubr.bf16.gmra.mrb[56].mxu0 %v4396_v26  ;;  %v4451_v26 = vld [vmem:[%s4842_s8 + $0x288] ss:$12 sps:$4 sm:$0xff]  }
 0x13f   : > { %2278 = vmatprep.mubr.bf16.mxu0 %v4509_v3 }
 0x143   : > { %1886 = vmatmul.mubr.bf16.gmra.mrb[44].mxu1 %v4387_v24  ;;  %v688_v24 = vld [vmem:[#allocation2 + $0x8] sm:$0xff] }
 0x144   : > { %1895 = vmatprep.mubr.bf16.mxu1 %v4389_v25 }
 0x146   : > { %2279 = vmatmul.mubr.bf16.gmra.mrb[60].mxu0 %v4400_v29 }
 0x147   : > { %2288 = vmatprep.mubr.bf16.mxu0 %v4509_v3 }
 0x14b   : > { %1896 = vmatmul.mubr.bf16.gmra.mrb[48].mxu1 %v4391_v27 }
 0x14c   : > { %1905 = vmatprep.mubr.bf16.mxu1 %v4393_v28  ;;  %v689_v28 = vld [vmem:[#allocation2 + $0x10] sm:$0xff] }
 0x14e   : > { %2289 = vmatmul.mubr.bf16.gmra.mrb[64].mxu0 %v4404_v32 }
 0x14f   : > { %2298 = vmatprep.mubr.bf16.mxu0 %v4509_v3 }
 0x153   : > { %1906 = vmatmul.mubr.bf16.gmra.mrb[52].mxu1 %v4395_v30  ;;  %v4453_v30 = vld [vmem:[%s4842_s8 + $0x2a4] ss:$12 sps:$4 sm:$0xff]  }
 0x154   : > { %1915 = vmatprep.mubr.bf16.mxu1 %v4397_v31 }
 0x156   : > { %2299 = vmatmul.mubr.bf16.gmra.mrb[68].mxu0 %v4408_v35 }
 0x157   : > { %2308 = vmatprep.mubr.bf16.mxu0 %v4509_v3 }
 0x15b   : > { %1916 = vmatmul.mubr.bf16.gmra.mrb[56].mxu1 %v4399_v33  ;;  %v690_v33 = vld [vmem:[#allocation2 + $0x18] sm:$0xff] }
 0x15c   : > { %1925 = vmatprep.mubr.bf16.mxu1 %v4401_v34 }
 0x15e   : > { %2309 = vmatmul.mubr.bf16.gmra.mrb[72].mxu0 %v4412_v38 }
 0x15f   : > { %2318 = vmatprep.mubr.bf16.mxu0 %v4509_v3 }
 0x163   : > { %1926 = vmatmul.mubr.bf16.gmra.mrb[60].mxu1 %v4403_v36 }
 0x164   : > { %1935 = vmatprep.mubr.bf16.mxu1 %v4405_v37 }
 0x166   : > { %2319 = vmatmul.mubr.bf16.gmra.mrb[76].mxu0 %v4416_v41 }
 0x167   : > { %2328 = vmatprep.mubr.bf16.mxu0 %v4509_v3 }
 0x16b   : > { %1936 = vmatmul.mubr.bf16.gmra.mrb[64].mxu1 %v4407_v39  ;;  %v4460_v39 = vld [vmem:[%s4842_s8 + $0x2d8] ss:$12 sps:$4 sm:$0xff]  }
 0x16c   : > { %1945 = vmatprep.mubr.bf16.mxu1 %v4409_v40 }
 0x16e   : > { %2329 = vmatmul.mubr.bf16.gmra.mrb[80].mxu0 %v4420_v44  ;;  %v691_v44 = vld [vmem:[#allocation2 + $0x20] sm:$0xff] }
 0x16f   : > { %2338 = vmatprep.mubr.bf16.mxu0 %v4509_v3 }
 0x173   : > { %1946 = vmatmul.mubr.bf16.gmra.mrb[68].mxu1 %v4411_v42 }
 0x174   : > { %1955 = vmatprep.mubr.bf16.mxu1 %v4413_v43 }
 0x176   : > { %2339 = vmatmul.mubr.bf16.gmra.mrb[84].mxu0 %v4424_v47  ;;  %v692_v47 = vld [vmem:[#allocation2 + $0x28] sm:$0xff] }
 0x177   : > { %2348 = vmatprep.mubr.bf16.mxu0 %v4509_v3 }
 0x17b   : > { %1956 = vmatmul.mubr.bf16.gmra.mrb[72].mxu1 %v4415_v45 }
 0x17c   : > { %1965 = vmatprep.mubr.bf16.mxu1 %v4417_v46 }
 0x17e   : > { %2349 = vmatmul.mubr.bf16.gmra.mrb[88].mxu0 %v4428_v50 }
 0x17f   : > { %2358 = vmatprep.mubr.bf16.mxu0 %v4509_v3 }
 0x183   : > { %1966 = vmatmul.mubr.bf16.gmra.mrb[76].mxu1 %v4419_v48 }
 0x184   : > { %1975 = vmatprep.mubr.bf16.mxu1 %v4421_v49  ;;  %v4455_v49 = vld [vmem:[%s4842_s8 + $0x2a0] ss:$12 sps:$4 sm:$0xff]  }
 0x186   : > { %2359 = vmatmul.mubr.bf16.gmra.mrb[92].mxu0 %v4432_v53  ;;  %v4457_v53 = vld [vmem:[%s4842_s8 + $0x2bc] ss:$12 sps:$4 sm:$0xff]  }
 0x187   : > { %2368 = vmatprep.mubr.bf16.mxu0 %v4509_v3 }
 0x18b   : > { %1976 = vmatmul.mubr.bf16.gmra.mrb[80].mxu1 %v4423_v51  ;;  %v693_v51 = vld [vmem:[#allocation2 + $0x30] sm:$0xff] }
 0x18c   : > { %1985 = vmatprep.mubr.bf16.mxu1 %v4425_v52 }
 0x18e   : > { %2369 = vmatmul.mubr.bf16.gmra.mrb[96].mxu0 %v4436_v56  ;;  %v694_v56 = vld [vmem:[#allocation2 + $0x38] sm:$0xff] }
 0x18f   : > { %2378 = vmatprep.mubr.bf16.mxu0 %v4509_v3 }
 0x193   : > { %1986 = vmatmul.mubr.bf16.gmra.mrb[84].mxu1 %v4427_v54 }
 0x194   : > { %1995 = vmatprep.mubr.bf16.mxu1 %v4429_v55 }
 0x196   : > { %2379 = vmatmul.mubr.bf16.gmra.mrb[100].mxu0 %v4440_v59 }
 0x197   : > { %2388 = vmatprep.mubr.bf16.mxu0 %v4509_v3 }
 0x19b   : > { %1996 = vmatmul.mubr.bf16.gmra.mrb[88].mxu1 %v4431_v57 }
 0x19c   : > { %2005 = vmatprep.mubr.bf16.mxu1 %v4433_v58 }
 0x19e   : > { %2389 = vmatmul.mubr.bf16.gmra.mrb[104].mxu0 %v4444_v62  ;;  %v4464_v62 = vld [vmem:[%s4842_s8 + $0x2f0] ss:$12 sps:$4 sm:$0xff]  }
 0x19f   : > { %2398 = vmatprep.mubr.bf16.mxu0 %v4509_v3 }
 0x1a1   : > { %v2130_v1 = vpop.f32.mrb[0].mxu0 }
 0x1a2   : > { %v2132_v2 = vpop.f32.mrb[1].mxu0 }
 0x1a3   : > { %2006 = vmatmul.mubr.bf16.gmra.mrb[92].mxu1 %v4435_v60  ;;  %v2134_v5 = vpop.f32.mrb[2].mxu0 }
 0x1a4   : > { %2015 = vmatprep.mubr.bf16.mxu1 %v4437_v61  ;;  %v2136_v6 = vpop.f32.mrb[3].mxu0 }
 0x1a6   : > { %2399 = vmatmul.mubr.bf16.gmra.mrb[108].mxu0 %v4448_v4 }
 0x1a7   : > { %2408 = vmatprep.mubr.bf16.mxu0 %v4509_v3 }
 0x1a9   : > { %v2140_v9 = vpop.f32.mrb[4].mxu0 }
 0x1aa   : > { %v2142_v10 = vpop.f32.mrb[5].mxu0 }
 0x1ab   : > { %2016 = vmatmul.mubr.bf16.gmra.mrb[96].mxu1 %v4439_v63  ;;  %v2144_v12 = vpop.f32.mrb[6].mxu0 }
 0x1ac   : > { %2025 = vmatprep.mubr.bf16.mxu1 %v4441_v0  ;;  %v2146_v13 = vpop.f32.mrb[7].mxu0 }
 0x1ae   : > { %2409 = vmatmul.mubr.bf16.gmra.mrb[112].mxu0 %v4452_v11 }
 0x1af   : > { %2418 = vmatprep.mubr.bf16.mxu0 %v4509_v3 }
 0x1b1   : > { %v5135_v16 = vpop.f32.mrb[8].mxu0 }
 0x1b2   : > { %v5137_v17 = vpop.f32.mrb[9].mxu0 }
 0x1b3   : > { %2026 = vmatmul.mubr.bf16.gmra.mrb[100].mxu1 %v4443_v7  ;;  %v5140_v19 = vpop.f32.mrb[10].mxu0 }
 0x1b4   : > { %2035 = vmatprep.mubr.bf16.mxu1 %v4445_v8  ;;  %v5142_v20 = vpop.f32.mrb[11].mxu0  ;;  %v4459_v8 = vld [vmem:[%s4842_s8 + $0x2b8] ss:$12 sps:$4 sm:$0xff]  }
 0x1b6   : > { %2419 = vmatmul.mubr.bf16.gmra.mrb[116].mxu0 %v4456_v18 }
 0x1b7   : > { %2428 = vmatprep.mubr.bf16.mxu0 %v4509_v3 }
 0x1b9   : > { %v5147_v35 = vpop.f32.mrb[12].mxu0 }
 0x1ba   : > { %v5149_v38 = vpop.f32.mrb[13].mxu0 }
 0x1bb   : > { %2036 = vmatmul.mubr.bf16.gmra.mrb[104].mxu1 %v4447_v14  ;;  %v5152_v41 = vpop.f32.mrb[14].mxu0 }
 0x1bc   : > { %2045 = vmatprep.mubr.bf16.mxu1 %v4449_v15  ;;  %v5154_v43 = vpop.f32.mrb[15].mxu0  ;;  %v698_v15 = vld [vmem:[#allocation2 + $0x58] sm:$0xff] }
 0x1be   : > { %v1777_v22 = vpop.f32.mrb[0].mxu1  ;;  %2429 = vmatmul.mubr.bf16.gmra.mrb[120].mxu0 %v4460_v39  ;;  %v702_v39 = vld [vmem:[#allocation2 + $0x78] sm:$0xff] }
 0x1bf   : > { %v2131_v23 = vadd.f32 %v2130_v1, %v1777_v22  ;;  %v1779_v25 = vpop.f32.mrb[1].mxu1  ;;  %2438 = vmatprep.mubr.bf16.mxu0 %v4509_v3 }
 0x1c0   : > { %v2133_v27 = vadd.f32 %v2132_v2, %v1779_v25  ;;  %v1781_v29 = vpop.f32.mrb[2].mxu1  ;;  %v695_v2 = vld [vmem:[#allocation2 + $0x40] sm:$0xff] }
 0x1c1   : > { %v2449_v31 = vadd.f32 %v2131_v23, %v687_v21  ;;  %v2135_v32 = vadd.f32 %v2134_v5, %v1781_v29  ;;  %v1783_v34 = vpop.f32.mrb[3].mxu1  ;;  %v5159_v58 = vpop.f32.mrb[16].mxu0 }
 0x1c2   : > { %v2450_v36 = vadd.f32 %v2133_v27, %v688_v24  ;;  %v2137_v37 = vadd.f32 %v2136_v6, %v1783_v34  ;;  %v5161_v61 = vpop.f32.mrb[17].mxu0  ;;  %v696_v6 = vld [vmem:[#allocation2 + $0x48] sm:$0xff] }
 0x1c3   : > { %2577 = vst [vmem:[#allocation2] sm:$0xff] %v2449_v31  ;;  %v2451_v40 = vadd.f32 %v2135_v32, %v689_v28  ;;  %2046 = vmatmul.mubr.bf16.gmra.mrb[108].mxu1 %v4451_v26  ;;  %v5164_v3 = vpop.f32.mrb[18].mxu0  ;;  %v699_v26 = vld [vmem:[#allocation2 + $0x60] sm:$0xff]  ;;  %v700_v28 = vld [vmem:[#allocation2 + $0x68] sm:$0xff]  ;;  %v701_v32 = vld [vmem:[#allocation2 + $0x70] sm:$0xff] }
 0x1c4   : > { %2578 = vst [vmem:[#allocation2 + $0x8] sm:$0xff] %v2450_v36  ;;  %v2452_v42 = vadd.f32 %v2137_v37, %v690_v33  ;;  %2055 = vmatprep.mubr.bf16.mxu1 %v4453_v30  ;;  %v5166_v1 = vpop.f32.mrb[19].mxu0  ;;  %v4463_v30 = vld [vmem:[%s4842_s8 + $0x2d0] ss:$12 sps:$4 sm:$0xff]   ;;  %v4465_v34 = vld [vmem:[%s4842_s8 + $0x2ec] ss:$12 sps:$4 sm:$0xff]  }
 0x1c5   : > { %2579 = vst [vmem:[#allocation2 + $0x10] sm:$0xff] %v2451_v40 }
 0x1c6   : > { %2580 = vst [vmem:[#allocation2 + $0x18] sm:$0xff] %v2452_v42  ;;  %v1787_v45 = vpop.f32.mrb[4].mxu1  ;;  %2439 = vmatmul.mubr.bf16.gmra.mrb[124].mxu0 %v4464_v62 }
 0x1c7   : > { %v2141_v46 = vadd.f32 %v2140_v9, %v1787_v45  ;;  %v1789_v48 = vpop.f32.mrb[5].mxu1 }
 0x1c8   : > { %v2143_v50 = vadd.f32 %v2142_v10, %v1789_v48  ;;  %v1791_v52 = vpop.f32.mrb[6].mxu1  ;;  %v697_v10 = vld [vmem:[#allocation2 + $0x50] sm:$0xff] }
 0x1c9   : > { %v2453_v54 = vadd.f32 %v2141_v46, %v691_v44  ;;  %v2145_v55 = vadd.f32 %v2144_v12, %v1791_v52  ;;  %v1793_v57 = vpop.f32.mrb[7].mxu1  ;;  %v4461_v12 = vld [vmem:[%s4842_s8 + $0x2d4] ss:$12 sps:$4 sm:$0xff]   ;;  %v5173_v21 = vpop.f32.mrb[20].mxu0 }
 0x1ca   : > { %v2454_v59 = vadd.f32 %v2143_v50, %v692_v47  ;;  %v2147_v60 = vadd.f32 %v2146_v13, %v1793_v57  ;;  %v5176_v24 = vpop.f32.mrb[21].mxu0  ;;  %v4467_v52 = vld [vmem:[%s4842_s8 + $0x2e8] ss:$12 sps:$4 sm:$0xff]  }
 0x1cb   : > { %2581 = vst [vmem:[#allocation2 + $0x20] sm:$0xff] %v2453_v54  ;;  %v2455_v63 = vadd.f32 %v2145_v55, %v693_v51  ;;  %2056 = vmatmul.mubr.bf16.gmra.mrb[112].mxu1 %v4455_v49  ;;  %v705_v54 = vld [vmem:[#allocation2 + $0x90] sm:$0xff] }
 0x1cc   : > { %2582 = vst [vmem:[#allocation2 + $0x28] sm:$0xff] %v2454_v59  ;;  %v2456_v0 = vadd.f32 %v2147_v60, %v694_v56  ;;  %2065 = vmatprep.mubr.bf16.mxu1 %v4457_v53  ;;  %v706_v59 = vld [vmem:[#allocation2 + $0x98] sm:$0xff] }
 0x1cd   : > { %2583 = vst [vmem:[#allocation2 + $0x30] sm:$0xff] %v2455_v63 }
 0x1ce   : > { %2584 = vst [vmem:[#allocation2 + $0x38] sm:$0xff] %v2456_v0  ;;  %v1797_v4 = vpop.f32.mrb[8].mxu1 }
 0x1cf   : > { %v2151_v5 = vadd.f32 %v5135_v16, %v1797_v4  ;;  %v1799_v7 = vpop.f32.mrb[9].mxu1 }
 0x1d0   : > { %v2153_v9 = vadd.f32 %v5137_v17, %v1799_v7  ;;  %v1801_v11 = vpop.f32.mrb[10].mxu1  ;;  %v5178_v17 = vpop.f32.mrb[22].mxu0 }
 0x1d1   : > { %v2457_v13 = vadd.f32 %v2151_v5, %v695_v2  ;;  %v2155_v14 = vadd.f32 %v5140_v19, %v1801_v11  ;;  %v1803_v18 = vpop.f32.mrb[11].mxu1  ;;  %v5180_v19 = vpop.f32.mrb[23].mxu0 }
 0x1d2   : > { %v2458_v22 = vadd.f32 %v2153_v9, %v696_v6  ;;  %v2157_v23 = vadd.f32 %v5142_v20, %v1803_v18  ;;  %v5187_v42 = vpop.f32.mrb[24].mxu0 }
 0x1d3   : > { %2585 = vst [vmem:[#allocation2 + $0x40] sm:$0xff] %v2457_v13  ;;  %v2459_v16 = vadd.f32 %v2155_v14, %v697_v10  ;;  %2066 = vmatmul.mubr.bf16.gmra.mrb[116].mxu1 %v4459_v8  ;;  %v5190_v46 = vpop.f32.mrb[25].mxu0  ;;  %v708_v8 = vld [vmem:[#allocation2 + $0xa8] sm:$0xff]  ;;  %v709_v10 = vld [vmem:[#allocation2 + $0xb0] sm:$0xff]  ;;  %v710_v14 = vld [vmem:[#allocation2 + $0xb8] sm:$0xff] }
 0x1d4   : > { %2586 = vst [vmem:[#allocation2 + $0x48] sm:$0xff] %v2458_v22  ;;  %v2460_v25 = vadd.f32 %v2157_v23, %v698_v15  ;;  %2075 = vmatprep.mubr.bf16.mxu1 %v4461_v12 }
 0x1d5   : > { %2587 = vst [vmem:[#allocation2 + $0x50] sm:$0xff] %v2459_v16 }
 0x1d6   : > { %2588 = vst [vmem:[#allocation2 + $0x58] sm:$0xff] %v2460_v25  ;;  %v1807_v27 = vpop.f32.mrb[12].mxu1 }
 0x1d7   : > { %v2161_v20 = vadd.f32 %v5147_v35, %v1807_v27  ;;  %v1809_v29 = vpop.f32.mrb[13].mxu1 }
 0x1d8   : > { %v2163_v31 = vadd.f32 %v5149_v38, %v1809_v29  ;;  %v1811_v33 = vpop.f32.mrb[14].mxu1  ;;  %v5192_v38 = vpop.f32.mrb[26].mxu0 }
 0x1d9   : > { %v2461_v36 = vadd.f32 %v2161_v20, %v699_v26  ;;  %v2165_v37 = vadd.f32 %v5152_v41, %v1811_v33  ;;  %v1813_v40 = vpop.f32.mrb[15].mxu1  ;;  %v5194_v48 = vpop.f32.mrb[27].mxu0  ;;  %v703_v41 = vld [vmem:[#allocation2 + $0x80] sm:$0xff] }
 0x1da   : > { %v2462_v44 = vadd.f32 %v2163_v31, %v700_v28  ;;  %v2167_v45 = vadd.f32 %v5154_v43, %v1813_v40  ;;  %v704_v43 = vld [vmem:[#allocation2 + $0x88] sm:$0xff]  ;;  %v5200_v62 = vpop.f32.mrb[28].mxu0 }
 0x1db   : > { %2589 = vst [vmem:[#allocation2 + $0x60] sm:$0xff] %v2461_v36  ;;  %v2463_v35 = vadd.f32 %v2165_v37, %v701_v32  ;;  %2076 = vmatmul.mubr.bf16.gmra.mrb[120].mxu1 %v4463_v30  ;;  %v5203_v2 = vpop.f32.mrb[29].mxu0  ;;  %v712_v28 = vld [vmem:[#allocation2 + $0xc8] sm:$0xff] }
 0x1dc   : > { %2590 = vst [vmem:[#allocation2 + $0x68] sm:$0xff] %v2462_v44  ;;  %v2464_v47 = vadd.f32 %v2167_v45, %v702_v39  ;;  %2085 = vmatprep.mubr.bf16.mxu1 %v4465_v34  ;;  %v5205_v4 = vpop.f32.mrb[30].mxu0  ;;  %v714_v34 = vld [vmem:[#allocation2 + $0xd8] sm:$0xff] }
 0x1dd   : > { %2591 = vst [vmem:[#allocation2 + $0x70] sm:$0xff] %v2463_v35  ;;  %v5207_v5 = vpop.f32.mrb[31].mxu0 }
 0x1de   : > { %2592 = vst [vmem:[#allocation2 + $0x78] sm:$0xff] %v2464_v47  ;;  %v1817_v49 = vpop.f32.mrb[16].mxu1 }
 0x1df   : > { %v2171_v50 = vadd.f32 %v5159_v58, %v1817_v49  ;;  %v1819_v51 = vpop.f32.mrb[17].mxu1  ;;  %v716_v49 = vld [vmem:[#allocation2 + $0xe8] sm:$0xff] }
 0x1e0   : > { %v2173_v53 = vadd.f32 %v5161_v61, %v1819_v51  ;;  %v1821_v55 = vpop.f32.mrb[18].mxu1 }
 0x1e1   : > { %v2465_v56 = vadd.f32 %v2171_v50, %v703_v41  ;;  %v2175_v57 = vadd.f32 %v5164_v3, %v1821_v55  ;;  %v1823_v60 = vpop.f32.mrb[19].mxu1  ;;  %v707_v3 = vld [vmem:[#allocation2 + $0xa0] sm:$0xff]  ;;  %v2210_v18 = vpop.f32.mrb[32].mxu0 }
 0x1e2   : > { %v2466_v63 = vadd.f32 %v2173_v53, %v704_v43  ;;  %v2177_v0 = vadd.f32 %v5166_v1, %v1823_v60  ;;  %v2212_v16 = vpop.f32.mrb[33].mxu0 }
 0x1e3   : > { %2593 = vst [vmem:[#allocation2 + $0x80] sm:$0xff] %v2465_v56  ;;  %v2467_v58 = vadd.f32 %v2175_v57, %v705_v54  ;;  %2086 = vmatmul.mubr.bf16.gmra.mrb[124].mxu1 %v4467_v52  ;;  %v5213_v26 = vpop.f32.mrb[34].mxu0  ;;  %v718_v54 = vld [vmem:[#allocation2 + $0xf8] sm:$0xff] }
 0x1e4   : > { %2594 = vst [vmem:[#allocation2 + $0x88] sm:$0xff] %v2466_v63  ;;  %v2468_v61 = vadd.f32 %v2177_v0, %v706_v59  ;;  %v5215_v27 = vpop.f32.mrb[35].mxu0 }
 0x1e5   : > { %2595 = vst [vmem:[#allocation2 + $0x90] sm:$0xff] %v2467_v58 }
 0x1e6   : > { %2596 = vst [vmem:[#allocation2 + $0x98] sm:$0xff] %v2468_v61  ;;  %v1827_v6 = vpop.f32.mrb[20].mxu1 }
 0x1e7   : > { %v2181_v7 = vadd.f32 %v5173_v21, %v1827_v6  ;;  %v1829_v9 = vpop.f32.mrb[21].mxu1 }
 0x1e8   : > { %v2183_v1 = vadd.f32 %v5176_v24, %v1829_v9  ;;  %v1831_v11 = vpop.f32.mrb[22].mxu1  ;;  %v711_v24 = vld [vmem:[#allocation2 + $0xc0] sm:$0xff] }
 0x1e9   : > { %v2469_v12 = vadd.f32 %v2181_v7, %v707_v3  ;;  %v2185_v13 = vadd.f32 %v5178_v17, %v1831_v11  ;;  %v1833_v15 = vpop.f32.mrb[23].mxu1  ;;  %v2220_v37 = vpop.f32.mrb[36].mxu0  ;;  %v720_v3 = vld [vmem:[#allocation2 + $0x108] sm:$0xff] }
 0x1ea   : > { %v2470_v22 = vadd.f32 %v2183_v1, %v708_v8  ;;  %v2187_v23 = vadd.f32 %v5180_v19, %v1833_v15  ;;  %v713_v19 = vld [vmem:[#allocation2 + $0xd0] sm:$0xff]  ;;  %v2222_v44 = vpop.f32.mrb[37].mxu0 }
 0x1eb   : > { %2597 = vst [vmem:[#allocation2 + $0xa0] sm:$0xff] %v2469_v12  ;;  %v2471_v25 = vadd.f32 %v2185_v13, %v709_v10  ;;  %v5221_v35 = vpop.f32.mrb[38].mxu0  ;;  %v721_v8 = vld [vmem:[#allocation2 + $0x110] sm:$0xff]  ;;  %v722_v10 = vld [vmem:[#allocation2 + $0x118] sm:$0xff] }
 0x1ec   : > { %2598 = vst [vmem:[#allocation2 + $0xa8] sm:$0xff] %v2470_v22  ;;  %v2472_v21 = vadd.f32 %v2187_v23, %v710_v14  ;;  %v5223_v47 = vpop.f32.mrb[39].mxu0 }
 0x1ed   : > { %2599 = vst [vmem:[#allocation2 + $0xb0] sm:$0xff] %v2471_v25 }
 0x1ee   : > { %2600 = vst [vmem:[#allocation2 + $0xb8] sm:$0xff] %v2472_v21  ;;  %v1837_v20 = vpop.f32.mrb[24].mxu1 }
 0x1ef   : > { %v2191_v17 = vadd.f32 %v5187_v42, %v1837_v20  ;;  %v1839_v29 = vpop.f32.mrb[25].mxu1 }
 0x1f0   : > { %v2193_v30 = vadd.f32 %v5190_v46, %v1839_v29  ;;  %v1841_v31 = vpop.f32.mrb[26].mxu1  ;;  %v715_v46 = vld [vmem:[#allocation2 + $0xe0] sm:$0xff] }
 0x1f1   : > { %v2473_v32 = vadd.f32 %v2191_v17, %v711_v24  ;;  %v2195_v33 = vadd.f32 %v5192_v38, %v1841_v31  ;;  %v1843_v36 = vpop.f32.mrb[27].mxu1  ;;  %v2230_v56 = vpop.f32.mrb[40].mxu0  ;;  %v724_v24 = vld [vmem:[#allocation2 + $0x128] sm:$0xff] }
 0x1f2   : > { %v2474_v39 = vadd.f32 %v2193_v30, %v712_v28  ;;  %v2197_v40 = vadd.f32 %v5194_v48, %v1843_v36  ;;  %v717_v48 = vld [vmem:[#allocation2 + $0xf0] sm:$0xff]  ;;  %v2232_v60 = vpop.f32.mrb[41].mxu0 }
 0x1f3   : > { %2601 = vst [vmem:[#allocation2 + $0xc0] sm:$0xff] %v2473_v32  ;;  %v2475_v45 = vadd.f32 %v2195_v33, %v713_v19  ;;  %v5229_v0 = vpop.f32.mrb[42].mxu0  ;;  %v725_v28 = vld [vmem:[#allocation2 + $0x130] sm:$0xff]  ;;  %v726_v19 = vld [vmem:[#allocation2 + $0x138] sm:$0xff] }
 0x1f4   : > { %2602 = vst [vmem:[#allocation2 + $0xc8] sm:$0xff] %v2474_v39  ;;  %v2476_v42 = vadd.f32 %v2197_v40, %v714_v34  ;;  %v5231_v58 = vpop.f32.mrb[43].mxu0 }
 0x1f5   : > { %2603 = vst [vmem:[#allocation2 + $0xd0] sm:$0xff] %v2475_v45 }
 0x1f6   : > { %2604 = vst [vmem:[#allocation2 + $0xd8] sm:$0xff] %v2476_v42  ;;  %v1847_v41 = vpop.f32.mrb[28].mxu1 }
 0x1f7   : > { %v2201_v38 = vadd.f32 %v5200_v62, %v1847_v41  ;;  %v1849_v50 = vpop.f32.mrb[29].mxu1 }
 0x1f8   : > { %v2203_v43 = vadd.f32 %v5203_v2, %v1849_v50  ;;  %v1851_v51 = vpop.f32.mrb[30].mxu1  ;;  %v719_v2 = vld [vmem:[#allocation2 + $0x100] sm:$0xff] }
 0x1f9   : > { %v2477_v52 = vadd.f32 %v2201_v38, %v715_v46  ;;  %v2205_v53 = vadd.f32 %v5205_v4, %v1851_v51  ;;  %v1853_v55 = vpop.f32.mrb[31].mxu1  ;;  %v2240_v12 = vpop.f32.mrb[44].mxu0  ;;  %v728_v46 = vld [vmem:[#allocation2 + $0x148] sm:$0xff] }
 0x1fa   : > { %v2478_v57 = vadd.f32 %v2203_v43, %v716_v49  ;;  %v2207_v59 = vadd.f32 %v5207_v5, %v1853_v55  ;;  %v2242_v15 = vpop.f32.mrb[45].mxu0  ;;  %v729_v49 = vld [vmem:[#allocation2 + $0x150] sm:$0xff] }
 0x1fb   : > { %2605 = vst [vmem:[#allocation2 + $0xe0] sm:$0xff] %v2477_v52  ;;  %v2479_v63 = vadd.f32 %v2205_v53, %v717_v48  ;;  %v5235_v23 = vpop.f32.mrb[46].mxu0  ;;  %v730_v48 = vld [vmem:[#allocation2 + $0x158] sm:$0xff] }
 0x1fc   : > { %2606 = vst [vmem:[#allocation2 + $0xe8] sm:$0xff] %v2478_v57  ;;  %v2480_v62 = vadd.f32 %v2207_v59, %v718_v54  ;;  %v5237_v25 = vpop.f32.mrb[47].mxu0 }
 0x1fd   : > { %2607 = vst [vmem:[#allocation2 + $0xf0] sm:$0xff] %v2479_v63 }
 0x1fe   : > { %2608 = vst [vmem:[#allocation2 + $0xf8] sm:$0xff] %v2480_v62  ;;  %v1857_v61 = vpop.f32.mrb[32].mxu1 }
 0x1ff   : > { %v2211_v4 = vadd.f32 %v2210_v18, %v1857_v61  ;;  %v1859_v6 = vpop.f32.mrb[33].mxu1 }
 0x200   : > { %v2213_v7 = vadd.f32 %v2212_v16, %v1859_v6  ;;  %v1861_v9 = vpop.f32.mrb[34].mxu1  ;;  %v723_v16 = vld [vmem:[#allocation2 + $0x120] sm:$0xff] }
 0x201   : > { %v2481_v5 = vadd.f32 %v2211_v4, %v719_v2  ;;  %v2215_v1 = vadd.f32 %v5213_v26, %v1861_v9  ;;  %v1863_v11 = vpop.f32.mrb[35].mxu1  ;;  %v2250_v32 = vpop.f32.mrb[48].mxu0  ;;  %v732_v2 = vld [vmem:[#allocation2 + $0x168] sm:$0xff] }
 0x202   : > { %v2482_v13 = vadd.f32 %v2213_v7, %v720_v3  ;;  %v2217_v14 = vadd.f32 %v5215_v27, %v1863_v11  ;;  %v2252_v36 = vpop.f32.mrb[49].mxu0  ;;  %v733_v3 = vld [vmem:[#allocation2 + $0x170] sm:$0xff] }
 0x203   : > { %2609 = vst [vmem:[#allocation2 + $0x100] sm:$0xff] %v2481_v5  ;;  %v2483_v22 = vadd.f32 %v2215_v1, %v721_v8  ;;  %v5241_v40 = vpop.f32.mrb[50].mxu0  ;;  %v734_v8 = vld [vmem:[#allocation2 + $0x178] sm:$0xff] }
 0x204   : > { %2610 = vst [vmem:[#allocation2 + $0x108] sm:$0xff] %v2482_v13  ;;  %v2484_v18 = vadd.f32 %v2217_v14, %v722_v10  ;;  %v5243_v45 = vpop.f32.mrb[51].mxu0 }
 0x205   : > { %2611 = vst [vmem:[#allocation2 + $0x110] sm:$0xff] %v2483_v22 }
 0x206   : > { %2612 = vst [vmem:[#allocation2 + $0x118] sm:$0xff] %v2484_v18  ;;  %v1867_v21 = vpop.f32.mrb[36].mxu1 }
 0x207   : > { %v2221_v26 = vadd.f32 %v2220_v37, %v1867_v21  ;;  %v1869_v20 = vpop.f32.mrb[37].mxu1 }
 0x208   : > { %v2223_v17 = vadd.f32 %v2222_v44, %v1869_v20  ;;  %v1871_v29 = vpop.f32.mrb[38].mxu1  ;;  %v727_v44 = vld [vmem:[#allocation2 + $0x140] sm:$0xff] }
 0x209   : > { %v2485_v27 = vadd.f32 %v2221_v26, %v723_v16  ;;  %v2225_v30 = vadd.f32 %v5221_v35, %v1871_v29  ;;  %v1873_v31 = vpop.f32.mrb[39].mxu1  ;;  %v2260_v52 = vpop.f32.mrb[52].mxu0  ;;  %v736_v16 = vld [vmem:[#allocation2 + $0x188] sm:$0xff] }
 0x20a   : > { %v2486_v33 = vadd.f32 %v2223_v17, %v724_v24  ;;  %v2227_v34 = vadd.f32 %v5223_v47, %v1873_v31  ;;  %v2262_v55 = vpop.f32.mrb[53].mxu0  ;;  %v737_v24 = vld [vmem:[#allocation2 + $0x190] sm:$0xff] }
 0x20b   : > { %2613 = vst [vmem:[#allocation2 + $0x120] sm:$0xff] %v2485_v27  ;;  %v2487_v39 = vadd.f32 %v2225_v30, %v725_v28  ;;  %v5247_v59 = vpop.f32.mrb[54].mxu0  ;;  %v738_v28 = vld [vmem:[#allocation2 + $0x198] sm:$0xff] }
 0x20c   : > { %2614 = vst [vmem:[#allocation2 + $0x128] sm:$0xff] %v2486_v33  ;;  %v2488_v37 = vadd.f32 %v2227_v34, %v726_v19  ;;  %v5249_v63 = vpop.f32.mrb[55].mxu0 }
 0x20d   : > { %2615 = vst [vmem:[#allocation2 + $0x130] sm:$0xff] %v2487_v39 }
 0x20e   : > { %2616 = vst [vmem:[#allocation2 + $0x138] sm:$0xff] %v2488_v37  ;;  %v1877_v42 = vpop.f32.mrb[40].mxu1 }
 0x20f   : > { %v2231_v35 = vadd.f32 %v2230_v56, %v1877_v42  ;;  %v1879_v41 = vpop.f32.mrb[41].mxu1 }
 0x210   : > { %v2233_v38 = vadd.f32 %v2232_v60, %v1879_v41  ;;  %v1881_v50 = vpop.f32.mrb[42].mxu1  ;;  %v731_v60 = vld [vmem:[#allocation2 + $0x160] sm:$0xff] }
 0x211   : > { %v2489_v47 = vadd.f32 %v2231_v35, %v727_v44  ;;  %v2235_v43 = vadd.f32 %v5229_v0, %v1881_v50  ;;  %v1883_v51 = vpop.f32.mrb[43].mxu1  ;;  %v2270_v5 = vpop.f32.mrb[56].mxu0  ;;  %v740_v44 = vld [vmem:[#allocation2 + $0x1a8] sm:$0xff] }
 0x212   : > { %v2490_v53 = vadd.f32 %v2233_v38, %v728_v46  ;;  %v2237_v54 = vadd.f32 %v5231_v58, %v1883_v51  ;;  %v2272_v11 = vpop.f32.mrb[57].mxu0  ;;  %v741_v46 = vld [vmem:[#allocation2 + $0x1b0] sm:$0xff] }
 0x213   : > { %2617 = vst [vmem:[#allocation2 + $0x140] sm:$0xff] %v2489_v47  ;;  %v2491_v57 = vadd.f32 %v2235_v43, %v729_v49  ;;  %v5253_v14 = vpop.f32.mrb[58].mxu0  ;;  %v742_v49 = vld [vmem:[#allocation2 + $0x1b8] sm:$0xff] }
 0x214   : > { %2618 = vst [vmem:[#allocation2 + $0x148] sm:$0xff] %v2490_v53  ;;  %v2492_v56 = vadd.f32 %v2237_v54, %v730_v48  ;;  %v5255_v22 = vpop.f32.mrb[59].mxu0 }
 0x215   : > { %2619 = vst [vmem:[#allocation2 + $0x150] sm:$0xff] %v2491_v57 }
 0x216   : > { %2620 = vst [vmem:[#allocation2 + $0x158] sm:$0xff] %v2492_v56  ;;  %v1887_v62 = vpop.f32.mrb[44].mxu1 }
 0x217   : > { %v2241_v0 = vadd.f32 %v2240_v12, %v1887_v62  ;;  %v1889_v61 = vpop.f32.mrb[45].mxu1 }
 0x218   : > { %v2243_v4 = vadd.f32 %v2242_v15, %v1889_v61  ;;  %v1891_v6 = vpop.f32.mrb[46].mxu1  ;;  %v735_v15 = vld [vmem:[#allocation2 + $0x180] sm:$0xff] }
 0x219   : > { %v2493_v58 = vadd.f32 %v2241_v0, %v731_v60  ;;  %v2245_v7 = vadd.f32 %v5235_v23, %v1891_v6  ;;  %v1893_v9 = vpop.f32.mrb[47].mxu1  ;;  %v2280_v27 = vpop.f32.mrb[60].mxu0  ;;  %v744_v60 = vld [vmem:[#allocation2 + $0x1c8] sm:$0xff] }
 0x21a   : > { %v2494_v1 = vadd.f32 %v2243_v4, %v732_v2  ;;  %v2247_v10 = vadd.f32 %v5237_v25, %v1893_v9  ;;  %v2282_v31 = vpop.f32.mrb[61].mxu0  ;;  %v745_v2 = vld [vmem:[#allocation2 + $0x1d0] sm:$0xff] }
 0x21b   : > { %2621 = vst [vmem:[#allocation2 + $0x160] sm:$0xff] %v2493_v58  ;;  %v2495_v13 = vadd.f32 %v2245_v7, %v733_v3  ;;  %v5259_v34 = vpop.f32.mrb[62].mxu0  ;;  %v746_v3 = vld [vmem:[#allocation2 + $0x1d8] sm:$0xff] }
 0x21c   : > { %2622 = vst [vmem:[#allocation2 + $0x168] sm:$0xff] %v2494_v1  ;;  %v2496_v12 = vadd.f32 %v2247_v10, %v734_v8  ;;  %v5261_v39 = vpop.f32.mrb[63].mxu0 }
 0x21d   : > { %2623 = vst [vmem:[#allocation2 + $0x170] sm:$0xff] %v2495_v13 }
 0x21e   : > { %2624 = vst [vmem:[#allocation2 + $0x178] sm:$0xff] %v2496_v12  ;;  %v1897_v18 = vpop.f32.mrb[48].mxu1 }
 0x21f   : > { %v2251_v23 = vadd.f32 %v2250_v32, %v1897_v18  ;;  %v1899_v21 = vpop.f32.mrb[49].mxu1 }
 0x220   : > { %v2253_v26 = vadd.f32 %v2252_v36, %v1899_v21  ;;  %v1901_v20 = vpop.f32.mrb[50].mxu1  ;;  %v739_v36 = vld [vmem:[#allocation2 + $0x1a0] sm:$0xff] }
 0x221   : > { %v2497_v25 = vadd.f32 %v2251_v23, %v735_v15  ;;  %v2255_v17 = vadd.f32 %v5241_v40, %v1901_v20  ;;  %v1903_v29 = vpop.f32.mrb[51].mxu1  ;;  %v2290_v47 = vpop.f32.mrb[64].mxu0  ;;  %v748_v15 = vld [vmem:[#allocation2 + $0x1e8] sm:$0xff] }
 0x222   : > { %v2498_v30 = vadd.f32 %v2253_v26, %v736_v16  ;;  %v2257_v19 = vadd.f32 %v5243_v45, %v1903_v29  ;;  %v2292_v51 = vpop.f32.mrb[65].mxu0  ;;  %v749_v16 = vld [vmem:[#allocation2 + $0x1f0] sm:$0xff] }
 0x223   : > { %2625 = vst [vmem:[#allocation2 + $0x180] sm:$0xff] %v2497_v25  ;;  %v2499_v33 = vadd.f32 %v2255_v17, %v737_v24  ;;  %v5265_v54 = vpop.f32.mrb[66].mxu0  ;;  %v750_v24 = vld [vmem:[#allocation2 + $0x1f8] sm:$0xff] }
 0x224   : > { %2626 = vst [vmem:[#allocation2 + $0x188] sm:$0xff] %v2498_v30  ;;  %v2500_v32 = vadd.f32 %v2257_v19, %v738_v28  ;;  %v5267_v57 = vpop.f32.mrb[67].mxu0 }
 0x225   : > { %2627 = vst [vmem:[#allocation2 + $0x190] sm:$0xff] %v2499_v33 }
 0x226   : > { %2628 = vst [vmem:[#allocation2 + $0x198] sm:$0xff] %v2500_v32  ;;  %v1907_v37 = vpop.f32.mrb[52].mxu1 }
 0x227   : > { %v2261_v40 = vadd.f32 %v2260_v52, %v1907_v37  ;;  %v1909_v42 = vpop.f32.mrb[53].mxu1 }
 0x228   : > { %v2263_v35 = vadd.f32 %v2262_v55, %v1909_v42  ;;  %v1911_v41 = vpop.f32.mrb[54].mxu1  ;;  %v743_v55 = vld [vmem:[#allocation2 + $0x1c0] sm:$0xff] }
 0x229   : > { %v2501_v45 = vadd.f32 %v2261_v40, %v739_v36  ;;  %v2265_v38 = vadd.f32 %v5247_v59, %v1911_v41  ;;  %v1913_v50 = vpop.f32.mrb[55].mxu1  ;;  %v2300_v58 = vpop.f32.mrb[68].mxu0  ;;  %v752_v36 = vld [vmem:[#allocation2 + $0x208] sm:$0xff] }
 0x22a   : > { %v2502_v43 = vadd.f32 %v2263_v35, %v740_v44  ;;  %v2267_v48 = vadd.f32 %v5249_v63, %v1913_v50  ;;  %v2302_v9 = vpop.f32.mrb[69].mxu0  ;;  %v753_v44 = vld [vmem:[#allocation2 + $0x210] sm:$0xff] }
 0x22b   : > { %2629 = vst [vmem:[#allocation2 + $0x1a0] sm:$0xff] %v2501_v45  ;;  %v2503_v53 = vadd.f32 %v2265_v38, %v741_v46  ;;  %v5271_v10 = vpop.f32.mrb[70].mxu0  ;;  %v754_v46 = vld [vmem:[#allocation2 + $0x218] sm:$0xff] }
 0x22c   : > { %2630 = vst [vmem:[#allocation2 + $0x1a8] sm:$0xff] %v2502_v43  ;;  %v2504_v52 = vadd.f32 %v2267_v48, %v742_v49  ;;  %v5273_v13 = vpop.f32.mrb[71].mxu0 }
 0x22d   : > { %2631 = vst [vmem:[#allocation2 + $0x1b0] sm:$0xff] %v2503_v53 }
 0x22e   : > { %2632 = vst [vmem:[#allocation2 + $0x1b8] sm:$0xff] %v2504_v52  ;;  %v1917_v56 = vpop.f32.mrb[56].mxu1 }
 0x22f   : > { %v2271_v59 = vadd.f32 %v2270_v5, %v1917_v56  ;;  %v1919_v62 = vpop.f32.mrb[57].mxu1 }
 0x230   : > { %v2273_v0 = vadd.f32 %v2272_v11, %v1919_v62  ;;  %v1921_v61 = vpop.f32.mrb[58].mxu1  ;;  %v747_v11 = vld [vmem:[#allocation2 + $0x1e0] sm:$0xff] }
 0x231   : > { %v2505_v63 = vadd.f32 %v2271_v59, %v743_v55  ;;  %v2275_v4 = vadd.f32 %v5253_v14, %v1921_v61  ;;  %v1923_v6 = vpop.f32.mrb[59].mxu1  ;;  %v2310_v25 = vpop.f32.mrb[72].mxu0  ;;  %v756_v55 = vld [vmem:[#allocation2 + $0x228] sm:$0xff] }
 0x232   : > { %v2506_v7 = vadd.f32 %v2273_v0, %v744_v60  ;;  %v2277_v8 = vadd.f32 %v5255_v22, %v1923_v6  ;;  %v2312_v29 = vpop.f32.mrb[73].mxu0  ;;  %v757_v60 = vld [vmem:[#allocation2 + $0x230] sm:$0xff] }
 0x233   : > { %2633 = vst [vmem:[#allocation2 + $0x1c0] sm:$0xff] %v2505_v63  ;;  %v2507_v1 = vadd.f32 %v2275_v4, %v745_v2  ;;  %v5277_v19 = vpop.f32.mrb[74].mxu0  ;;  %v758_v2 = vld [vmem:[#allocation2 + $0x238] sm:$0xff] }
 0x234   : > { %2634 = vst [vmem:[#allocation2 + $0x1c8] sm:$0xff] %v2506_v7  ;;  %v2508_v5 = vadd.f32 %v2277_v8, %v746_v3  ;;  %v5279_v33 = vpop.f32.mrb[75].mxu0 }
 0x235   : > { %2635 = vst [vmem:[#allocation2 + $0x1d0] sm:$0xff] %v2507_v1 }
 0x236   : > { %2636 = vst [vmem:[#allocation2 + $0x1d8] sm:$0xff] %v2508_v5  ;;  %v1927_v12 = vpop.f32.mrb[60].mxu1 }
 0x237   : > { %v2281_v14 = vadd.f32 %v2280_v27, %v1927_v12  ;;  %v1929_v18 = vpop.f32.mrb[61].mxu1 }
 0x238   : > { %v2283_v23 = vadd.f32 %v2282_v31, %v1929_v18  ;;  %v1931_v21 = vpop.f32.mrb[62].mxu1  ;;  %v751_v31 = vld [vmem:[#allocation2 + $0x200] sm:$0xff] }
 0x239   : > { %v2509_v22 = vadd.f32 %v2281_v14, %v747_v11  ;;  %v2285_v26 = vadd.f32 %v5259_v34, %v1931_v21  ;;  %v1933_v20 = vpop.f32.mrb[63].mxu1  ;;  %v2320_v45 = vpop.f32.mrb[76].mxu0  ;;  %v760_v11 = vld [vmem:[#allocation2 + $0x248] sm:$0xff] }
 0x23a   : > { %v2510_v17 = vadd.f32 %v2283_v23, %v748_v15  ;;  %v2287_v28 = vadd.f32 %v5261_v39, %v1933_v20  ;;  %v2322_v50 = vpop.f32.mrb[77].mxu0  ;;  %v761_v15 = vld [vmem:[#allocation2 + $0x250] sm:$0xff] }
 0x23b   : > { %2637 = vst [vmem:[#allocation2 + $0x1e0] sm:$0xff] %v2509_v22  ;;  %v2511_v30 = vadd.f32 %v2285_v26, %v749_v16  ;;  %v5283_v48 = vpop.f32.mrb[78].mxu0  ;;  %v762_v16 = vld [vmem:[#allocation2 + $0x258] sm:$0xff] }
 0x23c   : > { %2638 = vst [vmem:[#allocation2 + $0x1e8] sm:$0xff] %v2510_v17  ;;  %v2512_v27 = vadd.f32 %v2287_v28, %v750_v24  ;;  %v5285_v53 = vpop.f32.mrb[79].mxu0 }
 0x23d   : > { %2639 = vst [vmem:[#allocation2 + $0x1f0] sm:$0xff] %v2511_v30 }
 0x23e   : > { %2640 = vst [vmem:[#allocation2 + $0x1f8] sm:$0xff] %v2512_v27  ;;  %v1937_v32 = vpop.f32.mrb[64].mxu1 }
 0x23f   : > { %v2291_v34 = vadd.f32 %v2290_v47, %v1937_v32  ;;  %v1939_v37 = vpop.f32.mrb[65].mxu1 }
 0x240   : > { %v2293_v40 = vadd.f32 %v2292_v51, %v1939_v37  ;;  %v1941_v42 = vpop.f32.mrb[66].mxu1  ;;  %v755_v51 = vld [vmem:[#allocation2 + $0x220] sm:$0xff] }
 0x241   : > { %v2513_v39 = vadd.f32 %v2291_v34, %v751_v31  ;;  %v2295_v35 = vadd.f32 %v5265_v54, %v1941_v42  ;;  %v1943_v41 = vpop.f32.mrb[67].mxu1  ;;  %v2330_v63 = vpop.f32.mrb[80].mxu0  ;;  %v764_v31 = vld [vmem:[#allocation2 + $0x268] sm:$0xff] }
 0x242   : > { %v2514_v38 = vadd.f32 %v2293_v40, %v752_v36  ;;  %v2297_v49 = vadd.f32 %v5267_v57, %v1943_v41  ;;  %v2332_v6 = vpop.f32.mrb[81].mxu0  ;;  %v765_v36 = vld [vmem:[#allocation2 + $0x270] sm:$0xff] }
 0x243   : > { %2641 = vst [vmem:[#allocation2 + $0x200] sm:$0xff] %v2513_v39  ;;  %v2515_v43 = vadd.f32 %v2295_v35, %v753_v44  ;;  %v5289_v8 = vpop.f32.mrb[82].mxu0  ;;  %v766_v44 = vld [vmem:[#allocation2 + $0x278] sm:$0xff] }
 0x244   : > { %2642 = vst [vmem:[#allocation2 + $0x208] sm:$0xff] %v2514_v38  ;;  %v2516_v47 = vadd.f32 %v2297_v49, %v754_v46  ;;  %v5291_v1 = vpop.f32.mrb[83].mxu0 }
 0x245   : > { %2643 = vst [vmem:[#allocation2 + $0x210] sm:$0xff] %v2515_v43 }
 0x246   : > { %2644 = vst [vmem:[#allocation2 + $0x218] sm:$0xff] %v2516_v47  ;;  %v1947_v52 = vpop.f32.mrb[68].mxu1 }
 0x247   : > { %v2301_v54 = vadd.f32 %v2300_v58, %v1947_v52  ;;  %v1949_v56 = vpop.f32.mrb[69].mxu1 }
 0x248   : > { %v2303_v59 = vadd.f32 %v2302_v9, %v1949_v56  ;;  %v1951_v62 = vpop.f32.mrb[70].mxu1  ;;  %v759_v9 = vld [vmem:[#allocation2 + $0x240] sm:$0xff] }
 0x249   : > { %v2517_v57 = vadd.f32 %v2301_v54, %v755_v51  ;;  %v2305_v0 = vadd.f32 %v5271_v10, %v1951_v62  ;;  %v1953_v61 = vpop.f32.mrb[71].mxu1  ;;  %v2340_v22 = vpop.f32.mrb[84].mxu0  ;;  %v768_v51 = vld [vmem:[#allocation2 + $0x288] sm:$0xff] }
 0x24a   : > { %v2518_v4 = vadd.f32 %v2303_v59, %v756_v55  ;;  %v2307_v3 = vadd.f32 %v5273_v13, %v1953_v61  ;;  %v2342_v20 = vpop.f32.mrb[85].mxu0  ;;  %v769_v55 = vld [vmem:[#allocation2 + $0x290] sm:$0xff] }
 0x24b   : > { %2645 = vst [vmem:[#allocation2 + $0x220] sm:$0xff] %v2517_v57  ;;  %v2519_v7 = vadd.f32 %v2305_v0, %v757_v60  ;;  %v5295_v28 = vpop.f32.mrb[86].mxu0  ;;  %v770_v60 = vld [vmem:[#allocation2 + $0x298] sm:$0xff] }
 0x24c   : > { %2646 = vst [vmem:[#allocation2 + $0x228] sm:$0xff] %v2518_v4  ;;  %v2520_v58 = vadd.f32 %v2307_v3, %v758_v2  ;;  %v5297_v30 = vpop.f32.mrb[87].mxu0 }
 0x24d   : > { %2647 = vst [vmem:[#allocation2 + $0x230] sm:$0xff] %v2519_v7 }
 0x24e   : > { %2648 = vst [vmem:[#allocation2 + $0x238] sm:$0xff] %v2520_v58  ;;  %v1957_v5 = vpop.f32.mrb[72].mxu1 }
 0x24f   : > { %v2311_v10 = vadd.f32 %v2310_v25, %v1957_v5  ;;  %v1959_v12 = vpop.f32.mrb[73].mxu1 }
 0x250   : > { %v2313_v14 = vadd.f32 %v2312_v29, %v1959_v12  ;;  %v1961_v18 = vpop.f32.mrb[74].mxu1  ;;  %v763_v29 = vld [vmem:[#allocation2 + $0x260] sm:$0xff] }
 0x251   : > { %v2521_v13 = vadd.f32 %v2311_v10, %v759_v9  ;;  %v2315_v23 = vadd.f32 %v5277_v19, %v1961_v18  ;;  %v1963_v21 = vpop.f32.mrb[75].mxu1  ;;  %v2350_v39 = vpop.f32.mrb[88].mxu0  ;;  %v772_v9 = vld [vmem:[#allocation2 + $0x2a8] sm:$0xff] }
 0x252   : > { %v2522_v26 = vadd.f32 %v2313_v14, %v760_v11  ;;  %v2317_v24 = vadd.f32 %v5279_v33, %v1963_v21  ;;  %v2352_v41 = vpop.f32.mrb[89].mxu0  ;;  %v773_v11 = vld [vmem:[#allocation2 + $0x2b0] sm:$0xff] }
 0x253   : > { %2649 = vst [vmem:[#allocation2 + $0x240] sm:$0xff] %v2521_v13  ;;  %v2523_v17 = vadd.f32 %v2315_v23, %v761_v15  ;;  %v5301_v49 = vpop.f32.mrb[90].mxu0  ;;  %v774_v15 = vld [vmem:[#allocation2 + $0x2b8] sm:$0xff] }
 0x254   : > { %2650 = vst [vmem:[#allocation2 + $0x248] sm:$0xff] %v2522_v26  ;;  %v2524_v25 = vadd.f32 %v2317_v24, %v762_v16  ;;  %v5303_v43 = vpop.f32.mrb[91].mxu0 }
 0x255   : > { %2651 = vst [vmem:[#allocation2 + $0x250] sm:$0xff] %v2523_v17 }
 0x256   : > { %2652 = vst [vmem:[#allocation2 + $0x258] sm:$0xff] %v2524_v25  ;;  %v1967_v27 = vpop.f32.mrb[76].mxu1 }
 0x257   : > { %v2321_v19 = vadd.f32 %v2320_v45, %v1967_v27  ;;  %v1969_v32 = vpop.f32.mrb[77].mxu1 }
 0x258   : > { %v2323_v34 = vadd.f32 %v2322_v50, %v1969_v32  ;;  %v1971_v37 = vpop.f32.mrb[78].mxu1  ;;  %v767_v50 = vld [vmem:[#allocation2 + $0x280] sm:$0xff] }
 0x259   : > { %v2525_v33 = vadd.f32 %v2321_v19, %v763_v29  ;;  %v2325_v40 = vadd.f32 %v5283_v48, %v1971_v37  ;;  %v1973_v42 = vpop.f32.mrb[79].mxu1  ;;  %v2360_v57 = vpop.f32.mrb[92].mxu0  ;;  %v776_v29 = vld [vmem:[#allocation2 + $0x2c8] sm:$0xff] }
 0x25a   : > { %v2526_v35 = vadd.f32 %v2323_v34, %v764_v31  ;;  %v2327_v46 = vadd.f32 %v5285_v53, %v1973_v42  ;;  %v2362_v61 = vpop.f32.mrb[93].mxu0  ;;  %v777_v31 = vld [vmem:[#allocation2 + $0x2d0] sm:$0xff] }
 0x25b   : > { %2653 = vst [vmem:[#allocation2 + $0x260] sm:$0xff] %v2525_v33  ;;  %v2527_v38 = vadd.f32 %v2325_v40, %v765_v36  ;;  %v5307_v3 = vpop.f32.mrb[94].mxu0  ;;  %v778_v36 = vld [vmem:[#allocation2 + $0x2d8] sm:$0xff] }
 0x25c   : > { %2654 = vst [vmem:[#allocation2 + $0x268] sm:$0xff] %v2526_v35  ;;  %v2528_v45 = vadd.f32 %v2327_v46, %v766_v44  ;;  %v5309_v7 = vpop.f32.mrb[95].mxu0 }
 0x25d   : > { %2655 = vst [vmem:[#allocation2 + $0x270] sm:$0xff] %v2527_v38 }
 0x25e   : > { %2656 = vst [vmem:[#allocation2 + $0x278] sm:$0xff] %v2528_v45  ;;  %v1977_v47 = vpop.f32.mrb[80].mxu1 }
 0x25f   : > { %v2331_v48 = vadd.f32 %v2330_v63, %v1977_v47  ;;  %v1979_v52 = vpop.f32.mrb[81].mxu1 }
 0x260   : > { %v2333_v54 = vadd.f32 %v2332_v6, %v1979_v52  ;;  %v1981_v56 = vpop.f32.mrb[82].mxu1  ;;  %v771_v6 = vld [vmem:[#allocation2 + $0x2a0] sm:$0xff] }
 0x261   : > { %v2529_v53 = vadd.f32 %v2331_v48, %v767_v50  ;;  %v2335_v59 = vadd.f32 %v5289_v8, %v1981_v56  ;;  %v1983_v62 = vpop.f32.mrb[83].mxu1  ;;  %v2370_v13 = vpop.f32.mrb[96].mxu0  ;;  %v780_v50 = vld [vmem:[#allocation2 + $0x2e8] sm:$0xff] }
 0x262   : > { %v2530_v0 = vadd.f32 %v2333_v54, %v768_v51  ;;  %v2337_v2 = vadd.f32 %v5291_v1, %v1983_v62  ;;  %v2372_v21 = vpop.f32.mrb[97].mxu0  ;;  %v781_v51 = vld [vmem:[#allocation2 + $0x2f0] sm:$0xff] }
 0x263   : > { %2657 = vst [vmem:[#allocation2 + $0x280] sm:$0xff] %v2529_v53  ;;  %v2531_v4 = vadd.f32 %v2335_v59, %v769_v55  ;;  %v5313_v24 = vpop.f32.mrb[98].mxu0  ;;  %v782_v55 = vld [vmem:[#allocation2 + $0x2f8] sm:$0xff] }
 0x264   : > { %2658 = vst [vmem:[#allocation2 + $0x288] sm:$0xff] %v2530_v0  ;;  %v2532_v63 = vadd.f32 %v2337_v2, %v770_v60  ;;  %v5315_v17 = vpop.f32.mrb[99].mxu0 }
 0x265   : > { %2659 = vst [vmem:[#allocation2 + $0x290] sm:$0xff] %v2531_v4 }
 0x266   : > { %2660 = vst [vmem:[#allocation2 + $0x298] sm:$0xff] %v2532_v63  ;;  %v1987_v58 = vpop.f32.mrb[84].mxu1 }
 0x267   : > { %v2341_v8 = vadd.f32 %v2340_v22, %v1987_v58  ;;  %v1989_v5 = vpop.f32.mrb[85].mxu1 }
 0x268   : > { %v2343_v10 = vadd.f32 %v2342_v20, %v1989_v5  ;;  %v1991_v12 = vpop.f32.mrb[86].mxu1  ;;  %v775_v20 = vld [vmem:[#allocation2 + $0x2c0] sm:$0xff] }
 0x269   : > { %v2533_v1 = vadd.f32 %v2341_v8, %v771_v6  ;;  %v2345_v14 = vadd.f32 %v5295_v28, %v1991_v12  ;;  %v1993_v18 = vpop.f32.mrb[87].mxu1  ;;  %v2380_v33 = vpop.f32.mrb[100].mxu0  ;;  %v784_v6 = vld [vmem:[#allocation2 + $0x308] sm:$0xff] }
 0x26a   : > { %v2534_v23 = vadd.f32 %v2343_v10, %v772_v9  ;;  %v2347_v16 = vadd.f32 %v5297_v30, %v1993_v18  ;;  %v2382_v42 = vpop.f32.mrb[101].mxu0  ;;  %v785_v9 = vld [vmem:[#allocation2 + $0x310] sm:$0xff] }
 0x26b   : > { %2661 = vst [vmem:[#allocation2 + $0x2a0] sm:$0xff] %v2533_v1  ;;  %v2535_v26 = vadd.f32 %v2345_v14, %v773_v11  ;;  %v5319_v46 = vpop.f32.mrb[102].mxu0  ;;  %v786_v11 = vld [vmem:[#allocation2 + $0x318] sm:$0xff] }
 0x26c   : > { %2662 = vst [vmem:[#allocation2 + $0x2a8] sm:$0xff] %v2534_v23  ;;  %v2536_v22 = vadd.f32 %v2347_v16, %v774_v15  ;;  %v5321_v38 = vpop.f32.mrb[103].mxu0 }
 0x26d   : > { %2663 = vst [vmem:[#allocation2 + $0x2b0] sm:$0xff] %v2535_v26 }
 0x26e   : > { %2664 = vst [vmem:[#allocation2 + $0x2b8] sm:$0xff] %v2536_v22  ;;  %v1997_v25 = vpop.f32.mrb[88].mxu1 }
 0x26f   : > { %v2351_v28 = vadd.f32 %v2350_v39, %v1997_v25  ;;  %v1999_v27 = vpop.f32.mrb[89].mxu1 }
 0x270   : > { %v2353_v19 = vadd.f32 %v2352_v41, %v1999_v27  ;;  %v2001_v32 = vpop.f32.mrb[90].mxu1  ;;  %v779_v41 = vld [vmem:[#allocation2 + $0x2e0] sm:$0xff] }
 0x271   : > { %v2537_v30 = vadd.f32 %v2351_v28, %v775_v20  ;;  %v2355_v34 = vadd.f32 %v5301_v49, %v2001_v32  ;;  %v2003_v37 = vpop.f32.mrb[91].mxu1  ;;  %v2390_v53 = vpop.f32.mrb[104].mxu0  ;;  %v788_v20 = vld [vmem:[#allocation2 + $0x328] sm:$0xff] }
 0x272   : > { %v2538_v40 = vadd.f32 %v2353_v19, %v776_v29  ;;  %v2357_v44 = vadd.f32 %v5303_v43, %v2003_v37  ;;  %v2392_v62 = vpop.f32.mrb[105].mxu0  ;;  %v789_v29 = vld [vmem:[#allocation2 + $0x330] sm:$0xff] }
 0x273   : > { %2665 = vst [vmem:[#allocation2 + $0x2c0] sm:$0xff] %v2537_v30  ;;  %v2539_v35 = vadd.f32 %v2355_v34, %v777_v31  ;;  %v5325_v2 = vpop.f32.mrb[106].mxu0  ;;  %v790_v31 = vld [vmem:[#allocation2 + $0x338] sm:$0xff] }
 0x274   : > { %2666 = vst [vmem:[#allocation2 + $0x2c8] sm:$0xff] %v2538_v40  ;;  %v2540_v39 = vadd.f32 %v2357_v44, %v778_v36  ;;  %v5327_v4 = vpop.f32.mrb[107].mxu0 }
 0x275   : > { %2667 = vst [vmem:[#allocation2 + $0x2d0] sm:$0xff] %v2539_v35 }
 0x276   : > { %2668 = vst [vmem:[#allocation2 + $0x2d8] sm:$0xff] %v2540_v39  ;;  %v2007_v45 = vpop.f32.mrb[92].mxu1 }
 0x277   : > { %v2361_v49 = vadd.f32 %v2360_v57, %v2007_v45  ;;  %v2009_v47 = vpop.f32.mrb[93].mxu1 }
 0x278   : > { %v2363_v48 = vadd.f32 %v2362_v61, %v2009_v47  ;;  %v2011_v52 = vpop.f32.mrb[94].mxu1  ;;  %v783_v61 = vld [vmem:[#allocation2 + $0x300] sm:$0xff] }
 0x279   : > { %v2541_v43 = vadd.f32 %v2361_v49, %v779_v41  ;;  %v2365_v54 = vadd.f32 %v5307_v3, %v2011_v52  ;;  %v2013_v56 = vpop.f32.mrb[95].mxu1  ;;  %v2400_v1 = vpop.f32.mrb[108].mxu0  ;;  %v792_v41 = vld [vmem:[#allocation2 + $0x348] sm:$0xff] }
 0x27a   : > { %v2542_v59 = vadd.f32 %v2363_v48, %v780_v50  ;;  %v2367_v60 = vadd.f32 %v5309_v7, %v2013_v56  ;;  %v2402_v18 = vpop.f32.mrb[109].mxu0  ;;  %v793_v50 = vld [vmem:[#allocation2 + $0x350] sm:$0xff] }
 0x27b   : > { %2669 = vst [vmem:[#allocation2 + $0x2e0] sm:$0xff] %v2541_v43  ;;  %v2543_v0 = vadd.f32 %v2365_v54, %v781_v51  ;;  %v5331_v16 = vpop.f32.mrb[110].mxu0  ;;  %v794_v51 = vld [vmem:[#allocation2 + $0x358] sm:$0xff] }
 0x27c   : > { %2670 = vst [vmem:[#allocation2 + $0x2e8] sm:$0xff] %v2542_v59  ;;  %v2544_v57 = vadd.f32 %v2367_v60, %v782_v55  ;;  %v5333_v26 = vpop.f32.mrb[111].mxu0 }
 0x27d   : > { %2671 = vst [vmem:[#allocation2 + $0x2f0] sm:$0xff] %v2543_v0 }
 0x27e   : > { %2672 = vst [vmem:[#allocation2 + $0x2f8] sm:$0xff] %v2544_v57  ;;  %v2017_v63 = vpop.f32.mrb[96].mxu1 }
 0x27f   : > { %v2371_v3 = vadd.f32 %v2370_v13, %v2017_v63  ;;  %v2019_v58 = vpop.f32.mrb[97].mxu1 }
 0x280   : > { %v2373_v8 = vadd.f32 %v2372_v21, %v2019_v58  ;;  %v2021_v5 = vpop.f32.mrb[98].mxu1  ;;  %v787_v21 = vld [vmem:[#allocation2 + $0x320] sm:$0xff] }
 0x281   : > { %v2545_v7 = vadd.f32 %v2371_v3, %v783_v61  ;;  %v2375_v10 = vadd.f32 %v5313_v24, %v2021_v5  ;;  %v2023_v12 = vpop.f32.mrb[99].mxu1  ;;  %v2410_v30 = vpop.f32.mrb[112].mxu0  ;;  %v796_v61 = vld [vmem:[#allocation2 + $0x368] sm:$0xff] }
 0x282   : > { %v2546_v14 = vadd.f32 %v2373_v8, %v784_v6  ;;  %v2377_v15 = vadd.f32 %v5315_v17, %v2023_v12  ;;  %v2412_v37 = vpop.f32.mrb[113].mxu0  ;;  %v797_v6 = vld [vmem:[#allocation2 + $0x370] sm:$0xff] }
 0x283   : > { %2673 = vst [vmem:[#allocation2 + $0x300] sm:$0xff] %v2545_v7  ;;  %v2547_v23 = vadd.f32 %v2375_v10, %v785_v9  ;;  %v5337_v44 = vpop.f32.mrb[114].mxu0  ;;  %v798_v9 = vld [vmem:[#allocation2 + $0x378] sm:$0xff] }
 0x284   : > { %2674 = vst [vmem:[#allocation2 + $0x308] sm:$0xff] %v2546_v14  ;;  %v2548_v13 = vadd.f32 %v2377_v15, %v786_v11  ;;  %v5339_v35 = vpop.f32.mrb[115].mxu0 }
 0x285   : > { %2675 = vst [vmem:[#allocation2 + $0x310] sm:$0xff] %v2547_v23 }
 0x286   : > { %2676 = vst [vmem:[#allocation2 + $0x318] sm:$0xff] %v2548_v13  ;;  %v2027_v22 = vpop.f32.mrb[100].mxu1 }
 0x287   : > { %v2381_v24 = vadd.f32 %v2380_v33, %v2027_v22  ;;  %v2029_v25 = vpop.f32.mrb[101].mxu1  ;;  %v800_v22 = vld [vmem:[#allocation2 + $0x388] sm:$0xff] }
 0x288   : > { %v2383_v28 = vadd.f32 %v2382_v42, %v2029_v25  ;;  %v2031_v27 = vpop.f32.mrb[102].mxu1  ;;  %v791_v42 = vld [vmem:[#allocation2 + $0x340] sm:$0xff] }
 0x289   : > { %v2549_v17 = vadd.f32 %v2381_v24, %v787_v21  ;;  %v2385_v19 = vadd.f32 %v5319_v46, %v2031_v27  ;;  %v2033_v32 = vpop.f32.mrb[103].mxu1  ;;  %v2420_v43 = vpop.f32.mrb[116].mxu0 }
 0x28a   : > { %v2550_v34 = vadd.f32 %v2383_v28, %v788_v20  ;;  %v2387_v36 = vadd.f32 %v5321_v38, %v2033_v32  ;;  %v2422_v56 = vpop.f32.mrb[117].mxu0  ;;  %v801_v20 = vld [vmem:[#allocation2 + $0x390] sm:$0xff] }
 0x28b   : > { %2677 = vst [vmem:[#allocation2 + $0x320] sm:$0xff] %v2549_v17  ;;  %v2551_v40 = vadd.f32 %v2385_v19, %v789_v29  ;;  %v5343_v60 = vpop.f32.mrb[118].mxu0  ;;  %v802_v29 = vld [vmem:[#allocation2 + $0x398] sm:$0xff] }
 0x28c   : > { %2678 = vst [vmem:[#allocation2 + $0x328] sm:$0xff] %v2550_v34  ;;  %v2552_v33 = vadd.f32 %v2387_v36, %v790_v31  ;;  %v5345_v0 = vpop.f32.mrb[119].mxu0 }
 0x28d   : > { %2679 = vst [vmem:[#allocation2 + $0x330] sm:$0xff] %v2551_v40 }
 0x28e   : > { %2680 = vst [vmem:[#allocation2 + $0x338] sm:$0xff] %v2552_v33  ;;  %v2037_v39 = vpop.f32.mrb[104].mxu1 }
 0x28f   : > { %v2391_v46 = vadd.f32 %v2390_v53, %v2037_v39  ;;  %v2039_v45 = vpop.f32.mrb[105].mxu1  ;;  %v804_v39 = vld [vmem:[#allocation2 + $0x3a8] sm:$0xff] }
 0x290   : > { %v2393_v49 = vadd.f32 %v2392_v62, %v2039_v45  ;;  %v2041_v47 = vpop.f32.mrb[106].mxu1  ;;  %v795_v62 = vld [vmem:[#allocation2 + $0x360] sm:$0xff] }
 0x291   : > { %v2553_v38 = vadd.f32 %v2391_v46, %v791_v42  ;;  %v2395_v48 = vadd.f32 %v5325_v2, %v2041_v47  ;;  %v2043_v52 = vpop.f32.mrb[107].mxu1  ;;  %v2430_v7 = vpop.f32.mrb[120].mxu0 }
 0x292   : > { %v2554_v54 = vadd.f32 %v2393_v49, %v792_v41  ;;  %v2397_v55 = vadd.f32 %v5327_v4, %v2043_v52  ;;  %v2432_v12 = vpop.f32.mrb[121].mxu0  ;;  %v805_v41 = vld [vmem:[#allocation2 + $0x3b0] sm:$0xff] }
 0x293   : > { %2681 = vst [vmem:[#allocation2 + $0x340] sm:$0xff] %v2553_v38  ;;  %v2555_v59 = vadd.f32 %v2395_v48, %v793_v50  ;;  %v2434_v15 = vpop.f32.mrb[122].mxu0  ;;  %v806_v50 = vld [vmem:[#allocation2 + $0x3b8] sm:$0xff] }
 0x294   : > { %2682 = vst [vmem:[#allocation2 + $0x348] sm:$0xff] %v2554_v54  ;;  %v2556_v53 = vadd.f32 %v2397_v55, %v794_v51  ;;  %v2436_v23 = vpop.f32.mrb[123].mxu0 }
 0x295   : > { %2683 = vst [vmem:[#allocation2 + $0x350] sm:$0xff] %v2555_v59 }
 0x296   : > { %2684 = vst [vmem:[#allocation2 + $0x358] sm:$0xff] %v2556_v53  ;;  %v2047_v57 = vpop.f32.mrb[108].mxu1 }
 0x297   : > { %v2401_v2 = vadd.f32 %v2400_v1, %v2047_v57  ;;  %v2049_v63 = vpop.f32.mrb[109].mxu1 }
 0x298   : > { %v2403_v3 = vadd.f32 %v2402_v18, %v2049_v63  ;;  %v2051_v58 = vpop.f32.mrb[110].mxu1  ;;  %v799_v18 = vld [vmem:[#allocation2 + $0x380] sm:$0xff] }
 0x299   : > { %v2557_v4 = vadd.f32 %v2401_v2, %v795_v62  ;;  %v2405_v8 = vadd.f32 %v5331_v16, %v2051_v58  ;;  %v2053_v5 = vpop.f32.mrb[111].mxu1  ;;  %v2440_v17 = vpop.f32.mrb[124].mxu0  ;;  %v809_v62 = vld [vmem:[#allocation2 + $0x3d0] sm:$0xff] }
 0x29a   : > { %v2558_v10 = vadd.f32 %v2403_v3, %v796_v61  ;;  %v2407_v11 = vadd.f32 %v5333_v26, %v2053_v5  ;;  %v2442_v32 = vpop.f32.mrb[125].mxu0  ;;  %v810_v61 = vld [vmem:[#allocation2 + $0x3d8] sm:$0xff]  ;;  %v812_v5 = vld [vmem:[#allocation2 + $0x3e8] sm:$0xff] }
 0x29b   : > { %2685 = vst [vmem:[#allocation2 + $0x360] sm:$0xff] %v2557_v4  ;;  %v2559_v14 = vadd.f32 %v2405_v8, %v797_v6  ;;  %v2444_v36 = vpop.f32.mrb[126].mxu0  ;;  %v811_v4 = vld [vmem:[#allocation2 + $0x3e0] sm:$0xff] }
 0x29c   : > { %2686 = vst [vmem:[#allocation2 + $0x368] sm:$0xff] %v2558_v10  ;;  %v2560_v1 = vadd.f32 %v2407_v11, %v798_v9  ;;  %v2446_v40 = vpop.f32.mrb[127].mxu0  ;;  %v813_v11 = vld [vmem:[#allocation2 + $0x3f0] sm:$0xff] }
 0x29d   : > { %2687 = vst [vmem:[#allocation2 + $0x370] sm:$0xff] %v2559_v14 }
 0x29e   : > { %2688 = vst [vmem:[#allocation2 + $0x378] sm:$0xff] %v2560_v1  ;;  %v2057_v13 = vpop.f32.mrb[112].mxu1  ;;  %v814_v1 = vld [vmem:[#allocation2 + $0x3f8] sm:$0xff] }
 0x29f   : > { %v2411_v21 = vadd.f32 %v2410_v30, %v2057_v13  ;;  %v2059_v16 = vpop.f32.mrb[113].mxu1 }
 0x2a0   : > { %v2413_v24 = vadd.f32 %v2412_v37, %v2059_v16  ;;  %v2061_v25 = vpop.f32.mrb[114].mxu1  ;;  %v803_v37 = vld [vmem:[#allocation2 + $0x3a0] sm:$0xff]  ;;  %v2839_v16 = vlaneseq (!%p3961_p11) }
 0x2a1   : > { %v2561_v28 = vadd.f32 %v2411_v21, %v799_v18  ;;  %v2415_v26 = vadd.f32 %v5337_v44, %v2061_v25  ;;  %v2063_v27 = vpop.f32.mrb[115].mxu1  ;;  %v2709_v25 = vld [vmem:[#allocation2] sm:$0xff] (!%p3961_p11) }
 0x2a2   : > { %v2562_v19 = vadd.f32 %v2413_v24, %v800_v22  ;;  %v2417_v31 = vadd.f32 %v5339_v35, %v2063_v27  ;;  %v2840_v24 = vshrl.u32 (!%p3961_p11), %v2839_v16, 7  ;;  %v2711_v27 = vld [vmem:[#allocation2 + $0x10] sm:$0xff] (!%p3961_p11)  ;;  %v2730_v16 = vld [vmem:[#allocation2 + $0xa8] sm:$0xff] (!%p3961_p11) }
 0x2a3   : > { %2689 = vst [vmem:[#allocation2 + $0x380] sm:$0xff] %v2561_v28  ;;  %v2563_v34 = vadd.f32 %v2415_v26, %v801_v20  ;;  %v2837_v20 = vld [vmem:[%s5698_s2] sm:$0x3] (!%p3961_p11)  ;;  %v2710_v28 = vld [vmem:[#allocation2 + $0x8] sm:$0xff] (!%p3961_p11) }
 0x2a4   : > { %2690 = vst [vmem:[#allocation2 + $0x388] sm:$0xff] %v2562_v19  ;;  %v2564_v30 = vadd.f32 %v2417_v31, %v802_v29  ;;  %v2841_v26 = vsub.s32 (!%p3961_p11), 0, %v2840_v24  ;;  %v2845_v29 = vsub.s32 (!%p3961_p11), 1, %v2840_v24  ;;  %v2713_v19 = vld [vmem:[#allocation2 + $0x20] sm:$0xff] (!%p3961_p11) }
 0x2a5   : > { %2691 = vst [vmem:[#allocation2 + $0x390] sm:$0xff] %v2563_v34  ;;  %v2714_v34 = vld [vmem:[#allocation2 + $0x28] sm:$0xff] (!%p3961_p11) }
 0x2a6   : > { %2692 = vst [vmem:[#allocation2 + $0x398] sm:$0xff] %v2564_v30  ;;  %v2067_v33 = vpop.f32.mrb[116].mxu1  ;;  %v5357_v31 = vrot.slane (!%p3961_p11), %v2837_v20, %v2841_v26  ;;  %v2716_v30 = vld [vmem:[#allocation2 + $0x38] sm:$0xff] (!%p3961_p11)  ;;  %v2731_v26 = vld [vmem:[#allocation2 + $0xb0] sm:$0xff] (!%p3961_p11) }
 0x2a7   : > { %v2421_v42 = vadd.f32 %v2420_v43, %v2067_v33  ;;  %v2069_v44 = vpop.f32.mrb[117].mxu1  ;;  %v807_v43 = vld [vmem:[#allocation2 + $0x3c0] sm:$0xff] }
 0x2a8   : > { %v2423_v46 = vadd.f32 %v2422_v56, %v2069_v44  ;;  %v2071_v45 = vpop.f32.mrb[118].mxu1  ;;  %v808_v56 = vld [vmem:[#allocation2 + $0x3c8] sm:$0xff]  ;;  %v2851_v33 = vadd.f32 (!%p3961_p11), %v5357_v31, %v2711_v27 }
 0x2a9   : > { %v2565_v49 = vadd.f32 %v2421_v42, %v803_v37  ;;  %v2425_v35 = vadd.f32 %v5343_v60, %v2071_v45  ;;  %v2073_v47 = vpop.f32.mrb[119].mxu1  ;;  %v2717_v45 = vld [vmem:[#allocation2 + $0x40] sm:$0xff] (!%p3961_p11) }
 0x2aa   : > { %v2566_v38 = vadd.f32 %v2423_v46, %v804_v39  ;;  %v2427_v48 = vadd.f32 %v5345_v0, %v2073_v47  ;;  %v2853_v39 = vadd.f32 (!%p3961_p11), %v5357_v31, %v2713_v19  ;;  %v2979_v47 = vmax.f32 (!%p3961_p11), %v2851_v33, 0.0 }
 0x2ab   : > { %2693 = vst [vmem:[#allocation2 + $0x3a0] sm:$0xff] %v2565_v49  ;;  %v2567_v51 = vadd.f32 %v2425_v35, %v805_v41  ;;  %v2718_v49 = vld [vmem:[#allocation2 + $0x48] sm:$0xff] (!%p3961_p11) }
 0x2ac   : > { %2694 = vst [vmem:[#allocation2 + $0x3a8] sm:$0xff] %v2566_v38  ;;  %v2568_v52 = vadd.f32 %v2427_v48, %v806_v50  ;;  %v2719_v48 = vld [vmem:[#allocation2 + $0x50] sm:$0xff] (!%p3961_p11) }
 0x2ad   : > { %2695 = vst [vmem:[#allocation2 + $0x3b0] sm:$0xff] %v2567_v51  ;;  %v2720_v51 = vld [vmem:[#allocation2 + $0x58] sm:$0xff] (!%p3961_p11) }
 0x2ae   : > { %2696 = vst [vmem:[#allocation2 + $0x3b8] sm:$0xff] %v2568_v52  ;;  %v2077_v54 = vpop.f32.mrb[120].mxu1  ;;  %v2981_v52 = vmax.f32 (!%p3961_p11), %v2853_v39, 0.0 }
 0x2af   : > { %v2431_v55 = vadd.f32 %v2430_v7, %v2077_v54  ;;  %v2079_v59 = vpop.f32.mrb[121].mxu1 }
 0x2b0   : > { %v2433_v53 = vadd.f32 %v2432_v12, %v2079_v59  ;;  %v2081_v57 = vpop.f32.mrb[122].mxu1  ;;  %v2722_v59 = vld [vmem:[#allocation2 + $0x68] sm:$0xff] (!%p3961_p11) }
 0x2b1   : > { %v2569_v60 = vadd.f32 %v2431_v55, %v807_v43  ;;  %v2435_v2 = vadd.f32 %v2434_v15, %v2081_v57  ;;  %v2083_v63 = vpop.f32.mrb[123].mxu1  ;;  %v2857_v57 = vadd.f32 (!%p3961_p11), %v5357_v31, %v2717_v45  ;;  %v2735_v45 = vld [vmem:[#allocation2 + $0xd0] sm:$0xff] (!%p3961_p11) }
 0x2b2   : > { %v2570_v3 = vadd.f32 %v2433_v53, %v808_v56  ;;  %v2437_v0 = vadd.f32 %v2436_v23, %v2083_v63  ;;  %v2721_v56 = vld [vmem:[#allocation2 + $0x60] sm:$0xff] (!%p3961_p11) }
 0x2b3   : > { %2697 = vst [vmem:[#allocation2 + $0x3c0] sm:$0xff] %v2569_v60  ;;  %v2571_v6 = vadd.f32 %v2435_v2, %v809_v62  ;;  %v2723_v2 = vld [vmem:[#allocation2 + $0x70] sm:$0xff] (!%p3961_p11) }
 0x2b4   : > { %2698 = vst [vmem:[#allocation2 + $0x3c8] sm:$0xff] %v2570_v3  ;;  %v2572_v58 = vadd.f32 %v2437_v0, %v810_v61  ;;  %v2724_v61 = vld [vmem:[#allocation2 + $0x78] sm:$0xff] (!%p3961_p11)  ;;  %v2859_v0 = vadd.f32 (!%p3961_p11), %v5357_v31, %v2719_v48  ;;  %v2737_v48 = vld [vmem:[#allocation2 + $0xe0] sm:$0xff] (!%p3961_p11) }
 0x2b5   : > { %2699 = vst [vmem:[#allocation2 + $0x3d0] sm:$0xff] %v2571_v6 }
 0x2b6   : > { %2700 = vst [vmem:[#allocation2 + $0x3d8] sm:$0xff] %v2572_v58  ;;  %v2087_v8 = vpop.f32.mrb[124].mxu1  ;;  %v2725_v58 = vld [vmem:[#allocation2 + $0x80] sm:$0xff] (!%p3961_p11) }
 0x2b7   : > { %v2441_v9 = vadd.f32 %v2440_v17, %v2087_v8  ;;  %v2089_v7 = vpop.f32.mrb[125].mxu1  ;;  %v2712_v17 = vld [vmem:[#allocation2 + $0x18] sm:$0xff] (!%p3961_p11) }
 0x2b8   : > { %v2443_v10 = vadd.f32 %v2442_v32, %v2089_v7  ;;  %v2091_v12 = vpop.f32.mrb[126].mxu1  ;;  %2708 = sbr.rel (%p3961_p11) target bundleno = 781 (0x30d), region = 66  ;;  %v5359_v32 = vrot.slane (!%p3961_p11), %v2837_v20, %v2845_v29  ;;  %v2726_v7 = vld [vmem:[#allocation2 + $0x88] sm:$0xff] (!%p3961_p11)  ;;  %v2732_v29 = vld [vmem:[#allocation2 + $0xb8] sm:$0xff] (!%p3961_p11) }
 0x2b9   : > { %v2573_v14 = vadd.f32 %v2441_v9, %v811_v4  ;;  %v2445_v15 = vadd.f32 %v2444_v36, %v2091_v12  ;;  %v2093_v18 = vpop.f32.mrb[127].mxu1  ;;  %v2715_v36 = vld [vmem:[#allocation2 + $0x30] sm:$0xff] (!%p3961_p11)  ;;  %v2985_v4 = vmax.f32 (!%p3961_p11), %v2857_v57, 0.0  ;;  %v2861_v9 = vadd.f32 (!%p3961_p11), %v5357_v31, %v2721_v56 }
 0x2ba   : > { %v2574_v13 = vadd.f32 %v2443_v10, %v812_v5  ;;  %v2447_v23 = vadd.f32 %v2446_v40, %v2093_v18  ;;  %v2849_v40 = vadd.f32 (!%p3961_p11), %v5357_v31, %v2709_v25  ;;  %v2850_v37 = vadd.f32 (!%p3961_p11), %v5359_v32, %v2710_v28  ;;  %v2739_v56 = vld [vmem:[#allocation2 + $0xf0] sm:$0xff] (!%p3961_p11) }
 0x2bb   : > { %2701 = vst [vmem:[#allocation2 + $0x3e0] sm:$0xff] %v2573_v14  ;;  %v2575_v21 = vadd.f32 %v2445_v15, %v813_v11  ;;  %v2852_v42 = vadd.f32 (!%p3961_p11), %v5359_v32, %v2712_v17  ;;  %v2854_v44 = vadd.f32 (!%p3961_p11), %v5359_v32, %v2714_v34  ;;  %v2855_v46 = vadd.f32 (!%p3961_p11), %v5357_v31, %v2715_v36  ;;  %v2727_v15 = vld [vmem:[#allocation2 + $0x90] sm:$0xff] (!%p3961_p11)  ;;  %v2733_v36 = vld [vmem:[#allocation2 + $0xc0] sm:$0xff] (!%p3961_p11) }
 0x2bc   : > { %2702 = vst [vmem:[#allocation2 + $0x3e8] sm:$0xff] %v2574_v13  ;;  %v2576_v22 = vadd.f32 %v2447_v23, %v814_v1  ;;  %v2856_v41 = vadd.f32 (!%p3961_p11), %v5359_v32, %v2716_v30  ;;  %v2977_v35 = vmax.f32 (!%p3961_p11), %v2849_v40, 0.0  ;;  %v2978_v50 = vmax.f32 (!%p3961_p11), %v2850_v37, 0.0  ;;  %v2728_v1 = vld [vmem:[#allocation2 + $0x98] sm:$0xff] (!%p3961_p11) }
 0x2bd   : > { %2703 = vst [vmem:[#allocation2 + $0x3f0] sm:$0xff] %v2575_v21  ;;  %v2980_v38 = vmax.f32 (!%p3961_p11), %v2852_v42, 0.0  ;;  %v2982_v43 = vmax.f32 (!%p3961_p11), %v2854_v44, 0.0  ;;  %v2983_v54 = vmax.f32 (!%p3961_p11), %v2855_v46, 0.0  ;;  %v2858_v60 = vadd.f32 (!%p3961_p11), %v5359_v32, %v2718_v49  ;;  %v2734_v42 = vld [vmem:[#allocation2 + $0xc8] sm:$0xff] (!%p3961_p11)  ;;  %v2736_v49 = vld [vmem:[#allocation2 + $0xd8] sm:$0xff] (!%p3961_p11) }
 0x2be   : > { %2704 = vst [vmem:[#allocation2 + $0x3f8] sm:$0xff] %v2576_v22  ;;  %v2984_v55 = vmax.f32 (!%p3961_p11), %v2856_v41, 0.0  ;;  %v4032_v53 = vpack.c.bf16 (!%p3961_p11), %v2978_v50, %v2977_v35  ;;  %v2860_v6 = vadd.f32 (!%p3961_p11), %v5359_v32, %v2720_v51  ;;  %v2862_v5 = vadd.f32 (!%p3961_p11), %v5359_v32, %v2722_v59  ;;  %v2729_v22 = vld [vmem:[#allocation2 + $0xa0] sm:$0xff] (!%p3961_p11)  ;;  %v2738_v51 = vld [vmem:[#allocation2 + $0xe8] sm:$0xff] (!%p3961_p11)  ;;  %v2740_v59 = vld [vmem:[#allocation2 + $0xf8] sm:$0xff] (!%p3961_p11) }
 0x2bf   : > { %v4033_v62 = vpack.c.bf16 %v2980_v38, %v2979_v47  ;;  %v4034_v63 = vpack.c.bf16 %v2982_v43, %v2981_v52  ;;  %v2986_v8 = vmax.f32 %v2858_v60, 0.0  ;;  %v2987_v10 = vmax.f32 %v2859_v0, 0.0 }
 0x2c0   : > { %v4035_v3 = vpack.c.bf16 %v2984_v55, %v2983_v54  ;;  %3489 = vst [vmem:[%s5699_s3] sm:$0xff] %v4032_v53  ;;  %v2988_v11 = vmax.f32 %v2860_v6, 0.0  ;;  %v2863_v12 = vadd.f32 %v5357_v31, %v2723_v2  ;;  %v2864_v14 = vadd.f32 %v5359_v32, %v2724_v61  ;;  %v2741_v2 = vld [vmem:[#allocation2 + $0x100] sm:$0xff]  ;;  %v2742_v6 = vld [vmem:[#allocation2 + $0x108] sm:$0xff] }
 0x2c1   : > { %3490 = vst [vmem:[%s5699_s3 + $0x8] sm:$0xff] %v4033_v62  ;;  %3491 = vst [vmem:[%s5699_s3 + $0x10] sm:$0xff] %v4034_v63  ;;  %v4036_v18 = vpack.c.bf16 %v2986_v8, %v2985_v4  ;;  %v2989_v13 = vmax.f32 %v2861_v9, 0.0  ;;  %v2990_v23 = vmax.f32 %v2862_v5, 0.0  ;;  %v2865_v21 = vadd.f32 %v5357_v31, %v2725_v58  ;;  %v2743_v5 = vld [vmem:[#allocation2 + $0x110] sm:$0xff] }
 0x2c2   : > { %3492 = vst [vmem:[%s5699_s3 + $0x18] sm:$0xff] %v4035_v3  ;;  %v4037_v24 = vpack.c.bf16 %v2988_v11, %v2987_v10  ;;  %v2991_v20 = vmax.f32 %v2863_v12, 0.0  ;;  %v2992_v25 = vmax.f32 %v2864_v14, 0.0  ;;  %v2866_v28 = vadd.f32 %v5359_v32, %v2726_v7  ;;  %v2744_v7 = vld [vmem:[#allocation2 + $0x118] sm:$0xff] }
 0x2c3   : > { %3493 = vst [vmem:[%s5699_s3 + $0x20] sm:$0xff] %v4036_v18  ;;  %v4038_v27 = vpack.c.bf16 %v2990_v23, %v2989_v13  ;;  %v2993_v17 = vmax.f32 %v2865_v21, 0.0  ;;  %v2867_v19 = vadd.f32 %v5357_v31, %v2727_v15  ;;  %v2868_v34 = vadd.f32 %v5359_v32, %v2728_v1  ;;  %v2745_v15 = vld [vmem:[#allocation2 + $0x120] sm:$0xff]  ;;  %v2746_v1 = vld [vmem:[#allocation2 + $0x128] sm:$0xff] }
 0x2c4   : > { %3494 = vst [vmem:[%s5699_s3 + $0x28] sm:$0xff] %v4037_v24  ;;  %v4039_v30 = vpack.c.bf16 %v2992_v25, %v2991_v20  ;;  %v2994_v40 = vmax.f32 %v2866_v28, 0.0  ;;  %v2869_v37 = vadd.f32 %v5357_v31, %v2729_v22  ;;  %v2870_v33 = vadd.f32 %v5359_v32, %v2730_v16  ;;  %v2747_v22 = vld [vmem:[#allocation2 + $0x130] sm:$0xff]  ;;  %v2748_v16 = vld [vmem:[#allocation2 + $0x138] sm:$0xff] }
 0x2c5   : > { %3495 = vst [vmem:[%s5699_s3 + $0x30] sm:$0xff] %v4038_v27  ;;  %v2995_v39 = vmax.f32 %v2867_v19, 0.0  ;;  %v2996_v44 = vmax.f32 %v2868_v34, 0.0  ;;  %v2871_v46 = vadd.f32 %v5357_v31, %v2731_v26  ;;  %v2872_v41 = vadd.f32 %v5359_v32, %v2732_v29  ;;  %v2749_v26 = vld [vmem:[#allocation2 + $0x140] sm:$0xff]  ;;  %v2750_v34 = vld [vmem:[#allocation2 + $0x148] sm:$0xff] }
 0x2c6   : > { %3496 = vst [vmem:[%s5699_s3 + $0x38] sm:$0xff] %v4039_v30  ;;  %v4040_v35 = vpack.c.bf16 %v2994_v40, %v2993_v17  ;;  %v2997_v50 = vmax.f32 %v2869_v37, 0.0  ;;  %v2998_v47 = vmax.f32 %v2870_v33, 0.0  ;;  %v2873_v38 = vadd.f32 %v5357_v31, %v2733_v36  ;;  %v2751_v33 = vld [vmem:[#allocation2 + $0x150] sm:$0xff] }
 0x2c7   : > { %v4041_v52 = vpack.c.bf16 %v2996_v44, %v2995_v39  ;;  %v2999_v43 = vmax.f32 %v2871_v46, 0.0  ;;  %v3000_v54 = vmax.f32 %v2872_v41, 0.0  ;;  %v2874_v55 = vadd.f32 %v5359_v32, %v2734_v42  ;;  %v2752_v42 = vld [vmem:[#allocation2 + $0x158] sm:$0xff] }
 0x2c8   : > { %3497 = vst [vmem:[%s5699_s3 + $0x40] sm:$0xff] %v4040_v35  ;;  %v4042_v53 = vpack.c.bf16 %v2998_v47, %v2997_v50  ;;  %v3001_v62 = vmax.f32 %v2873_v38, 0.0  ;;  %v2875_v57 = vadd.f32 %v5357_v31, %v2735_v45  ;;  %v2876_v60 = vadd.f32 %v5359_v32, %v2736_v49  ;;  %v2753_v45 = vld [vmem:[#allocation2 + $0x160] sm:$0xff]  ;;  %v2754_v49 = vld [vmem:[#allocation2 + $0x168] sm:$0xff] }
 0x2c9   : > { %3498 = vst [vmem:[%s5699_s3 + $0x48] sm:$0xff] %v4041_v52  ;;  %v4043_v61 = vpack.c.bf16 %v3000_v54, %v2999_v43  ;;  %v3002_v63 = vmax.f32 %v2874_v55, 0.0  ;;  %v2877_v3 = vadd.f32 %v5357_v31, %v2737_v48  ;;  %v2878_v0 = vadd.f32 %v5359_v32, %v2738_v51  ;;  %v2755_v48 = vld [vmem:[#allocation2 + $0x170] sm:$0xff]  ;;  %v2756_v51 = vld [vmem:[#allocation2 + $0x178] sm:$0xff] }
 0x2ca   : > { %3499 = vst [vmem:[%s5699_s3 + $0x50] sm:$0xff] %v4042_v53  ;;  %v3003_v58 = vmax.f32 %v2875_v57, 0.0  ;;  %v3004_v4 = vmax.f32 %v2876_v60, 0.0  ;;  %v2879_v8 = vadd.f32 %v5357_v31, %v2739_v56  ;;  %v2880_v9 = vadd.f32 %v5359_v32, %v2740_v59  ;;  %v2757_v56 = vld [vmem:[#allocation2 + $0x180] sm:$0xff]  ;;  %v2758_v60 = vld [vmem:[#allocation2 + $0x188] sm:$0xff] }
 0x2cb   : > { %3500 = vst [vmem:[%s5699_s3 + $0x58] sm:$0xff] %v4043_v61  ;;  %v4044_v10 = vpack.c.bf16 %v3002_v63, %v3001_v62  ;;  %v3005_v11 = vmax.f32 %v2877_v3, 0.0  ;;  %v3006_v12 = vmax.f32 %v2878_v0, 0.0  ;;  %v2881_v14 = vadd.f32 %v5357_v31, %v2741_v2  ;;  %v2759_v0 = vld [vmem:[#allocation2 + $0x190] sm:$0xff] }
 0x2cc   : > { %v4045_v18 = vpack.c.bf16 %v3004_v4, %v3003_v58  ;;  %v3007_v13 = vmax.f32 %v2879_v8, 0.0  ;;  %v3008_v23 = vmax.f32 %v2880_v9, 0.0  ;;  %v2882_v21 = vadd.f32 %v5359_v32, %v2742_v6  ;;  %v2760_v6 = vld [vmem:[#allocation2 + $0x198] sm:$0xff] }
 0x2cd   : > { %3501 = vst [vmem:[%s5699_s3 + $0x60] sm:$0xff] %v4044_v10  ;;  %v4046_v24 = vpack.c.bf16 %v3006_v12, %v3005_v11  ;;  %v3009_v20 = vmax.f32 %v2881_v14, 0.0  ;;  %v2883_v25 = vadd.f32 %v5357_v31, %v2743_v5  ;;  %v2884_v28 = vadd.f32 %v5359_v32, %v2744_v7  ;;  %v2761_v5 = vld [vmem:[#allocation2 + $0x1a0] sm:$0xff]  ;;  %v2762_v7 = vld [vmem:[#allocation2 + $0x1a8] sm:$0xff] }
 0x2ce   : > { %3502 = vst [vmem:[%s5699_s3 + $0x68] sm:$0xff] %v4045_v18  ;;  %v4047_v29 = vpack.c.bf16 %v3008_v23, %v3007_v13  ;;  %v3010_v27 = vmax.f32 %v2882_v21, 0.0  ;;  %v2885_v17 = vadd.f32 %v5357_v31, %v2745_v15  ;;  %v2886_v19 = vadd.f32 %v5359_v32, %v2746_v1  ;;  %v2763_v15 = vld [vmem:[#allocation2 + $0x1b0] sm:$0xff]  ;;  %v2764_v1 = vld [vmem:[#allocation2 + $0x1b8] sm:$0xff] }
 0x2cf   : > { %3503 = vst [vmem:[%s5699_s3 + $0x70] sm:$0xff] %v4046_v24  ;;  %v3011_v36 = vmax.f32 %v2883_v25, 0.0  ;;  %v3012_v30 = vmax.f32 %v2884_v28, 0.0  ;;  %v2887_v40 = vadd.f32 %v5357_v31, %v2747_v22  ;;  %v2888_v37 = vadd.f32 %v5359_v32, %v2748_v16  ;;  %v2765_v22 = vld [vmem:[#allocation2 + $0x1c0] sm:$0xff]  ;;  %v2766_v28 = vld [vmem:[#allocation2 + $0x1c8] sm:$0xff] }
 0x2d0   : > { %3504 = vst [vmem:[%s5699_s3 + $0x78] sm:$0xff] %v4047_v29  ;;  %v4048_v39 = vpack.c.bf16 %v3010_v27, %v3009_v20  ;;  %v3013_v44 = vmax.f32 %v2885_v17, 0.0  ;;  %v3014_v46 = vmax.f32 %v2886_v19, 0.0  ;;  %v2889_v41 = vadd.f32 %v5357_v31, %v2749_v26  ;;  %v2767_v19 = vld [vmem:[#allocation2 + $0x1d0] sm:$0xff] }
 0x2d1   : > { %v4049_v35 = vpack.c.bf16 %v3012_v30, %v3011_v36  ;;  %v3015_v50 = vmax.f32 %v2887_v40, 0.0  ;;  %v3016_v47 = vmax.f32 %v2888_v37, 0.0  ;;  %v2890_v38 = vadd.f32 %v5359_v32, %v2750_v34  ;;  %v2768_v34 = vld [vmem:[#allocation2 + $0x1d8] sm:$0xff] }
 0x2d2   : > { %3505 = vst [vmem:[%s5699_s3 + $0x80] sm:$0xff] %v4048_v39  ;;  %v4050_v52 = vpack.c.bf16 %v3014_v46, %v3013_v44  ;;  %v3017_v43 = vmax.f32 %v2889_v41, 0.0  ;;  %v2891_v54 = vadd.f32 %v5357_v31, %v2751_v33  ;;  %v2892_v55 = vadd.f32 %v5359_v32, %v2752_v42  ;;  %v2769_v33 = vld [vmem:[#allocation2 + $0x1e0] sm:$0xff]  ;;  %v2770_v42 = vld [vmem:[#allocation2 + $0x1e8] sm:$0xff] }
 0x2d3   : > { %3506 = vst [vmem:[%s5699_s3 + $0x88] sm:$0xff] %v4049_v35  ;;  %v4051_v59 = vpack.c.bf16 %v3016_v47, %v3015_v50  ;;  %v3018_v53 = vmax.f32 %v2890_v38, 0.0  ;;  %v2893_v62 = vadd.f32 %v5357_v31, %v2753_v45  ;;  %v2894_v57 = vadd.f32 %v5359_v32, %v2754_v49  ;;  %v2771_v45 = vld [vmem:[#allocation2 + $0x1f0] sm:$0xff]  ;;  %v2772_v49 = vld [vmem:[#allocation2 + $0x1f8] sm:$0xff] }
 0x2d4   : > { %3507 = vst [vmem:[%s5699_s3 + $0x90] sm:$0xff] %v4050_v52  ;;  %v3019_v2 = vmax.f32 %v2891_v54, 0.0  ;;  %v3020_v61 = vmax.f32 %v2892_v55, 0.0  ;;  %v2895_v63 = vadd.f32 %v5357_v31, %v2755_v48  ;;  %v2896_v3 = vadd.f32 %v5359_v32, %v2756_v51  ;;  %v2773_v48 = vld [vmem:[#allocation2 + $0x200] sm:$0xff]  ;;  %v2774_v55 = vld [vmem:[#allocation2 + $0x208] sm:$0xff] }
 0x2d5   : > { %3508 = vst [vmem:[%s5699_s3 + $0x98] sm:$0xff] %v4051_v59  ;;  %v4052_v58 = vpack.c.bf16 %v3018_v53, %v3017_v43  ;;  %v3021_v4 = vmax.f32 %v2893_v62, 0.0  ;;  %v3022_v8 = vmax.f32 %v2894_v57, 0.0  ;;  %v2897_v9 = vadd.f32 %v5357_v31, %v2757_v56  ;;  %v2775_v57 = vld [vmem:[#allocation2 + $0x210] sm:$0xff] }
 0x2d6   : > { %v4053_v10 = vpack.c.bf16 %v3020_v61, %v3019_v2  ;;  %v3023_v11 = vmax.f32 %v2895_v63, 0.0  ;;  %v3024_v12 = vmax.f32 %v2896_v3, 0.0  ;;  %v2898_v14 = vadd.f32 %v5359_v32, %v2758_v60  ;;  %v2776_v60 = vld [vmem:[#allocation2 + $0x218] sm:$0xff] }
 0x2d7   : > { %3509 = vst [vmem:[%s5699_s3 + $0xa0] sm:$0xff] %v4052_v58  ;;  %v4054_v18 = vpack.c.bf16 %v3022_v8, %v3021_v4  ;;  %v3025_v13 = vmax.f32 %v2897_v9, 0.0  ;;  %v2899_v23 = vadd.f32 %v5357_v31, %v2759_v0  ;;  %v2900_v21 = vadd.f32 %v5359_v32, %v2760_v6  ;;  %v2777_v0 = vld [vmem:[#allocation2 + $0x220] sm:$0xff]  ;;  %v2778_v6 = vld [vmem:[#allocation2 + $0x228] sm:$0xff] }
 0x2d8   : > { %3510 = vst [vmem:[%s5699_s3 + $0xa8] sm:$0xff] %v4053_v10  ;;  %v4055_v16 = vpack.c.bf16 %v3024_v12, %v3023_v11  ;;  %v3026_v24 = vmax.f32 %v2898_v14, 0.0  ;;  %v2901_v20 = vadd.f32 %v5357_v31, %v2761_v5  ;;  %v2902_v25 = vadd.f32 %v5359_v32, %v2762_v7  ;;  %v2779_v5 = vld [vmem:[#allocation2 + $0x230] sm:$0xff]  ;;  %v2780_v7 = vld [vmem:[#allocation2 + $0x238] sm:$0xff] }
 0x2d9   : > { %3511 = vst [vmem:[%s5699_s3 + $0xb0] sm:$0xff] %v4054_v18  ;;  %v3027_v26 = vmax.f32 %v2899_v23, 0.0  ;;  %v3028_v29 = vmax.f32 %v2900_v21, 0.0  ;;  %v2903_v27 = vadd.f32 %v5357_v31, %v2763_v15  ;;  %v2904_v17 = vadd.f32 %v5359_v32, %v2764_v1  ;;  %v2781_v15 = vld [vmem:[#allocation2 + $0x240] sm:$0xff]  ;;  %v2782_v21 = vld [vmem:[#allocation2 + $0x248] sm:$0xff] }
 0x2da   : > { %3512 = vst [vmem:[%s5699_s3 + $0xb8] sm:$0xff] %v4055_v16  ;;  %v4056_v36 = vpack.c.bf16 %v3026_v24, %v3025_v13  ;;  %v3029_v30 = vmax.f32 %v2901_v20, 0.0  ;;  %v3030_v40 = vmax.f32 %v2902_v25, 0.0  ;;  %v2905_v37 = vadd.f32 %v5357_v31, %v2765_v22  ;;  %v2783_v25 = vld [vmem:[#allocation2 + $0x250] sm:$0xff] }
 0x2db   : > { %v4057_v39 = vpack.c.bf16 %v3028_v29, %v3027_v26  ;;  %v3031_v44 = vmax.f32 %v2903_v27, 0.0  ;;  %v3032_v46 = vmax.f32 %v2904_v17, 0.0  ;;  %v2906_v41 = vadd.f32 %v5359_v32, %v2766_v28  ;;  %v2784_v28 = vld [vmem:[#allocation2 + $0x258] sm:$0xff] }
 0x2dc   : > { %3513 = vst [vmem:[%s5699_s3 + $0xc0] sm:$0xff] %v4056_v36  ;;  %v4058_v35 = vpack.c.bf16 %v3030_v40, %v3029_v30  ;;  %v3033_v50 = vmax.f32 %v2905_v37, 0.0  ;;  %v2907_v47 = vadd.f32 %v5357_v31, %v2767_v19  ;;  %v2908_v38 = vadd.f32 %v5359_v32, %v2768_v34  ;;  %v2785_v19 = vld [vmem:[#allocation2 + $0x260] sm:$0xff]  ;;  %v2786_v34 = vld [vmem:[#allocation2 + $0x268] sm:$0xff] }
 0x2dd   : > { %3514 = vst [vmem:[%s5699_s3 + $0xc8] sm:$0xff] %v4057_v39  ;;  %v4059_v51 = vpack.c.bf16 %v3032_v46, %v3031_v44  ;;  %v3034_v52 = vmax.f32 %v2906_v41, 0.0  ;;  %v2909_v43 = vadd.f32 %v5357_v31, %v2769_v33  ;;  %v2910_v54 = vadd.f32 %v5359_v32, %v2770_v42  ;;  %v2787_v33 = vld [vmem:[#allocation2 + $0x270] sm:$0xff]  ;;  %v2788_v42 = vld [vmem:[#allocation2 + $0x278] sm:$0xff] }
 0x2de   : > { %3515 = vst [vmem:[%s5699_s3 + $0xd0] sm:$0xff] %v4058_v35  ;;  %v3035_v56 = vmax.f32 %v2907_v47, 0.0  ;;  %v3036_v59 = vmax.f32 %v2908_v38, 0.0  ;;  %v2911_v53 = vadd.f32 %v5357_v31, %v2771_v45  ;;  %v2912_v62 = vadd.f32 %v5359_v32, %v2772_v49  ;;  %v2789_v45 = vld [vmem:[#allocation2 + $0x280] sm:$0xff]  ;;  %v2790_v38 = vld [vmem:[#allocation2 + $0x288] sm:$0xff] }
 0x2df   : > { %3516 = vst [vmem:[%s5699_s3 + $0xd8] sm:$0xff] %v4059_v51  ;;  %v4060_v2 = vpack.c.bf16 %v3034_v52, %v3033_v50  ;;  %v3037_v61 = vmax.f32 %v2909_v43, 0.0  ;;  %v3038_v63 = vmax.f32 %v2910_v54, 0.0  ;;  %v2913_v3 = vadd.f32 %v5357_v31, %v2773_v48  ;;  %v2791_v54 = vld [vmem:[#allocation2 + $0x290] sm:$0xff] }
 0x2e0   : > { %v4061_v58 = vpack.c.bf16 %v3036_v59, %v3035_v56  ;;  %v3039_v4 = vmax.f32 %v2911_v53, 0.0  ;;  %v3040_v8 = vmax.f32 %v2912_v62, 0.0  ;;  %v2914_v9 = vadd.f32 %v5359_v32, %v2774_v55  ;;  %v2792_v55 = vld [vmem:[#allocation2 + $0x298] sm:$0xff] }
 0x2e1   : > { %3517 = vst [vmem:[%s5699_s3 + $0xe0] sm:$0xff] %v4060_v2  ;;  %v4062_v10 = vpack.c.bf16 %v3038_v63, %v3037_v61  ;;  %v3041_v11 = vmax.f32 %v2913_v3, 0.0  ;;  %v2915_v12 = vadd.f32 %v5357_v31, %v2775_v57  ;;  %v2916_v14 = vadd.f32 %v5359_v32, %v2776_v60  ;;  %v2793_v57 = vld [vmem:[#allocation2 + $0x2a0] sm:$0xff]  ;;  %v2794_v60 = vld [vmem:[#allocation2 + $0x2a8] sm:$0xff] }
 0x2e2   : > { %3518 = vst [vmem:[%s5699_s3 + $0xe8] sm:$0xff] %v4061_v58  ;;  %v4063_v1 = vpack.c.bf16 %v3040_v8, %v3039_v4  ;;  %v3042_v18 = vmax.f32 %v2914_v9, 0.0  ;;  %v2917_v13 = vadd.f32 %v5357_v31, %v2777_v0  ;;  %v2918_v23 = vadd.f32 %v5359_v32, %v2778_v6  ;;  %v2795_v0 = vld [vmem:[#allocation2 + $0x2b0] sm:$0xff]  ;;  %v2796_v6 = vld [vmem:[#allocation2 + $0x2b8] sm:$0xff] }
 0x2e3   : > { %3519 = vst [vmem:[%s5699_s3 + $0xf0] sm:$0xff] %v4062_v10  ;;  %v3043_v22 = vmax.f32 %v2915_v12, 0.0  ;;  %v3044_v16 = vmax.f32 %v2916_v14, 0.0  ;;  %v2919_v24 = vadd.f32 %v5357_v31, %v2779_v5  ;;  %v2920_v20 = vadd.f32 %v5359_v32, %v2780_v7  ;;  %v2797_v5 = vld [vmem:[#allocation2 + $0x2c0] sm:$0xff]  ;;  %v2798_v14 = vld [vmem:[#allocation2 + $0x2c8] sm:$0xff] }
 0x2e4   : > { %3520 = vst [vmem:[%s5699_s3 + $0xf8] sm:$0xff] %v4063_v1  ;;  %v4064_v26 = vpack.c.bf16 %v3042_v18, %v3041_v11  ;;  %v3045_v29 = vmax.f32 %v2917_v13, 0.0  ;;  %v3046_v27 = vmax.f32 %v2918_v23, 0.0  ;;  %v2921_v17 = vadd.f32 %v5357_v31, %v2781_v15  ;;  %v2799_v23 = vld [vmem:[#allocation2 + $0x2d0] sm:$0xff] }
 0x2e5   : > { %v4065_v36 = vpack.c.bf16 %v3044_v16, %v3043_v22  ;;  %v3047_v30 = vmax.f32 %v2919_v24, 0.0  ;;  %v3048_v40 = vmax.f32 %v2920_v20, 0.0  ;;  %v2922_v37 = vadd.f32 %v5359_v32, %v2782_v21  ;;  %v2800_v21 = vld [vmem:[#allocation2 + $0x2d8] sm:$0xff] }
 0x2e6   : > { %3521 = vst [vmem:[%s5699_s3 + $0x100] sm:$0xff] %v4064_v26  ;;  %v4066_v39 = vpack.c.bf16 %v3046_v27, %v3045_v29  ;;  %v3049_v44 = vmax.f32 %v2921_v17, 0.0  ;;  %v2923_v46 = vadd.f32 %v5357_v31, %v2783_v25  ;;  %v2924_v41 = vadd.f32 %v5359_v32, %v2784_v28  ;;  %v2801_v25 = vld [vmem:[#allocation2 + $0x2e0] sm:$0xff]  ;;  %v2802_v28 = vld [vmem:[#allocation2 + $0x2e8] sm:$0xff] }
 0x2e7   : > { %3522 = vst [vmem:[%s5699_s3 + $0x108] sm:$0xff] %v4065_v36  ;;  %v4067_v49 = vpack.c.bf16 %v3048_v40, %v3047_v30  ;;  %v3050_v35 = vmax.f32 %v2922_v37, 0.0  ;;  %v2925_v50 = vadd.f32 %v5357_v31, %v2785_v19  ;;  %v2926_v47 = vadd.f32 %v5359_v32, %v2786_v34  ;;  %v2803_v19 = vld [vmem:[#allocation2 + $0x2f0] sm:$0xff]  ;;  %v2804_v34 = vld [vmem:[#allocation2 + $0x2f8] sm:$0xff] }
 0x2e8   : > { %3523 = vst [vmem:[%s5699_s3 + $0x110] sm:$0xff] %v4066_v39  ;;  %v3051_v48 = vmax.f32 %v2923_v46, 0.0  ;;  %v3052_v51 = vmax.f32 %v2924_v41, 0.0  ;;  %v2927_v52 = vadd.f32 %v5357_v31, %v2787_v33  ;;  %v2928_v43 = vadd.f32 %v5359_v32, %v2788_v42  ;;  %v2805_v33 = vld [vmem:[#allocation2 + $0x300] sm:$0xff]  ;;  %v2806_v41 = vld [vmem:[#allocation2 + $0x308] sm:$0xff] }
 0x2e9   : > { %3524 = vst [vmem:[%s5699_s3 + $0x118] sm:$0xff] %v4067_v49  ;;  %v4068_v56 = vpack.c.bf16 %v3050_v35, %v3049_v44  ;;  %v3053_v59 = vmax.f32 %v2925_v50, 0.0  ;;  %v3054_v53 = vmax.f32 %v2926_v47, 0.0  ;;  %v2929_v62 = vadd.f32 %v5357_v31, %v2789_v45  ;;  %v2807_v47 = vld [vmem:[#allocation2 + $0x310] sm:$0xff] }
 0x2ea   : > { %v4069_v2 = vpack.c.bf16 %v3052_v51, %v3051_v48  ;;  %v3055_v61 = vmax.f32 %v2927_v52, 0.0  ;;  %v3056_v63 = vmax.f32 %v2928_v43, 0.0  ;;  %v2930_v3 = vadd.f32 %v5359_v32, %v2790_v38  ;;  %v2808_v38 = vld [vmem:[#allocation2 + $0x318] sm:$0xff] }
 0x2eb   : > { %3525 = vst [vmem:[%s5699_s3 + $0x120] sm:$0xff] %v4068_v56  ;;  %v4070_v58 = vpack.c.bf16 %v3054_v53, %v3053_v59  ;;  %v3057_v4 = vmax.f32 %v2929_v62, 0.0  ;;  %v2931_v8 = vadd.f32 %v5357_v31, %v2791_v54  ;;  %v2932_v9 = vadd.f32 %v5359_v32, %v2792_v55  ;;  %v2809_v54 = vld [vmem:[#allocation2 + $0x320] sm:$0xff]  ;;  %v2810_v55 = vld [vmem:[#allocation2 + $0x328] sm:$0xff] }
 0x2ec   : > { %3526 = vst [vmem:[%s5699_s3 + $0x128] sm:$0xff] %v4069_v2  ;;  %v4071_v7 = vpack.c.bf16 %v3056_v63, %v3055_v61  ;;  %v3058_v10 = vmax.f32 %v2930_v3, 0.0  ;;  %v2933_v11 = vadd.f32 %v5357_v31, %v2793_v57  ;;  %v2934_v12 = vadd.f32 %v5359_v32, %v2794_v60  ;;  %v2811_v57 = vld [vmem:[#allocation2 + $0x330] sm:$0xff]  ;;  %v2812_v60 = vld [vmem:[#allocation2 + $0x338] sm:$0xff] }
 0x2ed   : > { %3527 = vst [vmem:[%s5699_s3 + $0x130] sm:$0xff] %v4070_v58  ;;  %v3059_v15 = vmax.f32 %v2931_v8, 0.0  ;;  %v3060_v1 = vmax.f32 %v2932_v9, 0.0  ;;  %v2935_v18 = vadd.f32 %v5357_v31, %v2795_v0  ;;  %v2936_v13 = vadd.f32 %v5359_v32, %v2796_v6  ;;  %v2813_v0 = vld [vmem:[#allocation2 + $0x340] sm:$0xff]  ;;  %v2814_v9 = vld [vmem:[#allocation2 + $0x348] sm:$0xff] }
 0x2ee   : > { %3528 = vst [vmem:[%s5699_s3 + $0x138] sm:$0xff] %v4071_v7  ;;  %v4072_v22 = vpack.c.bf16 %v3058_v10, %v3057_v4  ;;  %v3061_v16 = vmax.f32 %v2933_v11, 0.0  ;;  %v3062_v24 = vmax.f32 %v2934_v12, 0.0  ;;  %v2937_v20 = vadd.f32 %v5357_v31, %v2797_v5  ;;  %v2815_v12 = vld [vmem:[#allocation2 + $0x350] sm:$0xff] }
 0x2ef   : > { %v4073_v26 = vpack.c.bf16 %v3060_v1, %v3059_v15  ;;  %v3063_v29 = vmax.f32 %v2935_v18, 0.0  ;;  %v3064_v27 = vmax.f32 %v2936_v13, 0.0  ;;  %v2938_v17 = vadd.f32 %v5359_v32, %v2798_v14  ;;  %v2816_v14 = vld [vmem:[#allocation2 + $0x358] sm:$0xff] }
 0x2f0   : > { %3529 = vst [vmem:[%s5699_s3 + $0x140] sm:$0xff] %v4072_v22  ;;  %v4074_v36 = vpack.c.bf16 %v3062_v24, %v3061_v16  ;;  %v3065_v30 = vmax.f32 %v2937_v20, 0.0  ;;  %v2939_v40 = vadd.f32 %v5357_v31, %v2799_v23  ;;  %v2940_v37 = vadd.f32 %v5359_v32, %v2800_v21  ;;  %v2817_v23 = vld [vmem:[#allocation2 + $0x360] sm:$0xff]  ;;  %v2818_v21 = vld [vmem:[#allocation2 + $0x368] sm:$0xff] }
 0x2f1   : > { %3530 = vst [vmem:[%s5699_s3 + $0x148] sm:$0xff] %v4073_v26  ;;  %v4075_v42 = vpack.c.bf16 %v3064_v27, %v3063_v29  ;;  %v3066_v39 = vmax.f32 %v2938_v17, 0.0  ;;  %v2941_v44 = vadd.f32 %v5357_v31, %v2801_v25  ;;  %v2942_v46 = vadd.f32 %v5359_v32, %v2802_v28  ;;  %v2819_v25 = vld [vmem:[#allocation2 + $0x370] sm:$0xff]  ;;  %v2820_v28 = vld [vmem:[#allocation2 + $0x378] sm:$0xff] }
 0x2f2   : > { %3531 = vst [vmem:[%s5699_s3 + $0x150] sm:$0xff] %v4074_v36  ;;  %v3067_v45 = vmax.f32 %v2939_v40, 0.0  ;;  %v3068_v49 = vmax.f32 %v2940_v37, 0.0  ;;  %v2943_v35 = vadd.f32 %v5357_v31, %v2803_v19  ;;  %v2944_v50 = vadd.f32 %v5359_v32, %v2804_v34  ;;  %v2821_v19 = vld [vmem:[#allocation2 + $0x380] sm:$0xff]  ;;  %v2822_v37 = vld [vmem:[#allocation2 + $0x388] sm:$0xff] }
 0x2f3   : > { %3532 = vst [vmem:[%s5699_s3 + $0x158] sm:$0xff] %v4075_v42  ;;  %v4076_v48 = vpack.c.bf16 %v3066_v39, %v3065_v30  ;;  %v3069_v51 = vmax.f32 %v2941_v44, 0.0  ;;  %v3070_v52 = vmax.f32 %v2942_v46, 0.0  ;;  %v2945_v43 = vadd.f32 %v5357_v31, %v2805_v33  ;;  %v2823_v46 = vld [vmem:[#allocation2 + $0x390] sm:$0xff] }
 0x2f4   : > { %v4077_v56 = vpack.c.bf16 %v3068_v49, %v3067_v45  ;;  %v3071_v59 = vmax.f32 %v2943_v35, 0.0  ;;  %v3072_v53 = vmax.f32 %v2944_v50, 0.0  ;;  %v2946_v62 = vadd.f32 %v5359_v32, %v2806_v41  ;;  %v2824_v41 = vld [vmem:[#allocation2 + $0x398] sm:$0xff] }
 0x2f5   : > { %3533 = vst [vmem:[%s5699_s3 + $0x160] sm:$0xff] %v4076_v48  ;;  %v4078_v2 = vpack.c.bf16 %v3070_v52, %v3069_v51  ;;  %v3073_v61 = vmax.f32 %v2945_v43, 0.0  ;;  %v2947_v63 = vadd.f32 %v5357_v31, %v2807_v47  ;;  %v2948_v3 = vadd.f32 %v5359_v32, %v2808_v38  ;;  %v2825_v47 = vld [vmem:[#allocation2 + $0x3a0] sm:$0xff]  ;;  %v2826_v38 = vld [vmem:[#allocation2 + $0x3a8] sm:$0xff] }
 0x2f6   : > { %3534 = vst [vmem:[%s5699_s3 + $0x168] sm:$0xff] %v4077_v56  ;;  %v4079_v6 = vpack.c.bf16 %v3072_v53, %v3071_v59  ;;  %v3074_v58 = vmax.f32 %v2946_v62, 0.0  ;;  %v2949_v4 = vadd.f32 %v5357_v31, %v2809_v54  ;;  %v2950_v8 = vadd.f32 %v5359_v32, %v2810_v55  ;;  %v2827_v54 = vld [vmem:[#allocation2 + $0x3b0] sm:$0xff]  ;;  %v2828_v55 = vld [vmem:[#allocation2 + $0x3b8] sm:$0xff] }
 0x2f7   : > { %3535 = vst [vmem:[%s5699_s3 + $0x170] sm:$0xff] %v4078_v2  ;;  %v3075_v5 = vmax.f32 %v2947_v63, 0.0  ;;  %v3076_v7 = vmax.f32 %v2948_v3, 0.0  ;;  %v2951_v10 = vadd.f32 %v5357_v31, %v2811_v57  ;;  %v2952_v11 = vadd.f32 %v5359_v32, %v2812_v60  ;;  %v2829_v57 = vld [vmem:[#allocation2 + $0x3c0] sm:$0xff]  ;;  %v2830_v3 = vld [vmem:[#allocation2 + $0x3c8] sm:$0xff] }
 0x2f8   : > { %3536 = vst [vmem:[%s5699_s3 + $0x178] sm:$0xff] %v4079_v6  ;;  %v4080_v15 = vpack.c.bf16 %v3074_v58, %v3073_v61  ;;  %v3077_v1 = vmax.f32 %v2949_v4, 0.0  ;;  %v3078_v18 = vmax.f32 %v2950_v8, 0.0  ;;  %v2953_v13 = vadd.f32 %v5357_v31, %v2813_v0  ;;  %v2831_v8 = vld [vmem:[#allocation2 + $0x3d0] sm:$0xff] }
 0x2f9   : > { %v4081_v22 = vpack.c.bf16 %v3076_v7, %v3075_v5  ;;  %v3079_v16 = vmax.f32 %v2951_v10, 0.0  ;;  %v3080_v24 = vmax.f32 %v2952_v11, 0.0  ;;  %v2954_v20 = vadd.f32 %v5359_v32, %v2814_v9  ;;  %v2832_v9 = vld [vmem:[#allocation2 + $0x3d8] sm:$0xff] }
 0x2fa   : > { %3537 = vst [vmem:[%s5699_s3 + $0x180] sm:$0xff] %v4080_v15  ;;  %v4082_v26 = vpack.c.bf16 %v3078_v18, %v3077_v1  ;;  %v3081_v29 = vmax.f32 %v2953_v13, 0.0  ;;  %v2955_v27 = vadd.f32 %v5357_v31, %v2815_v12  ;;  %v2956_v17 = vadd.f32 %v5359_v32, %v2816_v14  ;;  %v2833_v12 = vld [vmem:[#allocation2 + $0x3e0] sm:$0xff]  ;;  %v2834_v14 = vld [vmem:[#allocation2 + $0x3e8] sm:$0xff] }
 0x2fb   : > { %3538 = vst [vmem:[%s5699_s3 + $0x188] sm:$0xff] %v4081_v22  ;;  %v4083_v34 = vpack.c.bf16 %v3080_v24, %v3079_v16  ;;  %v3082_v36 = vmax.f32 %v2954_v20, 0.0  ;;  %v2957_v30 = vadd.f32 %v5357_v31, %v2817_v23  ;;  %v2958_v40 = vadd.f32 %v5359_v32, %v2818_v21  ;;  %v2835_v23 = vld [vmem:[#allocation2 + $0x3f0] sm:$0xff]  ;;  %v2836_v21 = vld [vmem:[#allocation2 + $0x3f8] sm:$0xff] }
 0x2fc   : > { %3539 = vst [vmem:[%s5699_s3 + $0x190] sm:$0xff] %v4082_v26  ;;  %v3083_v33 = vmax.f32 %v2955_v27, 0.0  ;;  %v3084_v42 = vmax.f32 %v2956_v17, 0.0  ;;  %v2959_v39 = vadd.f32 %v5357_v31, %v2819_v25  ;;  %v2960_v44 = vadd.f32 %v5359_v32, %v2820_v28 }
 0x2fd   : > { %3540 = vst [vmem:[%s5699_s3 + $0x198] sm:$0xff] %v4083_v34  ;;  %v4084_v45 = vpack.c.bf16 %v3082_v36, %v3081_v29  ;;  %v3085_v49 = vmax.f32 %v2957_v30, 0.0  ;;  %v3086_v35 = vmax.f32 %v2958_v40, 0.0  ;;  %v2961_v50 = vadd.f32 %v5357_v31, %v2821_v19 }
 0x2fe   : > { %v4085_v48 = vpack.c.bf16 %v3084_v42, %v3083_v33  ;;  %v3087_v51 = vmax.f32 %v2959_v39, 0.0  ;;  %v3088_v52 = vmax.f32 %v2960_v44, 0.0  ;;  %v2962_v43 = vadd.f32 %v5359_v32, %v2822_v37 }
 0x2ff   : > { %3541 = vst [vmem:[%s5699_s3 + $0x1a0] sm:$0xff] %v4084_v45  ;;  %v4086_v56 = vpack.c.bf16 %v3086_v35, %v3085_v49  ;;  %v3089_v59 = vmax.f32 %v2961_v50, 0.0  ;;  %v2963_v53 = vadd.f32 %v5357_v31, %v2823_v46  ;;  %v2964_v62 = vadd.f32 %v5359_v32, %v2824_v41 }
 0x300   : > { %3542 = vst [vmem:[%s5699_s3 + $0x1a8] sm:$0xff] %v4085_v48  ;;  %v4087_v60 = vpack.c.bf16 %v3088_v52, %v3087_v51  ;;  %v3090_v2 = vmax.f32 %v2962_v43, 0.0  ;;  %v2965_v61 = vadd.f32 %v5357_v31, %v2825_v47  ;;  %v2966_v63 = vadd.f32 %v5359_v32, %v2826_v38 }
 0x301   : > { %3543 = vst [vmem:[%s5699_s3 + $0x1b0] sm:$0xff] %v4086_v56  ;;  %v3091_v0 = vmax.f32 %v2963_v53, 0.0  ;;  %v3092_v6 = vmax.f32 %v2964_v62, 0.0  ;;  %v2967_v58 = vadd.f32 %v5357_v31, %v2827_v54  ;;  %v2968_v4 = vadd.f32 %v5359_v32, %v2828_v55 }
 0x302   : > { %3544 = vst [vmem:[%s5699_s3 + $0x1b8] sm:$0xff] %v4087_v60  ;;  %v4088_v5 = vpack.c.bf16 %v3090_v2, %v3089_v59  ;;  %v3093_v7 = vmax.f32 %v2965_v61, 0.0  ;;  %v3094_v10 = vmax.f32 %v2966_v63, 0.0  ;;  %v2969_v11 = vadd.f32 %v5357_v31, %v2829_v57 }
 0x303   : > { %v4089_v15 = vpack.c.bf16 %v3092_v6, %v3091_v0  ;;  %v3095_v1 = vmax.f32 %v2967_v58, 0.0  ;;  %v3096_v18 = vmax.f32 %v2968_v4, 0.0  ;;  %v2970_v13 = vadd.f32 %v5359_v32, %v2830_v3 }
 0x304   : > { %3545 = vst [vmem:[%s5699_s3 + $0x1c0] sm:$0xff] %v4088_v5  ;;  %v4090_v22 = vpack.c.bf16 %v3094_v10, %v3093_v7  ;;  %v3097_v16 = vmax.f32 %v2969_v11, 0.0  ;;  %v2971_v24 = vadd.f32 %v5357_v31, %v2831_v8  ;;  %v2972_v20 = vadd.f32 %v5359_v32, %v2832_v9 }
 0x305   : > { %3546 = vst [vmem:[%s5699_s3 + $0x1c8] sm:$0xff] %v4089_v15  ;;  %v4091_v25 = vpack.c.bf16 %v3096_v18, %v3095_v1  ;;  %v3098_v28 = vmax.f32 %v2970_v13, 0.0  ;;  %v2973_v26 = vadd.f32 %v5357_v31, %v2833_v12  ;;  %v2974_v29 = vadd.f32 %v5359_v32, %v2834_v14 }
 0x306   : > { %3547 = vst [vmem:[%s5699_s3 + $0x1d0] sm:$0xff] %v4090_v22  ;;  %v3099_v27 = vmax.f32 %v2971_v24, 0.0  ;;  %v3100_v17 = vmax.f32 %v2972_v20, 0.0  ;;  %v2975_v19 = vadd.f32 %v5357_v31, %v2835_v23  ;;  %v2976_v34 = vadd.f32 %v5359_v32, %v2836_v21 }
 0x307   : > { %3548 = vst [vmem:[%s5699_s3 + $0x1d8] sm:$0xff] %v4091_v25  ;;  %v4092_v36 = vpack.c.bf16 %v3098_v28, %v3097_v16  ;;  %v3101_v30 = vmax.f32 %v2973_v26, 0.0  ;;  %v3102_v40 = vmax.f32 %v2974_v29, 0.0 }
 0x308   : > { %v4093_v37 = vpack.c.bf16 %v3100_v17, %v3099_v27  ;;  %v3103_v33 = vmax.f32 %v2975_v19, 0.0  ;;  %v3104_v42 = vmax.f32 %v2976_v34, 0.0 }
 0x309   : > { %3549 = vst [vmem:[%s5699_s3 + $0x1e0] sm:$0xff] %v4092_v36  ;;  %v4094_v39 = vpack.c.bf16 %v3102_v40, %v3101_v30 }
 0x30a   : > { %3550 = vst [vmem:[%s5699_s3 + $0x1e8] sm:$0xff] %v4093_v37  ;;  %v4095_v31 = vpack.c.bf16 %v3104_v42, %v3103_v33 }
 0x30b   : > { %3551 = vst [vmem:[%s5699_s3 + $0x1f0] sm:$0xff] %v4094_v39 }
 0x30c   : > { %3552 = vst [vmem:[%s5699_s3 + $0x1f8] sm:$0xff] %v4095_v31 }
 0x30d PF: > { %s13_s16 = sadd.s32 1, %s4506_s16   ;;  %s5700_s12 = smov %s4494_s13 }
 0x30e   : > { %p10_p12 = scmp.ge.s32.totalorder %s13_s16, 8   ;;  %s5701_s13 = smov %s4565_s20 }
 0x30f   : > { %s5702_s14 = smov %s4502_s15  ;;  %s5703_s15 = smov %s5705_s17 }
 0x310   :  { %12 = sbr.rel (!%p10_p12) target bundleno = 3 (0x3), region = 113 }

</bundles_post_ra>
